<compile_context>
chip_gen: v6e
topology: v6e:2x2x1
jax: 0.10.0
libtpu: 0.0.40
codegen_flags: <defaults>
</compile_context>

<pallas_src>
import functools

import jax
import jax.numpy as jnp
from jax.experimental import pallas as pl
from jax.experimental.pallas import tpu as pltpu

_LANE = 128


def _round_up(x, m):
    return (x + m - 1) // m * m


# ----------------------------------------------------------------------------
# Fused conv-stack kernel (conv1+pool -> conv2+pool -> conv3) for one batch tile
# ----------------------------------------------------------------------------
def _conv_stack_kernel(x_ref, w1_ref, b1_ref, w2_ref, b2_ref, w3_ref, b3_ref,
                       o_ref, buf2, buf3, act1, act2, pool1, pool2,
                       *, B, H1, W1, C1, C2, KS):
    """All shapes/offsets below are static Python ints (trace-time).

    Layout per layer l: the layer input lives as a stacked, zero-padded,
    kw-im2col buffer of shape (B*F_l, KS*Cin_l) where
        row  = b*F_l + hp*W_l + w      (hp in [0, H_l+4), w in [0, W_l))
        lane = kw*Cin_l + c            (kw in [0, KS))
    so one kh-tap of the 5x5 conv is a single matmul with K = KS*Cin_l over a
    row-shifted slice (shift = kh*W_l); 5 taps total, no per-tap RMW.
    """
    pad = (KS - 1) // 2
    H2, W2 = H1 // 2, W1 // 2
    H3, W3 = H2 // 2, W2 // 2
    F1 = (H1 + 2 * pad) * W1
    F2 = (H2 + 2 * pad) * W2
    F3 = (H3 + 2 * pad) * W3
    L1 = (B - 1) * F1 + H1 * W1
    L2 = (B - 1) * F2 + H2 * W2
    L3 = (B - 1) * F3 + H3 * W3
    # Static safety: kh-shifted reads must stay inside each image's block.
    assert H1 * W1 + (KS - 1) * W1 <= F1
    assert H2 * W2 + (KS - 1) * W2 <= F2
    assert H3 * W3 + (KS - 1) * W3 <= F3

    def conv(src_ref, wk_ref, b_ref, L, Wl):
        """5 kh-tap matmuls (K = KS*Cin via the kw-im2col lanes) + bias + ReLU."""
        acc = jnp.dot(src_ref[pl.ds(0, L), :], wk_ref[0],
                      preferred_element_type=jnp.float32)
        for kh in range(1, KS):
            acc = acc + jnp.dot(src_ref[pl.ds(kh * Wl, L), :], wk_ref[kh],
                                preferred_element_type=jnp.float32)
        return jnp.maximum(acc + b_ref[...], 0.0)

    def pool_scatter(a, act_scr, pool_scr, nxt_ref, *, L, H, Wl, C, Fc, Fn, Wn):
        """2x2 max-pool of `a` (rows b*Fc + h*Wl + w) and scatter the pooled map
        into the next layer's zeroed kw-im2col buffer `nxt_ref`."""
        act_scr[pl.ds(0, L), :] = a
        # zero the read-slack tail so the strided loads below stay deterministic
        act_scr[pl.ds(L, Wl), :] = jnp.zeros((Wl, C), jnp.float32)
        Lh = L // 2
        # even flat rows == even w (Fc, Wl even); rows +Wl are the next h row.
        p = jnp.maximum(
            jnp.maximum(act_scr[pl.ds(0, Lh, stride=2), :],
                        act_scr[pl.ds(1, Lh, stride=2), :]),
            jnp.maximum(act_scr[pl.ds(Wl, Lh, stride=2), :],
                        act_scr[pl.ds(Wl + 1, Lh, stride=2), :]))
        pool_scr[...] = p.astype(pool_scr.dtype)   # row k = b*(Fc//2) + h*Wl//1 ...
        # zero next-layer buffer (handles the 'same' zero padding), then scatter.
        nxt_ref[...] = jnp.zeros(nxt_ref.shape, nxt_ref.dtype)
        Hn = H // 2
        for b in range(B):
            for ho in range(Hn):
                k0 = b * (Fc // 2) + ho * Wl          # pooled row block for (b, ho)
                for kw in range(KS):
                    ln = Wn - abs(kw - pad)
                    if ln <= 0:
                        continue
                    src = k0 + max(0, kw - pad)
                    dst = b * Fn + (ho + pad) * Wn + max(0, pad - kw)
                    nxt_ref[pl.ds(dst, ln), pl.ds(kw * C, C)] = \
                        pool_scr[pl.ds(src, ln), :]

    # conv1 + ReLU + pool -> buf2 (kw-im2col layout for conv2)
    a1 = conv(x_ref, w1_ref, b1_ref, L1, W1)
    pool_scatter(a1, act1, pool1, buf2, L=L1, H=H1, Wl=W1, C=C1,
                 Fc=F1, Fn=F2, Wn=W2)
    # conv2 + ReLU + pool -> buf3
    a2 = conv(buf2, w2_ref, b2_ref, L2, W2)
    pool_scatter(a2, act2, pool2, buf3, L=L2, H=H2, Wl=W2, C=C2,
                 Fc=F2, Fn=F3, Wn=W3)
    # conv3 + ReLU (no pool): valid rows per image are contiguous (no width pad).
    a3 = conv(buf3, w3_ref, b3_ref, L3, W3)
    for b in range(B):
        o_ref[b] = a3[b * F3:b * F3 + H3 * W3, :].astype(o_ref.dtype)


def conv_stack(x_nhwc, params, *, b_tile=8):
    """Fused conv1+pool / conv2+pool / conv3 stack.

    x_nhwc: (N, H, W, Cin) float32.  Returns (N, P, 128) bfloat16 where
    P = (H//4)*(W//4) and rows are ordered p = h*(W//4) + w (channels lane-padded
    100 -> 128 with zeros).
    """
    N, H, W, Cin = x_nhwc.shape
    # PyTorch MaxPool2d floor-divides; we require clean pooling (review note).
    assert H % 4 == 0 and W % 4 == 0, "spatial dims must be divisible by 4"
    KS, pad = 5, 2
    C1 = params["w1"].shape[-1]            # 16
    C2 = params["w2"].shape[-1]            # 64
    C3 = params["w3"].shape[-1]            # 100
    C3p = _round_up(C3, _LANE)             # 128

    B = max(1, min(b_tile, N))
    Np = pl.cdiv(N, B) * B

    H2, W2 = H // 2, W // 2
    H3, W3 = H2 // 2, W2 // 2
    F1 = (H + 2 * pad) * W
    F2 = (H2 + 2 * pad) * W2
    F3 = (H3 + 2 * pad) * W3
    L1 = (B - 1) * F1 + H * W
    L2 = (B - 1) * F2 + H2 * W2
    P = H3 * W3

    # --- layer-1 kw-im2col input: rows = b*F1 + hp*W + w, lanes = kw*Cin + c ---
    xb = x_nhwc.astype(jnp.bfloat16)
    if Np != N:
        xb = jnp.pad(xb, ((0, Np - N), (0, 0), (0, 0), (0, 0)))
    xpad = jnp.pad(xb, ((0, 0), (pad, pad), (pad, pad), (0, 0)))   # (Np,H+4,W+4,Cin)
    cols = [xpad[:, :, kw:kw + W, :] for kw in range(KS)]
    x2 = jnp.stack(cols, axis=3).reshape(Np * F1, KS * Cin)

    # --- weights: (KS, KS*Cin, Cout) with (kw, cin) merged as kw*Cin + c ---
    w1 = params["w1"].astype(jnp.bfloat16).reshape(KS, KS * Cin, C1)
    b1 = params["b1"].astype(jnp.float32).reshape(1, C1)
    w2 = params["w2"].astype(jnp.bfloat16).reshape(KS, KS * C1, C2)
    b2 = params["b2"].astype(jnp.float32).reshape(1, C2)
    w3 = jnp.pad(params["w3"], ((0, 0), (0, 0), (0, 0), (0, C3p - C3)))
    w3 = w3.astype(jnp.bfloat16).reshape(KS, KS * C2, C3p)
    b3 = jnp.pad(params["b3"], (0, C3p - C3)).astype(jnp.float32).reshape(1, C3p)

    kernel = functools.partial(_conv_stack_kernel, B=B, H1=H, W1=W,
                               C1=C1, C2=C2, KS=KS)

    out = pl.pallas_call(
        kernel,
        out_shape=jax.ShapeDtypeStruct((Np, P, C3p), jnp.bfloat16),
        grid=(Np // B,),
        in_specs=[
            pl.BlockSpec((B * F1, KS * Cin), lambda i: (i, 0)),
            pl.BlockSpec((KS, KS * Cin, C1), lambda i: (0, 0, 0)),
            pl.BlockSpec((1, C1), lambda i: (0, 0)),
            pl.BlockSpec((KS, KS * C1, C2), lambda i: (0, 0, 0)),
            pl.BlockSpec((1, C2), lambda i: (0, 0)),
            pl.BlockSpec((KS, KS * C2, C3p), lambda i: (0, 0, 0)),
            pl.BlockSpec((1, C3p), lambda i: (0, 0)),
        ],
        out_specs=pl.BlockSpec((B, P, C3p), lambda i: (i, 0, 0)),
        scratch_shapes=[
            pltpu.VMEM((B * F2, KS * C1), jnp.bfloat16),   # conv2 im2col input
            pltpu.VMEM((B * F3, KS * C2), jnp.bfloat16),   # conv3 im2col input
            pltpu.VMEM((L1 + W, C1), jnp.float32),         # conv1 act (pool source)
            pltpu.VMEM((L2 + W2, C2), jnp.float32),        # conv2 act (pool source)
            pltpu.VMEM((L1 // 2, C1), jnp.bfloat16),       # pooled conv1
            pltpu.VMEM((L2 // 2, C2), jnp.bfloat16),       # pooled conv2
        ],
        compiler_params=pltpu.CompilerParams(dimension_semantics=("parallel",)),
    )(x2, w1, b1, w2, b2, w3, b3)
    return out[:N]


# ----------------------------------------------------------------------------
# Fused fc1(+ReLU)+fc2 head
# ----------------------------------------------------------------------------
def _fc_head_kernel(x_ref, w1_ref, b1_ref, w2_ref, b2_ref, o_ref):
    h = jnp.dot(x_ref[...], w1_ref[...], preferred_element_type=jnp.float32)
    h = jnp.maximum(h + b1_ref[...], 0.0)
    y = jnp.dot(h.astype(w2_ref.dtype), w2_ref[...],
                preferred_element_type=jnp.float32)
    o_ref[...] = y + b2_ref[...]


def fc_head(feat, w1, b1, w2, b2, *, tm=128):
    """Fused fc1(+ReLU)+fc2. feat: (M, K1) bf16; w1: (K1, N1); w2: (N1, N2)."""
    M, K1 = feat.shape
    N1 = w1.shape[1]
    N2 = w2.shape[1]
    tm = min(tm, M)
    Mp = pl.cdiv(M, tm) * tm
    x = feat if Mp == M else jnp.pad(feat, ((0, Mp - M), (0, 0)))

    out = pl.pallas_call(
        _fc_head_kernel,
        out_shape=jax.ShapeDtypeStruct((Mp, N2), jnp.float32),
        grid=(Mp // tm,),
        in_specs=[
            pl.BlockSpec((tm, K1), lambda i: (i, 0)),
            pl.BlockSpec((K1, N1), lambda i: (0, 0)),
            pl.BlockSpec((1, N1), lambda i: (0, 0)),
            pl.BlockSpec((N1, N2), lambda i: (0, 0)),
            pl.BlockSpec((1, N2), lambda i: (0, 0)),
        ],
        out_specs=pl.BlockSpec((tm, N2), lambda i: (i, 0)),
        compiler_params=pltpu.CompilerParams(
            dimension_semantics=("parallel",),
            vmem_limit_bytes=64 * 1024 * 1024),
    )(x, w1.astype(jnp.bfloat16), b1.astype(jnp.float32),
      w2.astype(jnp.bfloat16), b2.astype(jnp.float32))
    return out[:M]


# ----------------------------------------------------------------------------
# Full idCNN forward (Pallas)
# ----------------------------------------------------------------------------
def idcnn_forward(x_nchw, params, *, b_tile=8):
    """Equivalent of idCNN.forward (logits, no softmax). Input is NCHW float32."""
    x = jnp.transpose(x_nchw, (0, 2, 3, 1))                       # -> NHWC
    N = x.shape[0]

    y = conv_stack(x, params, b_tile=b_tile)                      # (N, P, 128) bf16
    _, P, Cp = y.shape
    feat = y.reshape(N, P * Cp)          # NHWC flatten with lane-padded channels

    # Fold the PyTorch NCHW flatten + channel/lane padding into fc1's weight rows.
    c3 = params["w3"].shape[-1]                                   # 100
    hid = params["fw1"].shape[1]                                  # 100
    out_dim = params["fw2"].shape[1]
    HIDP = _round_up(hid, _LANE)
    ODP = _round_up(out_dim, _LANE)

    fw1 = params["fw1"].reshape(c3, P, hid)                       # rows were c*P + p
    fw1 = jnp.transpose(fw1, (1, 0, 2))                           # (p, c, hid)
    fw1 = jnp.pad(fw1, ((0, 0), (0, Cp - c3), (0, 0))).reshape(P * Cp, hid)
    fw1 = jnp.pad(fw1, ((0, 0), (0, HIDP - hid)))
    fb1 = jnp.pad(params["fb1"], (0, HIDP - hid)).reshape(1, HIDP)
    fw2 = jnp.pad(params["fw2"], ((0, HIDP - hid), (0, ODP - out_dim)))
    fb2 = jnp.pad(params["fb2"], (0, ODP - out_dim)).reshape(1, ODP)

    logits = fc_head(feat, fw1, fb1, fw2, fb2)                    # (N, ODP) f32
    return logits[:, :out_dim]


# ----------------------------------------------------------------------------
# Pure-JAX reference (mirrors the kernel's bf16 operand / f32 accumulation math)
# ----------------------------------------------------------------------------
def ref_forward(x_nchw, p):
    f32 = jnp.float32

    def q(a):  # bf16 operand quantization, compute in f32
        return a.astype(jnp.bfloat16).astype(f32)

    def conv(x, w, b):
        y = jax.lax.conv_general_dilated(
            q(x), q(w), window_strides=(1, 1), padding=((2, 2), (2, 2)),
            dimension_numbers=("NHWC", "HWIO", "NHWC"),
            precision=jax.lax.Precision.HIGHEST)
        return jnp.maximum(y + b.astype(f32), 0.0)

    def pool(x):
        n, h, w, c = x.shape
        return jnp.max(x.reshape(n, h // 2, 2, w // 2, 2, c), axis=(2, 4))

    x = q(jnp.transpose(x_nchw, (0, 2, 3, 1)))
    y = q(pool(conv(x, p["w1"], p["b1"])))
    y = q(pool(conv(y, p["w2"], p["b2"])))
    y = q(conv(y, p["w3"], p["b3"]))

    n, h, w, c = y.shape
    feat = jnp.transpose(y, (0, 3, 1, 2)).reshape(n, c * h * w)   # NCHW flatten
    h1 = jnp.maximum(
        jnp.dot(q(feat), q(p["fw1"]),
                precision=jax.lax.Precision.HIGHEST) + p["fb1"], 0.0)
    return jnp.dot(q(h1), q(p["fw2"]),
                   precision=jax.lax.Precision.HIGHEST) + p["fb2"]


# ----------------------------------------------------------------------------
# Deterministic synthetic parameter init (shapes from idCNN.__init__)
# ----------------------------------------------------------------------------
def init_params(key, in_ch, spatial, out_dim):
    w_out = spatial // 4                       # two 2x2 pools; 5x5 'same' keeps size
    flat = 100 * w_out * w_out                 # fc1 input dim (NCHW flatten)
    keys = jax.random.split(key, 10)

    def wnorm(k, shape, fan_in):
        return jax.random.normal(k, shape, jnp.float32) * (fan_in ** -0.5)

    return {
        "w1": wnorm(keys[0], (5, 5, in_ch, 16), 25 * in_ch),
        "b1": 0.01 * jax.random.normal(keys[1], (16,), jnp.float32),
        "w2": wnorm(keys[2], (5, 5, 16, 64), 25 * 16),
        "b2": 0.01 * jax.random.normal(keys[3], (64,), jnp.float32),
        "w3": wnorm(keys[4], (5, 5, 64, 100), 25 * 64),
        "b3": 0.01 * jax.random.normal(keys[5], (100,), jnp.float32),
        "fw1": wnorm(keys[6], (flat, 100), flat),      # stored (Din, Dout), NCHW rows
        "fb1": 0.01 * jax.random.normal(keys[7], (100,), jnp.float32),
        "fw2": wnorm(keys[8], (100, out_dim), 100),
        "fb2": 0.01 * jax.random.normal(keys[9], (out_dim,), jnp.float32),
    }


if __name__ == "__main__":
    # Small shapes consistent with the module: batch=2, channels=4, 16x16 images.
    N, C, H, W = 2, 4, 16, 16
    out_dim = 10

    key = jax.random.PRNGKey(0)
    kx, kp = jax.random.split(key)
    x = jax.random.normal(kx, (N, C, H, W), jnp.float32)
    params = init_params(kp, in_ch=C, spatial=H, out_dim=out_dim)

    fwd = jax.jit(idcnn_forward)
    logits = jax.block_until_ready(fwd(x, params))
    ref = jax.block_until_ready(ref_forward(x, params))

    assert logits.shape == (N, out_dim), logits.shape
    if not bool(jnp.allclose(logits, ref, rtol=1e-2, atol=1e-2)):
        max_err = float(jnp.max(jnp.abs(logits - ref)))
        raise AssertionError(f"Pallas idCNN mismatch vs reference, max err={max_err}")

    print("KERNEL_OK")
</pallas_src>

<mosaic_0001>
module attributes {stable_mosaic.version = 11 : i64} {
  func.func @_conv_stack_kernel(%arg0: i32, %arg1: memref<640x20xbf16, #tpu.memory_space<vmem>>, %arg2: memref<5x20x16xbf16, #tpu.memory_space<vmem>>, %arg3: memref<1x16xf32, #tpu.memory_space<vmem>>, %arg4: memref<5x80x64xbf16, #tpu.memory_space<vmem>>, %arg5: memref<1x64xf32, #tpu.memory_space<vmem>>, %arg6: memref<5x320x128xbf16, #tpu.memory_space<vmem>>, %arg7: memref<1x128xf32, #tpu.memory_space<vmem>>, %arg8: memref<2x16x128xbf16, #tpu.memory_space<vmem>>, %arg9: memref<192x80xbf16, #tpu.memory_space<vmem>>, %arg10: memref<64x320xbf16, #tpu.memory_space<vmem>>, %arg11: memref<592x16xf32, #tpu.memory_space<vmem>>, %arg12: memref<168x64xf32, #tpu.memory_space<vmem>>, %arg13: memref<288x16xbf16, #tpu.memory_space<vmem>>, %arg14: memref<80x64xbf16, #tpu.memory_space<vmem>>) attributes {dimension_semantics = [#tpu.dimension_semantics<parallel>], iteration_bounds = array<i64: 1>, scalar_prefetch = 0 : i64, scratch_operands = 6 : i64, tpu.core_type = #tpu.core_type<tc>, window_params = [{transform_indices = @transform_0, window_bounds = array<i64: 640, 20>}, {pipeline_mode = #tpu.pipeline_mode<synchronous>, transform_indices = @transform_1, window_bounds = array<i64: 5, 20, 16>}, {pipeline_mode = #tpu.pipeline_mode<synchronous>, transform_indices = @transform_2, window_bounds = array<i64: 1, 16>}, {pipeline_mode = #tpu.pipeline_mode<synchronous>, transform_indices = @transform_3, window_bounds = array<i64: 5, 80, 64>}, {pipeline_mode = #tpu.pipeline_mode<synchronous>, transform_indices = @transform_4, window_bounds = array<i64: 1, 64>}, {pipeline_mode = #tpu.pipeline_mode<synchronous>, transform_indices = @transform_5, window_bounds = array<i64: 5, 320, 128>}, {pipeline_mode = #tpu.pipeline_mode<synchronous>, transform_indices = @transform_6, window_bounds = array<i64: 1, 128>}, {transform_indices = @transform_7, window_bounds = array<i64: 2, 16, 128>}]} {
    %c0 = arith.constant 0 : index
    %c0_0 = arith.constant 0 : index
    %0 = vector.load %arg1[%c0, %c0_0] : memref<640x20xbf16, #tpu.memory_space<vmem>>, vector<576x20xbf16>
    %c0_1 = arith.constant 0 : index
    %c0_2 = arith.constant 0 : index
    %c0_3 = arith.constant 0 : index
    %1 = vector.load %arg2[%c0_1, %c0_2, %c0_3] : memref<5x20x16xbf16, #tpu.memory_space<vmem>>, vector<1x20x16xbf16>
    %2 = vector.shape_cast %1 : vector<1x20x16xbf16> to vector<20x16xbf16>
    %cst = arith.constant dense<0.000000e+00> : vector<576x16xf32>
    %3 = tpu.matmul %0, %2, %cst {dimension_numbers = #tpu.dot_dimension_numbers<[1], [0], [0], [1], [0, 0, 1, 1], [], []>} : vector<576x20xbf16>, vector<20x16xbf16>, vector<576x16xf32> -> vector<576x16xf32>
    %c16 = arith.constant 16 : index
    %c0_4 = arith.constant 0 : index
    %4 = vector.load %arg1[%c16, %c0_4] : memref<640x20xbf16, #tpu.memory_space<vmem>>, vector<576x20xbf16>
    %c1 = arith.constant 1 : index
    %c0_5 = arith.constant 0 : index
    %c0_6 = arith.constant 0 : index
    %5 = vector.load %arg2[%c1, %c0_5, %c0_6] : memref<5x20x16xbf16, #tpu.memory_space<vmem>>, vector<1x20x16xbf16>
    %6 = vector.shape_cast %5 : vector<1x20x16xbf16> to vector<20x16xbf16>
    %cst_7 = arith.constant dense<0.000000e+00> : vector<576x16xf32>
    %7 = tpu.matmul %4, %6, %cst_7 {dimension_numbers = #tpu.dot_dimension_numbers<[1], [0], [0], [1], [0, 0, 1, 1], [], []>} : vector<576x20xbf16>, vector<20x16xbf16>, vector<576x16xf32> -> vector<576x16xf32>
    %8 = arith.addf %3, %7 : vector<576x16xf32>
    %c32 = arith.constant 32 : index
    %c0_8 = arith.constant 0 : index
    %9 = vector.load %arg1[%c32, %c0_8] : memref<640x20xbf16, #tpu.memory_space<vmem>>, vector<576x20xbf16>
    %c2 = arith.constant 2 : index
    %c0_9 = arith.constant 0 : index
    %c0_10 = arith.constant 0 : index
    %10 = vector.load %arg2[%c2, %c0_9, %c0_10] : memref<5x20x16xbf16, #tpu.memory_space<vmem>>, vector<1x20x16xbf16>
    %11 = vector.shape_cast %10 : vector<1x20x16xbf16> to vector<20x16xbf16>
    %cst_11 = arith.constant dense<0.000000e+00> : vector<576x16xf32>
    %12 = tpu.matmul %9, %11, %cst_11 {dimension_numbers = #tpu.dot_dimension_numbers<[1], [0], [0], [1], [0, 0, 1, 1], [], []>} : vector<576x20xbf16>, vector<20x16xbf16>, vector<576x16xf32> -> vector<576x16xf32>
    %13 = arith.addf %8, %12 : vector<576x16xf32>
    %c48 = arith.constant 48 : index
    %c0_12 = arith.constant 0 : index
    %14 = vector.load %arg1[%c48, %c0_12] : memref<640x20xbf16, #tpu.memory_space<vmem>>, vector<576x20xbf16>
    %c3 = arith.constant 3 : index
    %c0_13 = arith.constant 0 : index
    %c0_14 = arith.constant 0 : index
    %15 = vector.load %arg2[%c3, %c0_13, %c0_14] : memref<5x20x16xbf16, #tpu.memory_space<vmem>>, vector<1x20x16xbf16>
    %16 = vector.shape_cast %15 : vector<1x20x16xbf16> to vector<20x16xbf16>
    %cst_15 = arith.constant dense<0.000000e+00> : vector<576x16xf32>
    %17 = tpu.matmul %14, %16, %cst_15 {dimension_numbers = #tpu.dot_dimension_numbers<[1], [0], [0], [1], [0, 0, 1, 1], [], []>} : vector<576x20xbf16>, vector<20x16xbf16>, vector<576x16xf32> -> vector<576x16xf32>
    %18 = arith.addf %13, %17 : vector<576x16xf32>
    %c64 = arith.constant 64 : index
    %c0_16 = arith.constant 0 : index
    %19 = vector.load %arg1[%c64, %c0_16] : memref<640x20xbf16, #tpu.memory_space<vmem>>, vector<576x20xbf16>
    %c4 = arith.constant 4 : index
    %c0_17 = arith.constant 0 : index
    %c0_18 = arith.constant 0 : index
    %20 = vector.load %arg2[%c4, %c0_17, %c0_18] : memref<5x20x16xbf16, #tpu.memory_space<vmem>>, vector<1x20x16xbf16>
    %21 = vector.shape_cast %20 : vector<1x20x16xbf16> to vector<20x16xbf16>
    %cst_19 = arith.constant dense<0.000000e+00> : vector<576x16xf32>
    %22 = tpu.matmul %19, %21, %cst_19 {dimension_numbers = #tpu.dot_dimension_numbers<[1], [0], [0], [1], [0, 0, 1, 1], [], []>} : vector<576x20xbf16>, vector<20x16xbf16>, vector<576x16xf32> -> vector<576x16xf32>
    %23 = arith.addf %18, %22 : vector<576x16xf32>
    %c0_20 = arith.constant 0 : index
    %c0_21 = arith.constant 0 : index
    %24 = vector.load %arg3[%c0_20, %c0_21] : memref<1x16xf32, #tpu.memory_space<vmem>>, vector<1x16xf32>
    %25 = vector.broadcast %24 : vector<1x16xf32> to vector<576x16xf32>
    %26 = arith.addf %23, %25 : vector<576x16xf32>
    %cst_22 = arith.constant 0.000000e+00 : f32
    %27 = vector.broadcast %cst_22 : f32 to vector<576x16xf32>
    %28 = arith.maximumf %26, %27 : vector<576x16xf32>
    %c0_23 = arith.constant 0 : index
    %c0_24 = arith.constant 0 : index
    %29 = vector.load %arg11[%c0_23, %c0_24] : memref<592x16xf32, #tpu.memory_space<vmem>>, vector<576x16xf32>
    tpu.vector_store %arg11[%c0_23, %c0_24], %28 {strides = array<i32>} : memref<592x16xf32, #tpu.memory_space<vmem>>, vector<576x16xf32>,
    %cst_25 = arith.constant 0.000000e+00 : f32
    %30 = vector.broadcast %cst_25 : f32 to vector<16x16xf32>
    %c576 = arith.constant 576 : index
    %c0_26 = arith.constant 0 : index
    %31 = vector.load %arg11[%c576, %c0_26] : memref<592x16xf32, #tpu.memory_space<vmem>>, vector<16x16xf32>
    tpu.vector_store %arg11[%c576, %c0_26], %30 {strides = array<i32>} : memref<592x16xf32, #tpu.memory_space<vmem>>, vector<16x16xf32>,
    %c0_27 = arith.constant 0 : index
    %c0_28 = arith.constant 0 : index
    %32 = tpu.strided_load %arg11[%c0_27, %c0_28] {strides = array<i32: 2, 1>} : memref<592x16xf32, #tpu.memory_space<vmem>>, vector<288x16xf32>
    %c1_29 = arith.constant 1 : index
    %c0_30 = arith.constant 0 : index
    %33 = tpu.strided_load %arg11[%c1_29, %c0_30] {strides = array<i32: 2, 1>} : memref<592x16xf32, #tpu.memory_space<vmem>>, vector<288x16xf32>
    %34 = arith.maximumf %32, %33 : vector<288x16xf32>
    %c16_31 = arith.constant 16 : index
    %c0_32 = arith.constant 0 : index
    %35 = tpu.strided_load %arg11[%c16_31, %c0_32] {strides = array<i32: 2, 1>} : memref<592x16xf32, #tpu.memory_space<vmem>>, vector<288x16xf32>
    %c17 = arith.constant 17 : index
    %c0_33 = arith.constant 0 : index
    %36 = tpu.strided_load %arg11[%c17, %c0_33] {strides = array<i32: 2, 1>} : memref<592x16xf32, #tpu.memory_space<vmem>>, vector<288x16xf32>
    %37 = arith.maximumf %35, %36 : vector<288x16xf32>
    %38 = arith.maximumf %34, %37 : vector<288x16xf32>
    %39 = arith.truncf %38 : vector<288x16xf32> to vector<288x16xbf16>
    %c0_34 = arith.constant 0 : index
    %c0_35 = arith.constant 0 : index
    %40 = vector.load %arg13[%c0_34, %c0_35] : memref<288x16xbf16, #tpu.memory_space<vmem>>, vector<288x16xbf16>
    tpu.vector_store %arg13[%c0_34, %c0_35], %39 {strides = array<i32>} : memref<288x16xbf16, #tpu.memory_space<vmem>>, vector<288x16xbf16>,
    %cst_36 = arith.constant 0.000000e+00 : bf16
    %41 = vector.broadcast %cst_36 : bf16 to vector<192x80xbf16>
    %c0_37 = arith.constant 0 : index
    %c0_38 = arith.constant 0 : index
    %42 = vector.load %arg9[%c0_37, %c0_38] : memref<192x80xbf16, #tpu.memory_space<vmem>>, vector<192x80xbf16>
    tpu.vector_store %arg9[%c0_37, %c0_38], %41 {strides = array<i32>} : memref<192x80xbf16, #tpu.memory_space<vmem>>, vector<192x80xbf16>,
    %c0_39 = arith.constant 0 : index
    %c0_40 = arith.constant 0 : index
    %43 = vector.load %arg13[%c0_39, %c0_40] : memref<288x16xbf16, #tpu.memory_space<vmem>>, vector<6x16xbf16>
    %c18 = arith.constant 18 : index
    %c0_41 = arith.constant 0 : index
    %44 = vector.load %arg9[%c18, %c0_41] : memref<192x80xbf16, #tpu.memory_space<vmem>>, vector<6x16xbf16>
    tpu.vector_store %arg9[%c18, %c0_41], %43 {strides = array<i32>} : memref<192x80xbf16, #tpu.memory_space<vmem>>, vector<6x16xbf16>,
    %c0_42 = arith.constant 0 : index
    %c0_43 = arith.constant 0 : index
    %45 = vector.load %arg13[%c0_42, %c0_43] : memref<288x16xbf16, #tpu.memory_space<vmem>>, vector<7x16xbf16>
    %c17_44 = arith.constant 17 : index
    %c16_45 = arith.constant 16 : index
    %46 = vector.load %arg9[%c17_44, %c16_45] : memref<192x80xbf16, #tpu.memory_space<vmem>>, vector<7x16xbf16>
    tpu.vector_store %arg9[%c17_44, %c16_45], %45 {strides = array<i32>} : memref<192x80xbf16, #tpu.memory_space<vmem>>, vector<7x16xbf16>,
    %c0_46 = arith.constant 0 : index
    %c0_47 = arith.constant 0 : index
    %47 = vector.load %arg13[%c0_46, %c0_47] : memref<288x16xbf16, #tpu.memory_space<vmem>>, vector<8x16xbf16>
    %c16_48 = arith.constant 16 : index
    %c32_49 = arith.constant 32 : index
    %48 = vector.load %arg9[%c16_48, %c32_49] : memref<192x80xbf16, #tpu.memory_space<vmem>>, vector<8x16xbf16>
    tpu.vector_store %arg9[%c16_48, %c32_49], %47 {strides = array<i32>} : memref<192x80xbf16, #tpu.memory_space<vmem>>, vector<8x16xbf16>,
    %c1_50 = arith.constant 1 : index
    %c0_51 = arith.constant 0 : index
    %49 = vector.load %arg13[%c1_50, %c0_51] : memref<288x16xbf16, #tpu.memory_space<vmem>>, vector<7x16xbf16>
    %c16_52 = arith.constant 16 : index
    %c48_53 = arith.constant 48 : index
    %50 = vector.load %arg9[%c16_52, %c48_53] : memref<192x80xbf16, #tpu.memory_space<vmem>>, vector<7x16xbf16>
    tpu.vector_store %arg9[%c16_52, %c48_53], %49 {strides = array<i32>} : memref<192x80xbf16, #tpu.memory_space<vmem>>, vector<7x16xbf16>,
    %c2_54 = arith.constant 2 : index
    %c0_55 = arith.constant 0 : index
    %51 = vector.load %arg13[%c2_54, %c0_55] : memref<288x16xbf16, #tpu.memory_space<vmem>>, vector<6x16xbf16>
    %c16_56 = arith.constant 16 : index
    %c64_57 = arith.constant 64 : index
    %52 = vector.load %arg9[%c16_56, %c64_57] : memref<192x80xbf16, #tpu.memory_space<vmem>>, vector<6x16xbf16>
    tpu.vector_store %arg9[%c16_56, %c64_57], %51 {strides = array<i32>} : memref<192x80xbf16, #tpu.memory_space<vmem>>, vector<6x16xbf16>,
    %c16_58 = arith.constant 16 : index
    %c0_59 = arith.constant 0 : index
    %53 = vector.load %arg13[%c16_58, %c0_59] : memref<288x16xbf16, #tpu.memory_space<vmem>>, vector<6x16xbf16>
    %c26 = arith.constant 26 : index
    %c0_60 = arith.constant 0 : index
    %54 = vector.load %arg9[%c26, %c0_60] : memref<192x80xbf16, #tpu.memory_space<vmem>>, vector<6x16xbf16>
    tpu.vector_store %arg9[%c26, %c0_60], %53 {strides = array<i32>} : memref<192x80xbf16, #tpu.memory_space<vmem>>, vector<6x16xbf16>,
    %c16_61 = arith.constant 16 : index
    %c0_62 = arith.constant 0 : index
    %55 = vector.load %arg13[%c16_61, %c0_62] : memref<288x16xbf16, #tpu.memory_space<vmem>>, vector<7x16xbf16>
    %c25 = arith.constant 25 : index
    %c16_63 = arith.constant 16 : index
    %56 = vector.load %arg9[%c25, %c16_63] : memref<192x80xbf16, #tpu.memory_space<vmem>>, vector<7x16xbf16>
    tpu.vector_store %arg9[%c25, %c16_63], %55 {strides = array<i32>} : memref<192x80xbf16, #tpu.memory_space<vmem>>, vector<7x16xbf16>,
    %c16_64 = arith.constant 16 : index
    %c0_65 = arith.constant 0 : index
    %57 = vector.load %arg13[%c16_64, %c0_65] : memref<288x16xbf16, #tpu.memory_space<vmem>>, vector<8x16xbf16>
    %c24 = arith.constant 24 : index
    %c32_66 = arith.constant 32 : index
    %58 = vector.load %arg9[%c24, %c32_66] : memref<192x80xbf16, #tpu.memory_space<vmem>>, vector<8x16xbf16>
    tpu.vector_store %arg9[%c24, %c32_66], %57 {strides = array<i32>} : memref<192x80xbf16, #tpu.memory_space<vmem>>, vector<8x16xbf16>,
    %c17_67 = arith.constant 17 : index
    %c0_68 = arith.constant 0 : index
    %59 = vector.load %arg13[%c17_67, %c0_68] : memref<288x16xbf16, #tpu.memory_space<vmem>>, vector<7x16xbf16>
    %c24_69 = arith.constant 24 : index
    %c48_70 = arith.constant 48 : index
    %60 = vector.load %arg9[%c24_69, %c48_70] : memref<192x80xbf16, #tpu.memory_space<vmem>>, vector<7x16xbf16>
    tpu.vector_store %arg9[%c24_69, %c48_70], %59 {strides = array<i32>} : memref<192x80xbf16, #tpu.memory_space<vmem>>, vector<7x16xbf16>,
    %c18_71 = arith.constant 18 : index
    %c0_72 = arith.constant 0 : index
    %61 = vector.load %arg13[%c18_71, %c0_72] : memref<288x16xbf16, #tpu.memory_space<vmem>>, vector<6x16xbf16>
    %c24_73 = arith.constant 24 : index
    %c64_74 = arith.constant 64 : index
    %62 = vector.load %arg9[%c24_73, %c64_74] : memref<192x80xbf16, #tpu.memory_space<vmem>>, vector<6x16xbf16>
    tpu.vector_store %arg9[%c24_73, %c64_74], %61 {strides = array<i32>} : memref<192x80xbf16, #tpu.memory_space<vmem>>, vector<6x16xbf16>,
    %c32_75 = arith.constant 32 : index
    %c0_76 = arith.constant 0 : index
    %63 = vector.load %arg13[%c32_75, %c0_76] : memref<288x16xbf16, #tpu.memory_space<vmem>>, vector<6x16xbf16>
    %c34 = arith.constant 34 : index
    %c0_77 = arith.constant 0 : index
    %64 = vector.load %arg9[%c34, %c0_77] : memref<192x80xbf16, #tpu.memory_space<vmem>>, vector<6x16xbf16>
    tpu.vector_store %arg9[%c34, %c0_77], %63 {strides = array<i32>} : memref<192x80xbf16, #tpu.memory_space<vmem>>, vector<6x16xbf16>,
    %c32_78 = arith.constant 32 : index
    %c0_79 = arith.constant 0 : index
    %65 = vector.load %arg13[%c32_78, %c0_79] : memref<288x16xbf16, #tpu.memory_space<vmem>>, vector<7x16xbf16>
    %c33 = arith.constant 33 : index
    %c16_80 = arith.constant 16 : index
    %66 = vector.load %arg9[%c33, %c16_80] : memref<192x80xbf16, #tpu.memory_space<vmem>>, vector<7x16xbf16>
    tpu.vector_store %arg9[%c33, %c16_80], %65 {strides = array<i32>} : memref<192x80xbf16, #tpu.memory_space<vmem>>, vector<7x16xbf16>,
    %c32_81 = arith.constant 32 : index
    %c0_82 = arith.constant 0 : index
    %67 = vector.load %arg13[%c32_81, %c0_82] : memref<288x16xbf16, #tpu.memory_space<vmem>>, vector<8x16xbf16>
    %c32_83 = arith.constant 32 : index
    %c32_84 = arith.constant 32 : index
    %68 = vector.load %arg9[%c32_83, %c32_84] : memref<192x80xbf16, #tpu.memory_space<vmem>>, vector<8x16xbf16>
    tpu.vector_store %arg9[%c32_83, %c32_84], %67 {strides = array<i32>} : memref<192x80xbf16, #tpu.memory_space<vmem>>, vector<8x16xbf16>,
    %c33_85 = arith.constant 33 : index
    %c0_86 = arith.constant 0 : index
    %69 = vector.load %arg13[%c33_85, %c0_86] : memref<288x16xbf16, #tpu.memory_space<vmem>>, vector<7x16xbf16>
    %c32_87 = arith.constant 32 : index
    %c48_88 = arith.constant 48 : index
    %70 = vector.load %arg9[%c32_87, %c48_88] : memref<192x80xbf16, #tpu.memory_space<vmem>>, vector<7x16xbf16>
    tpu.vector_store %arg9[%c32_87, %c48_88], %69 {strides = array<i32>} : memref<192x80xbf16, #tpu.memory_space<vmem>>, vector<7x16xbf16>,
    %c34_89 = arith.constant 34 : index
    %c0_90 = arith.constant 0 : index
    %71 = vector.load %arg13[%c34_89, %c0_90] : memref<288x16xbf16, #tpu.memory_space<vmem>>, vector<6x16xbf16>
    %c32_91 = arith.constant 32 : index
    %c64_92 = arith.constant 64 : index
    %72 = vector.load %arg9[%c32_91, %c64_92] : memref<192x80xbf16, #tpu.memory_space<vmem>>, vector<6x16xbf16>
    tpu.vector_store %arg9[%c32_91, %c64_92], %71 {strides = array<i32>} : memref<192x80xbf16, #tpu.memory_space<vmem>>, vector<6x16xbf16>,
    %c48_93 = arith.constant 48 : index
    %c0_94 = arith.constant 0 : index
    %73 = vector.load %arg13[%c48_93, %c0_94] : memref<288x16xbf16, #tpu.memory_space<vmem>>, vector<6x16xbf16>
    %c42 = arith.constant 42 : index
    %c0_95 = arith.constant 0 : index
    %74 = vector.load %arg9[%c42, %c0_95] : memref<192x80xbf16, #tpu.memory_space<vmem>>, vector<6x16xbf16>
    tpu.vector_store %arg9[%c42, %c0_95], %73 {strides = array<i32>} : memref<192x80xbf16, #tpu.memory_space<vmem>>, vector<6x16xbf16>,
    %c48_96 = arith.constant 48 : index
    %c0_97 = arith.constant 0 : index
    %75 = vector.load %arg13[%c48_96, %c0_97] : memref<288x16xbf16, #tpu.memory_space<vmem>>, vector<7x16xbf16>
    %c41 = arith.constant 41 : index
    %c16_98 = arith.constant 16 : index
    %76 = vector.load %arg9[%c41, %c16_98] : memref<192x80xbf16, #tpu.memory_space<vmem>>, vector<7x16xbf16>
    tpu.vector_store %arg9[%c41, %c16_98], %75 {strides = array<i32>} : memref<192x80xbf16, #tpu.memory_space<vmem>>, vector<7x16xbf16>,
    %c48_99 = arith.constant 48 : index
    %c0_100 = arith.constant 0 : index
    %77 = vector.load %arg13[%c48_99, %c0_100] : memref<288x16xbf16, #tpu.memory_space<vmem>>, vector<8x16xbf16>
    %c40 = arith.constant 40 : index
    %c32_101 = arith.constant 32 : index
    %78 = vector.load %arg9[%c40, %c32_101] : memref<192x80xbf16, #tpu.memory_space<vmem>>, vector<8x16xbf16>
    tpu.vector_store %arg9[%c40, %c32_101], %77 {strides = array<i32>} : memref<192x80xbf16, #tpu.memory_space<vmem>>, vector<8x16xbf16>,
    %c49 = arith.constant 49 : index
    %c0_102 = arith.constant 0 : index
    %79 = vector.load %arg13[%c49, %c0_102] : memref<288x16xbf16, #tpu.memory_space<vmem>>, vector<7x16xbf16>
    %c40_103 = arith.constant 40 : index
    %c48_104 = arith.constant 48 : index
    %80 = vector.load %arg9[%c40_103, %c48_104] : memref<192x80xbf16, #tpu.memory_space<vmem>>, vector<7x16xbf16>
    tpu.vector_store %arg9[%c40_103, %c48_104], %79 {strides = array<i32>} : memref<192x80xbf16, #tpu.memory_space<vmem>>, vector<7x16xbf16>,
    %c50 = arith.constant 50 : index
    %c0_105 = arith.constant 0 : index
    %81 = vector.load %arg13[%c50, %c0_105] : memref<288x16xbf16, #tpu.memory_space<vmem>>, vector<6x16xbf16>
    %c40_106 = arith.constant 40 : index
    %c64_107 = arith.constant 64 : index
    %82 = vector.load %arg9[%c40_106, %c64_107] : memref<192x80xbf16, #tpu.memory_space<vmem>>, vector<6x16xbf16>
    tpu.vector_store %arg9[%c40_106, %c64_107], %81 {strides = array<i32>} : memref<192x80xbf16, #tpu.memory_space<vmem>>, vector<6x16xbf16>,
    %c64_108 = arith.constant 64 : index
    %c0_109 = arith.constant 0 : index
    %83 = vector.load %arg13[%c64_108, %c0_109] : memref<288x16xbf16, #tpu.memory_space<vmem>>, vector<6x16xbf16>
    %c50_110 = arith.constant 50 : index
    %c0_111 = arith.constant 0 : index
    %84 = vector.load %arg9[%c50_110, %c0_111] : memref<192x80xbf16, #tpu.memory_space<vmem>>, vector<6x16xbf16>
    tpu.vector_store %arg9[%c50_110, %c0_111], %83 {strides = array<i32>} : memref<192x80xbf16, #tpu.memory_space<vmem>>, vector<6x16xbf16>,
    %c64_112 = arith.constant 64 : index
    %c0_113 = arith.constant 0 : index
    %85 = vector.load %arg13[%c64_112, %c0_113] : memref<288x16xbf16, #tpu.memory_space<vmem>>, vector<7x16xbf16>
    %c49_114 = arith.constant 49 : index
    %c16_115 = arith.constant 16 : index
    %86 = vector.load %arg9[%c49_114, %c16_115] : memref<192x80xbf16, #tpu.memory_space<vmem>>, vector<7x16xbf16>
    tpu.vector_store %arg9[%c49_114, %c16_115], %85 {strides = array<i32>} : memref<192x80xbf16, #tpu.memory_space<vmem>>, vector<7x16xbf16>,
    %c64_116 = arith.constant 64 : index
    %c0_117 = arith.constant 0 : index
    %87 = vector.load %arg13[%c64_116, %c0_117] : memref<288x16xbf16, #tpu.memory_space<vmem>>, vector<8x16xbf16>
    %c48_118 = arith.constant 48 : index
    %c32_119 = arith.constant 32 : index
    %88 = vector.load %arg9[%c48_118, %c32_119] : memref<192x80xbf16, #tpu.memory_space<vmem>>, vector<8x16xbf16>
    tpu.vector_store %arg9[%c48_118, %c32_119], %87 {strides = array<i32>} : memref<192x80xbf16, #tpu.memory_space<vmem>>, vector<8x16xbf16>,
    %c65 = arith.constant 65 : index
    %c0_120 = arith.constant 0 : index
    %89 = vector.load %arg13[%c65, %c0_120] : memref<288x16xbf16, #tpu.memory_space<vmem>>, vector<7x16xbf16>
    %c48_121 = arith.constant 48 : index
    %c48_122 = arith.constant 48 : index
    %90 = vector.load %arg9[%c48_121, %c48_122] : memref<192x80xbf16, #tpu.memory_space<vmem>>, vector<7x16xbf16>
    tpu.vector_store %arg9[%c48_121, %c48_122], %89 {strides = array<i32>} : memref<192x80xbf16, #tpu.memory_space<vmem>>, vector<7x16xbf16>,
    %c66 = arith.constant 66 : index
    %c0_123 = arith.constant 0 : index
    %91 = vector.load %arg13[%c66, %c0_123] : memref<288x16xbf16, #tpu.memory_space<vmem>>, vector<6x16xbf16>
    %c48_124 = arith.constant 48 : index
    %c64_125 = arith.constant 64 : index
    %92 = vector.load %arg9[%c48_124, %c64_125] : memref<192x80xbf16, #tpu.memory_space<vmem>>, vector<6x16xbf16>
    tpu.vector_store %arg9[%c48_124, %c64_125], %91 {strides = array<i32>} : memref<192x80xbf16, #tpu.memory_space<vmem>>, vector<6x16xbf16>,
    %c80 = arith.constant 80 : index
    %c0_126 = arith.constant 0 : index
    %93 = vector.load %arg13[%c80, %c0_126] : memref<288x16xbf16, #tpu.memory_space<vmem>>, vector<6x16xbf16>
    %c58 = arith.constant 58 : index
    %c0_127 = arith.constant 0 : index
    %94 = vector.load %arg9[%c58, %c0_127] : memref<192x80xbf16, #tpu.memory_space<vmem>>, vector<6x16xbf16>
    tpu.vector_store %arg9[%c58, %c0_127], %93 {strides = array<i32>} : memref<192x80xbf16, #tpu.memory_space<vmem>>, vector<6x16xbf16>,
    %c80_128 = arith.constant 80 : index
    %c0_129 = arith.constant 0 : index
    %95 = vector.load %arg13[%c80_128, %c0_129] : memref<288x16xbf16, #tpu.memory_space<vmem>>, vector<7x16xbf16>
    %c57 = arith.constant 57 : index
    %c16_130 = arith.constant 16 : index
    %96 = vector.load %arg9[%c57, %c16_130] : memref<192x80xbf16, #tpu.memory_space<vmem>>, vector<7x16xbf16>
    tpu.vector_store %arg9[%c57, %c16_130], %95 {strides = array<i32>} : memref<192x80xbf16, #tpu.memory_space<vmem>>, vector<7x16xbf16>,
    %c80_131 = arith.constant 80 : index
    %c0_132 = arith.constant 0 : index
    %97 = vector.load %arg13[%c80_131, %c0_132] : memref<288x16xbf16, #tpu.memory_space<vmem>>, vector<8x16xbf16>
    %c56 = arith.constant 56 : index
    %c32_133 = arith.constant 32 : index
    %98 = vector.load %arg9[%c56, %c32_133] : memref<192x80xbf16, #tpu.memory_space<vmem>>, vector<8x16xbf16>
    tpu.vector_store %arg9[%c56, %c32_133], %97 {strides = array<i32>} : memref<192x80xbf16, #tpu.memory_space<vmem>>, vector<8x16xbf16>,
    %c81 = arith.constant 81 : index
    %c0_134 = arith.constant 0 : index
    %99 = vector.load %arg13[%c81, %c0_134] : memref<288x16xbf16, #tpu.memory_space<vmem>>, vector<7x16xbf16>
    %c56_135 = arith.constant 56 : index
    %c48_136 = arith.constant 48 : index
    %100 = vector.load %arg9[%c56_135, %c48_136] : memref<192x80xbf16, #tpu.memory_space<vmem>>, vector<7x16xbf16>
    tpu.vector_store %arg9[%c56_135, %c48_136], %99 {strides = array<i32>} : memref<192x80xbf16, #tpu.memory_space<vmem>>, vector<7x16xbf16>,
    %c82 = arith.constant 82 : index
    %c0_137 = arith.constant 0 : index
    %101 = vector.load %arg13[%c82, %c0_137] : memref<288x16xbf16, #tpu.memory_space<vmem>>, vector<6x16xbf16>
    %c56_138 = arith.constant 56 : index
    %c64_139 = arith.constant 64 : index
    %102 = vector.load %arg9[%c56_138, %c64_139] : memref<192x80xbf16, #tpu.memory_space<vmem>>, vector<6x16xbf16>
    tpu.vector_store %arg9[%c56_138, %c64_139], %101 {strides = array<i32>} : memref<192x80xbf16, #tpu.memory_space<vmem>>, vector<6x16xbf16>,
    %c96 = arith.constant 96 : index
    %c0_140 = arith.constant 0 : index
    %103 = vector.load %arg13[%c96, %c0_140] : memref<288x16xbf16, #tpu.memory_space<vmem>>, vector<6x16xbf16>
    %c66_141 = arith.constant 66 : index
    %c0_142 = arith.constant 0 : index
    %104 = vector.load %arg9[%c66_141, %c0_142] : memref<192x80xbf16, #tpu.memory_space<vmem>>, vector<6x16xbf16>
    tpu.vector_store %arg9[%c66_141, %c0_142], %103 {strides = array<i32>} : memref<192x80xbf16, #tpu.memory_space<vmem>>, vector<6x16xbf16>,
    %c96_143 = arith.constant 96 : index
    %c0_144 = arith.constant 0 : index
    %105 = vector.load %arg13[%c96_143, %c0_144] : memref<288x16xbf16, #tpu.memory_space<vmem>>, vector<7x16xbf16>
    %c65_145 = arith.constant 65 : index
    %c16_146 = arith.constant 16 : index
    %106 = vector.load %arg9[%c65_145, %c16_146] : memref<192x80xbf16, #tpu.memory_space<vmem>>, vector<7x16xbf16>
    tpu.vector_store %arg9[%c65_145, %c16_146], %105 {strides = array<i32>} : memref<192x80xbf16, #tpu.memory_space<vmem>>, vector<7x16xbf16>,
    %c96_147 = arith.constant 96 : index
    %c0_148 = arith.constant 0 : index
    %107 = vector.load %arg13[%c96_147, %c0_148] : memref<288x16xbf16, #tpu.memory_space<vmem>>, vector<8x16xbf16>
    %c64_149 = arith.constant 64 : index
    %c32_150 = arith.constant 32 : index
    %108 = vector.load %arg9[%c64_149, %c32_150] : memref<192x80xbf16, #tpu.memory_space<vmem>>, vector<8x16xbf16>
    tpu.vector_store %arg9[%c64_149, %c32_150], %107 {strides = array<i32>} : memref<192x80xbf16, #tpu.memory_space<vmem>>, vector<8x16xbf16>,
    %c97 = arith.constant 97 : index
    %c0_151 = arith.constant 0 : index
    %109 = vector.load %arg13[%c97, %c0_151] : memref<288x16xbf16, #tpu.memory_space<vmem>>, vector<7x16xbf16>
    %c64_152 = arith.constant 64 : index
    %c48_153 = arith.constant 48 : index
    %110 = vector.load %arg9[%c64_152, %c48_153] : memref<192x80xbf16, #tpu.memory_space<vmem>>, vector<7x16xbf16>
    tpu.vector_store %arg9[%c64_152, %c48_153], %109 {strides = array<i32>} : memref<192x80xbf16, #tpu.memory_space<vmem>>, vector<7x16xbf16>,
    %c98 = arith.constant 98 : index
    %c0_154 = arith.constant 0 : index
    %111 = vector.load %arg13[%c98, %c0_154] : memref<288x16xbf16, #tpu.memory_space<vmem>>, vector<6x16xbf16>
    %c64_155 = arith.constant 64 : index
    %c64_156 = arith.constant 64 : index
    %112 = vector.load %arg9[%c64_155, %c64_156] : memref<192x80xbf16, #tpu.memory_space<vmem>>, vector<6x16xbf16>
    tpu.vector_store %arg9[%c64_155, %c64_156], %111 {strides = array<i32>} : memref<192x80xbf16, #tpu.memory_space<vmem>>, vector<6x16xbf16>,
    %c112 = arith.constant 112 : index
    %c0_157 = arith.constant 0 : index
    %113 = vector.load %arg13[%c112, %c0_157] : memref<288x16xbf16, #tpu.memory_space<vmem>>, vector<6x16xbf16>
    %c74 = arith.constant 74 : index
    %c0_158 = arith.constant 0 : index
    %114 = vector.load %arg9[%c74, %c0_158] : memref<192x80xbf16, #tpu.memory_space<vmem>>, vector<6x16xbf16>
    tpu.vector_store %arg9[%c74, %c0_158], %113 {strides = array<i32>} : memref<192x80xbf16, #tpu.memory_space<vmem>>, vector<6x16xbf16>,
    %c112_159 = arith.constant 112 : index
    %c0_160 = arith.constant 0 : index
    %115 = vector.load %arg13[%c112_159, %c0_160] : memref<288x16xbf16, #tpu.memory_space<vmem>>, vector<7x16xbf16>
    %c73 = arith.constant 73 : index
    %c16_161 = arith.constant 16 : index
    %116 = vector.load %arg9[%c73, %c16_161] : memref<192x80xbf16, #tpu.memory_space<vmem>>, vector<7x16xbf16>
    tpu.vector_store %arg9[%c73, %c16_161], %115 {strides = array<i32>} : memref<192x80xbf16, #tpu.memory_space<vmem>>, vector<7x16xbf16>,
    %c112_162 = arith.constant 112 : index
    %c0_163 = arith.constant 0 : index
    %117 = vector.load %arg13[%c112_162, %c0_163] : memref<288x16xbf16, #tpu.memory_space<vmem>>, vector<8x16xbf16>
    %c72 = arith.constant 72 : index
    %c32_164 = arith.constant 32 : index
    %118 = vector.load %arg9[%c72, %c32_164] : memref<192x80xbf16, #tpu.memory_space<vmem>>, vector<8x16xbf16>
    tpu.vector_store %arg9[%c72, %c32_164], %117 {strides = array<i32>} : memref<192x80xbf16, #tpu.memory_space<vmem>>, vector<8x16xbf16>,
    %c113 = arith.constant 113 : index
    %c0_165 = arith.constant 0 : index
    %119 = vector.load %arg13[%c113, %c0_165] : memref<288x16xbf16, #tpu.memory_space<vmem>>, vector<7x16xbf16>
    %c72_166 = arith.constant 72 : index
    %c48_167 = arith.constant 48 : index
    %120 = vector.load %arg9[%c72_166, %c48_167] : memref<192x80xbf16, #tpu.memory_space<vmem>>, vector<7x16xbf16>
    tpu.vector_store %arg9[%c72_166, %c48_167], %119 {strides = array<i32>} : memref<192x80xbf16, #tpu.memory_space<vmem>>, vector<7x16xbf16>,
    %c114 = arith.constant 114 : index
    %c0_168 = arith.constant 0 : index
    %121 = vector.load %arg13[%c114, %c0_168] : memref<288x16xbf16, #tpu.memory_space<vmem>>, vector<6x16xbf16>
    %c72_169 = arith.constant 72 : index
    %c64_170 = arith.constant 64 : index
    %122 = vector.load %arg9[%c72_169, %c64_170] : memref<192x80xbf16, #tpu.memory_space<vmem>>, vector<6x16xbf16>
    tpu.vector_store %arg9[%c72_169, %c64_170], %121 {strides = array<i32>} : memref<192x80xbf16, #tpu.memory_space<vmem>>, vector<6x16xbf16>,
    %c160 = arith.constant 160 : index
    %c0_171 = arith.constant 0 : index
    %123 = vector.load %arg13[%c160, %c0_171] : memref<288x16xbf16, #tpu.memory_space<vmem>>, vector<6x16xbf16>
    %c114_172 = arith.constant 114 : index
    %c0_173 = arith.constant 0 : index
    %124 = vector.load %arg9[%c114_172, %c0_173] : memref<192x80xbf16, #tpu.memory_space<vmem>>, vector<6x16xbf16>
    tpu.vector_store %arg9[%c114_172, %c0_173], %123 {strides = array<i32>} : memref<192x80xbf16, #tpu.memory_space<vmem>>, vector<6x16xbf16>,
    %c160_174 = arith.constant 160 : index
    %c0_175 = arith.constant 0 : index
    %125 = vector.load %arg13[%c160_174, %c0_175] : memref<288x16xbf16, #tpu.memory_space<vmem>>, vector<7x16xbf16>
    %c113_176 = arith.constant 113 : index
    %c16_177 = arith.constant 16 : index
    %126 = vector.load %arg9[%c113_176, %c16_177] : memref<192x80xbf16, #tpu.memory_space<vmem>>, vector<7x16xbf16>
    tpu.vector_store %arg9[%c113_176, %c16_177], %125 {strides = array<i32>} : memref<192x80xbf16, #tpu.memory_space<vmem>>, vector<7x16xbf16>,
    %c160_178 = arith.constant 160 : index
    %c0_179 = arith.constant 0 : index
    %127 = vector.load %arg13[%c160_178, %c0_179] : memref<288x16xbf16, #tpu.memory_space<vmem>>, vector<8x16xbf16>
    %c112_180 = arith.constant 112 : index
    %c32_181 = arith.constant 32 : index
    %128 = vector.load %arg9[%c112_180, %c32_181] : memref<192x80xbf16, #tpu.memory_space<vmem>>, vector<8x16xbf16>
    tpu.vector_store %arg9[%c112_180, %c32_181], %127 {strides = array<i32>} : memref<192x80xbf16, #tpu.memory_space<vmem>>, vector<8x16xbf16>,
    %c161 = arith.constant 161 : index
    %c0_182 = arith.constant 0 : index
    %129 = vector.load %arg13[%c161, %c0_182] : memref<288x16xbf16, #tpu.memory_space<vmem>>, vector<7x16xbf16>
    %c112_183 = arith.constant 112 : index
    %c48_184 = arith.constant 48 : index
    %130 = vector.load %arg9[%c112_183, %c48_184] : memref<192x80xbf16, #tpu.memory_space<vmem>>, vector<7x16xbf16>
    tpu.vector_store %arg9[%c112_183, %c48_184], %129 {strides = array<i32>} : memref<192x80xbf16, #tpu.memory_space<vmem>>, vector<7x16xbf16>,
    %c162 = arith.constant 162 : index
    %c0_185 = arith.constant 0 : index
    %131 = vector.load %arg13[%c162, %c0_185] : memref<288x16xbf16, #tpu.memory_space<vmem>>, vector<6x16xbf16>
    %c112_186 = arith.constant 112 : index
    %c64_187 = arith.constant 64 : index
    %132 = vector.load %arg9[%c112_186, %c64_187] : memref<192x80xbf16, #tpu.memory_space<vmem>>, vector<6x16xbf16>
    tpu.vector_store %arg9[%c112_186, %c64_187], %131 {strides = array<i32>} : memref<192x80xbf16, #tpu.memory_space<vmem>>, vector<6x16xbf16>,
    %c176 = arith.constant 176 : index
    %c0_188 = arith.constant 0 : index
    %133 = vector.load %arg13[%c176, %c0_188] : memref<288x16xbf16, #tpu.memory_space<vmem>>, vector<6x16xbf16>
    %c122 = arith.constant 122 : index
    %c0_189 = arith.constant 0 : index
    %134 = vector.load %arg9[%c122, %c0_189] : memref<192x80xbf16, #tpu.memory_space<vmem>>, vector<6x16xbf16>
    tpu.vector_store %arg9[%c122, %c0_189], %133 {strides = array<i32>} : memref<192x80xbf16, #tpu.memory_space<vmem>>, vector<6x16xbf16>,
    %c176_190 = arith.constant 176 : index
    %c0_191 = arith.constant 0 : index
    %135 = vector.load %arg13[%c176_190, %c0_191] : memref<288x16xbf16, #tpu.memory_space<vmem>>, vector<7x16xbf16>
    %c121 = arith.constant 121 : index
    %c16_192 = arith.constant 16 : index
    %136 = vector.load %arg9[%c121, %c16_192] : memref<192x80xbf16, #tpu.memory_space<vmem>>, vector<7x16xbf16>
    tpu.vector_store %arg9[%c121, %c16_192], %135 {strides = array<i32>} : memref<192x80xbf16, #tpu.memory_space<vmem>>, vector<7x16xbf16>,
    %c176_193 = arith.constant 176 : index
    %c0_194 = arith.constant 0 : index
    %137 = vector.load %arg13[%c176_193, %c0_194] : memref<288x16xbf16, #tpu.memory_space<vmem>>, vector<8x16xbf16>
    %c120 = arith.constant 120 : index
    %c32_195 = arith.constant 32 : index
    %138 = vector.load %arg9[%c120, %c32_195] : memref<192x80xbf16, #tpu.memory_space<vmem>>, vector<8x16xbf16>
    tpu.vector_store %arg9[%c120, %c32_195], %137 {strides = array<i32>} : memref<192x80xbf16, #tpu.memory_space<vmem>>, vector<8x16xbf16>,
    %c177 = arith.constant 177 : index
    %c0_196 = arith.constant 0 : index
    %139 = vector.load %arg13[%c177, %c0_196] : memref<288x16xbf16, #tpu.memory_space<vmem>>, vector<7x16xbf16>
    %c120_197 = arith.constant 120 : index
    %c48_198 = arith.constant 48 : index
    %140 = vector.load %arg9[%c120_197, %c48_198] : memref<192x80xbf16, #tpu.memory_space<vmem>>, vector<7x16xbf16>
    tpu.vector_store %arg9[%c120_197, %c48_198], %139 {strides = array<i32>} : memref<192x80xbf16, #tpu.memory_space<vmem>>, vector<7x16xbf16>,
    %c178 = arith.constant 178 : index
    %c0_199 = arith.constant 0 : index
    %141 = vector.load %arg13[%c178, %c0_199] : memref<288x16xbf16, #tpu.memory_space<vmem>>, vector<6x16xbf16>
    %c120_200 = arith.constant 120 : index
    %c64_201 = arith.constant 64 : index
    %142 = vector.load %arg9[%c120_200, %c64_201] : memref<192x80xbf16, #tpu.memory_space<vmem>>, vector<6x16xbf16>
    tpu.vector_store %arg9[%c120_200, %c64_201], %141 {strides = array<i32>} : memref<192x80xbf16, #tpu.memory_space<vmem>>, vector<6x16xbf16>,
    %c192 = arith.constant 192 : index
    %c0_202 = arith.constant 0 : index
    %143 = vector.load %arg13[%c192, %c0_202] : memref<288x16xbf16, #tpu.memory_space<vmem>>, vector<6x16xbf16>
    %c130 = arith.constant 130 : index
    %c0_203 = arith.constant 0 : index
    %144 = vector.load %arg9[%c130, %c0_203] : memref<192x80xbf16, #tpu.memory_space<vmem>>, vector<6x16xbf16>
    tpu.vector_store %arg9[%c130, %c0_203], %143 {strides = array<i32>} : memref<192x80xbf16, #tpu.memory_space<vmem>>, vector<6x16xbf16>,
    %c192_204 = arith.constant 192 : index
    %c0_205 = arith.constant 0 : index
    %145 = vector.load %arg13[%c192_204, %c0_205] : memref<288x16xbf16, #tpu.memory_space<vmem>>, vector<7x16xbf16>
    %c129 = arith.constant 129 : index
    %c16_206 = arith.constant 16 : index
    %146 = vector.load %arg9[%c129, %c16_206] : memref<192x80xbf16, #tpu.memory_space<vmem>>, vector<7x16xbf16>
    tpu.vector_store %arg9[%c129, %c16_206], %145 {strides = array<i32>} : memref<192x80xbf16, #tpu.memory_space<vmem>>, vector<7x16xbf16>,
    %c192_207 = arith.constant 192 : index
    %c0_208 = arith.constant 0 : index
    %147 = vector.load %arg13[%c192_207, %c0_208] : memref<288x16xbf16, #tpu.memory_space<vmem>>, vector<8x16xbf16>
    %c128 = arith.constant 128 : index
    %c32_209 = arith.constant 32 : index
    %148 = vector.load %arg9[%c128, %c32_209] : memref<192x80xbf16, #tpu.memory_space<vmem>>, vector<8x16xbf16>
    tpu.vector_store %arg9[%c128, %c32_209], %147 {strides = array<i32>} : memref<192x80xbf16, #tpu.memory_space<vmem>>, vector<8x16xbf16>,
    %c193 = arith.constant 193 : index
    %c0_210 = arith.constant 0 : index
    %149 = vector.load %arg13[%c193, %c0_210] : memref<288x16xbf16, #tpu.memory_space<vmem>>, vector<7x16xbf16>
    %c128_211 = arith.constant 128 : index
    %c48_212 = arith.constant 48 : index
    %150 = vector.load %arg9[%c128_211, %c48_212] : memref<192x80xbf16, #tpu.memory_space<vmem>>, vector<7x16xbf16>
    tpu.vector_store %arg9[%c128_211, %c48_212], %149 {strides = array<i32>} : memref<192x80xbf16, #tpu.memory_space<vmem>>, vector<7x16xbf16>,
    %c194 = arith.constant 194 : index
    %c0_213 = arith.constant 0 : index
    %151 = vector.load %arg13[%c194, %c0_213] : memref<288x16xbf16, #tpu.memory_space<vmem>>, vector<6x16xbf16>
    %c128_214 = arith.constant 128 : index
    %c64_215 = arith.constant 64 : index
    %152 = vector.load %arg9[%c128_214, %c64_215] : memref<192x80xbf16, #tpu.memory_space<vmem>>, vector<6x16xbf16>
    tpu.vector_store %arg9[%c128_214, %c64_215], %151 {strides = array<i32>} : memref<192x80xbf16, #tpu.memory_space<vmem>>, vector<6x16xbf16>,
    %c208 = arith.constant 208 : index
    %c0_216 = arith.constant 0 : index
    %153 = vector.load %arg13[%c208, %c0_216] : memref<288x16xbf16, #tpu.memory_space<vmem>>, vector<6x16xbf16>
    %c138 = arith.constant 138 : index
    %c0_217 = arith.constant 0 : index
    %154 = vector.load %arg9[%c138, %c0_217] : memref<192x80xbf16, #tpu.memory_space<vmem>>, vector<6x16xbf16>
    tpu.vector_store %arg9[%c138, %c0_217], %153 {strides = array<i32>} : memref<192x80xbf16, #tpu.memory_space<vmem>>, vector<6x16xbf16>,
    %c208_218 = arith.constant 208 : index
    %c0_219 = arith.constant 0 : index
    %155 = vector.load %arg13[%c208_218, %c0_219] : memref<288x16xbf16, #tpu.memory_space<vmem>>, vector<7x16xbf16>
    %c137 = arith.constant 137 : index
    %c16_220 = arith.constant 16 : index
    %156 = vector.load %arg9[%c137, %c16_220] : memref<192x80xbf16, #tpu.memory_space<vmem>>, vector<7x16xbf16>
    tpu.vector_store %arg9[%c137, %c16_220], %155 {strides = array<i32>} : memref<192x80xbf16, #tpu.memory_space<vmem>>, vector<7x16xbf16>,
    %c208_221 = arith.constant 208 : index
    %c0_222 = arith.constant 0 : index
    %157 = vector.load %arg13[%c208_221, %c0_222] : memref<288x16xbf16, #tpu.memory_space<vmem>>, vector<8x16xbf16>
    %c136 = arith.constant 136 : index
    %c32_223 = arith.constant 32 : index
    %158 = vector.load %arg9[%c136, %c32_223] : memref<192x80xbf16, #tpu.memory_space<vmem>>, vector<8x16xbf16>
    tpu.vector_store %arg9[%c136, %c32_223], %157 {strides = array<i32>} : memref<192x80xbf16, #tpu.memory_space<vmem>>, vector<8x16xbf16>,
    %c209 = arith.constant 209 : index
    %c0_224 = arith.constant 0 : index
    %159 = vector.load %arg13[%c209, %c0_224] : memref<288x16xbf16, #tpu.memory_space<vmem>>, vector<7x16xbf16>
    %c136_225 = arith.constant 136 : index
    %c48_226 = arith.constant 48 : index
    %160 = vector.load %arg9[%c136_225, %c48_226] : memref<192x80xbf16, #tpu.memory_space<vmem>>, vector<7x16xbf16>
    tpu.vector_store %arg9[%c136_225, %c48_226], %159 {strides = array<i32>} : memref<192x80xbf16, #tpu.memory_space<vmem>>, vector<7x16xbf16>,
    %c210 = arith.constant 210 : index
    %c0_227 = arith.constant 0 : index
    %161 = vector.load %arg13[%c210, %c0_227] : memref<288x16xbf16, #tpu.memory_space<vmem>>, vector<6x16xbf16>
    %c136_228 = arith.constant 136 : index
    %c64_229 = arith.constant 64 : index
    %162 = vector.load %arg9[%c136_228, %c64_229] : memref<192x80xbf16, #tpu.memory_space<vmem>>, vector<6x16xbf16>
    tpu.vector_store %arg9[%c136_228, %c64_229], %161 {strides = array<i32>} : memref<192x80xbf16, #tpu.memory_space<vmem>>, vector<6x16xbf16>,
    %c224 = arith.constant 224 : index
    %c0_230 = arith.constant 0 : index
    %163 = vector.load %arg13[%c224, %c0_230] : memref<288x16xbf16, #tpu.memory_space<vmem>>, vector<6x16xbf16>
    %c146 = arith.constant 146 : index
    %c0_231 = arith.constant 0 : index
    %164 = vector.load %arg9[%c146, %c0_231] : memref<192x80xbf16, #tpu.memory_space<vmem>>, vector<6x16xbf16>
    tpu.vector_store %arg9[%c146, %c0_231], %163 {strides = array<i32>} : memref<192x80xbf16, #tpu.memory_space<vmem>>, vector<6x16xbf16>,
    %c224_232 = arith.constant 224 : index
    %c0_233 = arith.constant 0 : index
    %165 = vector.load %arg13[%c224_232, %c0_233] : memref<288x16xbf16, #tpu.memory_space<vmem>>, vector<7x16xbf16>
    %c145 = arith.constant 145 : index
    %c16_234 = arith.constant 16 : index
    %166 = vector.load %arg9[%c145, %c16_234] : memref<192x80xbf16, #tpu.memory_space<vmem>>, vector<7x16xbf16>
    tpu.vector_store %arg9[%c145, %c16_234], %165 {strides = array<i32>} : memref<192x80xbf16, #tpu.memory_space<vmem>>, vector<7x16xbf16>,
    %c224_235 = arith.constant 224 : index
    %c0_236 = arith.constant 0 : index
    %167 = vector.load %arg13[%c224_235, %c0_236] : memref<288x16xbf16, #tpu.memory_space<vmem>>, vector<8x16xbf16>
    %c144 = arith.constant 144 : index
    %c32_237 = arith.constant 32 : index
    %168 = vector.load %arg9[%c144, %c32_237] : memref<192x80xbf16, #tpu.memory_space<vmem>>, vector<8x16xbf16>
    tpu.vector_store %arg9[%c144, %c32_237], %167 {strides = array<i32>} : memref<192x80xbf16, #tpu.memory_space<vmem>>, vector<8x16xbf16>,
    %c225 = arith.constant 225 : index
    %c0_238 = arith.constant 0 : index
    %169 = vector.load %arg13[%c225, %c0_238] : memref<288x16xbf16, #tpu.memory_space<vmem>>, vector<7x16xbf16>
    %c144_239 = arith.constant 144 : index
    %c48_240 = arith.constant 48 : index
    %170 = vector.load %arg9[%c144_239, %c48_240] : memref<192x80xbf16, #tpu.memory_space<vmem>>, vector<7x16xbf16>
    tpu.vector_store %arg9[%c144_239, %c48_240], %169 {strides = array<i32>} : memref<192x80xbf16, #tpu.memory_space<vmem>>, vector<7x16xbf16>,
    %c226 = arith.constant 226 : index
    %c0_241 = arith.constant 0 : index
    %171 = vector.load %arg13[%c226, %c0_241] : memref<288x16xbf16, #tpu.memory_space<vmem>>, vector<6x16xbf16>
    %c144_242 = arith.constant 144 : index
    %c64_243 = arith.constant 64 : index
    %172 = vector.load %arg9[%c144_242, %c64_243] : memref<192x80xbf16, #tpu.memory_space<vmem>>, vector<6x16xbf16>
    tpu.vector_store %arg9[%c144_242, %c64_243], %171 {strides = array<i32>} : memref<192x80xbf16, #tpu.memory_space<vmem>>, vector<6x16xbf16>,
    %c240 = arith.constant 240 : index
    %c0_244 = arith.constant 0 : index
    %173 = vector.load %arg13[%c240, %c0_244] : memref<288x16xbf16, #tpu.memory_space<vmem>>, vector<6x16xbf16>
    %c154 = arith.constant 154 : index
    %c0_245 = arith.constant 0 : index
    %174 = vector.load %arg9[%c154, %c0_245] : memref<192x80xbf16, #tpu.memory_space<vmem>>, vector<6x16xbf16>
    tpu.vector_store %arg9[%c154, %c0_245], %173 {strides = array<i32>} : memref<192x80xbf16, #tpu.memory_space<vmem>>, vector<6x16xbf16>,
    %c240_246 = arith.constant 240 : index
    %c0_247 = arith.constant 0 : index
    %175 = vector.load %arg13[%c240_246, %c0_247] : memref<288x16xbf16, #tpu.memory_space<vmem>>, vector<7x16xbf16>
    %c153 = arith.constant 153 : index
    %c16_248 = arith.constant 16 : index
    %176 = vector.load %arg9[%c153, %c16_248] : memref<192x80xbf16, #tpu.memory_space<vmem>>, vector<7x16xbf16>
    tpu.vector_store %arg9[%c153, %c16_248], %175 {strides = array<i32>} : memref<192x80xbf16, #tpu.memory_space<vmem>>, vector<7x16xbf16>,
    %c240_249 = arith.constant 240 : index
    %c0_250 = arith.constant 0 : index
    %177 = vector.load %arg13[%c240_249, %c0_250] : memref<288x16xbf16, #tpu.memory_space<vmem>>, vector<8x16xbf16>
    %c152 = arith.constant 152 : index
    %c32_251 = arith.constant 32 : index
    %178 = vector.load %arg9[%c152, %c32_251] : memref<192x80xbf16, #tpu.memory_space<vmem>>, vector<8x16xbf16>
    tpu.vector_store %arg9[%c152, %c32_251], %177 {strides = array<i32>} : memref<192x80xbf16, #tpu.memory_space<vmem>>, vector<8x16xbf16>,
    %c241 = arith.constant 241 : index
    %c0_252 = arith.constant 0 : index
    %179 = vector.load %arg13[%c241, %c0_252] : memref<288x16xbf16, #tpu.memory_space<vmem>>, vector<7x16xbf16>
    %c152_253 = arith.constant 152 : index
    %c48_254 = arith.constant 48 : index
    %180 = vector.load %arg9[%c152_253, %c48_254] : memref<192x80xbf16, #tpu.memory_space<vmem>>, vector<7x16xbf16>
    tpu.vector_store %arg9[%c152_253, %c48_254], %179 {strides = array<i32>} : memref<192x80xbf16, #tpu.memory_space<vmem>>, vector<7x16xbf16>,
    %c242 = arith.constant 242 : index
    %c0_255 = arith.constant 0 : index
    %181 = vector.load %arg13[%c242, %c0_255] : memref<288x16xbf16, #tpu.memory_space<vmem>>, vector<6x16xbf16>
    %c152_256 = arith.constant 152 : index
    %c64_257 = arith.constant 64 : index
    %182 = vector.load %arg9[%c152_256, %c64_257] : memref<192x80xbf16, #tpu.memory_space<vmem>>, vector<6x16xbf16>
    tpu.vector_store %arg9[%c152_256, %c64_257], %181 {strides = array<i32>} : memref<192x80xbf16, #tpu.memory_space<vmem>>, vector<6x16xbf16>,
    %c256 = arith.constant 256 : index
    %c0_258 = arith.constant 0 : index
    %183 = vector.load %arg13[%c256, %c0_258] : memref<288x16xbf16, #tpu.memory_space<vmem>>, vector<6x16xbf16>
    %c162_259 = arith.constant 162 : index
    %c0_260 = arith.constant 0 : index
    %184 = vector.load %arg9[%c162_259, %c0_260] : memref<192x80xbf16, #tpu.memory_space<vmem>>, vector<6x16xbf16>
    tpu.vector_store %arg9[%c162_259, %c0_260], %183 {strides = array<i32>} : memref<192x80xbf16, #tpu.memory_space<vmem>>, vector<6x16xbf16>,
    %c256_261 = arith.constant 256 : index
    %c0_262 = arith.constant 0 : index
    %185 = vector.load %arg13[%c256_261, %c0_262] : memref<288x16xbf16, #tpu.memory_space<vmem>>, vector<7x16xbf16>
    %c161_263 = arith.constant 161 : index
    %c16_264 = arith.constant 16 : index
    %186 = vector.load %arg9[%c161_263, %c16_264] : memref<192x80xbf16, #tpu.memory_space<vmem>>, vector<7x16xbf16>
    tpu.vector_store %arg9[%c161_263, %c16_264], %185 {strides = array<i32>} : memref<192x80xbf16, #tpu.memory_space<vmem>>, vector<7x16xbf16>,
    %c256_265 = arith.constant 256 : index
    %c0_266 = arith.constant 0 : index
    %187 = vector.load %arg13[%c256_265, %c0_266] : memref<288x16xbf16, #tpu.memory_space<vmem>>, vector<8x16xbf16>
    %c160_267 = arith.constant 160 : index
    %c32_268 = arith.constant 32 : index
    %188 = vector.load %arg9[%c160_267, %c32_268] : memref<192x80xbf16, #tpu.memory_space<vmem>>, vector<8x16xbf16>
    tpu.vector_store %arg9[%c160_267, %c32_268], %187 {strides = array<i32>} : memref<192x80xbf16, #tpu.memory_space<vmem>>, vector<8x16xbf16>,
    %c257 = arith.constant 257 : index
    %c0_269 = arith.constant 0 : index
    %189 = vector.load %arg13[%c257, %c0_269] : memref<288x16xbf16, #tpu.memory_space<vmem>>, vector<7x16xbf16>
    %c160_270 = arith.constant 160 : index
    %c48_271 = arith.constant 48 : index
    %190 = vector.load %arg9[%c160_270, %c48_271] : memref<192x80xbf16, #tpu.memory_space<vmem>>, vector<7x16xbf16>
    tpu.vector_store %arg9[%c160_270, %c48_271], %189 {strides = array<i32>} : memref<192x80xbf16, #tpu.memory_space<vmem>>, vector<7x16xbf16>,
    %c258 = arith.constant 258 : index
    %c0_272 = arith.constant 0 : index
    %191 = vector.load %arg13[%c258, %c0_272] : memref<288x16xbf16, #tpu.memory_space<vmem>>, vector<6x16xbf16>
    %c160_273 = arith.constant 160 : index
    %c64_274 = arith.constant 64 : index
    %192 = vector.load %arg9[%c160_273, %c64_274] : memref<192x80xbf16, #tpu.memory_space<vmem>>, vector<6x16xbf16>
    tpu.vector_store %arg9[%c160_273, %c64_274], %191 {strides = array<i32>} : memref<192x80xbf16, #tpu.memory_space<vmem>>, vector<6x16xbf16>,
    %c272 = arith.constant 272 : index
    %c0_275 = arith.constant 0 : index
    %193 = vector.load %arg13[%c272, %c0_275] : memref<288x16xbf16, #tpu.memory_space<vmem>>, vector<6x16xbf16>
    %c170 = arith.constant 170 : index
    %c0_276 = arith.constant 0 : index
    %194 = vector.load %arg9[%c170, %c0_276] : memref<192x80xbf16, #tpu.memory_space<vmem>>, vector<6x16xbf16>
    tpu.vector_store %arg9[%c170, %c0_276], %193 {strides = array<i32>} : memref<192x80xbf16, #tpu.memory_space<vmem>>, vector<6x16xbf16>,
    %c272_277 = arith.constant 272 : index
    %c0_278 = arith.constant 0 : index
    %195 = vector.load %arg13[%c272_277, %c0_278] : memref<288x16xbf16, #tpu.memory_space<vmem>>, vector<7x16xbf16>
    %c169 = arith.constant 169 : index
    %c16_279 = arith.constant 16 : index
    %196 = vector.load %arg9[%c169, %c16_279] : memref<192x80xbf16, #tpu.memory_space<vmem>>, vector<7x16xbf16>
    tpu.vector_store %arg9[%c169, %c16_279], %195 {strides = array<i32>} : memref<192x80xbf16, #tpu.memory_space<vmem>>, vector<7x16xbf16>,
    %c272_280 = arith.constant 272 : index
    %c0_281 = arith.constant 0 : index
    %197 = vector.load %arg13[%c272_280, %c0_281] : memref<288x16xbf16, #tpu.memory_space<vmem>>, vector<8x16xbf16>
    %c168 = arith.constant 168 : index
    %c32_282 = arith.constant 32 : index
    %198 = vector.load %arg9[%c168, %c32_282] : memref<192x80xbf16, #tpu.memory_space<vmem>>, vector<8x16xbf16>
    tpu.vector_store %arg9[%c168, %c32_282], %197 {strides = array<i32>} : memref<192x80xbf16, #tpu.memory_space<vmem>>, vector<8x16xbf16>,
    %c273 = arith.constant 273 : index
    %c0_283 = arith.constant 0 : index
    %199 = vector.load %arg13[%c273, %c0_283] : memref<288x16xbf16, #tpu.memory_space<vmem>>, vector<7x16xbf16>
    %c168_284 = arith.constant 168 : index
    %c48_285 = arith.constant 48 : index
    %200 = vector.load %arg9[%c168_284, %c48_285] : memref<192x80xbf16, #tpu.memory_space<vmem>>, vector<7x16xbf16>
    tpu.vector_store %arg9[%c168_284, %c48_285], %199 {strides = array<i32>} : memref<192x80xbf16, #tpu.memory_space<vmem>>, vector<7x16xbf16>,
    %c274 = arith.constant 274 : index
    %c0_286 = arith.constant 0 : index
    %201 = vector.load %arg13[%c274, %c0_286] : memref<288x16xbf16, #tpu.memory_space<vmem>>, vector<6x16xbf16>
    %c168_287 = arith.constant 168 : index
    %c64_288 = arith.constant 64 : index
    %202 = vector.load %arg9[%c168_287, %c64_288] : memref<192x80xbf16, #tpu.memory_space<vmem>>, vector<6x16xbf16>
    tpu.vector_store %arg9[%c168_287, %c64_288], %201 {strides = array<i32>} : memref<192x80xbf16, #tpu.memory_space<vmem>>, vector<6x16xbf16>,
    %c0_289 = arith.constant 0 : index
    %c0_290 = arith.constant 0 : index
    %203 = vector.load %arg9[%c0_289, %c0_290] : memref<192x80xbf16, #tpu.memory_space<vmem>>, vector<160x80xbf16>
    %c0_291 = arith.constant 0 : index
    %c0_292 = arith.constant 0 : index
    %c0_293 = arith.constant 0 : index
    %204 = vector.load %arg4[%c0_291, %c0_292, %c0_293] : memref<5x80x64xbf16, #tpu.memory_space<vmem>>, vector<1x80x64xbf16>
    %205 = vector.shape_cast %204 : vector<1x80x64xbf16> to vector<80x64xbf16>
    %cst_294 = arith.constant dense<0.000000e+00> : vector<160x64xf32>
    %206 = tpu.matmul %203, %205, %cst_294 {dimension_numbers = #tpu.dot_dimension_numbers<[1], [0], [0], [1], [0, 0, 1, 1], [], []>} : vector<160x80xbf16>, vector<80x64xbf16>, vector<160x64xf32> -> vector<160x64xf32>
    %c8 = arith.constant 8 : index
    %c0_295 = arith.constant 0 : index
    %207 = vector.load %arg9[%c8, %c0_295] : memref<192x80xbf16, #tpu.memory_space<vmem>>, vector<160x80xbf16>
    %c1_296 = arith.constant 1 : index
    %c0_297 = arith.constant 0 : index
    %c0_298 = arith.constant 0 : index
    %208 = vector.load %arg4[%c1_296, %c0_297, %c0_298] : memref<5x80x64xbf16, #tpu.memory_space<vmem>>, vector<1x80x64xbf16>
    %209 = vector.shape_cast %208 : vector<1x80x64xbf16> to vector<80x64xbf16>
    %cst_299 = arith.constant dense<0.000000e+00> : vector<160x64xf32>
    %210 = tpu.matmul %207, %209, %cst_299 {dimension_numbers = #tpu.dot_dimension_numbers<[1], [0], [0], [1], [0, 0, 1, 1], [], []>} : vector<160x80xbf16>, vector<80x64xbf16>, vector<160x64xf32> -> vector<160x64xf32>
    %211 = arith.addf %206, %210 : vector<160x64xf32>
    %c16_300 = arith.constant 16 : index
    %c0_301 = arith.constant 0 : index
    %212 = vector.load %arg9[%c16_300, %c0_301] : memref<192x80xbf16, #tpu.memory_space<vmem>>, vector<160x80xbf16>
    %c2_302 = arith.constant 2 : index
    %c0_303 = arith.constant 0 : index
    %c0_304 = arith.constant 0 : index
    %213 = vector.load %arg4[%c2_302, %c0_303, %c0_304] : memref<5x80x64xbf16, #tpu.memory_space<vmem>>, vector<1x80x64xbf16>
    %214 = vector.shape_cast %213 : vector<1x80x64xbf16> to vector<80x64xbf16>
    %cst_305 = arith.constant dense<0.000000e+00> : vector<160x64xf32>
    %215 = tpu.matmul %212, %214, %cst_305 {dimension_numbers = #tpu.dot_dimension_numbers<[1], [0], [0], [1], [0, 0, 1, 1], [], []>} : vector<160x80xbf16>, vector<80x64xbf16>, vector<160x64xf32> -> vector<160x64xf32>
    %216 = arith.addf %211, %215 : vector<160x64xf32>
    %c24_306 = arith.constant 24 : index
    %c0_307 = arith.constant 0 : index
    %217 = vector.load %arg9[%c24_306, %c0_307] : memref<192x80xbf16, #tpu.memory_space<vmem>>, vector<160x80xbf16>
    %c3_308 = arith.constant 3 : index
    %c0_309 = arith.constant 0 : index
    %c0_310 = arith.constant 0 : index
    %218 = vector.load %arg4[%c3_308, %c0_309, %c0_310] : memref<5x80x64xbf16, #tpu.memory_space<vmem>>, vector<1x80x64xbf16>
    %219 = vector.shape_cast %218 : vector<1x80x64xbf16> to vector<80x64xbf16>
    %cst_311 = arith.constant dense<0.000000e+00> : vector<160x64xf32>
    %220 = tpu.matmul %217, %219, %cst_311 {dimension_numbers = #tpu.dot_dimension_numbers<[1], [0], [0], [1], [0, 0, 1, 1], [], []>} : vector<160x80xbf16>, vector<80x64xbf16>, vector<160x64xf32> -> vector<160x64xf32>
    %221 = arith.addf %216, %220 : vector<160x64xf32>
    %c32_312 = arith.constant 32 : index
    %c0_313 = arith.constant 0 : index
    %222 = vector.load %arg9[%c32_312, %c0_313] : memref<192x80xbf16, #tpu.memory_space<vmem>>, vector<160x80xbf16>
    %c4_314 = arith.constant 4 : index
    %c0_315 = arith.constant 0 : index
    %c0_316 = arith.constant 0 : index
    %223 = vector.load %arg4[%c4_314, %c0_315, %c0_316] : memref<5x80x64xbf16, #tpu.memory_space<vmem>>, vector<1x80x64xbf16>
    %224 = vector.shape_cast %223 : vector<1x80x64xbf16> to vector<80x64xbf16>
    %cst_317 = arith.constant dense<0.000000e+00> : vector<160x64xf32>
    %225 = tpu.matmul %222, %224, %cst_317 {dimension_numbers = #tpu.dot_dimension_numbers<[1], [0], [0], [1], [0, 0, 1, 1], [], []>} : vector<160x80xbf16>, vector<80x64xbf16>, vector<160x64xf32> -> vector<160x64xf32>
    %226 = arith.addf %221, %225 : vector<160x64xf32>
    %c0_318 = arith.constant 0 : index
    %c0_319 = arith.constant 0 : index
    %227 = vector.load %arg5[%c0_318, %c0_319] : memref<1x64xf32, #tpu.memory_space<vmem>>, vector<1x64xf32>
    %228 = vector.broadcast %227 : vector<1x64xf32> to vector<160x64xf32>
    %229 = arith.addf %226, %228 : vector<160x64xf32>
    %cst_320 = arith.constant 0.000000e+00 : f32
    %230 = vector.broadcast %cst_320 : f32 to vector<160x64xf32>
    %231 = arith.maximumf %229, %230 : vector<160x64xf32>
    %c0_321 = arith.constant 0 : index
    %c0_322 = arith.constant 0 : index
    %232 = vector.load %arg12[%c0_321, %c0_322] : memref<168x64xf32, #tpu.memory_space<vmem>>, vector<160x64xf32>
    tpu.vector_store %arg12[%c0_321, %c0_322], %231 {strides = array<i32>} : memref<168x64xf32, #tpu.memory_space<vmem>>, vector<160x64xf32>,
    %cst_323 = arith.constant 0.000000e+00 : f32
    %233 = vector.broadcast %cst_323 : f32 to vector<8x64xf32>
    %c160_324 = arith.constant 160 : index
    %c0_325 = arith.constant 0 : index
    %234 = vector.load %arg12[%c160_324, %c0_325] : memref<168x64xf32, #tpu.memory_space<vmem>>, vector<8x64xf32>
    tpu.vector_store %arg12[%c160_324, %c0_325], %233 {strides = array<i32>} : memref<168x64xf32, #tpu.memory_space<vmem>>, vector<8x64xf32>,
    %c0_326 = arith.constant 0 : index
    %c0_327 = arith.constant 0 : index
    %235 = tpu.strided_load %arg12[%c0_326, %c0_327] {strides = array<i32: 2, 1>} : memref<168x64xf32, #tpu.memory_space<vmem>>, vector<80x64xf32>
    %c1_328 = arith.constant 1 : index
    %c0_329 = arith.constant 0 : index
    %236 = tpu.strided_load %arg12[%c1_328, %c0_329] {strides = array<i32: 2, 1>} : memref<168x64xf32, #tpu.memory_space<vmem>>, vector<80x64xf32>
    %237 = arith.maximumf %235, %236 : vector<80x64xf32>
    %c8_330 = arith.constant 8 : index
    %c0_331 = arith.constant 0 : index
    %238 = tpu.strided_load %arg12[%c8_330, %c0_331] {strides = array<i32: 2, 1>} : memref<168x64xf32, #tpu.memory_space<vmem>>, vector<80x64xf32>
    %c9 = arith.constant 9 : index
    %c0_332 = arith.constant 0 : index
    %239 = tpu.strided_load %arg12[%c9, %c0_332] {strides = array<i32: 2, 1>} : memref<168x64xf32, #tpu.memory_space<vmem>>, vector<80x64xf32>
    %240 = arith.maximumf %238, %239 : vector<80x64xf32>
    %241 = arith.maximumf %237, %240 : vector<80x64xf32>
    %242 = arith.truncf %241 : vector<80x64xf32> to vector<80x64xbf16>
    %c0_333 = arith.constant 0 : index
    %c0_334 = arith.constant 0 : index
    %243 = vector.load %arg14[%c0_333, %c0_334] : memref<80x64xbf16, #tpu.memory_space<vmem>>, vector<80x64xbf16>
    tpu.vector_store %arg14[%c0_333, %c0_334], %242 {strides = array<i32>} : memref<80x64xbf16, #tpu.memory_space<vmem>>, vector<80x64xbf16>,
    %cst_335 = arith.constant 0.000000e+00 : bf16
    %244 = vector.broadcast %cst_335 : bf16 to vector<64x320xbf16>
    %c0_336 = arith.constant 0 : index
    %c0_337 = arith.constant 0 : index
    %245 = vector.load %arg10[%c0_336, %c0_337] : memref<64x320xbf16, #tpu.memory_space<vmem>>, vector<64x320xbf16>
    tpu.vector_store %arg10[%c0_336, %c0_337], %244 {strides = array<i32>} : memref<64x320xbf16, #tpu.memory_space<vmem>>, vector<64x320xbf16>,
    %c0_338 = arith.constant 0 : index
    %c0_339 = arith.constant 0 : index
    %246 = vector.load %arg14[%c0_338, %c0_339] : memref<80x64xbf16, #tpu.memory_space<vmem>>, vector<2x64xbf16>
    %c10 = arith.constant 10 : index
    %c0_340 = arith.constant 0 : index
    %247 = vector.load %arg10[%c10, %c0_340] : memref<64x320xbf16, #tpu.memory_space<vmem>>, vector<2x64xbf16>
    tpu.vector_store %arg10[%c10, %c0_340], %246 {strides = array<i32>} : memref<64x320xbf16, #tpu.memory_space<vmem>>, vector<2x64xbf16>,
    %c0_341 = arith.constant 0 : index
    %c0_342 = arith.constant 0 : index
    %248 = vector.load %arg14[%c0_341, %c0_342] : memref<80x64xbf16, #tpu.memory_space<vmem>>, vector<3x64xbf16>
    %c9_343 = arith.constant 9 : index
    %c64_344 = arith.constant 64 : index
    %249 = vector.load %arg10[%c9_343, %c64_344] : memref<64x320xbf16, #tpu.memory_space<vmem>>, vector<3x64xbf16>
    tpu.vector_store %arg10[%c9_343, %c64_344], %248 {strides = array<i32>} : memref<64x320xbf16, #tpu.memory_space<vmem>>, vector<3x64xbf16>,
    %c0_345 = arith.constant 0 : index
    %c0_346 = arith.constant 0 : index
    %250 = vector.load %arg14[%c0_345, %c0_346] : memref<80x64xbf16, #tpu.memory_space<vmem>>, vector<4x64xbf16>
    %c8_347 = arith.constant 8 : index
    %c128_348 = arith.constant 128 : index
    %251 = vector.load %arg10[%c8_347, %c128_348] : memref<64x320xbf16, #tpu.memory_space<vmem>>, vector<4x64xbf16>
    tpu.vector_store %arg10[%c8_347, %c128_348], %250 {strides = array<i32>} : memref<64x320xbf16, #tpu.memory_space<vmem>>, vector<4x64xbf16>,
    %c1_349 = arith.constant 1 : index
    %c0_350 = arith.constant 0 : index
    %252 = vector.load %arg14[%c1_349, %c0_350] : memref<80x64xbf16, #tpu.memory_space<vmem>>, vector<3x64xbf16>
    %c8_351 = arith.constant 8 : index
    %c192_352 = arith.constant 192 : index
    %253 = vector.load %arg10[%c8_351, %c192_352] : memref<64x320xbf16, #tpu.memory_space<vmem>>, vector<3x64xbf16>
    tpu.vector_store %arg10[%c8_351, %c192_352], %252 {strides = array<i32>} : memref<64x320xbf16, #tpu.memory_space<vmem>>, vector<3x64xbf16>,
    %c2_353 = arith.constant 2 : index
    %c0_354 = arith.constant 0 : index
    %254 = vector.load %arg14[%c2_353, %c0_354] : memref<80x64xbf16, #tpu.memory_space<vmem>>, vector<2x64xbf16>
    %c8_355 = arith.constant 8 : index
    %c256_356 = arith.constant 256 : index
    %255 = vector.load %arg10[%c8_355, %c256_356] : memref<64x320xbf16, #tpu.memory_space<vmem>>, vector<2x64xbf16>
    tpu.vector_store %arg10[%c8_355, %c256_356], %254 {strides = array<i32>} : memref<64x320xbf16, #tpu.memory_space<vmem>>, vector<2x64xbf16>,
    %c8_357 = arith.constant 8 : index
    %c0_358 = arith.constant 0 : index
    %256 = vector.load %arg14[%c8_357, %c0_358] : memref<80x64xbf16, #tpu.memory_space<vmem>>, vector<2x64xbf16>
    %c14 = arith.constant 14 : index
    %c0_359 = arith.constant 0 : index
    %257 = vector.load %arg10[%c14, %c0_359] : memref<64x320xbf16, #tpu.memory_space<vmem>>, vector<2x64xbf16>
    tpu.vector_store %arg10[%c14, %c0_359], %256 {strides = array<i32>} : memref<64x320xbf16, #tpu.memory_space<vmem>>, vector<2x64xbf16>,
    %c8_360 = arith.constant 8 : index
    %c0_361 = arith.constant 0 : index
    %258 = vector.load %arg14[%c8_360, %c0_361] : memref<80x64xbf16, #tpu.memory_space<vmem>>, vector<3x64xbf16>
    %c13 = arith.constant 13 : index
    %c64_362 = arith.constant 64 : index
    %259 = vector.load %arg10[%c13, %c64_362] : memref<64x320xbf16, #tpu.memory_space<vmem>>, vector<3x64xbf16>
    tpu.vector_store %arg10[%c13, %c64_362], %258 {strides = array<i32>} : memref<64x320xbf16, #tpu.memory_space<vmem>>, vector<3x64xbf16>,
    %c8_363 = arith.constant 8 : index
    %c0_364 = arith.constant 0 : index
    %260 = vector.load %arg14[%c8_363, %c0_364] : memref<80x64xbf16, #tpu.memory_space<vmem>>, vector<4x64xbf16>
    %c12 = arith.constant 12 : index
    %c128_365 = arith.constant 128 : index
    %261 = vector.load %arg10[%c12, %c128_365] : memref<64x320xbf16, #tpu.memory_space<vmem>>, vector<4x64xbf16>
    tpu.vector_store %arg10[%c12, %c128_365], %260 {strides = array<i32>} : memref<64x320xbf16, #tpu.memory_space<vmem>>, vector<4x64xbf16>,
    %c9_366 = arith.constant 9 : index
    %c0_367 = arith.constant 0 : index
    %262 = vector.load %arg14[%c9_366, %c0_367] : memref<80x64xbf16, #tpu.memory_space<vmem>>, vector<3x64xbf16>
    %c12_368 = arith.constant 12 : index
    %c192_369 = arith.constant 192 : index
    %263 = vector.load %arg10[%c12_368, %c192_369] : memref<64x320xbf16, #tpu.memory_space<vmem>>, vector<3x64xbf16>
    tpu.vector_store %arg10[%c12_368, %c192_369], %262 {strides = array<i32>} : memref<64x320xbf16, #tpu.memory_space<vmem>>, vector<3x64xbf16>,
    %c10_370 = arith.constant 10 : index
    %c0_371 = arith.constant 0 : index
    %264 = vector.load %arg14[%c10_370, %c0_371] : memref<80x64xbf16, #tpu.memory_space<vmem>>, vector<2x64xbf16>
    %c12_372 = arith.constant 12 : index
    %c256_373 = arith.constant 256 : index
    %265 = vector.load %arg10[%c12_372, %c256_373] : memref<64x320xbf16, #tpu.memory_space<vmem>>, vector<2x64xbf16>
    tpu.vector_store %arg10[%c12_372, %c256_373], %264 {strides = array<i32>} : memref<64x320xbf16, #tpu.memory_space<vmem>>, vector<2x64xbf16>,
    %c16_374 = arith.constant 16 : index
    %c0_375 = arith.constant 0 : index
    %266 = vector.load %arg14[%c16_374, %c0_375] : memref<80x64xbf16, #tpu.memory_space<vmem>>, vector<2x64xbf16>
    %c18_376 = arith.constant 18 : index
    %c0_377 = arith.constant 0 : index
    %267 = vector.load %arg10[%c18_376, %c0_377] : memref<64x320xbf16, #tpu.memory_space<vmem>>, vector<2x64xbf16>
    tpu.vector_store %arg10[%c18_376, %c0_377], %266 {strides = array<i32>} : memref<64x320xbf16, #tpu.memory_space<vmem>>, vector<2x64xbf16>,
    %c16_378 = arith.constant 16 : index
    %c0_379 = arith.constant 0 : index
    %268 = vector.load %arg14[%c16_378, %c0_379] : memref<80x64xbf16, #tpu.memory_space<vmem>>, vector<3x64xbf16>
    %c17_380 = arith.constant 17 : index
    %c64_381 = arith.constant 64 : index
    %269 = vector.load %arg10[%c17_380, %c64_381] : memref<64x320xbf16, #tpu.memory_space<vmem>>, vector<3x64xbf16>
    tpu.vector_store %arg10[%c17_380, %c64_381], %268 {strides = array<i32>} : memref<64x320xbf16, #tpu.memory_space<vmem>>, vector<3x64xbf16>,
    %c16_382 = arith.constant 16 : index
    %c0_383 = arith.constant 0 : index
    %270 = vector.load %arg14[%c16_382, %c0_383] : memref<80x64xbf16, #tpu.memory_space<vmem>>, vector<4x64xbf16>
    %c16_384 = arith.constant 16 : index
    %c128_385 = arith.constant 128 : index
    %271 = vector.load %arg10[%c16_384, %c128_385] : memref<64x320xbf16, #tpu.memory_space<vmem>>, vector<4x64xbf16>
    tpu.vector_store %arg10[%c16_384, %c128_385], %270 {strides = array<i32>} : memref<64x320xbf16, #tpu.memory_space<vmem>>, vector<4x64xbf16>,
    %c17_386 = arith.constant 17 : index
    %c0_387 = arith.constant 0 : index
    %272 = vector.load %arg14[%c17_386, %c0_387] : memref<80x64xbf16, #tpu.memory_space<vmem>>, vector<3x64xbf16>
    %c16_388 = arith.constant 16 : index
    %c192_389 = arith.constant 192 : index
    %273 = vector.load %arg10[%c16_388, %c192_389] : memref<64x320xbf16, #tpu.memory_space<vmem>>, vector<3x64xbf16>
    tpu.vector_store %arg10[%c16_388, %c192_389], %272 {strides = array<i32>} : memref<64x320xbf16, #tpu.memory_space<vmem>>, vector<3x64xbf16>,
    %c18_390 = arith.constant 18 : index
    %c0_391 = arith.constant 0 : index
    %274 = vector.load %arg14[%c18_390, %c0_391] : memref<80x64xbf16, #tpu.memory_space<vmem>>, vector<2x64xbf16>
    %c16_392 = arith.constant 16 : index
    %c256_393 = arith.constant 256 : index
    %275 = vector.load %arg10[%c16_392, %c256_393] : memref<64x320xbf16, #tpu.memory_space<vmem>>, vector<2x64xbf16>
    tpu.vector_store %arg10[%c16_392, %c256_393], %274 {strides = array<i32>} : memref<64x320xbf16, #tpu.memory_space<vmem>>, vector<2x64xbf16>,
    %c24_394 = arith.constant 24 : index
    %c0_395 = arith.constant 0 : index
    %276 = vector.load %arg14[%c24_394, %c0_395] : memref<80x64xbf16, #tpu.memory_space<vmem>>, vector<2x64xbf16>
    %c22 = arith.constant 22 : index
    %c0_396 = arith.constant 0 : index
    %277 = vector.load %arg10[%c22, %c0_396] : memref<64x320xbf16, #tpu.memory_space<vmem>>, vector<2x64xbf16>
    tpu.vector_store %arg10[%c22, %c0_396], %276 {strides = array<i32>} : memref<64x320xbf16, #tpu.memory_space<vmem>>, vector<2x64xbf16>,
    %c24_397 = arith.constant 24 : index
    %c0_398 = arith.constant 0 : index
    %278 = vector.load %arg14[%c24_397, %c0_398] : memref<80x64xbf16, #tpu.memory_space<vmem>>, vector<3x64xbf16>
    %c21 = arith.constant 21 : index
    %c64_399 = arith.constant 64 : index
    %279 = vector.load %arg10[%c21, %c64_399] : memref<64x320xbf16, #tpu.memory_space<vmem>>, vector<3x64xbf16>
    tpu.vector_store %arg10[%c21, %c64_399], %278 {strides = array<i32>} : memref<64x320xbf16, #tpu.memory_space<vmem>>, vector<3x64xbf16>,
    %c24_400 = arith.constant 24 : index
    %c0_401 = arith.constant 0 : index
    %280 = vector.load %arg14[%c24_400, %c0_401] : memref<80x64xbf16, #tpu.memory_space<vmem>>, vector<4x64xbf16>
    %c20 = arith.constant 20 : index
    %c128_402 = arith.constant 128 : index
    %281 = vector.load %arg10[%c20, %c128_402] : memref<64x320xbf16, #tpu.memory_space<vmem>>, vector<4x64xbf16>
    tpu.vector_store %arg10[%c20, %c128_402], %280 {strides = array<i32>} : memref<64x320xbf16, #tpu.memory_space<vmem>>, vector<4x64xbf16>,
    %c25_403 = arith.constant 25 : index
    %c0_404 = arith.constant 0 : index
    %282 = vector.load %arg14[%c25_403, %c0_404] : memref<80x64xbf16, #tpu.memory_space<vmem>>, vector<3x64xbf16>
    %c20_405 = arith.constant 20 : index
    %c192_406 = arith.constant 192 : index
    %283 = vector.load %arg10[%c20_405, %c192_406] : memref<64x320xbf16, #tpu.memory_space<vmem>>, vector<3x64xbf16>
    tpu.vector_store %arg10[%c20_405, %c192_406], %282 {strides = array<i32>} : memref<64x320xbf16, #tpu.memory_space<vmem>>, vector<3x64xbf16>,
    %c26_407 = arith.constant 26 : index
    %c0_408 = arith.constant 0 : index
    %284 = vector.load %arg14[%c26_407, %c0_408] : memref<80x64xbf16, #tpu.memory_space<vmem>>, vector<2x64xbf16>
    %c20_409 = arith.constant 20 : index
    %c256_410 = arith.constant 256 : index
    %285 = vector.load %arg10[%c20_409, %c256_410] : memref<64x320xbf16, #tpu.memory_space<vmem>>, vector<2x64xbf16>
    tpu.vector_store %arg10[%c20_409, %c256_410], %284 {strides = array<i32>} : memref<64x320xbf16, #tpu.memory_space<vmem>>, vector<2x64xbf16>,
    %c48_411 = arith.constant 48 : index
    %c0_412 = arith.constant 0 : index
    %286 = vector.load %arg14[%c48_411, %c0_412] : memref<80x64xbf16, #tpu.memory_space<vmem>>, vector<2x64xbf16>
    %c42_413 = arith.constant 42 : index
    %c0_414 = arith.constant 0 : index
    %287 = vector.load %arg10[%c42_413, %c0_414] : memref<64x320xbf16, #tpu.memory_space<vmem>>, vector<2x64xbf16>
    tpu.vector_store %arg10[%c42_413, %c0_414], %286 {strides = array<i32>} : memref<64x320xbf16, #tpu.memory_space<vmem>>, vector<2x64xbf16>,
    %c48_415 = arith.constant 48 : index
    %c0_416 = arith.constant 0 : index
    %288 = vector.load %arg14[%c48_415, %c0_416] : memref<80x64xbf16, #tpu.memory_space<vmem>>, vector<3x64xbf16>
    %c41_417 = arith.constant 41 : index
    %c64_418 = arith.constant 64 : index
    %289 = vector.load %arg10[%c41_417, %c64_418] : memref<64x320xbf16, #tpu.memory_space<vmem>>, vector<3x64xbf16>
    tpu.vector_store %arg10[%c41_417, %c64_418], %288 {strides = array<i32>} : memref<64x320xbf16, #tpu.memory_space<vmem>>, vector<3x64xbf16>,
    %c48_419 = arith.constant 48 : index
    %c0_420 = arith.constant 0 : index
    %290 = vector.load %arg14[%c48_419, %c0_420] : memref<80x64xbf16, #tpu.memory_space<vmem>>, vector<4x64xbf16>
    %c40_421 = arith.constant 40 : index
    %c128_422 = arith.constant 128 : index
    %291 = vector.load %arg10[%c40_421, %c128_422] : memref<64x320xbf16, #tpu.memory_space<vmem>>, vector<4x64xbf16>
    tpu.vector_store %arg10[%c40_421, %c128_422], %290 {strides = array<i32>} : memref<64x320xbf16, #tpu.memory_space<vmem>>, vector<4x64xbf16>,
    %c49_423 = arith.constant 49 : index
    %c0_424 = arith.constant 0 : index
    %292 = vector.load %arg14[%c49_423, %c0_424] : memref<80x64xbf16, #tpu.memory_space<vmem>>, vector<3x64xbf16>
    %c40_425 = arith.constant 40 : index
    %c192_426 = arith.constant 192 : index
    %293 = vector.load %arg10[%c40_425, %c192_426] : memref<64x320xbf16, #tpu.memory_space<vmem>>, vector<3x64xbf16>
    tpu.vector_store %arg10[%c40_425, %c192_426], %292 {strides = array<i32>} : memref<64x320xbf16, #tpu.memory_space<vmem>>, vector<3x64xbf16>,
    %c50_427 = arith.constant 50 : index
    %c0_428 = arith.constant 0 : index
    %294 = vector.load %arg14[%c50_427, %c0_428] : memref<80x64xbf16, #tpu.memory_space<vmem>>, vector<2x64xbf16>
    %c40_429 = arith.constant 40 : index
    %c256_430 = arith.constant 256 : index
    %295 = vector.load %arg10[%c40_429, %c256_430] : memref<64x320xbf16, #tpu.memory_space<vmem>>, vector<2x64xbf16>
    tpu.vector_store %arg10[%c40_429, %c256_430], %294 {strides = array<i32>} : memref<64x320xbf16, #tpu.memory_space<vmem>>, vector<2x64xbf16>,
    %c56_431 = arith.constant 56 : index
    %c0_432 = arith.constant 0 : index
    %296 = vector.load %arg14[%c56_431, %c0_432] : memref<80x64xbf16, #tpu.memory_space<vmem>>, vector<2x64xbf16>
    %c46 = arith.constant 46 : index
    %c0_433 = arith.constant 0 : index
    %297 = vector.load %arg10[%c46, %c0_433] : memref<64x320xbf16, #tpu.memory_space<vmem>>, vector<2x64xbf16>
    tpu.vector_store %arg10[%c46, %c0_433], %296 {strides = array<i32>} : memref<64x320xbf16, #tpu.memory_space<vmem>>, vector<2x64xbf16>,
    %c56_434 = arith.constant 56 : index
    %c0_435 = arith.constant 0 : index
    %298 = vector.load %arg14[%c56_434, %c0_435] : memref<80x64xbf16, #tpu.memory_space<vmem>>, vector<3x64xbf16>
    %c45 = arith.constant 45 : index
    %c64_436 = arith.constant 64 : index
    %299 = vector.load %arg10[%c45, %c64_436] : memref<64x320xbf16, #tpu.memory_space<vmem>>, vector<3x64xbf16>
    tpu.vector_store %arg10[%c45, %c64_436], %298 {strides = array<i32>} : memref<64x320xbf16, #tpu.memory_space<vmem>>, vector<3x64xbf16>,
    %c56_437 = arith.constant 56 : index
    %c0_438 = arith.constant 0 : index
    %300 = vector.load %arg14[%c56_437, %c0_438] : memref<80x64xbf16, #tpu.memory_space<vmem>>, vector<4x64xbf16>
    %c44 = arith.constant 44 : index
    %c128_439 = arith.constant 128 : index
    %301 = vector.load %arg10[%c44, %c128_439] : memref<64x320xbf16, #tpu.memory_space<vmem>>, vector<4x64xbf16>
    tpu.vector_store %arg10[%c44, %c128_439], %300 {strides = array<i32>} : memref<64x320xbf16, #tpu.memory_space<vmem>>, vector<4x64xbf16>,
    %c57_440 = arith.constant 57 : index
    %c0_441 = arith.constant 0 : index
    %302 = vector.load %arg14[%c57_440, %c0_441] : memref<80x64xbf16, #tpu.memory_space<vmem>>, vector<3x64xbf16>
    %c44_442 = arith.constant 44 : index
    %c192_443 = arith.constant 192 : index
    %303 = vector.load %arg10[%c44_442, %c192_443] : memref<64x320xbf16, #tpu.memory_space<vmem>>, vector<3x64xbf16>
    tpu.vector_store %arg10[%c44_442, %c192_443], %302 {strides = array<i32>} : memref<64x320xbf16, #tpu.memory_space<vmem>>, vector<3x64xbf16>,
    %c58_444 = arith.constant 58 : index
    %c0_445 = arith.constant 0 : index
    %304 = vector.load %arg14[%c58_444, %c0_445] : memref<80x64xbf16, #tpu.memory_space<vmem>>, vector<2x64xbf16>
    %c44_446 = arith.constant 44 : index
    %c256_447 = arith.constant 256 : index
    %305 = vector.load %arg10[%c44_446, %c256_447] : memref<64x320xbf16, #tpu.memory_space<vmem>>, vector<2x64xbf16>
    tpu.vector_store %arg10[%c44_446, %c256_447], %304 {strides = array<i32>} : memref<64x320xbf16, #tpu.memory_space<vmem>>, vector<2x64xbf16>,
    %c64_448 = arith.constant 64 : index
    %c0_449 = arith.constant 0 : index
    %306 = vector.load %arg14[%c64_448, %c0_449] : memref<80x64xbf16, #tpu.memory_space<vmem>>, vector<2x64xbf16>
    %c50_450 = arith.constant 50 : index
    %c0_451 = arith.constant 0 : index
    %307 = vector.load %arg10[%c50_450, %c0_451] : memref<64x320xbf16, #tpu.memory_space<vmem>>, vector<2x64xbf16>
    tpu.vector_store %arg10[%c50_450, %c0_451], %306 {strides = array<i32>} : memref<64x320xbf16, #tpu.memory_space<vmem>>, vector<2x64xbf16>,
    %c64_452 = arith.constant 64 : index
    %c0_453 = arith.constant 0 : index
    %308 = vector.load %arg14[%c64_452, %c0_453] : memref<80x64xbf16, #tpu.memory_space<vmem>>, vector<3x64xbf16>
    %c49_454 = arith.constant 49 : index
    %c64_455 = arith.constant 64 : index
    %309 = vector.load %arg10[%c49_454, %c64_455] : memref<64x320xbf16, #tpu.memory_space<vmem>>, vector<3x64xbf16>
    tpu.vector_store %arg10[%c49_454, %c64_455], %308 {strides = array<i32>} : memref<64x320xbf16, #tpu.memory_space<vmem>>, vector<3x64xbf16>,
    %c64_456 = arith.constant 64 : index
    %c0_457 = arith.constant 0 : index
    %310 = vector.load %arg14[%c64_456, %c0_457] : memref<80x64xbf16, #tpu.memory_space<vmem>>, vector<4x64xbf16>
    %c48_458 = arith.constant 48 : index
    %c128_459 = arith.constant 128 : index
    %311 = vector.load %arg10[%c48_458, %c128_459] : memref<64x320xbf16, #tpu.memory_space<vmem>>, vector<4x64xbf16>
    tpu.vector_store %arg10[%c48_458, %c128_459], %310 {strides = array<i32>} : memref<64x320xbf16, #tpu.memory_space<vmem>>, vector<4x64xbf16>,
    %c65_460 = arith.constant 65 : index
    %c0_461 = arith.constant 0 : index
    %312 = vector.load %arg14[%c65_460, %c0_461] : memref<80x64xbf16, #tpu.memory_space<vmem>>, vector<3x64xbf16>
    %c48_462 = arith.constant 48 : index
    %c192_463 = arith.constant 192 : index
    %313 = vector.load %arg10[%c48_462, %c192_463] : memref<64x320xbf16, #tpu.memory_space<vmem>>, vector<3x64xbf16>
    tpu.vector_store %arg10[%c48_462, %c192_463], %312 {strides = array<i32>} : memref<64x320xbf16, #tpu.memory_space<vmem>>, vector<3x64xbf16>,
    %c66_464 = arith.constant 66 : index
    %c0_465 = arith.constant 0 : index
    %314 = vector.load %arg14[%c66_464, %c0_465] : memref<80x64xbf16, #tpu.memory_space<vmem>>, vector<2x64xbf16>
    %c48_466 = arith.constant 48 : index
    %c256_467 = arith.constant 256 : index
    %315 = vector.load %arg10[%c48_466, %c256_467] : memref<64x320xbf16, #tpu.memory_space<vmem>>, vector<2x64xbf16>
    tpu.vector_store %arg10[%c48_466, %c256_467], %314 {strides = array<i32>} : memref<64x320xbf16, #tpu.memory_space<vmem>>, vector<2x64xbf16>,
    %c72_468 = arith.constant 72 : index
    %c0_469 = arith.constant 0 : index
    %316 = vector.load %arg14[%c72_468, %c0_469] : memref<80x64xbf16, #tpu.memory_space<vmem>>, vector<2x64xbf16>
    %c54 = arith.constant 54 : index
    %c0_470 = arith.constant 0 : index
    %317 = vector.load %arg10[%c54, %c0_470] : memref<64x320xbf16, #tpu.memory_space<vmem>>, vector<2x64xbf16>
    tpu.vector_store %arg10[%c54, %c0_470], %316 {strides = array<i32>} : memref<64x320xbf16, #tpu.memory_space<vmem>>, vector<2x64xbf16>,
    %c72_471 = arith.constant 72 : index
    %c0_472 = arith.constant 0 : index
    %318 = vector.load %arg14[%c72_471, %c0_472] : memref<80x64xbf16, #tpu.memory_space<vmem>>, vector<3x64xbf16>
    %c53 = arith.constant 53 : index
    %c64_473 = arith.constant 64 : index
    %319 = vector.load %arg10[%c53, %c64_473] : memref<64x320xbf16, #tpu.memory_space<vmem>>, vector<3x64xbf16>
    tpu.vector_store %arg10[%c53, %c64_473], %318 {strides = array<i32>} : memref<64x320xbf16, #tpu.memory_space<vmem>>, vector<3x64xbf16>,
    %c72_474 = arith.constant 72 : index
    %c0_475 = arith.constant 0 : index
    %320 = vector.load %arg14[%c72_474, %c0_475] : memref<80x64xbf16, #tpu.memory_space<vmem>>, vector<4x64xbf16>
    %c52 = arith.constant 52 : index
    %c128_476 = arith.constant 128 : index
    %321 = vector.load %arg10[%c52, %c128_476] : memref<64x320xbf16, #tpu.memory_space<vmem>>, vector<4x64xbf16>
    tpu.vector_store %arg10[%c52, %c128_476], %320 {strides = array<i32>} : memref<64x320xbf16, #tpu.memory_space<vmem>>, vector<4x64xbf16>,
    %c73_477 = arith.constant 73 : index
    %c0_478 = arith.constant 0 : index
    %322 = vector.load %arg14[%c73_477, %c0_478] : memref<80x64xbf16, #tpu.memory_space<vmem>>, vector<3x64xbf16>
    %c52_479 = arith.constant 52 : index
    %c192_480 = arith.constant 192 : index
    %323 = vector.load %arg10[%c52_479, %c192_480] : memref<64x320xbf16, #tpu.memory_space<vmem>>, vector<3x64xbf16>
    tpu.vector_store %arg10[%c52_479, %c192_480], %322 {strides = array<i32>} : memref<64x320xbf16, #tpu.memory_space<vmem>>, vector<3x64xbf16>,
    %c74_481 = arith.constant 74 : index
    %c0_482 = arith.constant 0 : index
    %324 = vector.load %arg14[%c74_481, %c0_482] : memref<80x64xbf16, #tpu.memory_space<vmem>>, vector<2x64xbf16>
    %c52_483 = arith.constant 52 : index
    %c256_484 = arith.constant 256 : index
    %325 = vector.load %arg10[%c52_483, %c256_484] : memref<64x320xbf16, #tpu.memory_space<vmem>>, vector<2x64xbf16>
    tpu.vector_store %arg10[%c52_483, %c256_484], %324 {strides = array<i32>} : memref<64x320xbf16, #tpu.memory_space<vmem>>, vector<2x64xbf16>,
    %c0_485 = arith.constant 0 : index
    %c0_486 = arith.constant 0 : index
    %326 = vector.load %arg10[%c0_485, %c0_486] : memref<64x320xbf16, #tpu.memory_space<vmem>>, vector<48x320xbf16>
    %c0_487 = arith.constant 0 : index
    %c0_488 = arith.constant 0 : index
    %c0_489 = arith.constant 0 : index
    %327 = vector.load %arg6[%c0_487, %c0_488, %c0_489] : memref<5x320x128xbf16, #tpu.memory_space<vmem>>, vector<1x320x128xbf16>
    %328 = vector.shape_cast %327 : vector<1x320x128xbf16> to vector<320x128xbf16>
    %cst_490 = arith.constant dense<0.000000e+00> : vector<48x128xf32>
    %329 = tpu.matmul %326, %328, %cst_490 {dimension_numbers = #tpu.dot_dimension_numbers<[1], [0], [0], [1], [0, 0, 1, 1], [], []>} : vector<48x320xbf16>, vector<320x128xbf16>, vector<48x128xf32> -> vector<48x128xf32>
    %c4_491 = arith.constant 4 : index
    %c0_492 = arith.constant 0 : index
    %330 = vector.load %arg10[%c4_491, %c0_492] : memref<64x320xbf16, #tpu.memory_space<vmem>>, vector<48x320xbf16>
    %c1_493 = arith.constant 1 : index
    %c0_494 = arith.constant 0 : index
    %c0_495 = arith.constant 0 : index
    %331 = vector.load %arg6[%c1_493, %c0_494, %c0_495] : memref<5x320x128xbf16, #tpu.memory_space<vmem>>, vector<1x320x128xbf16>
    %332 = vector.shape_cast %331 : vector<1x320x128xbf16> to vector<320x128xbf16>
    %cst_496 = arith.constant dense<0.000000e+00> : vector<48x128xf32>
    %333 = tpu.matmul %330, %332, %cst_496 {dimension_numbers = #tpu.dot_dimension_numbers<[1], [0], [0], [1], [0, 0, 1, 1], [], []>} : vector<48x320xbf16>, vector<320x128xbf16>, vector<48x128xf32> -> vector<48x128xf32>
    %334 = arith.addf %329, %333 : vector<48x128xf32>
    %c8_497 = arith.constant 8 : index
    %c0_498 = arith.constant 0 : index
    %335 = vector.load %arg10[%c8_497, %c0_498] : memref<64x320xbf16, #tpu.memory_space<vmem>>, vector<48x320xbf16>
    %c2_499 = arith.constant 2 : index
    %c0_500 = arith.constant 0 : index
    %c0_501 = arith.constant 0 : index
    %336 = vector.load %arg6[%c2_499, %c0_500, %c0_501] : memref<5x320x128xbf16, #tpu.memory_space<vmem>>, vector<1x320x128xbf16>
    %337 = vector.shape_cast %336 : vector<1x320x128xbf16> to vector<320x128xbf16>
    %cst_502 = arith.constant dense<0.000000e+00> : vector<48x128xf32>
    %338 = tpu.matmul %335, %337, %cst_502 {dimension_numbers = #tpu.dot_dimension_numbers<[1], [0], [0], [1], [0, 0, 1, 1], [], []>} : vector<48x320xbf16>, vector<320x128xbf16>, vector<48x128xf32> -> vector<48x128xf32>
    %339 = arith.addf %334, %338 : vector<48x128xf32>
    %c12_503 = arith.constant 12 : index
    %c0_504 = arith.constant 0 : index
    %340 = vector.load %arg10[%c12_503, %c0_504] : memref<64x320xbf16, #tpu.memory_space<vmem>>, vector<48x320xbf16>
    %c3_505 = arith.constant 3 : index
    %c0_506 = arith.constant 0 : index
    %c0_507 = arith.constant 0 : index
    %341 = vector.load %arg6[%c3_505, %c0_506, %c0_507] : memref<5x320x128xbf16, #tpu.memory_space<vmem>>, vector<1x320x128xbf16>
    %342 = vector.shape_cast %341 : vector<1x320x128xbf16> to vector<320x128xbf16>
    %cst_508 = arith.constant dense<0.000000e+00> : vector<48x128xf32>
    %343 = tpu.matmul %340, %342, %cst_508 {dimension_numbers = #tpu.dot_dimension_numbers<[1], [0], [0], [1], [0, 0, 1, 1], [], []>} : vector<48x320xbf16>, vector<320x128xbf16>, vector<48x128xf32> -> vector<48x128xf32>
    %344 = arith.addf %339, %343 : vector<48x128xf32>
    %c16_509 = arith.constant 16 : index
    %c0_510 = arith.constant 0 : index
    %345 = vector.load %arg10[%c16_509, %c0_510] : memref<64x320xbf16, #tpu.memory_space<vmem>>, vector<48x320xbf16>
    %c4_511 = arith.constant 4 : index
    %c0_512 = arith.constant 0 : index
    %c0_513 = arith.constant 0 : index
    %346 = vector.load %arg6[%c4_511, %c0_512, %c0_513] : memref<5x320x128xbf16, #tpu.memory_space<vmem>>, vector<1x320x128xbf16>
    %347 = vector.shape_cast %346 : vector<1x320x128xbf16> to vector<320x128xbf16>
    %cst_514 = arith.constant dense<0.000000e+00> : vector<48x128xf32>
    %348 = tpu.matmul %345, %347, %cst_514 {dimension_numbers = #tpu.dot_dimension_numbers<[1], [0], [0], [1], [0, 0, 1, 1], [], []>} : vector<48x320xbf16>, vector<320x128xbf16>, vector<48x128xf32> -> vector<48x128xf32>
    %349 = arith.addf %344, %348 : vector<48x128xf32>
    %c0_515 = arith.constant 0 : index
    %c0_516 = arith.constant 0 : index
    %350 = vector.load %arg7[%c0_515, %c0_516] : memref<1x128xf32, #tpu.memory_space<vmem>>, vector<1x128xf32>
    %351 = vector.broadcast %350 : vector<1x128xf32> to vector<48x128xf32>
    %352 = arith.addf %349, %351 : vector<48x128xf32>
    %cst_517 = arith.constant 0.000000e+00 : f32
    %353 = vector.broadcast %cst_517 : f32 to vector<48x128xf32>
    %354 = arith.maximumf %352, %353 : vector<48x128xf32>
    %355 = vector.extract_strided_slice %354 {offsets = [0, 0], sizes = [16, 128], strides = [1, 1]} : vector<48x128xf32> to vector<16x128xf32>
    %356 = arith.truncf %355 : vector<16x128xf32> to vector<16x128xbf16>
    %c0_518 = arith.constant 0 : index
    %c0_519 = arith.constant 0 : index
    %c0_520 = arith.constant 0 : index
    %357 = vector.load %arg8[%c0_518, %c0_519, %c0_520] : memref<2x16x128xbf16, #tpu.memory_space<vmem>>, vector<1x16x128xbf16>
    %358 = vector.shape_cast %357 : vector<1x16x128xbf16> to vector<16x128xbf16>
    %359 = vector.shape_cast %356 : vector<16x128xbf16> to vector<1x16x128xbf16>
    tpu.vector_store %arg8[%c0_518, %c0_519, %c0_520], %359 {strides = array<i32>} : memref<2x16x128xbf16, #tpu.memory_space<vmem>>, vector<1x16x128xbf16>,
    %360 = vector.extract_strided_slice %354 {offsets = [32, 0], sizes = [16, 128], strides = [1, 1]} : vector<48x128xf32> to vector<16x128xf32>
    %361 = arith.truncf %360 : vector<16x128xf32> to vector<16x128xbf16>
    %c1_521 = arith.constant 1 : index
    %c0_522 = arith.constant 0 : index
    %c0_523 = arith.constant 0 : index
    %362 = vector.load %arg8[%c1_521, %c0_522, %c0_523] : memref<2x16x128xbf16, #tpu.memory_space<vmem>>, vector<1x16x128xbf16>
    %363 = vector.shape_cast %362 : vector<1x16x128xbf16> to vector<16x128xbf16>
    %364 = vector.shape_cast %361 : vector<16x128xbf16> to vector<1x16x128xbf16>
    tpu.vector_store %arg8[%c1_521, %c0_522, %c0_523], %364 {strides = array<i32>} : memref<2x16x128xbf16, #tpu.memory_space<vmem>>, vector<1x16x128xbf16>,
    return
  }
  func.func @transform_0(%arg0: i32) -> (i32, i32) {
    %c0_i32 = arith.constant 0 : i32
    %c0_i32_0 = arith.constant 0 : i32
    return %arg0, %c0_i32 : i32, i32
  }
  func.func @transform_1(%arg0: i32) -> (i32, i32, i32) {
    %c0_i32 = arith.constant 0 : i32
    %c0_i32_0 = arith.constant 0 : i32
    %c0_i32_1 = arith.constant 0 : i32
    %c0_i32_2 = arith.constant 0 : i32
    return %c0_i32, %c0_i32_0, %c0_i32_1 : i32, i32, i32
  }
  func.func @transform_2(%arg0: i32) -> (i32, i32) {
    %c0_i32 = arith.constant 0 : i32
    %c0_i32_0 = arith.constant 0 : i32
    %c0_i32_1 = arith.constant 0 : i32
    return %c0_i32, %c0_i32_0 : i32, i32
  }
  func.func @transform_3(%arg0: i32) -> (i32, i32, i32) {
    %c0_i32 = arith.constant 0 : i32
    %c0_i32_0 = arith.constant 0 : i32
    %c0_i32_1 = arith.constant 0 : i32
    %c0_i32_2 = arith.constant 0 : i32
    return %c0_i32, %c0_i32_0, %c0_i32_1 : i32, i32, i32
  }
  func.func @transform_4(%arg0: i32) -> (i32, i32) {
    %c0_i32 = arith.constant 0 : i32
    %c0_i32_0 = arith.constant 0 : i32
    %c0_i32_1 = arith.constant 0 : i32
    return %c0_i32, %c0_i32_0 : i32, i32
  }
  func.func @transform_5(%arg0: i32) -> (i32, i32, i32) {
    %c0_i32 = arith.constant 0 : i32
    %c0_i32_0 = arith.constant 0 : i32
    %c0_i32_1 = arith.constant 0 : i32
    %c0_i32_2 = arith.constant 0 : i32
    return %c0_i32, %c0_i32_0, %c0_i32_1 : i32, i32, i32
  }
  func.func @transform_6(%arg0: i32) -> (i32, i32) {
    %c0_i32 = arith.constant 0 : i32
    %c0_i32_0 = arith.constant 0 : i32
    %c0_i32_1 = arith.constant 0 : i32
    return %c0_i32, %c0_i32_0 : i32, i32
  }
  func.func @transform_7(%arg0: i32) -> (i32, i32, i32) {
    %c0_i32 = arith.constant 0 : i32
    %c0_i32_0 = arith.constant 0 : i32
    %c0_i32_1 = arith.constant 0 : i32
    return %arg0, %c0_i32, %c0_i32_0 : i32, i32, i32
  }
}

module attributes {stable_mosaic.version = 11 : i64} {
  func.func @_fc_head_kernel(%arg0: i32, %arg1: memref<2x2048xbf16, #tpu.memory_space<vmem>>, %arg2: memref<2048x128xbf16, #tpu.memory_space<vmem>>, %arg3: memref<1x128xf32, #tpu.memory_space<vmem>>, %arg4: memref<128x128xbf16, #tpu.memory_space<vmem>>, %arg5: memref<1x128xf32, #tpu.memory_space<vmem>>, %arg6: memref<2x128xf32, #tpu.memory_space<vmem>>) attributes {dimension_semantics = [#tpu.dimension_semantics<parallel>], iteration_bounds = array<i64: 1>, scalar_prefetch = 0 : i64, scratch_operands = 0 : i64, tpu.core_type = #tpu.core_type<tc>, window_params = [{transform_indices = @transform_0, window_bounds = array<i64: 2, 2048>}, {pipeline_mode = #tpu.pipeline_mode<synchronous>, transform_indices = @transform_1, window_bounds = array<i64: 2048, 128>}, {pipeline_mode = #tpu.pipeline_mode<synchronous>, transform_indices = @transform_2, window_bounds = array<i64: 1, 128>}, {pipeline_mode = #tpu.pipeline_mode<synchronous>, transform_indices = @transform_3, window_bounds = array<i64: 128, 128>}, {pipeline_mode = #tpu.pipeline_mode<synchronous>, transform_indices = @transform_4, window_bounds = array<i64: 1, 128>}, {transform_indices = @transform_5, window_bounds = array<i64: 2, 128>}]} {
    %c0 = arith.constant 0 : index
    %c0_0 = arith.constant 0 : index
    %0 = vector.load %arg1[%c0, %c0_0] : memref<2x2048xbf16, #tpu.memory_space<vmem>>, vector<2x2048xbf16>
    %c0_1 = arith.constant 0 : index
    %c0_2 = arith.constant 0 : index
    %1 = vector.load %arg2[%c0_1, %c0_2] : memref<2048x128xbf16, #tpu.memory_space<vmem>>, vector<2048x128xbf16>
    %cst = arith.constant dense<0.000000e+00> : vector<2x128xf32>
    %2 = tpu.matmul %0, %1, %cst {dimension_numbers = #tpu.dot_dimension_numbers<[1], [0], [0], [1], [0, 0, 1, 1], [], []>} : vector<2x2048xbf16>, vector<2048x128xbf16>, vector<2x128xf32> -> vector<2x128xf32>
    %c0_3 = arith.constant 0 : index
    %c0_4 = arith.constant 0 : index
    %3 = vector.load %arg3[%c0_3, %c0_4] : memref<1x128xf32, #tpu.memory_space<vmem>>, vector<1x128xf32>
    %4 = vector.broadcast %3 : vector<1x128xf32> to vector<2x128xf32>
    %5 = arith.addf %2, %4 : vector<2x128xf32>
    %cst_5 = arith.constant 0.000000e+00 : f32
    %6 = vector.broadcast %cst_5 : f32 to vector<2x128xf32>
    %7 = arith.maximumf %5, %6 : vector<2x128xf32>
    %8 = arith.truncf %7 : vector<2x128xf32> to vector<2x128xbf16>
    %c0_6 = arith.constant 0 : index
    %c0_7 = arith.constant 0 : index
    %9 = vector.load %arg4[%c0_6, %c0_7] : memref<128x128xbf16, #tpu.memory_space<vmem>>, vector<128x128xbf16>
    %cst_8 = arith.constant dense<0.000000e+00> : vector<2x128xf32>
    %10 = tpu.matmul %8, %9, %cst_8 {dimension_numbers = #tpu.dot_dimension_numbers<[1], [0], [0], [1], [0, 0, 1, 1], [], []>} : vector<2x128xbf16>, vector<128x128xbf16>, vector<2x128xf32> -> vector<2x128xf32>
    %c0_9 = arith.constant 0 : index
    %c0_10 = arith.constant 0 : index
    %11 = vector.load %arg5[%c0_9, %c0_10] : memref<1x128xf32, #tpu.memory_space<vmem>>, vector<1x128xf32>
    %12 = vector.broadcast %11 : vector<1x128xf32> to vector<2x128xf32>
    %13 = arith.addf %10, %12 : vector<2x128xf32>
    %c0_11 = arith.constant 0 : index
    %c0_12 = arith.constant 0 : index
    %14 = vector.load %arg6[%c0_11, %c0_12] : memref<2x128xf32, #tpu.memory_space<vmem>>, vector<2x128xf32>
    tpu.vector_store %arg6[%c0_11, %c0_12], %13 {strides = array<i32>} : memref<2x128xf32, #tpu.memory_space<vmem>>, vector<2x128xf32>,
    return
  }
  func.func @transform_0(%arg0: i32) -> (i32, i32) {
    %c0_i32 = arith.constant 0 : i32
    %c0_i32_0 = arith.constant 0 : i32
    return %arg0, %c0_i32 : i32, i32
  }
  func.func @transform_1(%arg0: i32) -> (i32, i32) {
    %c0_i32 = arith.constant 0 : i32
    %c0_i32_0 = arith.constant 0 : i32
    %c0_i32_1 = arith.constant 0 : i32
    return %c0_i32, %c0_i32_0 : i32, i32
  }
  func.func @transform_2(%arg0: i32) -> (i32, i32) {
    %c0_i32 = arith.constant 0 : i32
    %c0_i32_0 = arith.constant 0 : i32
    %c0_i32_1 = arith.constant 0 : i32
    return %c0_i32, %c0_i32_0 : i32, i32
  }
  func.func @transform_3(%arg0: i32) -> (i32, i32) {
    %c0_i32 = arith.constant 0 : i32
    %c0_i32_0 = arith.constant 0 : i32
    %c0_i32_1 = arith.constant 0 : i32
    return %c0_i32, %c0_i32_0 : i32, i32
  }
  func.func @transform_4(%arg0: i32) -> (i32, i32) {
    %c0_i32 = arith.constant 0 : i32
    %c0_i32_0 = arith.constant 0 : i32
    %c0_i32_1 = arith.constant 0 : i32
    return %c0_i32, %c0_i32_0 : i32, i32
  }
  func.func @transform_5(%arg0: i32) -> (i32, i32) {
    %c0_i32 = arith.constant 0 : i32
    %c0_i32_0 = arith.constant 0 : i32
    return %arg0, %c0_i32 : i32, i32
  }
}

</mosaic_0001>

<bundles_post_ra>
// kernel: idcnn_forward.3
= control target key start
LH: loop header
LB: loop body
LE: loop exit
PB: predicated region body
PF: predicated region fallthrough
CT: control target
= control target key end

     0   :  { %v293_v28 = vlaneseq  ;;  %v2126_v36 = vmov 1966171168   ;;  %s2607_s0 = inlined_call_operand.vmem [shape: bf16[2,2048], index: 0, kind: input, shape index: {}]   ;;  %s2608_s1 = inlined_call_operand.vmem [shape: bf16[2048,128], index: 1, kind: input, shape index: {}]   ;;  %s2609_s2 = inlined_call_operand.vmem [shape: f32[1,128], index: 2, kind: input, shape index: {}]   ;;  %s2610_s3 = inlined_call_operand.vmem [shape: bf16[128,128], index: 3, kind: input, shape index: {}]   ;;  %s2611_s4 = inlined_call_operand.vmem [shape: f32[1,128], index: 4, kind: input, shape index: {}]   ;;  %s2612_s5 = inlined_call_operand.hbm [shape: f32[2,128], index: 5, kind: output, shape index: {}]  }
   0x1   :  { %v1966_v0 = vld [vmem:[%s2608_s1 + $0x78] sm:$0xff]   ;;  %v1970_v4 = vld [vmem:[%s2608_s1 + $0x70] sm:$0xff]   ;;  %v1974_v8 = vld [vmem:[%s2608_s1 + $0x68] sm:$0xff]   ;;  %v291_v37 = vunpack.c.l.s4 %v2126_v36 }
   0x2   :  { %v1967_v1 = vld [vmem:[%s2608_s1 + $0xf8] sm:$0xff]   ;;  %1757 = vmatprep.subr.bf16.mxu0 %v1966_v0  ;;  %v1971_v5 = vld [vmem:[%s2608_s1 + $0xf0] sm:$0xff]   ;;  %v1975_v9 = vld [vmem:[%s2608_s1 + $0xe8] sm:$0xff]   ;;  %v294_v33 = vshrl.u32 %v293_v28, 7 }
   0x3   :  { %v1968_v2 = vld [vmem:[%s2608_s1 + $0x38] sm:$0xff]   ;;  %1779 = vmatprep.subr.bf16.mxu1 %v1967_v1  ;;  %v1972_v6 = vld [vmem:[%s2608_s1 + $0x30] sm:$0xff]   ;;  %v1976_v10 = vld [vmem:[%s2608_s1 + $0x28] sm:$0xff]   ;;  %v292_v40 = vunpack.c.0.s8 %v291_v37 }
   0x4   :  { %v1969_v3 = vld [vmem:[%s2608_s1 + $0xb8] sm:$0xff]   ;;  %1758 = vmatpush3.bf16.msra.mxu0 %v1968_v2  ;;  %v1973_v7 = vld [vmem:[%s2608_s1 + $0xb0] sm:$0xff]   ;;  %v1977_v11 = vld [vmem:[%s2608_s1 + $0xa8] sm:$0xff]  }
   0x5   :  { %1780 = vmatpush3.bf16.msra.mxu1 %v1969_v3  ;;  %1759 = vmatprep.subr.bf16.mxu0 %v1970_v4  ;;  %v1978_v12 = vld [vmem:[%s2608_s1 + $0x60] sm:$0xff]   ;;  %v1982_v16 = vld [vmem:[%s2608_s1 + $0x58] sm:$0xff]   ;;  %v1986_v20 = vld [vmem:[%s2608_s1 + $0x50] sm:$0xff]   ;;  %v2265_v41 = vsub.s32 %v292_v40, %v294_v33 }
   0x6   :  { %1781 = vmatprep.subr.bf16.mxu1 %v1971_v5  ;;  %v1979_v13 = vld [vmem:[%s2608_s1 + $0xe0] sm:$0xff]   ;;  %v1983_v17 = vld [vmem:[%s2608_s1 + $0xd8] sm:$0xff]   ;;  %v1987_v21 = vld [vmem:[%s2608_s1 + $0xd0] sm:$0xff]  }
   0x7   :  { %v1980_v14 = vld [vmem:[%s2608_s1 + $0x20] sm:$0xff]   ;;  %v1984_v18 = vld [vmem:[%s2608_s1 + $0x18] sm:$0xff]   ;;  %v1988_v22 = vld [vmem:[%s2608_s1 + $0x10] sm:$0xff]  }
   0x8   :  { %1760 = vmatpush3.bf16.msra.mxu0 %v1972_v6  ;;  %v1981_v15 = vld [vmem:[%s2608_s1 + $0xa0] sm:$0xff]   ;;  %v1985_v19 = vld [vmem:[%s2608_s1 + $0x98] sm:$0xff]   ;;  %v1989_v23 = vld [vmem:[%s2608_s1 + $0x90] sm:$0xff]  }
   0x9   :  { %1782 = vmatpush3.bf16.msra.mxu1 %v1973_v7  ;;  %1761 = vmatprep.subr.bf16.mxu0 %v1974_v8  ;;  %v1990_v24 = vld [vmem:[%s2608_s1 + $0x48] sm:$0xff]   ;;  %v1994_v29 = vld [vmem:[%s2608_s1 + $0x40] sm:$0xff]   ;;  %v1999_v35 = vld [vmem:[%s2608_s1 + $0x178] sm:$0xff]  }
   0xa   :  { %1783 = vmatprep.subr.bf16.mxu1 %v1975_v9  ;;  %v1991_v25 = vld [vmem:[%s2608_s1 + $0xc8] sm:$0xff]   ;;  %v1995_v30 = vld [vmem:[%s2608_s1 + $0xc0] sm:$0xff]   ;;  %v2000_v38 = vld [vmem:[%s2608_s1 + $0x1f8] sm:$0xff]  }
   0xb   :  { %v1992_v26 = vld [vmem:[%s2608_s1 + $0x8] sm:$0xff]   ;;  %v1996_v31 = vld [vmem:[%s2608_s1] sm:$0xff]   ;;  %v2001_v47 = vld [vmem:[%s2608_s1 + $0x138] sm:$0xff]  }
   0xc   :  { %1762 = vmatpush3.bf16.msra.mxu0 %v1976_v10  ;;  %v1993_v27 = vld [vmem:[%s2608_s1 + $0x88] sm:$0xff]   ;;  %v1997_v32 = vld [vmem:[%s2608_s1 + $0x80] sm:$0xff]   ;;  %v2002_v49 = vld [vmem:[%s2608_s1 + $0x1b8] sm:$0xff]  }
   0xd   :  { %1784 = vmatpush3.bf16.msra.mxu1 %v1977_v11  ;;  %1763 = vmatprep.subr.bf16.mxu0 %v1978_v12  ;;  %v22_v34 = vld [vmem:[%s2607_s0] sm:$0xff]  ;;  %v2003_v52 = vld [vmem:[%s2608_s1 + $0x170] sm:$0xff]   ;;  %v2007_v58 = vld [vmem:[%s2608_s1 + $0x168] sm:$0xff]  }
   0xe   :  { %1785 = vmatprep.subr.bf16.mxu1 %v1979_v13  ;;  %v289_v39 = vcombine.high %v22_v34, %v22_v34  ;;  %v296_v42 = vrot.slane %v22_v34, %v2265_v41  ;;  %v2004_v54 = vld [vmem:[%s2608_s1 + $0x1f0] sm:$0xff]   ;;  %v2008_v59 = vld [vmem:[%s2608_s1 + $0x1e8] sm:$0xff]   ;;  %v2011_v62 = vld [vmem:[%s2608_s1 + $0x160] sm:$0xff]  }
   0xf   :  { %v2005_v55 = vld [vmem:[%s2608_s1 + $0x130] sm:$0xff]   ;;  %v2009_v60 = vld [vmem:[%s2608_s1 + $0x128] sm:$0xff]   ;;  %v2012_v63 = vld [vmem:[%s2608_s1 + $0x1e0] sm:$0xff]  }
  0x10   :  { %1764 = vmatpush3.bf16.msra.mxu0 %v1980_v14  ;;  %v2269_v43 = vrot.slane %v289_v39, %v2265_v41  ;;  %v304_v44 = vcombine.high %v296_v42, %v296_v42  ;;  %v312_v45 = vrot.slane %v296_v42, %v2265_v41  ;;  %v2006_v57 = vld [vmem:[%s2608_s1 + $0x1b0] sm:$0xff]   ;;  %v2010_v61 = vld [vmem:[%s2608_s1 + $0x1a8] sm:$0xff]   ;;  %v2013_v0 = vld [vmem:[%s2608_s1 + $0x120] sm:$0xff]  }
  0x11   :  { %1786 = vmatpush3.bf16.msra.mxu1 %v1981_v15  ;;  %1765 = vmatprep.subr.bf16.mxu0 %v1982_v16  ;;  %v2014_v1 = vld [vmem:[%s2608_s1 + $0x1a0] sm:$0xff]   ;;  %v2015_v2 = vld [vmem:[%s2608_s1 + $0x158] sm:$0xff]   ;;  %v2019_v6 = vld [vmem:[%s2608_s1 + $0x150] sm:$0xff]  }
  0x12   :  { %1787 = vmatprep.subr.bf16.mxu1 %v1983_v17  ;;  %v305_v46 = vcombine.high %v2269_v43, %v2269_v43  ;;  %v326_v48 = vrot.slane %v304_v44, %v2265_v41  ;;  %v334_v51 = vcombine.high %v312_v45, %v312_v45  ;;  %v2016_v3 = vld [vmem:[%s2608_s1 + $0x1d8] sm:$0xff]   ;;  %v2020_v7 = vld [vmem:[%s2608_s1 + $0x1d0] sm:$0xff]   ;;  %v2023_v10 = vld [vmem:[%s2608_s1 + $0x148] sm:$0xff]  }
  0x13   :  { %v2017_v4 = vld [vmem:[%s2608_s1 + $0x118] sm:$0xff]   ;;  %v2021_v8 = vld [vmem:[%s2608_s1 + $0x110] sm:$0xff]   ;;  %v2024_v11 = vld [vmem:[%s2608_s1 + $0x1c8] sm:$0xff]  }
  0x14   :  { %1766 = vmatpush3.bf16.msra.mxu0 %v1984_v18  ;;  %v333_v50 = vrot.slane %v305_v46, %v2265_v41  ;;  %1203 = vmatprep.mubr.bf16.mxu0 %v326_v48  ;;  %v336_v53 = vcombine.high %v326_v48, %v326_v48  ;;  %v2018_v5 = vld [vmem:[%s2608_s1 + $0x198] sm:$0xff]   ;;  %v2022_v9 = vld [vmem:[%s2608_s1 + $0x190] sm:$0xff]   ;;  %v2025_v12 = vld [vmem:[%s2608_s1 + $0x108] sm:$0xff]   ;;  %v319_v18 = vrot.slane %v2269_v43, %v2265_v41 }
  0x15   :  { %1788 = vmatpush3.bf16.msra.mxu1 %v1985_v19  ;;  %1767 = vmatprep.subr.bf16.mxu0 %v1986_v20  ;;  %v2026_v13 = vld [vmem:[%s2608_s1 + $0x188] sm:$0xff]   ;;  %v2027_v14 = vld [vmem:[%s2608_s1 + $0x140] sm:$0xff]   ;;  %v2031_v19 = vld [vmem:[%s2608_s1 + $0x278] sm:$0xff]  }
  0x16   :  { %1789 = vmatprep.subr.bf16.mxu1 %v1987_v21  ;;  %v337_v56 = vcombine.high %v333_v50, %v333_v50  ;;  %1243 = vmatprep.mubr.bf16.mxu1 %v336_v53  ;;  %v2028_v15 = vld [vmem:[%s2608_s1 + $0x1c0] sm:$0xff]   ;;  %v2032_v20 = vld [vmem:[%s2608_s1 + $0x2f8] sm:$0xff]   ;;  %v2039_v28 = vld [vmem:[%s2608_s1 + $0x268] sm:$0xff]  }
  0x17   :  { %v2029_v16 = vld [vmem:[%s2608_s1 + $0x100] sm:$0xff]   ;;  %v2033_v21 = vld [vmem:[%s2608_s1 + $0x238] sm:$0xff]   ;;  %v2051_v40 = vld [vmem:[%s2608_s1 + $0x250] sm:$0xff]  }
  0x18   :  { %1768 = vmatpush3.bf16.msra.mxu0 %v1988_v22  ;;  %v2030_v17 = vld [vmem:[%s2608_s1 + $0x180] sm:$0xff]   ;;  %v2034_v22 = vld [vmem:[%s2608_s1 + $0x2b8] sm:$0xff]   ;;  %v2052_v42 = vld [vmem:[%s2608_s1 + $0x2d0] sm:$0xff]  }
  0x19   :  { %1790 = vmatpush3.bf16.msra.mxu1 %v1989_v23  ;;  %1769 = vmatprep.subr.bf16.mxu0 %v1990_v24  ;;  %v335_v23 = vcombine.high %v319_v18, %v319_v18  ;;  %v2035_v24 = vld [vmem:[%s2608_s1 + $0x270] sm:$0xff]   ;;  %v2044_v33 = vld [vmem:[%s2608_s1 + $0x2e0] sm:$0xff]   ;;  %v2047_v36 = vld [vmem:[%s2608_s1 + $0x258] sm:$0xff]  }
  0x1a   :  { %1791 = vmatprep.subr.bf16.mxu1 %v1991_v25  ;;  %v2036_v25 = vld [vmem:[%s2608_s1 + $0x2f0] sm:$0xff]   ;;  %v2045_v34 = vld [vmem:[%s2608_s1 + $0x220] sm:$0xff]   ;;  %v2048_v37 = vld [vmem:[%s2608_s1 + $0x2d8] sm:$0xff]  }
  0x1b   :  { %v2050_v39 = vld [vmem:[%s2608_s1 + $0x298] sm:$0xff]   ;;  %v2053_v43 = vld [vmem:[%s2608_s1 + $0x210] sm:$0xff]   ;;  %v23_v46 = vld [vmem:[%s2607_s0 + $0x8] sm:$0xff] }
  0x1c   :  { %1770 = vmatpush3.bf16.msra.mxu0 %v1992_v26  ;;  %v2037_v26 = vld [vmem:[%s2608_s1 + $0x230] sm:$0xff]   ;;  %v345_v48 = vrot.slane %v23_v46, %v2265_v41 }
  0x1d   :  { %1792 = vmatpush3.bf16.msra.mxu1 %v1993_v27  ;;  %1771 = vmatprep.subr.bf16.mxu0 %v1994_v29  ;;  %v2038_v27 = vld [vmem:[%s2608_s1 + $0x2b0] sm:$0xff]   ;;  %v2040_v29 = vld [vmem:[%s2608_s1 + $0x2e8] sm:$0xff]  }
  0x1e   :  { %1793 = vmatprep.subr.bf16.mxu1 %v1995_v30  ;;  %v2041_v30 = vld [vmem:[%s2608_s1 + $0x228] sm:$0xff]   ;;  %v2054_v44 = vld [vmem:[%s2608_s1 + $0x290] sm:$0xff]  }
  0x20   :  { %1772 = vmatpush3.bf16.msra.mxu0 %v1996_v31  ;;  %v2042_v31 = vld [vmem:[%s2608_s1 + $0x2a8] sm:$0xff]  }
  0x21   :  { %1794 = vmatpush3.bf16.msra.mxu1 %v1997_v32  ;;  %1801 = vmatprep.subr.bf16.mxu0 %v1999_v35  ;;  %v2043_v32 = vld [vmem:[%s2608_s1 + $0x260] sm:$0xff]  }
  0x22   :  { %1823 = vmatprep.subr.bf16.mxu1 %v2000_v38  ;;  %v2046_v35 = vld [vmem:[%s2608_s1 + $0x2a0] sm:$0xff]   ;;  %v2049_v38 = vld [vmem:[%s2608_s1 + $0x218] sm:$0xff]  }
  0x23   :  { %1204 = vmatmul.mubr.bf16.vlgmr.msra.gmra.mxu0 %v312_v45  ;;  %v2055_v45 = vld [vmem:[%s2608_s1 + $0x248] sm:$0xff]  }
  0x24   :  { %1802 = vmatpush3.bf16.msra.mxu0 %v2001_v47  ;;  %1244 = vmatmul.mubr.bf16.vlgmr.msra.gmra.mxu1 %v334_v51  ;;  %v2056_v47 = vld [vmem:[%s2608_s1 + $0x2c8] sm:$0xff]  }
  0x25   :  { %1803 = vmatprep.subr.bf16.mxu0 %v2003_v52  ;;  %1824 = vmatpush3.bf16.msra.mxu1 %v2002_v49  ;;  %v338_v49 = vcombine.high %v23_v46, %v23_v46  ;;  %v2058_v51 = vld [vmem:[%s2608_s1 + $0x288] sm:$0xff]   ;;  %v353_v52 = vcombine.high %v345_v48, %v345_v48 }
  0x26   :  { %1283 = vmatprep.mubr.bf16.mxu0 %v333_v50  ;;  %1825 = vmatprep.subr.bf16.mxu1 %v2004_v54  ;;  %v2057_v50 = vld [vmem:[%s2608_s1 + $0x208] sm:$0xff]   ;;  %v2059_v54 = vld [vmem:[%s2608_s1 + $0x240] sm:$0xff]  }
  0x27   :  { %1323 = vmatprep.mubr.bf16.mxu1 %v337_v56  ;;  %v2457_v53 = vrot.slane %v338_v49, %v2265_v41  ;;  %v375_v56 = vrot.slane %v353_v52, %v2265_v41 }
  0x28   :  { %1804 = vmatpush3.bf16.msra.mxu0 %v2005_v55  ;;  %v2060_v55 = vld [vmem:[%s2608_s1 + $0x2c0] sm:$0xff]  }
  0x29   :  { %1805 = vmatprep.subr.bf16.mxu0 %v2007_v58  ;;  %1826 = vmatpush3.bf16.msra.mxu1 %v2006_v57  ;;  %v354_v57 = vcombine.high %v2457_v53, %v2457_v53  ;;  %v2061_v58 = vld [vmem:[%s2608_s1 + $0x200] sm:$0xff]  }
  0x2a   :  { %1827 = vmatprep.subr.bf16.mxu1 %v2008_v59  ;;  %v2062_v59 = vld [vmem:[%s2608_s1 + $0x280] sm:$0xff]  }
  0x2c   :  { %1806 = vmatpush3.bf16.msra.mxu0 %v2009_v60  ;;  %v385_v60 = vcombine.high %v375_v56, %v375_v56 }
  0x2d   :  { %1807 = vmatprep.subr.bf16.mxu0 %v2011_v62  ;;  %1828 = vmatpush3.bf16.msra.mxu1 %v2010_v61  ;;  %v361_v61 = vrot.slane %v345_v48, %v2265_v41  ;;  %v2063_v62 = vld [vmem:[%s2608_s1 + $0x378] sm:$0xff]  }
  0x2e   :  { %1829 = vmatprep.subr.bf16.mxu1 %v2012_v63  ;;  %v2064_v63 = vld [vmem:[%s2608_s1 + $0x3f8] sm:$0xff]  }
  0x30   :  { %1808 = vmatpush3.bf16.msra.mxu0 %v2013_v0  ;;  %v382_v0 = vrot.slane %v354_v57, %v2265_v41 }
  0x31   :  { %1809 = vmatprep.subr.bf16.mxu0 %v2015_v2  ;;  %1830 = vmatpush3.bf16.msra.mxu1 %v2014_v1  ;;  %v2065_v1 = vld [vmem:[%s2608_s1 + $0x338] sm:$0xff]  }
  0x32   :  { %1831 = vmatprep.subr.bf16.mxu1 %v2016_v3  ;;  %v2066_v2 = vld [vmem:[%s2608_s1 + $0x3b8] sm:$0xff]   ;;  %v383_v3 = vcombine.high %v361_v61, %v361_v61 }
  0x34   :  { %1810 = vmatpush3.bf16.msra.mxu0 %v2017_v4  ;;  %v2067_v4 = vld [vmem:[%s2608_s1 + $0x370] sm:$0xff]  }
  0x35   :  { %1811 = vmatprep.subr.bf16.mxu0 %v2019_v6  ;;  %1832 = vmatpush3.bf16.msra.mxu1 %v2018_v5  ;;  %v2068_v5 = vld [vmem:[%s2608_s1 + $0x3f0] sm:$0xff]   ;;  %v386_v6 = vcombine.high %v382_v0, %v382_v0 }
  0x36   :  { %1833 = vmatprep.subr.bf16.mxu1 %v2020_v7  ;;  %v2069_v7 = vld [vmem:[%s2608_s1 + $0x330] sm:$0xff]  }
  0x38   :  { %1812 = vmatpush3.bf16.msra.mxu0 %v2021_v8  ;;  %v2070_v8 = vld [vmem:[%s2608_s1 + $0x3b0] sm:$0xff]  }
  0x39   :  { %1813 = vmatprep.subr.bf16.mxu0 %v2023_v10  ;;  %1834 = vmatpush3.bf16.msra.mxu1 %v2022_v9  ;;  %v2071_v9 = vld [vmem:[%s2608_s1 + $0x368] sm:$0xff]  }
  0x3a   :  { %1835 = vmatprep.subr.bf16.mxu1 %v2024_v11  ;;  %v2072_v10 = vld [vmem:[%s2608_s1 + $0x3e8] sm:$0xff]  }
  0x3b   :  { %v2073_v11 = vld [vmem:[%s2608_s1 + $0x328] sm:$0xff]  }
  0x3c   :  { %1814 = vmatpush3.bf16.msra.mxu0 %v2025_v12  ;;  %v2074_v12 = vld [vmem:[%s2608_s1 + $0x3a8] sm:$0xff]  }
  0x3d   :  { %1815 = vmatprep.subr.bf16.mxu0 %v2027_v14  ;;  %1836 = vmatpush3.bf16.msra.mxu1 %v2026_v13  ;;  %v2075_v13 = vld [vmem:[%s2608_s1 + $0x360] sm:$0xff]  }
  0x3e   :  { %1837 = vmatprep.subr.bf16.mxu1 %v2028_v15  ;;  %v2076_v14 = vld [vmem:[%s2608_s1 + $0x3e0] sm:$0xff]  }
  0x3f   :  { %v2077_v15 = vld [vmem:[%s2608_s1 + $0x320] sm:$0xff]  }
  0x40   :  { %1816 = vmatpush3.bf16.msra.mxu0 %v2029_v16  ;;  %v2078_v16 = vld [vmem:[%s2608_s1 + $0x3a0] sm:$0xff]  }
  0x41   :  { %1845 = vmatprep.subr.bf16.mxu0 %v2031_v19  ;;  %1838 = vmatpush3.bf16.msra.mxu1 %v2030_v17  ;;  %v2079_v17 = vld [vmem:[%s2608_s1 + $0x358] sm:$0xff]  }
  0x42   :  { %1867 = vmatprep.subr.bf16.mxu1 %v2032_v20  ;;  %v2081_v19 = vld [vmem:[%s2608_s1 + $0x318] sm:$0xff]  }
  0x43   :  { %1284 = vmatmul.mubr.bf16.vlgmr.msra.gmra.mxu0 %v319_v18  ;;  %v2080_v18 = vld [vmem:[%s2608_s1 + $0x3d8] sm:$0xff]  }
  0x44   :  { %1846 = vmatpush3.bf16.msra.mxu0 %v2033_v21  ;;  %1324 = vmatmul.mubr.bf16.vlgmr.msra.gmra.mxu1 %v335_v23  ;;  %v2082_v20 = vld [vmem:[%s2608_s1 + $0x398] sm:$0xff]   ;;  %v2083_v21 = vld [vmem:[%s2608_s1 + $0x350] sm:$0xff]  }
  0x45   :  { %1847 = vmatprep.subr.bf16.mxu0 %v2035_v24  ;;  %1868 = vmatpush3.bf16.msra.mxu1 %v2034_v22  ;;  %v2084_v22 = vld [vmem:[%s2608_s1 + $0x3d0] sm:$0xff]  }
  0x46   :  { %1869 = vmatprep.subr.bf16.mxu1 %v2036_v25  ;;  %1363 = vmatprep.mubr.bf16.mxu0 %v375_v56  ;;  %v2085_v23 = vld [vmem:[%s2608_s1 + $0x310] sm:$0xff]   ;;  %v2087_v25 = vld [vmem:[%s2608_s1 + $0x348] sm:$0xff]  }
  0x47   :  { %1403 = vmatprep.mubr.bf16.mxu1 %v385_v60  ;;  %v2086_v24 = vld [vmem:[%s2608_s1 + $0x390] sm:$0xff]  }
  0x48   :  { %1848 = vmatpush3.bf16.msra.mxu0 %v2037_v26  ;;  %v2088_v26 = vld [vmem:[%s2608_s1 + $0x3c8] sm:$0xff]  }
  0x49   :  { %1849 = vmatprep.subr.bf16.mxu0 %v2039_v28  ;;  %1870 = vmatpush3.bf16.msra.mxu1 %v2038_v27  ;;  %v2089_v27 = vld [vmem:[%s2608_s1 + $0x308] sm:$0xff]   ;;  %v2091_v28 = vld [vmem:[%s2608_s1 + $0x340] sm:$0xff]  }
  0x4a   :  { %1871 = vmatprep.subr.bf16.mxu1 %v2040_v29  ;;  %v2090_v29 = vld [vmem:[%s2608_s1 + $0x388] sm:$0xff]  }
  0x4c   :  { %1850 = vmatpush3.bf16.msra.mxu0 %v2041_v30  ;;  %v2092_v30 = vld [vmem:[%s2608_s1 + $0x3c0] sm:$0xff]  }
  0x4d   :  { %1851 = vmatprep.subr.bf16.mxu0 %v2043_v32  ;;  %1872 = vmatpush3.bf16.msra.mxu1 %v2042_v31 }
  0x4e   :  { %1873 = vmatprep.subr.bf16.mxu1 %v2044_v33 }
  0x50   :  { %1852 = vmatpush3.bf16.msra.mxu0 %v2045_v34 }
  0x51   :  { %1853 = vmatprep.subr.bf16.mxu0 %v2047_v36  ;;  %1874 = vmatpush3.bf16.msra.mxu1 %v2046_v35 }
  0x52   :  { %1875 = vmatprep.subr.bf16.mxu1 %v2048_v37 }
  0x54   :  { %1854 = vmatpush3.bf16.msra.mxu0 %v2049_v38 }
  0x55   :  { %1855 = vmatprep.subr.bf16.mxu0 %v2051_v40  ;;  %1876 = vmatpush3.bf16.msra.mxu1 %v2050_v39 }
  0x56   :  { %1877 = vmatprep.subr.bf16.mxu1 %v2052_v42 }
  0x58   :  { %1856 = vmatpush3.bf16.msra.mxu0 %v2053_v43 }
  0x59   :  { %1857 = vmatprep.subr.bf16.mxu0 %v2055_v45  ;;  %1878 = vmatpush3.bf16.msra.mxu1 %v2054_v44 }
  0x5a   :  { %1879 = vmatprep.subr.bf16.mxu1 %v2056_v47 }
  0x5c   :  { %1858 = vmatpush3.bf16.msra.mxu0 %v2057_v50 }
  0x5d   :  { %1859 = vmatprep.subr.bf16.mxu0 %v2059_v54  ;;  %1880 = vmatpush3.bf16.msra.mxu1 %v2058_v51 }
  0x5e   :  { %1881 = vmatprep.subr.bf16.mxu1 %v2060_v55 }
  0x60   :  { %1860 = vmatpush3.bf16.msra.mxu0 %v2061_v58 }
  0x61   :  { %1889 = vmatprep.subr.bf16.mxu0 %v2063_v62  ;;  %1882 = vmatpush3.bf16.msra.mxu1 %v2062_v59 }
  0x62   :  { %1911 = vmatprep.subr.bf16.mxu1 %v2064_v63 }
  0x63   :  { %1364 = vmatmul.mubr.bf16.vlgmr.msra.gmra.mxu0 %v361_v61 }
  0x64   :  { %1890 = vmatpush3.bf16.msra.mxu0 %v2065_v1  ;;  %1443 = vmatprep.mubr.bf16.mxu0 %v382_v0 }
  0x65   :  { %1404 = vmatmul.mubr.bf16.vlgmr.msra.gmra.mxu1 %v383_v3  ;;  %1891 = vmatprep.subr.bf16.mxu0 %v2067_v4 }
  0x66   :  { %1912 = vmatpush3.bf16.msra.mxu1 %v2066_v2  ;;  %1483 = vmatprep.mubr.bf16.mxu1 %v386_v6 }
  0x67   :  { %1913 = vmatprep.subr.bf16.mxu1 %v2068_v5 }
  0x68   :  { %1892 = vmatpush3.bf16.msra.mxu0 %v2069_v7 }
  0x69   :  { %1893 = vmatprep.subr.bf16.mxu0 %v2071_v9 }
  0x6a   :  { %1914 = vmatpush3.bf16.msra.mxu1 %v2070_v8 }
  0x6b   :  { %1915 = vmatprep.subr.bf16.mxu1 %v2072_v10 }
  0x6c   :  { %1894 = vmatpush3.bf16.msra.mxu0 %v2073_v11 }
  0x6d   :  { %1895 = vmatprep.subr.bf16.mxu0 %v2075_v13 }
  0x6e   :  { %1916 = vmatpush3.bf16.msra.mxu1 %v2074_v12 }
  0x6f   :  { %1917 = vmatprep.subr.bf16.mxu1 %v2076_v14 }
  0x70   :  { %1896 = vmatpush3.bf16.msra.mxu0 %v2077_v15 }
  0x71   :  { %1897 = vmatprep.subr.bf16.mxu0 %v2079_v17 }
  0x72   :  { %1918 = vmatpush3.bf16.msra.mxu1 %v2078_v16 }
  0x73   :  { %1919 = vmatprep.subr.bf16.mxu1 %v2080_v18 }
  0x74   :  { %1898 = vmatpush3.bf16.msra.mxu0 %v2081_v19 }
  0x75   :  { %1899 = vmatprep.subr.bf16.mxu0 %v2083_v21 }
  0x76   :  { %1920 = vmatpush3.bf16.msra.mxu1 %v2082_v20 }
  0x77   :  { %1921 = vmatprep.subr.bf16.mxu1 %v2084_v22 }
  0x78   :  { %1900 = vmatpush3.bf16.msra.mxu0 %v2085_v23 }
  0x79   :  { %1901 = vmatprep.subr.bf16.mxu0 %v2087_v25 }
  0x7a   :  { %1922 = vmatpush3.bf16.msra.mxu1 %v2086_v24 }
  0x7b   :  { %1923 = vmatprep.subr.bf16.mxu1 %v2088_v26 }
  0x7c   :  { %10 = vsyncpa [#allocation3], 0  ;;  %1902 = vmatpush3.bf16.msra.mxu0 %v2089_v27  ;;  %v2093_v31 = vld [vmem:[%s2608_s1 + $0x300] sm:$0xff]   ;;  %v368_v32 = vrot.slane %v2457_v53, %v2265_v41  ;;  %v2096_v35 = vld [vmem:[%s2610_s3 + $0x38] sm:$0xff]   ;;  %v2127_v36 = vmov 0.0   ;;  %vm2128_vm0 = vmmov 0  }
  0x7d   :  { %1903 = vmatprep.subr.bf16.mxu0 %v2091_v28  ;;  %v2094_v33 = vld [vmem:[%s2608_s1 + $0x380] sm:$0xff]   ;;  %v2097_v41 = vld [vmem:[%s2610_s3 + $0x30] sm:$0xff]   ;;  %v2098_v37 = vld [vmem:[%s2610_s3 + $0x28] sm:$0xff]   ;;  %s2129_s16 = smov [#allocation2]  }
  0x7e   :  { %1924 = vmatpush3.bf16.msra.mxu1 %v2090_v29  ;;  %v384_v34 = vcombine.high %v368_v32, %v368_v32  ;;  %v2099_v38 = vld [vmem:[%s2610_s3 + $0x20] sm:$0xff]   ;;  %v2100_v39 = vld [vmem:[%s2610_s3 + $0x18] sm:$0xff]   ;;  %v2101_v40 = vld [vmem:[%s2610_s3 + $0x10] sm:$0xff]   ;;  %s1611_s17 = sshll.u32 %s2129_s16, 4  ;;  %s1612_s17 = int_to_ptr.vmem [resolvable:$true] %s1611_s17 }
  0x7f   :  { %1925 = vmatprep.subr.bf16.mxu1 %v2092_v30  ;;  %v2102_v42 = vld [vmem:[%s2610_s3 + $0x8] sm:$0xff]   ;;  %v2103_v43 = vld [vmem:[%s2610_s3] sm:$0xff]   ;;  %s2104_s18 = scalar_lea.vmem %s1612_s17, 32  ;;  %p2109_p1 = scmp.lt.s32.totalorder %s1612_s17, %s1612_s17 }
  0x80   :  { %1904 = vmatpush3.bf16.msra.mxu0 %v2093_v31  ;;  %v1619_v46 = vld [vmem:[%s2609_s2] ss:$0 sm:$0xff]  ;;  %p2105_p0 = scmp.ne.s32.totalorder %s1612_s17, %s2104_s18  ;;  %p2110_p2 = scmp.lt.s32.totalorder %s2104_s18, %s2104_s18 }
  0x81   :  { %1942 = vmatprep.subr.bf16.mxu0 %v2127_v36  ;;  %v1748_v31 = vld [vmem:[%s2611_s4] ss:$0 sm:$0xff] }
  0x82   :  { %1926 = vmatpush3.bf16.msra.mxu1 %v2094_v33  ;;  %p2111_p3 = por %p2110_p2, %p2109_p1 }
  0x83   :  { %1444 = vmatmul.mubr.bf16.vlgmr.msra.gmra.mxu0 %v368_v32 }
  0x84   :  { %1943 = vmatpush3.bf16.msra.mxu0 %v2096_v35  ;;  %1958 = vmatprep.mubr.msk.bf16.mxu0 %vm2128_vm0, %v2127_v36  ;;  %p2112_p4 = pnand %p2111_p3, %p2105_p0 }
  0x85   :  { %1484 = vmatmul.mubr.bf16.vlgmr.msra.gmra.mxu1 %v384_v34  ;;  %1944 = vmatprep.subr.bf16.mxu0 %v2127_v36 }
  0x88   :  { %1945 = vmatpush3.bf16.msra.mxu0 %v2097_v41 }
  0x89   :  { %1946 = vmatprep.subr.bf16.mxu0 %v2127_v36 }
  0x8c   :  { %1947 = vmatpush3.bf16.msra.mxu0 %v2098_v37 }
  0x8d   :  { %1948 = vmatprep.subr.bf16.mxu0 %v2127_v36 }
  0x90   :  { %1949 = vmatpush3.bf16.msra.mxu0 %v2099_v38 }
  0x91   :  { %1950 = vmatprep.subr.bf16.mxu0 %v2127_v36 }
  0x94   :  { %1951 = vmatpush3.bf16.msra.mxu0 %v2100_v39 }
  0x95   :  { %1952 = vmatprep.subr.bf16.mxu0 %v2127_v36 }
  0x98   :  { %1953 = vmatpush3.bf16.msra.mxu0 %v2101_v40 }
  0x99   :  { %1954 = vmatprep.subr.bf16.mxu0 %v2127_v36 }
  0x9c   :  { %1955 = vmatpush3.bf16.msra.mxu0 %v2102_v42 }
  0x9d   :  { %1956 = vmatprep.subr.bf16.mxu0 %v2127_v36 }
  0xa0   :  { %1957 = vmatpush3.bf16.msra.mxu0 %v2103_v43 }
  0xe3   :  { %v1773_v44 = vpop.f32.mrf.mxu0 }
  0xe4   :  { %v1795_v45 = vpop.f32.mrf.mxu1 }
  0xe5   :  { %v1774_v47 = vpop.f32.mrf.mxu0 }
  0xe6   :  { %v1775_v48 = vadd.f32 %v1774_v47, %v1773_v44  ;;  %v1796_v49 = vpop.f32.mrf.mxu1 }
  0xe7   :  { %v1776_v50 = vpop.f32.mrf.mxu0  ;;  %v1797_v52 = vadd.f32 %v1796_v49, %v1795_v45 }
  0xe8   :  { %v1206_v51 = vadd.f32 %v1775_v48, %v1619_v46  ;;  %v1798_v53 = vpop.f32.mrf.mxu1 }
  0xe9   :  { %v1777_v54 = vpop.f32.mrf.mxu0 }
  0xea   :  { %v1246_v55 = vadd.f32 %v1797_v52, %v1206_v51  ;;  %v1799_v56 = vpop.f32.mrf.mxu1 }
 0x103   :  { %v1817_v57 = vpop.f32.mrf.mxu0 }
 0x104   :  { %v1839_v58 = vpop.f32.mrf.mxu1 }
 0x105   :  { %v1818_v59 = vpop.f32.mrf.mxu0 }
 0x106   :  { %v1840_v60 = vpop.f32.mrf.mxu1  ;;  %v1819_v9 = vadd.f32 %v1818_v59, %v1817_v57 }
 0x107   :  { %v1820_v61 = vpop.f32.mrf.mxu0  ;;  %v1841_v11 = vadd.f32 %v1840_v60, %v1839_v58 }
 0x108   :  { %v1842_v62 = vpop.f32.mrf.mxu1  ;;  %v1286_v10 = vadd.f32 %v1819_v9, %v1246_v55 }
 0x109   :  { %v1821_v63 = vpop.f32.mrf.mxu0 }
 0x10a   :  { %v1843_v0 = vpop.f32.mrf.mxu1  ;;  %v1326_v13 = vadd.f32 %v1841_v11, %v1286_v10 }
 0x123   :  { %v1861_v1 = vpop.f32.mrf.mxu0 }
 0x125   :  { %v1883_v2 = vpop.f32.mrf.mxu1  ;;  %v1862_v3 = vpop.f32.mrf.mxu0 }
 0x126   :  { %v1863_v12 = vadd.f32 %v1862_v3, %v1861_v1 }
 0x127   :  { %v1884_v4 = vpop.f32.mrf.mxu1  ;;  %v1864_v5 = vpop.f32.mrf.mxu0 }
 0x128   :  { %v1366_v14 = vadd.f32 %v1863_v12, %v1326_v13  ;;  %v1885_v15 = vadd.f32 %v1884_v4, %v1883_v2 }
 0x129   :  { %v1886_v6 = vpop.f32.mrf.mxu1  ;;  %v1865_v7 = vpop.f32.mrf.mxu0 }
 0x12a   :  { %v1406_v19 = vadd.f32 %v1885_v15, %v1366_v14 }
 0x12b   :  { %v1887_v8 = vpop.f32.mrf.mxu1 }
 0x143   :  { %v1905_v16 = vpop.f32.mrf.mxu0 }
 0x145   :  { %v1927_v17 = vpop.f32.mrf.mxu1  ;;  %v1906_v18 = vpop.f32.mrf.mxu0 }
 0x146   :  { %v1907_v20 = vadd.f32 %v1906_v18, %v1905_v16 }
 0x147   :  { %v1928_v21 = vpop.f32.mrf.mxu1  ;;  %v1908_v22 = vpop.f32.mrf.mxu0 }
 0x148   :  { %v1446_v23 = vadd.f32 %v1907_v20, %v1406_v19  ;;  %v1929_v24 = vadd.f32 %v1928_v21, %v1927_v17 }
 0x149   :  { %v1930_v25 = vpop.f32.mrf.mxu1  ;;  %v1909_v26 = vpop.f32.mrf.mxu0 }
 0x14a   :  { %v1486_v27 = vadd.f32 %v1929_v24, %v1446_v23 }
 0x14b   :  { %v1931_v28 = vpop.f32.mrf.mxu1 }
 0x14c   :  { %v1491_v29 = vmax.f32 %v1486_v27, 0.0 }
 0x14e   :  { %v1492_v30 = vpack.c.bf16 %v1491_v29, %v1491_v29 }
 0x150   :  { %1959 = vmatmul.mubr.bf16.vlgmr.msra.gmra.mxu0 %v1492_v30 }
 0x210   :  { %v1598_v32 = vpop.f32.mrf.mxu0 }
 0x211   :  { %v1599_v33 = vadd.f32 %v1748_v31, %v1598_v32 }
 0x212   :  { %v1960_v34 = vpop.f32.mrf.mxu0 }
 0x213   :  { %1604 = vst [vmem:[#allocation2] sm:$0x3] %v1599_v33 }
 0x214   :  { %v1601_v35 = vpop.f32.mrf.mxu0 }
 0x215   :  { %2115 = shalt.err (!%p2112_p4)
}
 0x216   :  { %1614 = dma.vmem_to_hbm [thread:$0]  %s1612_s17, 32, %s2612_s5, [#allocation3]   ;;  %v1961_v36 = vpop.f32.mrf.mxu0 }
 0x217   :  { %2124 = dma.done.wait [#allocation3], 32  }
 0x218   :  { %2125 = vsyncadd [#allocation3], 4294967264 }
 0x219   :  { %1618 = vsyncpa [#allocation3], 1 }

// kernel: idcnn_forward.2
= control target key start
LH: loop header
LB: loop body
LE: loop exit
PB: predicated region body
PF: predicated region fallthrough
CT: control target
= control target key end

     0   :  { %vm406_vm0 = vcmask 1041408   ;;  %vm297_vm1 = vcmask 162816   ;;  %vm4006_vm2 = vcmask 650240   ;;  %vm3530_vm3 = vcmask 130048   ;;  %s10825_s29 = smov 32   ;;  %s10826_s9 = smov 64   ;;  %s13857_s1 = inlined_call_operand.vmem [shape: bf16[5,20,16], index: 1, kind: input, shape index: {}]   ;;  %s13858_s0 = inlined_call_operand.vmem [shape: bf16[640,20], index: 0, kind: input, shape index: {}]   ;;  %s13859_s2 = inlined_call_operand.vmem [shape: f32[1,16], index: 2, kind: input, shape index: {}]   ;;  %s13860_s3 = inlined_call_operand.vmem [shape: bf16[5,80,64], index: 3, kind: input, shape index: {}]   ;;  %s13861_s5 = inlined_call_operand.vmem [shape: bf16[5,320,128], index: 5, kind: input, shape index: {}]   ;;  %s13862_s4 = inlined_call_operand.vmem [shape: f32[1,64], index: 4, kind: input, shape index: {}]   ;;  %s13863_s6 = inlined_call_operand.vmem [shape: f32[1,128], index: 6, kind: input, shape index: {}]   ;;  %s13864_s7 = inlined_call_operand.vmem [shape: bf16[2,16,128], index: 7, kind: output, shape index: {}]  }
   0x1   :  { %v10476_v0 = vld [vmem:[%s13857_s1 + $0x14] ss:$0 sps:$4 sm:$0x33]   ;;  %v10478_v1 = vld [vmem:[%s13857_s1 + $0xc] sm:$0xff]   ;;  %v10479_v3 = vld [vmem:[%s13857_s1] sm:$0xff]   ;;  %vm3969_vm4 = vcmask 125952  }
   0x2   :  { %v10477_v2 = vld [vmem:[%s13857_s1 + $0x8] ss:$0 sps:$4 sm:$0x33]   ;;  %10464 = vmatprep.subr.msk.bf16.mxu0 %vm406_vm0, %v10476_v0  ;;  %v408_v4 = vsel %vm406_vm0, %v10476_v0, 0  ;;  %v10481_v7 = vld [vmem:[%s13858_s0] sm:$0xff]   ;;  %v10482_v8 = vld [vmem:[%s13858_s0 + $0x10] sm:$0xff]  }
   0x3   :  { %v10480_v5 = vld [vmem:[%s13858_s0 + $0x8] sm:$0xff]   ;;  %10465 = vmatprep.subr.msk.bf16.mxu1 %vm406_vm0, %v10477_v2  ;;  %9835 = vmatpush3.bf16.msra.mxu0 %v408_v4  ;;  %v749_v6 = vsel %vm406_vm0, %v10477_v2, 0  ;;  %v10483_v9 = vld [vmem:[%s13857_s1 + $0x20] ss:$0 sps:$4 sm:$0x33]   ;;  %v10484_v11 = vld [vmem:[%s13858_s0 + $0x18] sm:$0xff]  }
   0x4   :  { %9911 = vmatpush3.bf16.msra.mxu1 %v749_v6  ;;  %9836 = vmatprep.subr.bf16.mxu0 %v10478_v1  ;;  %v1446_v10 = vsel %vm406_vm0, %v10483_v9, 0  ;;  %v10485_v12 = vld [vmem:[%s13858_s0 + $0x20] sm:$0xff]   ;;  %v10486_v13 = vld [vmem:[%s13858_s0 + $0x28] sm:$0xff]   ;;  %v10487_v14 = vld [vmem:[%s13858_s0 + $0x30] sm:$0xff]   ;;  %vm4035_vm5 = vcmask 125953   ;;  %s10827_s10 = smov 16  }
   0x5   :  { %9912 = vmatprep.subr.bf16.mxu1 %v10479_v3  ;;  %9838 = vmatprep.mubr.msk.bf16.mxu0 %vm297_vm1, %v10480_v5  ;;  %v10488_v15 = vld [vmem:[%s13858_s0 + $0x38] sm:$0xff]   ;;  %v10489_v17 = vld [vmem:[%s13858_s0 + $0x40] sm:$0xff]   ;;  %v10490_v18 = vld [vmem:[%s13858_s0 + $0x48] sm:$0xff]   ;;  %s10828_s11 = smov 48   ;;  %vm4049_vm6 = vsmask.f32 7938 }
   0x6   :  { %9914 = vmatprep.mubr.msk.bf16.mxu1 %vm297_vm1, %v10481_v7  ;;  %v10502_v16 = vld [vmem:[%s13857_s1 + $0x18] sm:$0xff]   ;;  %v10491_v19 = vld [vmem:[%s13858_s0 + $0x50] sm:$0xff]   ;;  %v10519_v21 = vld [vmem:[%s13857_s1 + $0x2c] ss:$0 sps:$4 sm:$0x33]   ;;  %vm4048_vm7 = vcmask 257152  }
   0x7   :  { %9837 = vmatpush3.bf16.msra.mxu0 %v10478_v1  ;;  %v10492_v20 = vld [vmem:[%s13858_s0 + $0x58] sm:$0xff]   ;;  %v10520_v22 = vld [vmem:[%s13857_s1 + $0x24] sm:$0xff]   ;;  %v2215_v23 = vsel %vm406_vm0, %v10519_v21, 0  ;;  %v10495_v28 = vld [vmem:[%s13858_s0 + $0x70] sm:$0xff]   ;;  %vm4059_vm9 = vcmask 388352   ;;  %vm4074_vm10 = vcmask 519552  }
   0x8   :  { %9913 = vmatpush3.bf16.msra.mxu1 %v10479_v3  ;;  %10466 = vmatprep.subr.msk.bf16.mxu0 %vm406_vm0, %v10483_v9  ;;  %v10493_v24 = vld [vmem:[%s13858_s0 + $0x60] sm:$0xff]   ;;  %v10494_v25 = vld [vmem:[%s13858_s0 + $0x68] sm:$0xff]   ;;  %v10523_v26 = vld [vmem:[%s13857_s1 + $0x38] ss:$0 sps:$4 sm:$0x33]   ;;  %vm4087_vm13 = vcmask 649728  }
   0x9   :  { %10467 = vmatprep.subr.msk.bf16.mxu1 %vm406_vm0, %v10519_v21  ;;  %v10971_v27 = vsel %vm406_vm0, %v10523_v26, 0  ;;  %v10496_v29 = vld [vmem:[%s13858_s0 + $0x78] sm:$0xff]   ;;  %v10497_v30 = vld [vmem:[%s13858_s0 + $0x80] sm:$0xff]   ;;  %v10498_v31 = vld [vmem:[%s13858_s0 + $0x88] sm:$0xff]   ;;  %vm4075_vm11 = vsmask.f32 3328 }
   0xa   :  { %9839 = vmatmul.mubr.msk.bf16.vlgmr.msra.gmra.mxu0 %vm297_vm1, %v10482_v8  ;;  %v10499_v32 = vld [vmem:[%s13858_s0 + $0x90] sm:$0xff]   ;;  %v10500_v33 = vld [vmem:[%s13858_s0 + $0x98] sm:$0xff]   ;;  %v10501_v34 = vld [vmem:[%s13858_s0 + $0xa0] sm:$0xff]   ;;  %vm4946_vm14 = vcmask 654336   ;;  %vm6144_vm15 = vcmask 523264  }
   0xb   :  { %9915 = vmatmul.mubr.msk.bf16.vlgmr.msra.gmra.mxu1 %vm297_vm1, %v10480_v5  ;;  %9987 = vmatpush3.bf16.msra.mxu0 %v1446_v10  ;;  %v10503_v35 = vld [vmem:[%s13858_s0 + $0xa8] sm:$0xff]   ;;  %v10504_v36 = vld [vmem:[%s13858_s0 + $0xb0] sm:$0xff]   ;;  %v10505_v37 = vld [vmem:[%s13858_s0 + $0xb8] sm:$0xff]  }
   0xc   :  { %9842 = vmatprep.mubr.msk.bf16.mxu0 %vm297_vm1, %v10484_v11  ;;  %9918 = vmatprep.mubr.msk.bf16.mxu1 %vm297_vm1, %v10482_v8  ;;  %v10506_v38 = vld [vmem:[%s13858_s0 + $0xc0] sm:$0xff]   ;;  %v10507_v39 = vld [vmem:[%s13858_s0 + $0xc8] sm:$0xff]   ;;  %v10508_v40 = vld [vmem:[%s13858_s0 + $0xd0] sm:$0xff]  }
   0xd   :  { %9988 = vmatprep.subr.bf16.mxu0 %v10502_v16  ;;  %10063 = vmatpush3.bf16.msra.mxu1 %v2215_v23  ;;  %v10509_v41 = vld [vmem:[%s13858_s0 + $0xd8] sm:$0xff]   ;;  %v10510_v42 = vld [vmem:[%s13858_s0 + $0xe0] sm:$0xff]   ;;  %v10511_v43 = vld [vmem:[%s13858_s0 + $0xe8] sm:$0xff]  }
   0xe   :  { %10064 = vmatprep.subr.bf16.mxu1 %v10520_v22  ;;  %v10512_v44 = vld [vmem:[%s13858_s0 + $0xf0] sm:$0xff]   ;;  %v10513_v45 = vld [vmem:[%s13858_s0 + $0xf8] sm:$0xff]   ;;  %v10514_v46 = vld [vmem:[%s13858_s0 + $0x100] sm:$0xff]  }
   0xf   :  { %9989 = vmatpush3.bf16.msra.mxu0 %v10502_v16  ;;  %v10515_v47 = vld [vmem:[%s13858_s0 + $0x108] sm:$0xff]   ;;  %v10516_v48 = vld [vmem:[%s13858_s0 + $0x110] sm:$0xff]   ;;  %v10517_v49 = vld [vmem:[%s13858_s0 + $0x118] sm:$0xff]  }
  0x10   :  { %10468 = vmatprep.subr.msk.bf16.mxu0 %vm406_vm0, %v10523_v26  ;;  %v10518_v50 = vld [vmem:[%s13858_s0 + $0x120] sm:$0xff]   ;;  %v10521_v51 = vld [vmem:[%s13858_s0 + $0x10] sm:$0xff]   ;;  %v10524_v52 = vld [vmem:[%s13858_s0 + $0x18] sm:$0xff]   ;;  %vm6315_vm0 = vcmask 519168  }
  0x11   :  { %10065 = vmatpush3.bf16.msra.mxu1 %v10520_v22  ;;  %v10522_v53 = vld [vmem:[%s13858_s0 + $0x18] sm:$0xff]   ;;  %v10525_v54 = vld [vmem:[%s13858_s0 + $0x20] sm:$0xff]   ;;  %v10528_v56 = vld [vmem:[%s13858_s0 + $0x28] sm:$0xff]  }
  0x12   :  { %9843 = vmatmul.mubr.msk.bf16.gmra.mxu0 %vm297_vm1, %v10485_v12  ;;  %v10526_v55 = vld [vmem:[%s13858_s0 + $0x20] sm:$0xff]   ;;  %v10560_v57 = vld [vmem:[%s13857_s1 + $0x30] sm:$0xff]   ;;  %v10527_v58 = vld [vmem:[%s13858_s0 + $0x28] sm:$0xff]  }
  0x13   :  { %9919 = vmatmul.mubr.msk.bf16.gmra.mxu1 %vm297_vm1, %v10484_v11  ;;  %9846 = vmatprep.mubr.msk.bf16.mxu0 %vm297_vm1, %v10486_v13  ;;  %v10529_v59 = vld [vmem:[%s13858_s0 + $0x30] sm:$0xff]   ;;  %v10532_v61 = vld [vmem:[%s13858_s0 + $0x38] sm:$0xff]   ;;  %v10533_v63 = vld [vmem:[%s13858_s0 + $0x40] sm:$0xff]  }
  0x14   :  { %9922 = vmatprep.mubr.msk.bf16.mxu1 %vm297_vm1, %v10485_v12  ;;  %v10530_v60 = vld [vmem:[%s13858_s0 + $0x30] sm:$0xff]   ;;  %v10531_v62 = vld [vmem:[%s13858_s0 + $0x38] sm:$0xff]   ;;  %v10534_v0 = vld [vmem:[%s13858_s0 + $0x40] sm:$0xff]  }
  0x15   :  { %v10536_v1 = vld [vmem:[%s13858_s0 + $0x48] sm:$0xff]   ;;  %v10537_v3 = vld [vmem:[%s13858_s0 + $0x50] sm:$0xff]   ;;  %v10540_v5 = vld [vmem:[%s13858_s0 + $0x58] sm:$0xff]  }
  0x16   :  { %v10535_v2 = vld [vmem:[%s13858_s0 + $0x48] sm:$0xff]   ;;  %v10538_v4 = vld [vmem:[%s13858_s0 + $0x50] sm:$0xff]   ;;  %v10539_v6 = vld [vmem:[%s13858_s0 + $0x58] sm:$0xff]  }
  0x17   :  { %v10541_v7 = vld [vmem:[%s13858_s0 + $0x60] sm:$0xff]   ;;  %v10544_v9 = vld [vmem:[%s13858_s0 + $0x68] sm:$0xff]   ;;  %v10545_v11 = vld [vmem:[%s13858_s0 + $0x70] sm:$0xff]  }
  0x18   :  { %v10542_v8 = vld [vmem:[%s13858_s0 + $0x60] sm:$0xff]   ;;  %v10543_v10 = vld [vmem:[%s13858_s0 + $0x68] sm:$0xff]   ;;  %v10546_v12 = vld [vmem:[%s13858_s0 + $0x70] sm:$0xff]  }
  0x19   :  { %v10550_v16 = vld [vmem:[%s13858_s0 + $0x80] sm:$0xff]   ;;  %vm12650_vm8 = vmand %vm4048_vm7, %vm4049_vm6  ;;  %vm6396_vm7 = vcmask 519171  }
  0x1a   :  { %9847 = vmatmul.mubr.msk.bf16.gmra.mxu0 %vm297_vm1, %v10487_v14  ;;  %vm12668_vm12 = vmand %vm4074_vm10, %vm4075_vm11  ;;  %vm6359_vm10 = vcmask 1041920  }
  0x1b   :  { %9923 = vmatmul.mubr.msk.bf16.gmra.mxu1 %vm297_vm1, %v10486_v13  ;;  %9850 = vmatprep.mubr.msk.bf16.mxu0 %vm297_vm1, %v10488_v15  ;;  %v10548_v13 = vld [vmem:[%s13858_s0 + $0x78] sm:$0xff]  }
  0x1c   :  { %9926 = vmatprep.mubr.msk.bf16.mxu1 %vm297_vm1, %v10487_v14  ;;  %v10547_v14 = vld [vmem:[%s13858_s0 + $0x78] sm:$0xff]  }
  0x22   :  { %9851 = vmatmul.mubr.msk.bf16.gmra.mxu0 %vm297_vm1, %v10489_v17 }
  0x23   :  { %9927 = vmatmul.mubr.msk.bf16.gmra.mxu1 %vm297_vm1, %v10488_v15  ;;  %9854 = vmatprep.mubr.msk.bf16.mxu0 %vm297_vm1, %v10490_v18  ;;  %v10549_v15 = vld [vmem:[%s13858_s0 + $0x80] sm:$0xff]  }
  0x24   :  { %9930 = vmatprep.mubr.msk.bf16.mxu1 %vm297_vm1, %v10489_v17  ;;  %v10552_v17 = vld [vmem:[%s13858_s0 + $0x88] sm:$0xff]  }
  0x2a   :  { %9855 = vmatmul.mubr.msk.bf16.gmra.mxu0 %vm297_vm1, %v10491_v19 }
  0x2b   :  { %9931 = vmatmul.mubr.msk.bf16.gmra.mxu1 %vm297_vm1, %v10490_v18  ;;  %9858 = vmatprep.mubr.msk.bf16.mxu0 %vm297_vm1, %v10492_v20 }
  0x2c   :  { %9934 = vmatprep.mubr.msk.bf16.mxu1 %vm297_vm1, %v10491_v19 }
  0x32   :  { %9859 = vmatmul.mubr.msk.bf16.gmra.mxu0 %vm297_vm1, %v10493_v24 }
  0x33   :  { %9935 = vmatmul.mubr.msk.bf16.gmra.mxu1 %vm297_vm1, %v10492_v20  ;;  %9862 = vmatprep.mubr.msk.bf16.mxu0 %vm297_vm1, %v10494_v25 }
  0x34   :  { %9938 = vmatprep.mubr.msk.bf16.mxu1 %vm297_vm1, %v10493_v24 }
  0x3a   :  { %9863 = vmatmul.mubr.msk.bf16.gmra.mxu0 %vm297_vm1, %v10495_v28 }
  0x3b   :  { %9939 = vmatmul.mubr.msk.bf16.gmra.mxu1 %vm297_vm1, %v10494_v25  ;;  %9866 = vmatprep.mubr.msk.bf16.mxu0 %vm297_vm1, %v10496_v29  ;;  %v10551_v25 = vld [vmem:[%s13858_s0 + $0x88] sm:$0xff]  }
  0x3c   :  { %9942 = vmatprep.mubr.msk.bf16.mxu1 %vm297_vm1, %v10495_v28  ;;  %v10554_v28 = vld [vmem:[%s13858_s0 + $0x90] sm:$0xff]  }
  0x42   :  { %9867 = vmatmul.mubr.msk.bf16.gmra.mxu0 %vm297_vm1, %v10497_v30 }
  0x43   :  { %9943 = vmatmul.mubr.msk.bf16.gmra.mxu1 %vm297_vm1, %v10496_v29  ;;  %9870 = vmatprep.mubr.msk.bf16.mxu0 %vm297_vm1, %v10498_v31 }
  0x44   :  { %9946 = vmatprep.mubr.msk.bf16.mxu1 %vm297_vm1, %v10497_v30 }
  0x4a   :  { %9871 = vmatmul.mubr.msk.bf16.gmra.mxu0 %vm297_vm1, %v10499_v32 }
  0x4b   :  { %9947 = vmatmul.mubr.msk.bf16.gmra.mxu1 %vm297_vm1, %v10498_v31  ;;  %9874 = vmatprep.mubr.msk.bf16.mxu0 %vm297_vm1, %v10500_v33  ;;  %v10556_v31 = vld [vmem:[%s13858_s0 + $0x98] sm:$0xff]  }
  0x4c   :  { %9950 = vmatprep.mubr.msk.bf16.mxu1 %vm297_vm1, %v10499_v32 }
  0x52   :  { %9875 = vmatmul.mubr.msk.bf16.gmra.mxu0 %vm297_vm1, %v10501_v34 }
  0x53   :  { %9951 = vmatmul.mubr.msk.bf16.gmra.mxu1 %vm297_vm1, %v10500_v33  ;;  %9878 = vmatprep.mubr.msk.bf16.mxu0 %vm297_vm1, %v10503_v35 }
  0x54   :  { %9954 = vmatprep.mubr.msk.bf16.mxu1 %vm297_vm1, %v10501_v34 }
  0x5a   :  { %9879 = vmatmul.mubr.msk.bf16.gmra.mxu0 %vm297_vm1, %v10504_v36 }
  0x5b   :  { %9955 = vmatmul.mubr.msk.bf16.gmra.mxu1 %vm297_vm1, %v10503_v35  ;;  %9882 = vmatprep.mubr.msk.bf16.mxu0 %vm297_vm1, %v10505_v37 }
  0x5c   :  { %9958 = vmatprep.mubr.msk.bf16.mxu1 %vm297_vm1, %v10504_v36 }
  0x62   :  { %9883 = vmatmul.mubr.msk.bf16.gmra.mxu0 %vm297_vm1, %v10506_v38 }
  0x63   :  { %9959 = vmatmul.mubr.msk.bf16.gmra.mxu1 %vm297_vm1, %v10505_v37  ;;  %9886 = vmatprep.mubr.msk.bf16.mxu0 %vm297_vm1, %v10507_v39 }
  0x64   :  { %9962 = vmatprep.mubr.msk.bf16.mxu1 %vm297_vm1, %v10506_v38 }
  0x6a   :  { %9887 = vmatmul.mubr.msk.bf16.gmra.mxu0 %vm297_vm1, %v10508_v40 }
  0x6b   :  { %9963 = vmatmul.mubr.msk.bf16.gmra.mxu1 %vm297_vm1, %v10507_v39  ;;  %9890 = vmatprep.mubr.msk.bf16.mxu0 %vm297_vm1, %v10509_v41 }
  0x6c   :  { %9966 = vmatprep.mubr.msk.bf16.mxu1 %vm297_vm1, %v10508_v40 }
  0x72   :  { %9891 = vmatmul.mubr.msk.bf16.gmra.mxu0 %vm297_vm1, %v10510_v42 }
  0x73   :  { %9967 = vmatmul.mubr.msk.bf16.gmra.mxu1 %vm297_vm1, %v10509_v41  ;;  %9894 = vmatprep.mubr.msk.bf16.mxu0 %vm297_vm1, %v10511_v43  ;;  %v10555_v41 = vld [vmem:[%s13858_s0 + $0x98] sm:$0xff]  }
  0x74   :  { %9970 = vmatprep.mubr.msk.bf16.mxu1 %vm297_vm1, %v10510_v42 }
  0x7a   :  { %9895 = vmatmul.mubr.msk.bf16.gmra.mxu0 %vm297_vm1, %v10512_v44 }
  0x7b   :  { %9971 = vmatmul.mubr.msk.bf16.gmra.mxu1 %vm297_vm1, %v10511_v43  ;;  %9898 = vmatprep.mubr.msk.bf16.mxu0 %vm297_vm1, %v10513_v45  ;;  %v10557_v43 = vld [vmem:[%s13858_s0 + $0xa0] sm:$0xff]  }
  0x7c   :  { %9974 = vmatprep.mubr.msk.bf16.mxu1 %vm297_vm1, %v10512_v44  ;;  %v10558_v44 = vld [vmem:[%s13858_s0 + $0xa0] sm:$0xff]  }
  0x82   :  { %9899 = vmatmul.mubr.msk.bf16.gmra.mxu0 %vm297_vm1, %v10514_v46 }
  0x83   :  { %9975 = vmatmul.mubr.msk.bf16.gmra.mxu1 %vm297_vm1, %v10513_v45  ;;  %9902 = vmatprep.mubr.msk.bf16.mxu0 %vm297_vm1, %v10515_v47 }
  0x84   :  { %9978 = vmatprep.mubr.msk.bf16.mxu1 %vm297_vm1, %v10514_v46 }
  0x8a   :  { %9903 = vmatmul.mubr.msk.bf16.gmra.mxu0 %vm297_vm1, %v10516_v48 }
  0x8b   :  { %9979 = vmatmul.mubr.msk.bf16.gmra.mxu1 %vm297_vm1, %v10515_v47  ;;  %9906 = vmatprep.mubr.msk.bf16.mxu0 %vm297_vm1, %v10517_v49  ;;  %v10561_v47 = vld [vmem:[%s13858_s0 + $0xa8] sm:$0xff]  }
  0x8c   :  { %9982 = vmatprep.mubr.msk.bf16.mxu1 %vm297_vm1, %v10516_v48 }
  0x92   :  { %9907 = vmatmul.mubr.msk.bf16.gmra.mxu0 %vm297_vm1, %v10518_v50 }
  0x93   :  { %9983 = vmatmul.mubr.msk.bf16.gmra.mxu1 %vm297_vm1, %v10517_v49  ;;  %9990 = vmatprep.mubr.msk.bf16.mxu0 %vm297_vm1, %v10521_v51 }
  0x94   :  { %10066 = vmatprep.mubr.msk.bf16.mxu1 %vm297_vm1, %v10524_v52 }
  0x9a   :  { %9991 = vmatmul.mubr.msk.bf16.vlgmr.msra.gmra.mxu0 %vm297_vm1, %v10522_v53 }
  0x9b   :  { %10139 = vmatpush3.bf16.msra.mxu0 %v10971_v27  ;;  %10067 = vmatmul.mubr.msk.bf16.vlgmr.msra.gmra.mxu1 %vm297_vm1, %v10525_v54  ;;  %v10553_v27 = vld [vmem:[%s13858_s0 + $0x90] sm:$0xff]  }
  0x9c   :  { %9994 = vmatprep.mubr.msk.bf16.mxu0 %vm297_vm1, %v10526_v55  ;;  %10070 = vmatprep.mubr.msk.bf16.mxu1 %vm297_vm1, %v10528_v56 }
  0x9d   :  { %10140 = vmatprep.subr.bf16.mxu0 %v10560_v57 }
  0x9f   :  { %10141 = vmatpush3.bf16.msra.mxu0 %v10560_v57  ;;  %v10559_v57 = vld [vmem:[%s13858_s0 + $0xa8] sm:$0xff]  }
  0xa2   :  { %9995 = vmatmul.mubr.msk.bf16.gmra.mxu0 %vm297_vm1, %v10527_v58 }
  0xa3   :  { %10071 = vmatmul.mubr.msk.bf16.gmra.mxu1 %vm297_vm1, %v10529_v59  ;;  %9998 = vmatprep.mubr.msk.bf16.mxu0 %vm297_vm1, %v10530_v60  ;;  %v10562_v59 = vld [vmem:[%s13858_s0 + $0xb0] sm:$0xff]  }
  0xa4   :  { %10074 = vmatprep.mubr.msk.bf16.mxu1 %vm297_vm1, %v10532_v61  ;;  %v10563_v60 = vld [vmem:[%s13858_s0 + $0xb0] sm:$0xff]  }
  0xaa   :  { %9999 = vmatmul.mubr.msk.bf16.gmra.mxu0 %vm297_vm1, %v10531_v62 }
  0xab   :  { %10075 = vmatmul.mubr.msk.bf16.gmra.mxu1 %vm297_vm1, %v10533_v63  ;;  %10002 = vmatprep.mubr.msk.bf16.mxu0 %vm297_vm1, %v10534_v0  ;;  %v10565_v63 = vld [vmem:[%s13858_s0 + $0xb8] sm:$0xff]  }
  0xac   :  { %10078 = vmatprep.mubr.msk.bf16.mxu1 %vm297_vm1, %v10536_v1 }
  0xb2   :  { %10003 = vmatmul.mubr.msk.bf16.gmra.mxu0 %vm297_vm1, %v10535_v2 }
  0xb3   :  { %10079 = vmatmul.mubr.msk.bf16.gmra.mxu1 %vm297_vm1, %v10537_v3  ;;  %10006 = vmatprep.mubr.msk.bf16.mxu0 %vm297_vm1, %v10538_v4 }
  0xb4   :  { %10082 = vmatprep.mubr.msk.bf16.mxu1 %vm297_vm1, %v10540_v5 }
  0xba   :  { %10007 = vmatmul.mubr.msk.bf16.gmra.mxu0 %vm297_vm1, %v10539_v6 }
  0xbb   :  { %10083 = vmatmul.mubr.msk.bf16.gmra.mxu1 %vm297_vm1, %v10541_v7  ;;  %10010 = vmatprep.mubr.msk.bf16.mxu0 %vm297_vm1, %v10542_v8 }
  0xbc   :  { %10086 = vmatprep.mubr.msk.bf16.mxu1 %vm297_vm1, %v10544_v9  ;;  %v10564_v9 = vld [vmem:[%s13858_s0 + $0xb8] sm:$0xff]  }
  0xc2   :  { %10011 = vmatmul.mubr.msk.bf16.gmra.mxu0 %vm297_vm1, %v10543_v10 }
  0xc3   :  { %10087 = vmatmul.mubr.msk.bf16.gmra.mxu1 %vm297_vm1, %v10545_v11  ;;  %10014 = vmatprep.mubr.msk.bf16.mxu0 %vm297_vm1, %v10546_v12  ;;  %v10566_v11 = vld [vmem:[%s13858_s0 + $0xc0] sm:$0xff]  }
  0xc4   :  { %10090 = vmatprep.mubr.msk.bf16.mxu1 %vm297_vm1, %v10548_v13  ;;  %v10567_v12 = vld [vmem:[%s13858_s0 + $0xc0] sm:$0xff]  }
  0xca   :  { %v9840_v18 = vpop.f32.mrf.mxu0  ;;  %10015 = vmatmul.mubr.msk.bf16.gmra.mxu0 %vm297_vm1, %v10547_v14 }
  0xcb   :  { %v9916_v19 = vpop.f32.mrf.mxu1  ;;  %10091 = vmatmul.mubr.msk.bf16.gmra.mxu1 %vm297_vm1, %v10549_v15  ;;  %10018 = vmatprep.mubr.msk.bf16.mxu0 %vm297_vm1, %v10550_v16  ;;  %v10569_v15 = vld [vmem:[%s13858_s0 + $0xc8] sm:$0xff]  }
  0xcc   :  { %v11215_v20 = vadd.f32 %v9916_v19, %v9840_v18  ;;  %v444_v21 = vpop.f32.mrf.mxu0  ;;  %10094 = vmatprep.mubr.msk.bf16.mxu1 %vm297_vm1, %v10552_v17 }
  0xcd   :  { %v785_v22 = vpop.f32.mrf.mxu1 }
  0xce   :  { %v11218_v23 = vadd.f32 %v785_v22, %v444_v21  ;;  %v9841_v24 = vpop.f32.mrf.mxu0 }
  0xcf   :  { %v9917_v26 = vpop.f32.mrf.mxu1 }
  0xd0   :  { %v11229_v29 = vadd.f32 %v9917_v26, %v9841_v24  ;;  %v447_v30 = vpop.f32.mrf.mxu0 }
  0xd1   :  { %v788_v32 = vpop.f32.mrf.mxu1 }
  0xd2   :  { %v11234_v33 = vadd.f32 %v788_v32, %v447_v30  ;;  %v9844_v34 = vpop.f32.mrf.mxu0  ;;  %10019 = vmatmul.mubr.msk.bf16.gmra.mxu0 %vm297_vm1, %v10551_v25  ;;  %v10570_v30 = vld [vmem:[%s13858_s0 + $0xd0] sm:$0xff]  }
  0xd3   :  { %v9920_v35 = vpop.f32.mrf.mxu1  ;;  %10095 = vmatmul.mubr.msk.bf16.gmra.mxu1 %vm297_vm1, %v10553_v27  ;;  %10022 = vmatprep.mubr.msk.bf16.mxu0 %vm297_vm1, %v10554_v28  ;;  %v10568_v27 = vld [vmem:[%s13858_s0 + $0xc8] sm:$0xff]  }
  0xd4   :  { %v11239_v36 = vadd.f32 %v9920_v35, %v9844_v34  ;;  %v460_v37 = vpop.f32.mrf.mxu0  ;;  %10098 = vmatprep.mubr.msk.bf16.mxu1 %vm297_vm1, %v10556_v31  ;;  %v10571_v31 = vld [vmem:[%s13858_s0 + $0xd0] sm:$0xff]   ;;  %v10573_v35 = vld [vmem:[%s13858_s0 + $0xd8] sm:$0xff]  }
  0xd5   :  { %v801_v38 = vpop.f32.mrf.mxu1 }
  0xd6   :  { %v11242_v39 = vadd.f32 %v801_v38, %v460_v37  ;;  %v9845_v40 = vpop.f32.mrf.mxu0 }
  0xd7   :  { %v9921_v42 = vpop.f32.mrf.mxu1 }
  0xd8   :  { %v11253_v45 = vadd.f32 %v9921_v42, %v9845_v40  ;;  %v463_v46 = vpop.f32.mrf.mxu0 }
  0xd9   :  { %v804_v48 = vpop.f32.mrf.mxu1 }
  0xda   :  { %v11258_v49 = vadd.f32 %v804_v48, %v463_v46  ;;  %v9848_v50 = vpop.f32.mrf.mxu0  ;;  %10023 = vmatmul.mubr.msk.bf16.gmra.mxu0 %vm297_vm1, %v10555_v41  ;;  %v10572_v48 = vld [vmem:[%s13858_s0 + $0xd8] sm:$0xff]  }
  0xdb   :  { %v9924_v51 = vpop.f32.mrf.mxu1  ;;  %10099 = vmatmul.mubr.msk.bf16.gmra.mxu1 %vm297_vm1, %v10557_v43  ;;  %10026 = vmatprep.mubr.msk.bf16.mxu0 %vm297_vm1, %v10558_v44 }
  0xdc   :  { %v11263_v52 = vadd.f32 %v9924_v51, %v9848_v50  ;;  %v476_v53 = vpop.f32.mrf.mxu0  ;;  %10102 = vmatprep.mubr.msk.bf16.mxu1 %vm297_vm1, %v10561_v47  ;;  %v10574_v51 = vld [vmem:[%s13858_s0 + $0xe0] sm:$0xff]  }
  0xdd   :  { %v817_v54 = vpop.f32.mrf.mxu1 }
  0xde   :  { %v11266_v55 = vadd.f32 %v817_v54, %v476_v53  ;;  %v9849_v56 = vpop.f32.mrf.mxu0  ;;  %v10575_v53 = vld [vmem:[%s13858_s0 + $0xe0] sm:$0xff]  }
  0xdf   :  { %v9925_v58 = vpop.f32.mrf.mxu1 }
  0xe0   :  { %v11277_v61 = vadd.f32 %v9925_v58, %v9849_v56  ;;  %v479_v62 = vpop.f32.mrf.mxu0 }
  0xe1   :  { %v820_v0 = vpop.f32.mrf.mxu1 }
  0xe2   :  { %v11282_v1 = vadd.f32 %v820_v0, %v479_v62  ;;  %v9852_v2 = vpop.f32.mrf.mxu0  ;;  %10027 = vmatmul.mubr.msk.bf16.gmra.mxu0 %vm297_vm1, %v10559_v57  ;;  %v10577_v57 = vld [vmem:[%s13858_s0 + $0xe8] sm:$0xff]  }
  0xe3   :  { %v9928_v3 = vpop.f32.mrf.mxu1  ;;  %10103 = vmatmul.mubr.msk.bf16.gmra.mxu1 %vm297_vm1, %v10562_v59  ;;  %10030 = vmatprep.mubr.msk.bf16.mxu0 %vm297_vm1, %v10563_v60 }
  0xe4   :  { %v11287_v4 = vadd.f32 %v9928_v3, %v9852_v2  ;;  %v492_v5 = vpop.f32.mrf.mxu0  ;;  %10106 = vmatprep.mubr.msk.bf16.mxu1 %vm297_vm1, %v10565_v63 }
  0xe5   :  { %v833_v6 = vpop.f32.mrf.mxu1 }
  0xe6   :  { %v11290_v7 = vadd.f32 %v833_v6, %v492_v5  ;;  %v9853_v8 = vpop.f32.mrf.mxu0  ;;  %v10576_v6 = vld [vmem:[%s13858_s0 + $0xe8] sm:$0xff]  }
  0xe7   :  { %v9929_v10 = vpop.f32.mrf.mxu1 }
  0xe8   :  { %v11301_v13 = vadd.f32 %v9929_v10, %v9853_v8  ;;  %v495_v14 = vpop.f32.mrf.mxu0  ;;  %v10579_v10 = vld [vmem:[%s13858_s0 + $0xf0] sm:$0xff]  }
  0xe9   :  { %v836_v16 = vpop.f32.mrf.mxu1 }
  0xea   :  { %v11306_v17 = vadd.f32 %v836_v16, %v495_v14  ;;  %v9856_v18 = vpop.f32.mrf.mxu0  ;;  %10031 = vmatmul.mubr.msk.bf16.gmra.mxu0 %vm297_vm1, %v10564_v9  ;;  %v10578_v9 = vld [vmem:[%s13858_s0 + $0xf0] sm:$0xff]   ;;  %v10581_v14 = vld [vmem:[%s13858_s0 + $0xf8] sm:$0xff]  }
  0xeb   :  { %v9932_v19 = vpop.f32.mrf.mxu1  ;;  %10107 = vmatmul.mubr.msk.bf16.gmra.mxu1 %vm297_vm1, %v10566_v11  ;;  %10034 = vmatprep.mubr.msk.bf16.mxu0 %vm297_vm1, %v10567_v12 }
  0xec   :  { %v11311_v21 = vadd.f32 %v9932_v19, %v9856_v18  ;;  %v508_v22 = vpop.f32.mrf.mxu0  ;;  %10110 = vmatprep.mubr.msk.bf16.mxu1 %vm297_vm1, %v10569_v15 }
  0xed   :  { %v849_v24 = vpop.f32.mrf.mxu1 }
  0xee   :  { %v11314_v25 = vadd.f32 %v849_v24, %v508_v22  ;;  %v9857_v26 = vpop.f32.mrf.mxu0 }
  0xef   :  { %v9933_v28 = vpop.f32.mrf.mxu1 }
  0xf0   :  { %v11325_v32 = vadd.f32 %v9933_v28, %v9857_v26  ;;  %v511_v34 = vpop.f32.mrf.mxu0 }
  0xf1   :  { %v852_v37 = vpop.f32.mrf.mxu1 }
  0xf2   :  { %v11330_v38 = vadd.f32 %v852_v37, %v511_v34  ;;  %v9860_v40 = vpop.f32.mrf.mxu0  ;;  %10035 = vmatmul.mubr.msk.bf16.gmra.mxu0 %vm297_vm1, %v10568_v27  ;;  %v10582_v34 = vld [vmem:[%s13858_s0 + $0x100] sm:$0xff]  }
  0xf3   :  { %v9936_v41 = vpop.f32.mrf.mxu1  ;;  %10111 = vmatmul.mubr.msk.bf16.gmra.mxu1 %vm297_vm1, %v10570_v30  ;;  %10038 = vmatprep.mubr.msk.bf16.mxu0 %vm297_vm1, %v10571_v31  ;;  %v10580_v30 = vld [vmem:[%s13858_s0 + $0xf8] sm:$0xff]  }
  0xf4   :  { %v11335_v42 = vadd.f32 %v9936_v41, %v9860_v40  ;;  %v524_v43 = vpop.f32.mrf.mxu0  ;;  %10114 = vmatprep.mubr.msk.bf16.mxu1 %vm297_vm1, %v10573_v35  ;;  %v10583_v35 = vld [vmem:[%s13858_s0 + $0x100] sm:$0xff]   ;;  %v10585_v41 = vld [vmem:[%s13858_s0 + $0x108] sm:$0xff]  }
  0xf5   :  { %v865_v44 = vpop.f32.mrf.mxu1 }
  0xf6   :  { %v11338_v46 = vadd.f32 %v865_v44, %v524_v43  ;;  %v9861_v47 = vpop.f32.mrf.mxu0 }
  0xf7   :  { %v9937_v50 = vpop.f32.mrf.mxu1 }
  0xf8   :  { %v11349_v54 = vadd.f32 %v9937_v50, %v9861_v47  ;;  %v527_v56 = vpop.f32.mrf.mxu0 }
  0xf9   :  { %v868_v58 = vpop.f32.mrf.mxu1 }
  0xfa   :  { %v11354_v59 = vadd.f32 %v868_v58, %v527_v56  ;;  %v9864_v60 = vpop.f32.mrf.mxu0  ;;  %10039 = vmatmul.mubr.msk.bf16.gmra.mxu0 %vm297_vm1, %v10572_v48  ;;  %v10584_v58 = vld [vmem:[%s13858_s0 + $0x108] sm:$0xff]  }
  0xfb   :  { %v9940_v62 = vpop.f32.mrf.mxu1  ;;  %10115 = vmatmul.mubr.msk.bf16.gmra.mxu1 %vm297_vm1, %v10574_v51  ;;  %10042 = vmatprep.mubr.msk.bf16.mxu0 %vm297_vm1, %v10575_v53 }
  0xfc   :  { %v11359_v63 = vadd.f32 %v9940_v62, %v9864_v60  ;;  %v540_v0 = vpop.f32.mrf.mxu0  ;;  %10118 = vmatprep.mubr.msk.bf16.mxu1 %vm297_vm1, %v10577_v57  ;;  %v10586_v62 = vld [vmem:[%s13858_s0 + $0x110] sm:$0xff]  }
  0xfd   :  { %v881_v2 = vpop.f32.mrf.mxu1 }
  0xfe   :  { %v11362_v3 = vadd.f32 %v881_v2, %v540_v0  ;;  %v9865_v5 = vpop.f32.mrf.mxu0  ;;  %v10587_v0 = vld [vmem:[%s13858_s0 + $0x110] sm:$0xff]  }
  0xff   :  { %v9941_v8 = vpop.f32.mrf.mxu1 }
 0x100   :  { %v11373_v11 = vadd.f32 %v9941_v8, %v9865_v5  ;;  %v543_v12 = vpop.f32.mrf.mxu0 }
 0x101   :  { %v884_v15 = vpop.f32.mrf.mxu1 }
 0x102   :  { %v11378_v16 = vadd.f32 %v884_v15, %v543_v12  ;;  %v9868_v18 = vpop.f32.mrf.mxu0  ;;  %10043 = vmatmul.mubr.msk.bf16.gmra.mxu0 %vm297_vm1, %v10576_v6  ;;  %v10589_v6 = vld [vmem:[%s13858_s0 + $0x118] sm:$0xff]  }
 0x103   :  { %v9944_v19 = vpop.f32.mrf.mxu1  ;;  %10119 = vmatmul.mubr.msk.bf16.gmra.mxu1 %vm297_vm1, %v10578_v9  ;;  %10046 = vmatprep.mubr.msk.bf16.mxu0 %vm297_vm1, %v10579_v10 }
 0x104   :  { %v11383_v22 = vadd.f32 %v9944_v19, %v9868_v18  ;;  %v556_v24 = vpop.f32.mrf.mxu0  ;;  %10122 = vmatprep.mubr.msk.bf16.mxu1 %vm297_vm1, %v10581_v14 }
 0x105   :  { %v897_v26 = vpop.f32.mrf.mxu1 }
 0x106   :  { %v11386_v27 = vadd.f32 %v897_v26, %v556_v24  ;;  %v9869_v28 = vpop.f32.mrf.mxu0  ;;  %v10588_v24 = vld [vmem:[%s13858_s0 + $0x118] sm:$0xff]  }
 0x107   :  { %v9945_v31 = vpop.f32.mrf.mxu1 }
 0x108   :  { %v11397_v37 = vadd.f32 %v9945_v31, %v9869_v28  ;;  %v559_v40 = vpop.f32.mrf.mxu0  ;;  %v10590_v28 = vld [vmem:[%s13858_s0 + $0x120] sm:$0xff]  }
 0x109   :  { %v900_v43 = vpop.f32.mrf.mxu1 }
 0x10a   :  { %v11402_v44 = vadd.f32 %v900_v43, %v559_v40  ;;  %v9872_v47 = vpop.f32.mrf.mxu0  ;;  %10047 = vmatmul.mubr.msk.bf16.gmra.mxu0 %vm297_vm1, %v10580_v30  ;;  %v10591_v30 = vld [vmem:[%s13858_s0 + $0x120] sm:$0xff]  }
 0x10b   :  { %v9948_v48 = vpop.f32.mrf.mxu1  ;;  %10123 = vmatmul.mubr.msk.bf16.gmra.mxu1 %vm297_vm1, %v10582_v34  ;;  %10050 = vmatprep.mubr.msk.bf16.mxu0 %vm297_vm1, %v10583_v35  ;;  %v10593_v35 = vld [vmem:[%s13858_s0 + $0x128] sm:$0xff]  }
 0x10c   :  { %v11407_v50 = vadd.f32 %v9948_v48, %v9872_v47  ;;  %v572_v51 = vpop.f32.mrf.mxu0  ;;  %10126 = vmatprep.mubr.msk.bf16.mxu1 %vm297_vm1, %v10585_v41 }
 0x10d   :  { %v913_v53 = vpop.f32.mrf.mxu1 }
 0x10e   :  { %v11410_v56 = vadd.f32 %v913_v53, %v572_v51  ;;  %v9873_v57 = vpop.f32.mrf.mxu0 }
 0x10f   :  { %v9949_v60 = vpop.f32.mrf.mxu1 }
 0x110   :  { %v11421_v2 = vadd.f32 %v9949_v60, %v9873_v57  ;;  %v11423_v5 = vpop.f32.mrf.mxu0 }
 0x111   :  { %13867 = vst [vmem:[#allocation8_spill] sm:$0xff] %v11423_v5  ;;  %v11428_v8 = vpop.f32.mrf.mxu1 }
 0x112   :  { %13868 = vst [vmem:[#allocation9_spill] sm:$0xff] %v11428_v8  ;;  %v9876_v9 = vpop.f32.mrf.mxu0  ;;  %10051 = vmatmul.mubr.msk.bf16.gmra.mxu0 %vm297_vm1, %v10584_v58  ;;  %v10592_v58 = vld [vmem:[%s13858_s0 + $0x128] sm:$0xff]  }
 0x113   :  { %v9952_v10 = vpop.f32.mrf.mxu1  ;;  %10127 = vmatmul.mubr.msk.bf16.gmra.mxu1 %vm297_vm1, %v10586_v62  ;;  %10054 = vmatprep.mubr.msk.bf16.mxu0 %vm297_vm1, %v10587_v0  ;;  %v10594_v62 = vld [vmem:[%s13858_s0 + $0x130] sm:$0xff]   ;;  %v10595_v0 = vld [vmem:[%s13858_s0 + $0x20] sm:$0xff]  }
 0x114   :  { %v11433_v12 = vadd.f32 %v9952_v10, %v9876_v9  ;;  %v588_v14 = vpop.f32.mrf.mxu0  ;;  %10130 = vmatprep.mubr.msk.bf16.mxu1 %vm297_vm1, %v10589_v6 }
 0x115   :  { %v929_v15 = vpop.f32.mrf.mxu1 }
 0x116   :  { %v11436_v18 = vadd.f32 %v929_v15, %v588_v14  ;;  %v9877_v19 = vpop.f32.mrf.mxu0 }
 0x117   :  { %v9953_v26 = vpop.f32.mrf.mxu1 }
 0x118   :  { %v11447_v31 = vadd.f32 %v9953_v26, %v9877_v19  ;;  %v11449_v34 = vpop.f32.mrf.mxu0 }
 0x119   :  { %13869 = vst [vmem:[#allocation10_spill] sm:$0xff] %v11449_v34  ;;  %v11454_v40 = vpop.f32.mrf.mxu1 }
 0x11a   :  { %13870 = vst [vmem:[#allocation11_spill] sm:$0xff] %v11454_v40  ;;  %v9880_v41 = vpop.f32.mrf.mxu0  ;;  %10055 = vmatmul.mubr.msk.bf16.gmra.mxu0 %vm297_vm1, %v10588_v24 }
 0x11b   :  { %v9956_v43 = vpop.f32.mrf.mxu1  ;;  %10131 = vmatmul.mubr.msk.bf16.gmra.mxu1 %vm297_vm1, %v10590_v28  ;;  %10058 = vmatprep.mubr.msk.bf16.mxu0 %vm297_vm1, %v10591_v30 }
 0x11c   :  { %v11459_v47 = vadd.f32 %v9956_v43, %v9880_v41  ;;  %v604_v48 = vpop.f32.mrf.mxu0  ;;  %10134 = vmatprep.mubr.msk.bf16.mxu1 %vm297_vm1, %v10593_v35  ;;  %v10596_v35 = vld [vmem:[%s13858_s0 + $0x28] sm:$0xff]   ;;  %v10597_v43 = vld [vmem:[%s13858_s0 + $0x30] sm:$0xff]  }
 0x11d   :  { %v945_v51 = vpop.f32.mrf.mxu1 }
 0x11e   :  { %v11462_v53 = vadd.f32 %v945_v51, %v604_v48  ;;  %v9881_v57 = vpop.f32.mrf.mxu0 }
 0x11f   :  { %v9957_v60 = vpop.f32.mrf.mxu1 }
 0x120   :  { %v11473_v6 = vadd.f32 %v9957_v60, %v9881_v57  ;;  %v11475_v9 = vpop.f32.mrf.mxu0 }
 0x121   :  { %13871 = vst [vmem:[#allocation12_spill] sm:$0xff] %v11475_v9  ;;  %v11477_v10 = vpop.f32.mrf.mxu1 }
 0x122   :  { %13872 = vst [vmem:[#allocation13_spill] sm:$0xff] %v11477_v10  ;;  %v9884_v14 = vpop.f32.mrf.mxu0  ;;  %10059 = vmatmul.mubr.msk.bf16.gmra.mxu0 %vm297_vm1, %v10592_v58 }
 0x123   :  { %v9960_v15 = vpop.f32.mrf.mxu1  ;;  %10135 = vmatmul.mubr.msk.bf16.gmra.mxu1 %vm297_vm1, %v10594_v62  ;;  %10142 = vmatprep.mubr.msk.bf16.mxu0 %vm297_vm1, %v10595_v0 }
 0x124   :  { %v11482_v19 = vadd.f32 %v9960_v15, %v9884_v14  ;;  %v620_v24 = vpop.f32.mrf.mxu0 }
 0x125   :  { %v961_v26 = vpop.f32.mrf.mxu1 }
 0x126   :  { %v11484_v28 = vadd.f32 %v961_v26, %v620_v24  ;;  %v9885_v30 = vpop.f32.mrf.mxu0  ;;  %v10598_v26 = vld [vmem:[%s13858_s0 + $0x38] sm:$0xff]  }
 0x127   :  { %v9961_v41 = vpop.f32.mrf.mxu1 }
 0x128   :  { %v11492_v48 = vadd.f32 %v9961_v41, %v9885_v30  ;;  %v11494_v51 = vpop.f32.mrf.mxu0  ;;  %v10599_v41 = vld [vmem:[%s13858_s0 + $0x40] sm:$0xff]  }
 0x129   :  { %13873 = vst [vmem:[#allocation14_spill] sm:$0xff] %v11494_v51  ;;  %v11496_v57 = vpop.f32.mrf.mxu1 }
 0x12a   :  { %13874 = vst [vmem:[#allocation15_spill] sm:$0xff] %v11496_v57  ;;  %v9888_v58 = vpop.f32.mrf.mxu0  ;;  %10143 = vmatmul.mubr.msk.bf16.vlgmr.msra.gmra.mxu0 %vm297_vm1, %v10596_v35 }
 0x12b   :  { %v9964_v60 = vpop.f32.mrf.mxu1  ;;  %10146 = vmatprep.mubr.msk.bf16.mxu0 %vm297_vm1, %v10597_v43 }
 0x12c   :  { %v11500_v62 = vadd.f32 %v9964_v60, %v9888_v58  ;;  %v636_v0 = vpop.f32.mrf.mxu0 }
 0x12d   :  { %v977_v14 = vpop.f32.mrf.mxu1 }
 0x12e   :  { %v11502_v15 = vadd.f32 %v977_v14, %v636_v0  ;;  %v9889_v24 = vpop.f32.mrf.mxu0 }
 0x12f   :  { %v9965_v30 = vpop.f32.mrf.mxu1 }
 0x130   :  { %v11510_v35 = vadd.f32 %v9965_v30, %v9889_v24  ;;  %v11512_v57 = vpop.f32.mrf.mxu0  ;;  %v10600_v24 = vld [vmem:[%s13858_s0 + $0x48] sm:$0xff]  }
 0x131   :  { %13875 = vst [vmem:[#allocation16_spill] sm:$0xff] %v11512_v57  ;;  %v11514_v43 = vpop.f32.mrf.mxu1 }
 0x132   :  { %13876 = vst [vmem:[#allocation17_spill] sm:$0xff] %v11514_v43  ;;  %v9892_v58 = vpop.f32.mrf.mxu0  ;;  %10147 = vmatmul.mubr.msk.bf16.gmra.mxu0 %vm297_vm1, %v10598_v26  ;;  %v10601_v43 = vld [vmem:[%s13858_s0 + $0x50] sm:$0xff]  }
 0x133   :  { %v9968_v60 = vpop.f32.mrf.mxu1  ;;  %10150 = vmatprep.mubr.msk.bf16.mxu0 %vm297_vm1, %v10599_v41 }
 0x134   :  { %v11518_v0 = vadd.f32 %v9968_v60, %v9892_v58  ;;  %v652_v14 = vpop.f32.mrf.mxu0 }
 0x135   :  { %v993_v51 = vpop.f32.mrf.mxu1 }
 0x136   :  { %v11520_v10 = vadd.f32 %v993_v51, %v652_v14  ;;  %v9893_v9 = vpop.f32.mrf.mxu0 }
 0x137   :  { %v9969_v30 = vpop.f32.mrf.mxu1 }
 0x138   :  { %v11528_v26 = vadd.f32 %v9969_v30, %v9893_v9  ;;  %v11530_v57 = vpop.f32.mrf.mxu0  ;;  %v10602_v9 = vld [vmem:[%s13858_s0 + $0x58] sm:$0xff]  }
 0x139   :  { %13877 = vst [vmem:[#allocation18_spill] sm:$0xff] %v11530_v57  ;;  %v11532_v41 = vpop.f32.mrf.mxu1 }
 0x13a   :  { %13878 = vst [vmem:[#allocation19_spill] sm:$0xff] %v11532_v41  ;;  %v9896_v58 = vpop.f32.mrf.mxu0  ;;  %10151 = vmatmul.mubr.msk.bf16.gmra.mxu0 %vm297_vm1, %v10600_v24  ;;  %v10603_v41 = vld [vmem:[%s13858_s0 + $0x60] sm:$0xff]  }
 0x13b   :  { %v9972_v51 = vpop.f32.mrf.mxu1  ;;  %10154 = vmatprep.mubr.msk.bf16.mxu0 %vm297_vm1, %v10601_v43 }
 0x13c   :  { %v11536_v60 = vadd.f32 %v9972_v51, %v9896_v58  ;;  %v668_v14 = vpop.f32.mrf.mxu0 }
 0x13d   :  { %v1009_v40 = vpop.f32.mrf.mxu1 }
 0x13e   :  { %13879 = vst [vmem:[#allocation20_spill] sm:$0xff] %v11536_v60  ;;  %v11538_v34 = vadd.f32 %v1009_v40, %v668_v14  ;;  %v9897_v8 = vpop.f32.mrf.mxu0 }
 0x13f   :  { %v9973_v30 = vpop.f32.mrf.mxu1 }
 0x140   :  { %13880 = vst [vmem:[#allocation21_spill] sm:$0xff] %v11538_v34  ;;  %v11546_v24 = vadd.f32 %v9973_v30, %v9897_v8  ;;  %v11548_v57 = vpop.f32.mrf.mxu0  ;;  %v10604_v8 = vld [vmem:[%s13858_s0 + $0x68] sm:$0xff]  }
 0x141   :  { %13882 = vst [vmem:[#allocation23_spill] sm:$0xff] %v11548_v57  ;;  %v11550_v43 = vpop.f32.mrf.mxu1 }
 0x142   :  { %13881 = vst [vmem:[#allocation22_spill] sm:$0xff] %v11546_v24  ;;  %13883 = vst [vmem:[#allocation24_spill] sm:$0xff] %v11550_v43  ;;  %v9900_v58 = vpop.f32.mrf.mxu0  ;;  %10155 = vmatmul.mubr.msk.bf16.gmra.mxu0 %vm297_vm1, %v10602_v9  ;;  %v10605_v43 = vld [vmem:[%s13858_s0 + $0x70] sm:$0xff]  }
 0x143   :  { %v9976_v40 = vpop.f32.mrf.mxu1  ;;  %10158 = vmatprep.mubr.msk.bf16.mxu0 %vm297_vm1, %v10603_v41 }
 0x144   :  { %v11554_v51 = vadd.f32 %v9976_v40, %v9900_v58  ;;  %v684_v14 = vpop.f32.mrf.mxu0 }
 0x145   :  { %v1025_v5 = vpop.f32.mrf.mxu1 }
 0x146   :  { %13884 = vst [vmem:[#allocation25_spill] sm:$0xff] %v11554_v51  ;;  %v11556_v34 = vadd.f32 %v1025_v5, %v684_v14  ;;  %v9901_v60 = vpop.f32.mrf.mxu0 }
 0x147   :  { %v9977_v30 = vpop.f32.mrf.mxu1 }
 0x148   :  { %13885 = vst [vmem:[#allocation26_spill] sm:$0xff] %v11556_v34  ;;  %v11564_v9 = vadd.f32 %v9977_v30, %v9901_v60  ;;  %v11566_v57 = vpop.f32.mrf.mxu0  ;;  %v10606_v60 = vld [vmem:[%s13858_s0 + $0x78] sm:$0xff]  }
 0x149   :  { %13887 = vst [vmem:[#allocation28_spill] sm:$0xff] %v11566_v57  ;;  %v11568_v41 = vpop.f32.mrf.mxu1 }
 0x14a   :  { %13886 = vst [vmem:[#allocation27_spill] sm:$0xff] %v11564_v9  ;;  %13888 = vst [vmem:[#allocation29_spill] sm:$0xff] %v11568_v41  ;;  %v9904_v58 = vpop.f32.mrf.mxu0  ;;  %10159 = vmatmul.mubr.msk.bf16.gmra.mxu0 %vm297_vm1, %v10604_v8  ;;  %v10607_v41 = vld [vmem:[%s13858_s0 + $0x80] sm:$0xff]  }
 0x14b   :  { %v9980_v5 = vpop.f32.mrf.mxu1  ;;  %10162 = vmatprep.mubr.msk.bf16.mxu0 %vm297_vm1, %v10605_v43 }
 0x14c   :  { %v11572_v40 = vadd.f32 %v9980_v5, %v9904_v58  ;;  %v700_v14 = vpop.f32.mrf.mxu0 }
 0x14d   :  { %v1041_v34 = vpop.f32.mrf.mxu1 }
 0x14e   :  { %13889 = vst [vmem:[#allocation30_spill] sm:$0xff] %v11572_v40  ;;  %v11574_v51 = vadd.f32 %v1041_v34, %v700_v14  ;;  %v9905_v24 = vpop.f32.mrf.mxu0 }
 0x14f   :  { %v9981_v30 = vpop.f32.mrf.mxu1 }
 0x150   :  { %13890 = vst [vmem:[#allocation31_spill] sm:$0xff] %v11574_v51  ;;  %v11582_v8 = vadd.f32 %v9981_v30, %v9905_v24  ;;  %v11584_v57 = vpop.f32.mrf.mxu0  ;;  %v10608_v24 = vld [vmem:[%s13858_s0 + $0x88] sm:$0xff]  }
 0x151   :  { %13891 = vst [vmem:[#allocation32_spill] sm:$0xff] %v11584_v57  ;;  %v11586_v43 = vpop.f32.mrf.mxu1 }
 0x152   :  { %13892 = vst [vmem:[#allocation33_spill] sm:$0xff] %v11586_v43  ;;  %v9908_v58 = vpop.f32.mrf.mxu0  ;;  %10163 = vmatmul.mubr.msk.bf16.gmra.mxu0 %vm297_vm1, %v10606_v60  ;;  %v10609_v43 = vld [vmem:[%s13858_s0 + $0x90] sm:$0xff]  }
 0x153   :  { %v9984_v34 = vpop.f32.mrf.mxu1  ;;  %10166 = vmatprep.mubr.msk.bf16.mxu0 %vm297_vm1, %v10607_v41 }
 0x154   :  { %v11590_v5 = vadd.f32 %v9984_v34, %v9908_v58  ;;  %v716_v14 = vpop.f32.mrf.mxu0 }
 0x155   :  { %v1057_v51 = vpop.f32.mrf.mxu1 }
 0x156   :  { %v11592_v40 = vadd.f32 %v1057_v51, %v716_v14  ;;  %v9909_v9 = vpop.f32.mrf.mxu0 }
 0x157   :  { %v9985_v30 = vpop.f32.mrf.mxu1 }
 0x158   :  { %13893 = vst [vmem:[#allocation34_spill] sm:$0xff] %v11592_v40  ;;  %v11600_v60 = vadd.f32 %v9985_v30, %v9909_v9  ;;  %v11602_v57 = vpop.f32.mrf.mxu0 }
 0x159   :  { %13894 = vst [vmem:[#allocation35_spill] sm:$0xff] %v11602_v57  ;;  %v11604_v41 = vpop.f32.mrf.mxu1 }
 0x15a   :  { %13895 = vst [vmem:[#allocation36_spill] sm:$0xff] %v11604_v41  ;;  %v9992_v58 = vpop.f32.mrf.mxu0  ;;  %10167 = vmatmul.mubr.msk.bf16.gmra.mxu0 %vm297_vm1, %v10608_v24  ;;  %v10610_v41 = vld [vmem:[%s13858_s0 + $0x98] sm:$0xff]  }
 0x15b   :  { %v11608_v51 = vadd.f32 %v9992_v58, %v11215_v20  ;;  %v11610_v34 = vpop.f32.mrf.mxu1  ;;  %10170 = vmatprep.mubr.msk.bf16.mxu0 %vm297_vm1, %v10609_v43  ;;  %v10611_v43 = vld [vmem:[%s13858_s0 + $0xa0] sm:$0xff]  }
 0x15c   :  { %v1482_v14 = vpop.f32.mrf.mxu0 }
 0x15d   :  { %v11614_v40 = vadd.f32 %v1482_v14, %v11218_v23  ;;  %v11616_v9 = vpop.f32.mrf.mxu1 }
 0x15e   :  { %13896 = vst [vmem:[#allocation37_spill] sm:$0xff] %v11616_v9  ;;  %v9993_v30 = vpop.f32.mrf.mxu0 }
 0x15f   :  { %v11622_v24 = vadd.f32 %v9993_v30, %v11229_v29  ;;  %v11624_v20 = vpop.f32.mrf.mxu1 }
 0x160   :  { %13898 = vst [vmem:[#allocation39_spill] sm:$0xff] %v11624_v20  ;;  %v1485_v58 = vpop.f32.mrf.mxu0 }
 0x161   :  { %13897 = vst [vmem:[#allocation38_spill] sm:$0xff] %v11622_v24  ;;  %v11630_v23 = vadd.f32 %v1485_v58, %v11234_v33  ;;  %v11632_v14 = vpop.f32.mrf.mxu1  ;;  %v10612_v33 = vld [vmem:[%s13858_s0 + $0xa8] sm:$0xff]  }
 0x162   :  { %v9996_v57 = vpop.f32.mrf.mxu0  ;;  %10171 = vmatmul.mubr.msk.bf16.gmra.mxu0 %vm297_vm1, %v10610_v41 }
 0x163   :  { %v11636_v9 = vadd.f32 %v9996_v57, %v11239_v36  ;;  %v11638_v29 = vpop.f32.mrf.mxu1  ;;  %10174 = vmatprep.mubr.msk.bf16.mxu0 %vm297_vm1, %v10611_v43  ;;  %v10613_v36 = vld [vmem:[%s13858_s0 + $0xb0] sm:$0xff]  }
 0x164   :  { %v1498_v30 = vpop.f32.mrf.mxu0 }
 0x165   :  { %v11642_v20 = vadd.f32 %v1498_v30, %v11242_v39  ;;  %v11650_v41 = vpop.f32.mrf.mxu1 }
 0x166   :  { %v9997_v24 = vpop.f32.mrf.mxu0 }
 0x167   :  { %13899 = vst [vmem:[#allocation40_spill] sm:$0xff] %v11642_v20  ;;  %v11648_v58 = vadd.f32 %v9997_v24, %v11253_v45  ;;  %v11659_v30 = vpop.f32.mrf.mxu1 }
 0x168   :  { %v1501_v57 = vpop.f32.mrf.mxu0 }
 0x169   :  { %13900 = vst [vmem:[#allocation41_spill] sm:$0xff] %v11648_v58  ;;  %v11656_v43 = vadd.f32 %v1501_v57, %v11258_v49  ;;  %v10614_v49 = vld [vmem:[%s13858_s0 + $0xb8] sm:$0xff]   ;;  %v11671_v57 = vpop.f32.mrf.mxu1 }
 0x16a   :  { %v10000_v39 = vpop.f32.mrf.mxu0  ;;  %10175 = vmatmul.mubr.msk.bf16.gmra.mxu0 %vm297_vm1, %v10612_v33 }
 0x16b   :  { %v11662_v20 = vadd.f32 %v10000_v39, %v11263_v52  ;;  %10178 = vmatprep.mubr.msk.bf16.mxu0 %vm297_vm1, %v10613_v36  ;;  %v10615_v52 = vld [vmem:[%s13858_s0 + $0xc0] sm:$0xff]  }
 0x16c   :  { %v1514_v45 = vpop.f32.mrf.mxu0 }
 0x16d   :  { %v11666_v24 = vadd.f32 %v1514_v45, %v11266_v55  ;;  %v11683_v45 = vpop.f32.mrf.mxu1 }
 0x16e   :  { %v10001_v58 = vpop.f32.mrf.mxu0 }
 0x16f   :  { %13901 = vst [vmem:[#allocation42_spill] sm:$0xff] %v11666_v24  ;;  %v11674_v33 = vadd.f32 %v10001_v58, %v11277_v61 }
 0x170   :  { %v1517_v39 = vpop.f32.mrf.mxu0 }
 0x171   :  { %13902 = vst [vmem:[#allocation43_spill] sm:$0xff] %v11674_v33  ;;  %v11680_v36 = vadd.f32 %v1517_v39, %v11282_v1  ;;  %v10616_v1 = vld [vmem:[%s13858_s0 + $0xc8] sm:$0xff]   ;;  %v11695_v39 = vpop.f32.mrf.mxu1 }
 0x172   :  { %v10004_v55 = vpop.f32.mrf.mxu0  ;;  %10179 = vmatmul.mubr.msk.bf16.gmra.mxu0 %vm297_vm1, %v10614_v49 }
 0x173   :  { %v11686_v24 = vadd.f32 %v10004_v55, %v11287_v4  ;;  %10182 = vmatprep.mubr.msk.bf16.mxu0 %vm297_vm1, %v10615_v52  ;;  %v10617_v4 = vld [vmem:[%s13858_s0 + $0xd0] sm:$0xff]  }
 0x174   :  { %v1530_v61 = vpop.f32.mrf.mxu0 }
 0x175   :  { %v11690_v58 = vadd.f32 %v1530_v61, %v11290_v7  ;;  %v11707_v61 = vpop.f32.mrf.mxu1 }
 0x176   :  { %v10005_v33 = vpop.f32.mrf.mxu0 }
 0x177   :  { %13903 = vst [vmem:[#allocation44_spill] sm:$0xff] %v11690_v58  ;;  %v11698_v49 = vadd.f32 %v10005_v33, %v11301_v13 }
 0x178   :  { %v1533_v55 = vpop.f32.mrf.mxu0 }
 0x179   :  { %13904 = vst [vmem:[#allocation45_spill] sm:$0xff] %v11698_v49  ;;  %v11704_v52 = vadd.f32 %v1533_v55, %v11306_v17  ;;  %v10618_v17 = vld [vmem:[%s13858_s0 + $0xd8] sm:$0xff]   ;;  %v11719_v55 = vpop.f32.mrf.mxu1 }
 0x17a   :  { %v10008_v7 = vpop.f32.mrf.mxu0  ;;  %10183 = vmatmul.mubr.msk.bf16.gmra.mxu0 %vm297_vm1, %v10616_v1 }
 0x17b   :  { %v11710_v58 = vadd.f32 %v10008_v7, %v11311_v21  ;;  %10186 = vmatprep.mubr.msk.bf16.mxu0 %vm297_vm1, %v10617_v4  ;;  %v10619_v21 = vld [vmem:[%s13858_s0 + $0xe0] sm:$0xff]  }
 0x17c   :  { %v1546_v13 = vpop.f32.mrf.mxu0 }
 0x17d   :  { %v11714_v33 = vadd.f32 %v1546_v13, %v11314_v25  ;;  %v11731_v13 = vpop.f32.mrf.mxu1 }
 0x17e   :  { %v10009_v49 = vpop.f32.mrf.mxu0 }
 0x17f   :  { %13905 = vst [vmem:[#allocation46_spill] sm:$0xff] %v11714_v33  ;;  %v11722_v1 = vadd.f32 %v10009_v49, %v11325_v32 }
 0x180   :  { %v1549_v7 = vpop.f32.mrf.mxu0 }
 0x181   :  { %13906 = vst [vmem:[#allocation47_spill] sm:$0xff] %v11722_v1  ;;  %v11728_v4 = vadd.f32 %v1549_v7, %v11330_v38  ;;  %v10620_v38 = vld [vmem:[%s13858_s0 + $0xe8] sm:$0xff]   ;;  %v11743_v7 = vpop.f32.mrf.mxu1 }
 0x182   :  { %v10012_v25 = vpop.f32.mrf.mxu0  ;;  %10187 = vmatmul.mubr.msk.bf16.gmra.mxu0 %vm297_vm1, %v10618_v17 }
 0x183   :  { %v11734_v33 = vadd.f32 %v10012_v25, %v11335_v42  ;;  %10190 = vmatprep.mubr.msk.bf16.mxu0 %vm297_vm1, %v10619_v21  ;;  %v10621_v42 = vld [vmem:[%s13858_s0 + $0xf0] sm:$0xff]  }
 0x184   :  { %v1562_v32 = vpop.f32.mrf.mxu0 }
 0x185   :  { %v11738_v49 = vadd.f32 %v1562_v32, %v11338_v46  ;;  %v11755_v32 = vpop.f32.mrf.mxu1 }
 0x186   :  { %v10013_v1 = vpop.f32.mrf.mxu0 }
 0x187   :  { %13907 = vst [vmem:[#allocation48_spill] sm:$0xff] %v11738_v49  ;;  %v11746_v17 = vadd.f32 %v10013_v1, %v11349_v54 }
 0x188   :  { %v1565_v25 = vpop.f32.mrf.mxu0 }
 0x189   :  { %13908 = vst [vmem:[#allocation49_spill] sm:$0xff] %v11746_v17  ;;  %v11752_v21 = vadd.f32 %v1565_v25, %v11354_v59  ;;  %v10622_v59 = vld [vmem:[%s13858_s0 + $0xf8] sm:$0xff]   ;;  %v11767_v25 = vpop.f32.mrf.mxu1 }
 0x18a   :  { %v10016_v46 = vpop.f32.mrf.mxu0  ;;  %10191 = vmatmul.mubr.msk.bf16.gmra.mxu0 %vm297_vm1, %v10620_v38 }
 0x18b   :  { %v11758_v49 = vadd.f32 %v10016_v46, %v11359_v63  ;;  %10194 = vmatprep.mubr.msk.bf16.mxu0 %vm297_vm1, %v10621_v42  ;;  %v10623_v63 = vld [vmem:[%s13858_s0 + $0x100] sm:$0xff]  }
 0x18c   :  { %v1578_v54 = vpop.f32.mrf.mxu0 }
 0x18d   :  { %v11762_v1 = vadd.f32 %v1578_v54, %v11362_v3  ;;  %v11779_v54 = vpop.f32.mrf.mxu1 }
 0x18e   :  { %v10017_v17 = vpop.f32.mrf.mxu0 }
 0x18f   :  { %13909 = vst [vmem:[#allocation50_spill] sm:$0xff] %v11762_v1  ;;  %v11770_v38 = vadd.f32 %v10017_v17, %v11373_v11 }
 0x190   :  { %v1581_v46 = vpop.f32.mrf.mxu0 }
 0x191   :  { %13910 = vst [vmem:[#allocation51_spill] sm:$0xff] %v11770_v38  ;;  %v11776_v42 = vadd.f32 %v1581_v46, %v11378_v16  ;;  %v10624_v16 = vld [vmem:[%s13858_s0 + $0x108] sm:$0xff]   ;;  %v11791_v46 = vpop.f32.mrf.mxu1 }
 0x192   :  { %v10020_v3 = vpop.f32.mrf.mxu0  ;;  %10195 = vmatmul.mubr.msk.bf16.gmra.mxu0 %vm297_vm1, %v10622_v59 }
 0x193   :  { %v11782_v1 = vadd.f32 %v10020_v3, %v11383_v22  ;;  %10198 = vmatprep.mubr.msk.bf16.mxu0 %vm297_vm1, %v10623_v63  ;;  %v10625_v22 = vld [vmem:[%s13858_s0 + $0x110] sm:$0xff]   ;;  %v10823_v63 = vmov 0   ;;  %v11827_v3 = vpop.f32.mrf.mxu1 }
 0x194   :  { %v1594_v11 = vpop.f32.mrf.mxu0  ;;  %4009 = vst.msk [vmem:[#allocation2 + $0x8] sm:$0xf] %vm4006_vm2, %v10823_v63  ;;  %4007 = vst.msk [vmem:[#allocation2] sm:$0xf] %vm4006_vm2, %v10823_v63 }
 0x195   :  { %v11786_v17 = vadd.f32 %v1594_v11, %v11386_v27  ;;  %4008 = vst.msk [vmem:[#allocation2 + $0x4] sm:$0xf] %vm4006_vm2, %v10823_v63  ;;  %4010 = vst.msk [vmem:[#allocation2 + $0xc] sm:$0xf] %vm4006_vm2, %v10823_v63 }
 0x196   :  { %v10021_v38 = vpop.f32.mrf.mxu0  ;;  %4011 = vst.msk [vmem:[#allocation2 + $0x10] sm:$0xf] %vm4006_vm2, %v10823_v63  ;;  %4012 = vst.msk [vmem:[#allocation2 + $0x14] sm:$0xf] %vm4006_vm2, %v10823_v63 }
 0x197   :  { %13911 = vst [vmem:[#allocation52_spill] sm:$0xff] %v11786_v17  ;;  %v11794_v59 = vadd.f32 %v10021_v38, %v11397_v37  ;;  %4013 = vst.msk [vmem:[#allocation2 + $0x18] sm:$0xf] %vm4006_vm2, %v10823_v63 }
 0x198   :  { %4014 = vst.msk [vmem:[#allocation2 + $0x1c] sm:$0xf] %vm4006_vm2, %v10823_v63  ;;  %4015 = vst.msk [vmem:[#allocation2 + $0x20] sm:$0xf] %vm4006_vm2, %v10823_v63  ;;  %v1597_v27 = vpop.f32.mrf.mxu0 }
 0x199   :  { %13912 = vst [vmem:[#allocation53_spill] sm:$0xff] %v11794_v59  ;;  %4016 = vst.msk [vmem:[#allocation2 + $0x24] sm:$0xf] %vm4006_vm2, %v10823_v63  ;;  %v11824_v37 = vadd.f32 %v1597_v27, %v11402_v44  ;;  %v10627_v44 = vld [vmem:[%s13858_s0 + $0x120] sm:$0xff]   ;;  %v11842_v27 = vpop.f32.mrf.mxu1 }
 0x19a   :  { %4017 = vst.msk [vmem:[#allocation2 + $0x28] sm:$0xf] %vm4006_vm2, %v10823_v63  ;;  %4018 = vst.msk [vmem:[#allocation2 + $0x2c] sm:$0xf] %vm4006_vm2, %v10823_v63  ;;  %v10024_v38 = vpop.f32.mrf.mxu0  ;;  %10199 = vmatmul.mubr.msk.bf16.gmra.mxu0 %vm297_vm1, %v10624_v16 }
 0x19b   :  { %4019 = vst.msk [vmem:[#allocation2 + $0x30] sm:$0xf] %vm4006_vm2, %v10823_v63  ;;  %4020 = vst.msk [vmem:[#allocation2 + $0x34] sm:$0xf] %vm4006_vm2, %v10823_v63  ;;  %v11830_v11 = vadd.f32 %v10024_v38, %v11407_v50  ;;  %10202 = vmatprep.mubr.msk.bf16.mxu0 %vm297_vm1, %v10625_v22 }
 0x19c   :  { %4021 = vst.msk [vmem:[#allocation2 + $0x38] sm:$0xf] %vm4006_vm2, %v10823_v63  ;;  %4022 = vst.msk [vmem:[#allocation2 + $0x3c] sm:$0xf] %vm4006_vm2, %v10823_v63  ;;  %v1610_v59 = vpop.f32.mrf.mxu0 }
 0x19d   :  { %4023 = vst.msk [vmem:[#allocation2 + $0x40] sm:$0xf] %vm4006_vm2, %v10823_v63  ;;  %4024 = vst.msk [vmem:[#allocation2 + $0x44] sm:$0xf] %vm4006_vm2, %v10823_v63  ;;  %v11834_v17 = vadd.f32 %v1610_v59, %v11410_v56  ;;  %v11850_v56 = vpop.f32.mrf.mxu1 }
 0x19e   :  { %4025 = vst.msk [vmem:[#allocation2 + $0x48] sm:$0xf] %vm4006_vm2, %v10823_v63  ;;  %4026 = vst.msk [vmem:[#allocation2 + $0x4c] sm:$0xf] %vm4006_vm2, %v10823_v63  ;;  %v10025_v16 = vpop.f32.mrf.mxu0 }
 0x19f   :  { %4027 = vst.msk [vmem:[#allocation2 + $0x50] sm:$0xf] %vm4006_vm2, %v10823_v63  ;;  %4028 = vst.msk [vmem:[#allocation2 + $0x54] sm:$0xf] %vm4006_vm2, %v10823_v63  ;;  %v11845_v50 = vadd.f32 %v10025_v16, %v11421_v2  ;;  %v10628_v2 = vld [vmem:[%s13858_s0 + $0x128] sm:$0xff]   ;;  %v11862_v16 = vpop.f32.mrf.mxu1 }
 0x1a0   :  { %4029 = vst.msk [vmem:[#allocation2 + $0x58] sm:$0xf] %vm4006_vm2, %v10823_v63  ;;  %4030 = vst.msk [vmem:[#allocation2 + $0x5c] sm:$0xf] %vm4006_vm2, %v10823_v63  ;;  %v11847_v38 = vpop.f32.mrf.mxu0  ;;  %vm6390_vm2 = vcmask 516096  }
 0x1a1   :  { %6326 = vst [vmem:[#allocation3] sm:$0xff] %v10823_v63  ;;  %6328 = vst [vmem:[#allocation3 + $0xc] sm:$0xff] %v10823_v63 }
 0x1a2   :  { %6330 = vst [vmem:[#allocation3 + $0x18] sm:$0xff] %v10823_v63  ;;  %6336 = vst [vmem:[#allocation3 + $0x3c] sm:$0xff] %v10823_v63  ;;  %v10028_v22 = vpop.f32.mrf.mxu0 }
 0x1a3   :  { %6338 = vst [vmem:[#allocation3 + $0x48] sm:$0xff] %v10823_v63  ;;  %6340 = vst [vmem:[#allocation3 + $0x54] sm:$0xff] %v10823_v63  ;;  %v10626_v63 = vld [vmem:[%s13858_s0 + $0x118] sm:$0xff]   ;;  %v11853_v59 = vadd.f32 %v10028_v22, %v11433_v12  ;;  %v10629_v12 = vld [vmem:[%s13858_s0 + $0x130] sm:$0xff]  }
 0x1a4   :  { %13913 = vst [vmem:[#allocation54_spill] sm:$0xff] %v11824_v37  ;;  %13914 = vst [vmem:[#allocation55_spill] sm:$0xff] %v11830_v11  ;;  %10203 = vmatmul.mubr.msk.bf16.gmra.mxu0 %vm297_vm1, %v10626_v63 }
 0x1a5   :  { %13915 = vst [vmem:[#allocation56_spill] sm:$0xff] %v11834_v17  ;;  %13916 = vst [vmem:[#allocation57_spill] sm:$0xff] %v11845_v50  ;;  %10206 = vmatprep.mubr.msk.bf16.mxu0 %vm297_vm1, %v10627_v44  ;;  %v1626_v17 = vpop.f32.mrf.mxu0 }
 0x1a6   :  { %13917 = vst [vmem:[#allocation58_spill] sm:$0xff] %v11847_v38  ;;  %13918 = vst [vmem:[#allocation59_spill] sm:$0xff] %v11853_v59  ;;  %v11857_v11 = vadd.f32 %v1626_v17, %v11436_v18  ;;  %v11873_v18 = vpop.f32.mrf.mxu1 }
 0x1a7   :  { %v10029_v37 = vpop.f32.mrf.mxu0 }
 0x1a8   :  { %13919 = vst [vmem:[#allocation60_spill] sm:$0xff] %v11857_v11  ;;  %v11865_v63 = vadd.f32 %v10029_v37, %v11447_v31 }
 0x1a9   :  { %v11870_v22 = vpop.f32.mrf.mxu0 }
 0x1aa   :  { %13920 = vst [vmem:[#allocation61_spill] sm:$0xff] %v11865_v63  ;;  %13921 = vst [vmem:[#allocation62_spill] sm:$0xff] %v11870_v22  ;;  %v10630_v63 = vld [vmem:[%s13858_s0 + $0x138] sm:$0xff]   ;;  %v11885_v22 = vpop.f32.mrf.mxu1 }
 0x1ab   :  { %v10032_v44 = vpop.f32.mrf.mxu0 }
 0x1ac   :  { %10207 = vmatmul.mubr.msk.bf16.gmra.mxu0 %vm297_vm1, %v10628_v2  ;;  %v11876_v17 = vadd.f32 %v10032_v44, %v11459_v47 }
 0x1ad   :  { %10210 = vmatprep.mubr.msk.bf16.mxu0 %vm297_vm1, %v10629_v12  ;;  %v1642_v11 = vpop.f32.mrf.mxu0  ;;  %v11893_v12 = vpop.f32.mrf.mxu1 }
 0x1ae   :  { %13922 = vst [vmem:[#allocation63_spill] sm:$0xff] %v11876_v17  ;;  %v11880_v31 = vadd.f32 %v1642_v11, %v11462_v53 }
 0x1af   :  { %v10033_v37 = vpop.f32.mrf.mxu0  ;;  %v11901_v17 = vpop.f32.mrf.mxu1 }
 0x1b0   :  { %13923 = vst [vmem:[#allocation64_spill] sm:$0xff] %v11880_v31  ;;  %v11888_v2 = vadd.f32 %v10033_v37, %v11473_v6 }
 0x1b1   :  { %v11890_v59 = vpop.f32.mrf.mxu0 }
 0x1b2   :  { %13924 = vst [vmem:[#allocation65_spill] sm:$0xff] %v11888_v2  ;;  %13925 = vst [vmem:[#allocation66_spill] sm:$0xff] %v11890_v59  ;;  %v11908_v59 = vpop.f32.mrf.mxu1 }
 0x1b3   :  { %v10036_v47 = vpop.f32.mrf.mxu0 }
 0x1b4   :  { %10211 = vmatmul.mubr.msk.bf16.gmra.mxu0 %vm297_vm1, %v10630_v63  ;;  %v11896_v53 = vadd.f32 %v10036_v47, %v11482_v19  ;;  %vm10829_vm1 = vmmov 0  }
 0x1b5   :  { %v1658_v11 = vpop.f32.mrf.mxu0 }
 0x1b6   :  { %13926 = vst [vmem:[#allocation67_spill] sm:$0xff] %v11896_v53  ;;  %v11899_v44 = vadd.f32 %v1658_v11, %v11484_v28  ;;  %v11916_v11 = vpop.f32.mrf.mxu1 }
 0x1b7   :  { %v10037_v31 = vpop.f32.mrf.mxu0 }
 0x1b8   :  { %13927 = vst [vmem:[#allocation68_spill] sm:$0xff] %v11899_v44  ;;  %v11904_v6 = vadd.f32 %v10037_v31, %v11492_v48 }
 0x1b9   :  { %v11906_v37 = vpop.f32.mrf.mxu0 }
 0x1ba   :  { %13928 = vst [vmem:[#allocation69_spill] sm:$0xff] %v11904_v6  ;;  %13929 = vst [vmem:[#allocation70_spill] sm:$0xff] %v11906_v37  ;;  %v11923_v6 = vpop.f32.mrf.mxu1 }
 0x1bb   :  { %v10040_v2 = vpop.f32.mrf.mxu0 }
 0x1bc   :  { %v11911_v63 = vadd.f32 %v10040_v2, %v11500_v62 }
 0x1bd   :  { %v1674_v19 = vpop.f32.mrf.mxu0 }
 0x1be   :  { %13930 = vst [vmem:[#allocation71_spill] sm:$0xff] %v11911_v63  ;;  %v11914_v47 = vadd.f32 %v1674_v19, %v11502_v15  ;;  %v11931_v19 = vpop.f32.mrf.mxu1 }
 0x1bf   :  { %v10041_v28 = vpop.f32.mrf.mxu0 }
 0x1c0   :  { %13931 = vst [vmem:[#allocation72_spill] sm:$0xff] %v11914_v47  ;;  %v11919_v44 = vadd.f32 %v10041_v28, %v11510_v35 }
 0x1c1   :  { %v11921_v48 = vpop.f32.mrf.mxu0 }
 0x1c2   :  { %13932 = vst [vmem:[#allocation73_spill] sm:$0xff] %v11919_v44  ;;  %13933 = vst [vmem:[#allocation74_spill] sm:$0xff] %v11921_v48  ;;  %v11938_v44 = vpop.f32.mrf.mxu1  ;;  %v13938_v48 = vld [vmem:[#allocation20_spill] sm:$0xff] }
 0x1c3   :  { %v10044_v31 = vpop.f32.mrf.mxu0 }
 0x1c4   :  { %v11926_v37 = vadd.f32 %v10044_v31, %v11518_v0  ;;  %v13940_v31 = vld [vmem:[#allocation21_spill] sm:$0xff] }
 0x1c5   :  { %v1690_v62 = vpop.f32.mrf.mxu0 }
 0x1c6   :  { %13934 = vst [vmem:[#allocation75_spill] sm:$0xff] %v11926_v37  ;;  %v11929_v2 = vadd.f32 %v1690_v62, %v11520_v10  ;;  %v11946_v62 = vpop.f32.mrf.mxu1 }
 0x1c7   :  { %v10045_v15 = vpop.f32.mrf.mxu0 }
 0x1c8   :  { %13935 = vst [vmem:[#allocation76_spill] sm:$0xff] %v11929_v2  ;;  %v11934_v47 = vadd.f32 %v10045_v15, %v11528_v26  ;;  %v13942_v2 = vld [vmem:[#allocation22_spill] sm:$0xff] }
 0x1c9   :  { %v11936_v35 = vpop.f32.mrf.mxu0 }
 0x1ca   :  { %13936 = vst [vmem:[#allocation77_spill] sm:$0xff] %v11934_v47  ;;  %13937 = vst [vmem:[#allocation78_spill] sm:$0xff] %v11936_v35  ;;  %v11953_v47 = vpop.f32.mrf.mxu1  ;;  %v13946_v35 = vld [vmem:[#allocation25_spill] sm:$0xff] }
 0x1cb   :  { %v10048_v28 = vpop.f32.mrf.mxu0  ;;  %13945 = vst [vmem:[#allocation80_spill] sm:$0xff] %v11953_v47 }
 0x1cc   :  { %v11941_v63 = vadd.f32 %v10048_v28, %v13938_v48  ;;  %v13948_v28 = vld [vmem:[#allocation26_spill] sm:$0xff] }
 0x1cd   :  { %v1706_v0 = vpop.f32.mrf.mxu0 }
 0x1ce   :  { %13939 = vst [vmem:[#allocation20_spill] sm:$0xff] %v11941_v63  ;;  %v11944_v37 = vadd.f32 %v1706_v0, %v13940_v31  ;;  %v11961_v31 = vpop.f32.mrf.mxu1 }
 0x1cf   :  { %v10049_v10 = vpop.f32.mrf.mxu0 }
 0x1d0   :  { %13941 = vst [vmem:[#allocation21_spill] sm:$0xff] %v11944_v37  ;;  %v11949_v53 = vadd.f32 %v10049_v10, %v13942_v2  ;;  %v13950_v37 = vld [vmem:[#allocation27_spill] sm:$0xff] }
 0x1d1   :  { %v11951_v26 = vpop.f32.mrf.mxu0 }
 0x1d2   :  { %13943 = vst [vmem:[#allocation22_spill] sm:$0xff] %v11949_v53  ;;  %13944 = vst [vmem:[#allocation79_spill] sm:$0xff] %v11951_v26  ;;  %v11968_v53 = vpop.f32.mrf.mxu1  ;;  %v13953_v26 = vld [vmem:[#allocation30_spill] sm:$0xff] }
 0x1d3   :  { %v10052_v15 = vpop.f32.mrf.mxu0 }
 0x1d4   :  { %v11956_v50 = vadd.f32 %v10052_v15, %v13946_v35  ;;  %v13955_v15 = vld [vmem:[#allocation31_spill] sm:$0xff] }
 0x1d5   :  { %v1722_v48 = vpop.f32.mrf.mxu0 }
 0x1d6   :  { %13947 = vst [vmem:[#allocation25_spill] sm:$0xff] %v11956_v50  ;;  %v11959_v63 = vadd.f32 %v1722_v48, %v13948_v28  ;;  %v11976_v28 = vpop.f32.mrf.mxu1 }
 0x1d7   :  { %v10053_v0 = vpop.f32.mrf.mxu0 }
 0x1d8   :  { %13949 = vst [vmem:[#allocation26_spill] sm:$0xff] %v11959_v63  ;;  %v11964_v38 = vadd.f32 %v10053_v0, %v13950_v37 }
 0x1d9   :  { %v11966_v2 = vpop.f32.mrf.mxu0 }
 0x1da   :  { %13951 = vst [vmem:[#allocation27_spill] sm:$0xff] %v11964_v38  ;;  %13952 = vst [vmem:[#allocation81_spill] sm:$0xff] %v11966_v2  ;;  %v11983_v38 = vpop.f32.mrf.mxu1 }
 0x1db   :  { %v10056_v10 = vpop.f32.mrf.mxu0  ;;  %13959 = vst [vmem:[#allocation84_spill] sm:$0xff] %v11983_v38 }
 0x1dc   :  { %v11971_v47 = vadd.f32 %v10056_v10, %v13953_v26  ;;  %v13961_v10 = vld [vmem:[#allocation34_spill] sm:$0xff] }
 0x1dd   :  { %v1738_v35 = vpop.f32.mrf.mxu0 }
 0x1de   :  { %13954 = vst [vmem:[#allocation30_spill] sm:$0xff] %v11971_v47  ;;  %v11974_v50 = vadd.f32 %v1738_v35, %v13955_v15  ;;  %v11991_v15 = vpop.f32.mrf.mxu1 }
 0x1df   :  { %v10057_v48 = vpop.f32.mrf.mxu0  ;;  %13963 = vst [vmem:[#allocation86_spill] sm:$0xff] %v11991_v15 }
 0x1e0   :  { %13956 = vst [vmem:[#allocation31_spill] sm:$0xff] %v11974_v50  ;;  %v11979_v63 = vadd.f32 %v10057_v48, %v11582_v8  ;;  %v2540_v48 = vadd.f32 %v11610_v34, %v11608_v51  ;;  %v2539_v34 = vadd.f32 %v11632_v14, %v11630_v23 }
 0x1e1   :  { %v11981_v37 = vpop.f32.mrf.mxu0 }
 0x1e2   :  { %13957 = vst [vmem:[#allocation82_spill] sm:$0xff] %v11979_v63  ;;  %13958 = vst [vmem:[#allocation83_spill] sm:$0xff] %v11981_v37 }
 0x1e3   :  { %v10060_v0 = vpop.f32.mrf.mxu0 }
 0x1e4   :  { %v11986_v2 = vadd.f32 %v10060_v0, %v11590_v5  ;;  %v12003_v5 = vld [vmem:[%s13859_s2] ss:$0 sm:$0xff]  ;;  %v13966_v0 = vld [vmem:[#allocation37_spill] sm:$0xff] }
 0x1e5   :  { %v1754_v26 = vpop.f32.mrf.mxu0 }
 0x1e6   :  { %13960 = vst [vmem:[#allocation85_spill] sm:$0xff] %v11986_v2  ;;  %v11989_v47 = vadd.f32 %v1754_v26, %v13961_v10  ;;  %v2538_v26 = vadd.f32 %v13966_v0, %v11614_v40  ;;  %v12007_v10 = vpop.f32.mrf.mxu1 }
 0x1e7   :  { %v10061_v35 = vpop.f32.mrf.mxu0  ;;  %13967 = vst [vmem:[#allocation37_spill] sm:$0xff] %v12007_v10 }
 0x1e8   :  { %13962 = vst [vmem:[#allocation34_spill] sm:$0xff] %v11989_v47  ;;  %v11994_v50 = vadd.f32 %v10061_v35, %v11600_v60  ;;  %v13968_v60 = vld [vmem:[#allocation38_spill] sm:$0xff]  ;;  %v13969_v35 = vld [vmem:[#allocation39_spill] sm:$0xff]  ;;  %v12014_v15 = vpop.f32.mrf.mxu1 }
 0x1e9   :  { %v11996_v8 = vpop.f32.mrf.mxu0 }
 0x1ea   :  { %13964 = vst [vmem:[#allocation87_spill] sm:$0xff] %v11994_v50  ;;  %13965 = vst [vmem:[#allocation88_spill] sm:$0xff] %v11996_v8  ;;  %v2541_v50 = vadd.f32 %v13969_v35, %v13968_v60  ;;  %v13970_v60 = vld [vmem:[#allocation40_spill] sm:$0xff]  ;;  %v12023_v14 = vpop.f32.mrf.mxu1 }
 0x1eb   :  { %v10144_v63 = vpop.f32.mrf.mxu0  ;;  %v2542_v23 = vadd.f32 %v11650_v41, %v13970_v60  ;;  %v2543_v41 = vadd.f32 %v11671_v57, %v11656_v43  ;;  %v13972_v43 = vld [vmem:[#allocation42_spill] sm:$0xff] }
 0x1ec   :  { %v3309_v47 = vadd.f32 %v10144_v63, %v2540_v48  ;;  %v2544_v63 = vadd.f32 %v11638_v29, %v11636_v9  ;;  %v13971_v9 = vld [vmem:[#allocation41_spill] sm:$0xff]  ;;  %v2546_v57 = vadd.f32 %v11695_v39, %v13972_v43 }
 0x1ed   :  { %v3020_v2 = vpop.f32.mrf.mxu0  ;;  %v2545_v29 = vadd.f32 %v11659_v30, %v13971_v9  ;;  %v2548_v30 = vadd.f32 %v11683_v45, %v11662_v20  ;;  %v13973_v9 = vld [vmem:[#allocation8_spill] sm:$0xff]  ;;  %v13974_v20 = vld [vmem:[#allocation9_spill] sm:$0xff] }
 0x1ee   :  { %v3388_v8 = vadd.f32 %v12003_v5, %v3309_v47  ;;  %v3307_v37 = vadd.f32 %v3020_v2, %v2538_v26  ;;  %v12049_v45 = vadd.f32 %v13974_v20, %v13973_v9 }
 0x1ef   :  { %v10145_v51 = vpop.f32.mrf.mxu0 }
 0x1f0   :  { %v3460_v38 = vmax.f32 %v3388_v8, 0.0  ;;  %v3386_v40 = vadd.f32 %v12003_v5, %v3307_v37  ;;  %v3310_v0 = vadd.f32 %v10145_v51, %v2541_v50 }
 0x1f1   :  { %v3023_v10 = vpop.f32.mrf.mxu0 }
 0x1f2   :  { %3533 = vst.msk [vmem:[#allocation4 + $0x10] sm:$0xff] %vm3530_vm3, %v3460_v38  ;;  %v3458_v48 = vmax.f32 %v3386_v40, 0.0  ;;  %v3389_v47 = vadd.f32 %v12003_v5, %v3310_v0  ;;  %v3308_v2 = vadd.f32 %v3023_v10, %v2539_v34  ;;  %v12033_v40 = vpop.f32.mrf.mxu1 }
 0x1f3   :  { %v10148_v26 = vpop.f32.mrf.mxu0 }
 0x1f4   :  { %3531 = vst.msk [vmem:[#allocation4] sm:$0xff] %vm3530_vm3, %v3458_v48  ;;  %v3461_v37 = vmax.f32 %v3389_v47, 0.0  ;;  %v3387_v50 = vadd.f32 %v12003_v5, %v3308_v2  ;;  %v3313_v8 = vadd.f32 %v10148_v26, %v2544_v63 }
 0x1f5   :  { %v3036_v35 = vpop.f32.mrf.mxu0 }
 0x1f6   :  { %3534 = vst.msk [vmem:[#allocation4 + $0x18] sm:$0xff] %vm3530_vm3, %v3461_v37  ;;  %v3459_v38 = vmax.f32 %v3387_v50, 0.0  ;;  %v3392_v10 = vadd.f32 %v12003_v5, %v3313_v8  ;;  %v3311_v51 = vadd.f32 %v3036_v35, %v2542_v23  ;;  %v12043_v37 = vpop.f32.mrf.mxu1 }
 0x1f7   :  { %v10149_v34 = vpop.f32.mrf.mxu0 }
 0x1f8   :  { %3532 = vst.msk [vmem:[#allocation4 + $0x8] sm:$0xff] %vm3530_vm3, %v3459_v38  ;;  %v3464_v0 = vmax.f32 %v3392_v10, 0.0  ;;  %v3390_v63 = vadd.f32 %v12003_v5, %v3311_v51  ;;  %v3314_v48 = vadd.f32 %v10149_v34, %v2545_v29  ;;  %v13975_v29 = vld [vmem:[#allocation43_spill] sm:$0xff] }
 0x1f9   :  { %v3039_v47 = vpop.f32.mrf.mxu0  ;;  %v2549_v38 = vadd.f32 %v11707_v61, %v13975_v29  ;;  %v2547_v61 = vadd.f32 %v11719_v55, %v11680_v36  ;;  %v10631_v29 = vld [vmem:[%s13860_s3 + $0x48] sm:$0xff]   ;;  %v13982_v55 = vld [vmem:[#allocation16_spill] sm:$0xff] }
 0x1fa   :  { %3537 = vst.msk [vmem:[#allocation4 + $0x30] sm:$0xff] %vm3530_vm3, %v3464_v0  ;;  %v3462_v2 = vmax.f32 %v3390_v63, 0.0  ;;  %v3393_v26 = vadd.f32 %v12003_v5, %v3314_v48  ;;  %v3312_v60 = vadd.f32 %v3039_v47, %v2543_v41  ;;  %v13976_v63 = vld [vmem:[#allocation10_spill] sm:$0xff]  ;;  %v13977_v48 = vld [vmem:[#allocation11_spill] sm:$0xff]  ;;  %10214 = vmatprep.subr.bf16.mxu1 %v10631_v29 }
 0x1fb   :  { %v10152_v23 = vpop.f32.mrf.mxu0  ;;  %v12057_v47 = vadd.f32 %v13977_v48, %v13976_v63  ;;  %v13981_v63 = vld [vmem:[#allocation15_spill] sm:$0xff]  ;;  %v13983_v48 = vld [vmem:[#allocation17_spill] sm:$0xff]  ;;  %10215 = vmatpush3.bf16.msra.mxu1 %v10631_v29 }
 0x1fc   :  { %3535 = vst.msk [vmem:[#allocation4 + $0x20] sm:$0xff] %vm3530_vm3, %v3462_v2  ;;  %v3465_v50 = vmax.f32 %v3393_v26, 0.0  ;;  %v3391_v8 = vadd.f32 %v12003_v5, %v3312_v60  ;;  %v3317_v35 = vadd.f32 %v10152_v23, %v2548_v30  ;;  %v13978_v30 = vld [vmem:[#allocation12_spill] sm:$0xff]  ;;  %v13979_v2 = vld [vmem:[#allocation13_spill] sm:$0xff] }
 0x1fd   :  { %v3607_v10 = vld [vmem:[#allocation4 + $0x10] ss:$2 sm:$0xff]  ;;  %v3679_v51 = vld [vmem:[#allocation4 + $0x11] ss:$2 sm:$0xff]  ;;  %v3052_v34 = vpop.f32.mrf.mxu0  ;;  %v12061_v26 = vadd.f32 %v13979_v2, %v13978_v30  ;;  %v13985_v30 = vld [vmem:[#allocation19_spill] sm:$0xff] }
 0x1fe   :  { %3538 = vst.msk [vmem:[#allocation4 + $0x38] sm:$0xff] %vm3530_vm3, %v3465_v50  ;;  %v3463_v39 = vmax.f32 %v3391_v8, 0.0  ;;  %v3396_v41 = vadd.f32 %v12003_v5, %v3317_v35  ;;  %v3315_v0 = vadd.f32 %v3052_v34, %v2546_v57  ;;  %v3749_v50 = vmax.f32 %v3607_v10, %v3679_v51  ;;  %v12065_v8 = vpop.f32.mrf.mxu1  ;;  %v13980_v34 = vld [vmem:[#allocation14_spill] sm:$0xff] }
 0x1ff   :  { %v10153_v60 = vpop.f32.mrf.mxu0  ;;  %v3605_v23 = vld [vmem:[#allocation4] ss:$2 sm:$0xff]  ;;  %v3677_v43 = vld [vmem:[#allocation4 + $0x1] ss:$2 sm:$0xff]  ;;  %v12074_v36 = vadd.f32 %v13981_v63, %v13980_v34  ;;  %v12078_v10 = vadd.f32 %v13983_v48, %v13982_v55  ;;  %v13988_v34 = vld [vmem:[#allocation24_spill] sm:$0xff] }
 0x200   :  { %3536 = vst.msk [vmem:[#allocation4 + $0x28] sm:$0xff] %vm3530_vm3, %v3463_v39  ;;  %v3468_v57 = vmax.f32 %v3396_v41, 0.0  ;;  %v3394_v35 = vadd.f32 %v12003_v5, %v3315_v0  ;;  %v3318_v9 = vadd.f32 %v10153_v60, %v2549_v38  ;;  %v3748_v20 = vmax.f32 %v3605_v23, %v3677_v43  ;;  %v13984_v51 = vld [vmem:[#allocation18_spill] sm:$0xff]  ;;  %v13987_v43 = vld [vmem:[#allocation23_spill] sm:$0xff]  ;;  %v13989_v55 = vld [vmem:[#allocation28_spill] sm:$0xff] }
 0x201   :  { %v12082_v39 = vadd.f32 %v13985_v30, %v13984_v51  ;;  %v2552_v38 = vadd.f32 %v11731_v13, %v11686_v24  ;;  %v3055_v41 = vpop.f32.mrf.mxu0  ;;  %v12090_v63 = vadd.f32 %v13988_v34, %v13987_v43  ;;  %v13990_v48 = vld [vmem:[#allocation29_spill] sm:$0xff]  ;;  %v13991_v30 = vld [vmem:[#allocation32_spill] sm:$0xff] }
 0x202   :  { %3541 = vst.msk [vmem:[#allocation4 + $0x50] sm:$0xff] %vm3530_vm3, %v3468_v57  ;;  %v3466_v0 = vmax.f32 %v3394_v35, 0.0  ;;  %v3397_v2 = vadd.f32 %v12003_v5, %v3318_v9  ;;  %v3316_v60 = vadd.f32 %v3055_v41, %v2547_v61  ;;  %v3789_v23 = vmax.f32 %v3748_v20, %v3749_v50  ;;  %v13993_v13 = vld [vmem:[#allocation44_spill] sm:$0xff]  ;;  %v12102_v61 = vpop.f32.mrf.mxu1  ;;  %v13994_v43 = vld [vmem:[#allocation45_spill] sm:$0xff] }
 0x203   :  { %13986 = vst [vmem:[#allocation38_spill] sm:$0xff] %v12082_v39  ;;  %v12094_v51 = vadd.f32 %v13990_v48, %v13989_v55  ;;  %v13992_v39 = vld [vmem:[#allocation33_spill] sm:$0xff]  ;;  %v2550_v57 = vadd.f32 %v11743_v7, %v13993_v13  ;;  %v10156_v35 = vpop.f32.mrf.mxu0  ;;  %v2553_v34 = vadd.f32 %v11755_v32, %v13994_v43  ;;  %v2556_v7 = vadd.f32 %v11779_v54, %v11710_v58  ;;  %v13995_v55 = vld [vmem:[#allocation46_spill] sm:$0xff] }
 0x204   :  { %v12098_v24 = vadd.f32 %v13992_v39, %v13991_v30  ;;  %3539 = vst.msk [vmem:[#allocation4 + $0x40] sm:$0xff] %vm3530_vm3, %v3466_v0  ;;  %v3469_v50 = vmax.f32 %v3397_v2, 0.0  ;;  %v3395_v9 = vadd.f32 %v12003_v5, %v3316_v60  ;;  %v3321_v20 = vadd.f32 %v10156_v35, %v2552_v38  ;;  %v13996_v2 = vld [vmem:[#allocation47_spill] sm:$0xff]  ;;  %v12133_v35 = vpop.f32.mrf.mxu1 }
 0x205   :  { %v9303_v41 = vpack.c.bf16 %v3789_v23, %v3789_v23  ;;  %v2551_v39 = vadd.f32 %v11767_v25, %v11704_v52  ;;  %v2554_v29 = vadd.f32 %v11791_v46, %v13995_v55  ;;  %v3611_v48 = vld [vmem:[#allocation4 + $0x30] ss:$2 sm:$0xff]  ;;  %v3683_v30 = vld [vmem:[#allocation4 + $0x31] ss:$2 sm:$0xff]  ;;  %v3068_v0 = vpop.f32.mrf.mxu0  ;;  %v12116_v60 = vadd.f32 %v11827_v3, %v13996_v2  ;;  %v13999_v2 = vld [vmem:[#allocation50_spill] sm:$0xff] }
 0x206   :  { %3542 = vst.msk [vmem:[#allocation4 + $0x58] sm:$0xff] %vm3530_vm3, %v3469_v50  ;;  %v3467_v38 = vmax.f32 %v3395_v9, 0.0  ;;  %v3400_v32 = vadd.f32 %v12003_v5, %v3321_v20  ;;  %v3319_v23 = vadd.f32 %v3068_v0, %v2550_v57  ;;  %v12123_v58 = vadd.f32 %v11842_v27, %v11728_v4  ;;  %v13997_v25 = vld [vmem:[#allocation48_spill] sm:$0xff] }
 0x207   :  { %3970 = vst.msk [vmem:[#allocation6] sm:$0xf] %vm3969_vm4, %v9303_v41  ;;  %v12127_v52 = vadd.f32 %v11850_v56, %v11734_v33  ;;  %v12131_v54 = vadd.f32 %v11862_v16, %v13997_v25  ;;  %v3609_v46 = vld [vmem:[#allocation4 + $0x20] ss:$2 sm:$0xff]  ;;  %v3681_v3 = vld [vmem:[#allocation4 + $0x21] ss:$2 sm:$0xff]  ;;  %v10157_v13 = vpop.f32.mrf.mxu0  ;;  %v12147_v16 = vadd.f32 %v11885_v22, %v11752_v21  ;;  %v12151_v20 = vadd.f32 %v11893_v12, %v11758_v49 }
 0x208   :  { %3540 = vst.msk [vmem:[#allocation4 + $0x48] sm:$0xff] %vm3530_vm3, %v3467_v38  ;;  %v3472_v57 = vmax.f32 %v3400_v32, 0.0  ;;  %v3398_v50 = vadd.f32 %v12003_v5, %v3319_v23  ;;  %v3322_v4 = vadd.f32 %v10157_v13, %v2553_v34  ;;  %v3750_v27 = vmax.f32 %v3609_v46, %v3681_v3  ;;  %v13998_v33 = vld [vmem:[#allocation49_spill] sm:$0xff]  ;;  %v14000_v38 = vld [vmem:[#allocation51_spill] sm:$0xff] }
 0x209   :  { %v13865_v9 = vmov 0.0   ;;  %v12143_v56 = vadd.f32 %v11873_v18, %v13998_v33  ;;  %v3751_v41 = vmax.f32 %v3611_v48, %v3683_v30  ;;  %v3071_v43 = vpop.f32.mrf.mxu0  ;;  %v12157_v18 = vadd.f32 %v11901_v17, %v13999_v2  ;;  %v12167_v48 = vpop.f32.mrf.mxu1  ;;  %v14004_v33 = vld [vmem:[#allocation55_spill] sm:$0xff] }
 0x20a   :  { %3603 = vst.msk [vmem:[#allocation4 + $0x240] sm:$0xff] %vm3530_vm3, %v13865_v9  ;;  %3604 = vst.msk [vmem:[#allocation4 + $0x248] sm:$0xff] %vm3530_vm3, %v13865_v9  ;;  %v3470_v34 = vmax.f32 %v3398_v50, 0.0  ;;  %v3401_v55 = vadd.f32 %v12003_v5, %v3322_v4  ;;  %v3320_v0 = vadd.f32 %v3071_v43, %v2551_v39  ;;  %v12161_v21 = vadd.f32 %v11908_v59, %v14000_v38  ;;  %v14001_v59 = vld [vmem:[#allocation52_spill] sm:$0xff]  ;;  %v14003_v50 = vld [vmem:[#allocation54_spill] sm:$0xff] }
 0x20b   :  { %3545 = vst.msk [vmem:[#allocation4 + $0x70] sm:$0xff] %vm3530_vm3, %v3472_v57  ;;  %v12165_v49 = vadd.f32 %v11916_v11, %v11776_v42  ;;  %v10160_v22 = vpop.f32.mrf.mxu0  ;;  %v3791_v12 = vmax.f32 %v3750_v27, %v3751_v41  ;;  %v12173_v17 = vadd.f32 %v11923_v6, %v11782_v1  ;;  %v12177_v23 = vadd.f32 %v11931_v19, %v14001_v59  ;;  %v14002_v42 = vld [vmem:[#allocation53_spill] sm:$0xff]  ;;  %v10632_v27 = vld [vmem:[%s13860_s3 + $0x40] sm:$0xff]   ;;  %v14005_v41 = vld [vmem:[#allocation80_spill] sm:$0xff] }
 0x20c   :  { %3543 = vst.msk [vmem:[#allocation4 + $0x60] sm:$0xff] %vm3530_vm3, %v3470_v34  ;;  %v3473_v30 = vmax.f32 %v3401_v55, 0.0  ;;  %v3399_v39 = vadd.f32 %v12003_v5, %v3320_v0  ;;  %v3325_v32 = vadd.f32 %v10160_v22, %v2556_v7  ;;  %v12181_v11 = vadd.f32 %v11938_v44, %v14002_v42  ;;  %v12200_v22 = vpop.f32.mrf.mxu1  ;;  %10216 = vmatprep.subr.bf16.mxu1 %v10632_v27 }
 0x20d   :  { %v3615_v25 = vld [vmem:[#allocation4 + $0x50] ss:$2 sm:$0xff]  ;;  %v3687_v46 = vld [vmem:[#allocation4 + $0x51] ss:$2 sm:$0xff]  ;;  %v3084_v3 = vpop.f32.mrf.mxu0  ;;  %v9305_v57 = vpack.c.bf16 %v3791_v12, %v3791_v12  ;;  %v12185_v7 = vadd.f32 %v11946_v62, %v14003_v50  ;;  %v12195_v43 = vadd.f32 %v14005_v41, %v14004_v33  ;;  %v14006_v62 = vld [vmem:[#allocation58_spill] sm:$0xff]  ;;  %10217 = vmatpush3.bf16.msra.mxu1 %v10632_v27  ;;  %6165 = vst.msk [vmem:[#allocation5 + $0xa0] sm:$0xff] %vm6144_vm15, %v13865_v9 }
 0x20e   :  { %v4054_v13 = vld [vmem:[#allocation6] sm:$0xf]  ;;  %3546 = vst.msk [vmem:[#allocation4 + $0x78] sm:$0xff] %vm3530_vm3, %v3473_v30  ;;  %v3471_v1 = vmax.f32 %v3399_v39, 0.0  ;;  %v3404_v6 = vadd.f32 %v12003_v5, %v3325_v32  ;;  %v3323_v19 = vadd.f32 %v3084_v3, %v2554_v29  ;;  %v1802_v34 = vadd.f32 %v14006_v62, %v12049_v45  ;;  %v12209_v62 = vpop.f32.mrf.mxu1 }
 0x20f   :  { %4056 = vrot.lane.b32.xlu1 %v4054_v13, %s10825_s29  ;;  %v4080_v44 = vld [vmem:[#allocation6] sm:$0xe]  ;;  %v3613_v55 = vld [vmem:[#allocation4 + $0x40] ss:$2 sm:$0xff]  ;;  %v3685_v0 = vld [vmem:[#allocation4 + $0x41] ss:$2 sm:$0xff]  ;;  %v10161_v2 = vpop.f32.mrf.mxu0 }
 0x210   :  { %v4037_v4 = vld [vmem:[#allocation6] sm:$0xf]  ;;  %v8780_v29 = vrot.slane %v4080_v44, 9  ;;  %3972 = vst.msk [vmem:[#allocation6 + $0x8] sm:$0xf] %vm3969_vm4, %v9305_v57  ;;  %v3476_v12 = vmax.f32 %v3404_v6, 0.0  ;;  %v3402_v30 = vadd.f32 %v12003_v5, %v3323_v19  ;;  %v3326_v39 = vadd.f32 %v10161_v2, %v12116_v60 }
 0x211   :  { %v4039_v38 = vshrl.u32 %v4037_v4, 16  ;;  %3544 = vst.msk [vmem:[#allocation4 + $0x68] sm:$0xff] %vm3530_vm3, %v3471_v1  ;;  %v4042_v32 = vshll.u32 %v4037_v4, 16  ;;  %v4061_v59 = vld [vmem:[#allocation6] sm:$0xf]  ;;  %v3087_v45 = vpop.f32.mrf.mxu0  ;;  %v3752_v50 = vmax.f32 %v3613_v55, %v3685_v0  ;;  %v3753_v44 = vmax.f32 %v3615_v25, %v3687_v46  ;;  %v14007_v0 = vld [vmem:[#allocation56_spill] sm:$0xff] }
 0x212   :  { %v4063_v3 = vshrl.u32 %v4061_v59, 16  ;;  %v4066_v13 = vshll.u32 %v4061_v59, 16  ;;  %3549 = vst.msk [vmem:[#allocation4 + $0x90] sm:$0xff] %vm3530_vm3, %v3476_v12  ;;  %v3474_v57 = vmax.f32 %v3402_v30, 0.0  ;;  %v3405_v1 = vadd.f32 %v12003_v5, %v3326_v39  ;;  %v4031_v60 = vld [vmem:[#allocation6] sm:$0x7] }
 0x213   :  { %v4041_v42 = vrot.slane %v4039_v38, 7  ;;  %v3324_v6 = vadd.f32 %v3087_v45, %v12123_v58  ;;  %4084 = vrot.lane.b32.xlu1 %v8780_v29, %s10826_s9  ;;  %v10164_v19 = vpop.f32.mrf.mxu0  ;;  %v3793_v55 = vmax.f32 %v3752_v50, %v3753_v44  ;;  %v12216_v58 = vadd.f32 %v11961_v31, %v14007_v0  ;;  %v14008_v2 = vld [vmem:[#allocation57_spill] sm:$0xff]  ;;  %v14009_v45 = vld [vmem:[#allocation59_spill] sm:$0xff] }
 0x214   :  { %v4065_v33 = vrot.slane %v4063_v3, 4  ;;  %v4068_v41 = vrot.slane %v4066_v13, 5  ;;  %3547 = vst.msk [vmem:[#allocation4 + $0x80] sm:$0xff] %vm3530_vm3, %v3474_v57  ;;  %v3477_v25 = vmax.f32 %v3405_v1, 0.0  ;;  %v3329_v27 = vadd.f32 %v10164_v19, %v12127_v52  ;;  %v14011_v3 = vld [vmem:[#allocation62_spill] sm:$0xff] }
 0x215   :  { %v4044_v4 = vor.u32 %v4042_v32, %v4041_v42  ;;  %v3403_v46 = vadd.f32 %v12003_v5, %v3324_v6  ;;  %v12220_v29 = vadd.f32 %v11968_v53, %v14008_v2  ;;  %v3100_v38 = vpop.f32.mrf.mxu0  ;;  %v4033_v12 = vrot.slane %v4031_v60, 7  ;;  %v3619_v39 = vld [vmem:[#allocation4 + $0x70] ss:$2 sm:$0xff]  ;;  %v3691_v32 = vld [vmem:[#allocation4 + $0x71] ss:$2 sm:$0xff]  ;;  %v12236_v6 = vpop.f32.mrf.mxu1 }
 0x216   :  { %v12224_v30 = vadd.f32 %v11976_v28, %v1802_v34  ;;  %3550 = vst.msk [vmem:[#allocation4 + $0x98] sm:$0xff] %vm3530_vm3, %v3477_v25  ;;  %v3408_v31 = vadd.f32 %v12003_v5, %v3329_v27  ;;  %v3327_v59 = vadd.f32 %v3100_v38, %v12131_v54  ;;  %v14010_v53 = vld [vmem:[#allocation84_spill] sm:$0xff]  ;;  %v1806_v13 = vadd.f32 %v14011_v3, %v12057_v47 }
 0x217   :  { %4045 = vrot.lane.b32.xlu0 %v4044_v4, %s10827_s10  ;;  %v3475_v52 = vmax.f32 %v3403_v46, 0.0  ;;  %v12231_v42 = vadd.f32 %v14010_v53, %v14009_v45  ;;  %v10165_v28 = vpop.f32.mrf.mxu0  ;;  %v4108_v34 = vld [vmem:[#allocation6 + $0x8] sm:$0xf]  ;;  %v4069_v57 = vor.u32 %v4068_v41, %v4065_v33  ;;  %v9307_v1 = vpack.c.bf16 %v3793_v55, %v3793_v55  ;;  %4036 = vst.msk [vmem:[#allocation2 + $0x8] sm:$0xe] %vm4035_vm5, %v4033_v12 }
 0x218   :  { %v3617_v50 = vld [vmem:[#allocation4 + $0x60] ss:$2 sm:$0xff]  ;;  %v3689_v44 = vld [vmem:[#allocation4 + $0x61] ss:$2 sm:$0xff]  ;;  %v3480_v54 = vmax.f32 %v3408_v31, 0.0  ;;  %v3406_v19 = vadd.f32 %v12003_v5, %v3327_v59  ;;  %v3330_v4 = vadd.f32 %v10165_v28, %v12143_v56  ;;  %v3755_v46 = vmax.f32 %v3619_v39, %v3691_v32  ;;  %v12246_v59 = vpop.f32.mrf.mxu1 }
 0x219   :  { %v3754_v60 = vmax.f32 %v3617_v50, %v3689_v44  ;;  %3548 = vst.msk [vmem:[#allocation4 + $0x88] sm:$0xff] %vm3530_vm3, %v3475_v52  ;;  %v4114_v25 = vld [vmem:[#allocation6 + $0x8] sm:$0xf]  ;;  %v3103_v27 = vpop.f32.mrf.mxu0  ;;  %v4070_v52 = vrot.slane %v4069_v57, 4  ;;  %v14012_v50 = vld [vmem:[#allocation60_spill] sm:$0xff] }
 0x21a   :  { %v4094_v47 = vld [vmem:[#allocation6 + $0x8] sm:$0xf]  ;;  %3974 = vst.msk [vmem:[#allocation6 + $0x10] sm:$0xf] %vm3969_vm4, %v9307_v1  ;;  %v4116_v33 = vshrl.u32 %v4114_v25, 16  ;;  %v4119_v41 = vshll.u32 %v4114_v25, 16  ;;  %v3409_v2 = vadd.f32 %v12003_v5, %v3330_v4  ;;  %v3328_v38 = vadd.f32 %v3103_v27, %v12147_v16 }
 0x21b   :  { %4110 = vrot.lane.b32.xlu0 %v4108_v34, %s10825_s29  ;;  %v4096_v55 = vshrl.u32 %v4094_v47, 16  ;;  %3553 = vst.msk [vmem:[#allocation4 + $0xb0] sm:$0xff] %vm3530_vm3, %v3480_v54  ;;  %v3478_v0 = vmax.f32 %v3406_v19, 0.0  ;;  %v4130_v12 = vld [vmem:[#allocation6 + $0x8] sm:$0xe]  ;;  %v10168_v56 = vpop.f32.mrf.mxu0  ;;  %v3795_v32 = vmax.f32 %v3754_v60, %v3755_v46  ;;  %v14014_v54 = vld [vmem:[#allocation61_spill] sm:$0xff] }
 0x21c   :  { %v4118_v31 = vrot.slane %v4116_v33, 4  ;;  %v4121_v39 = vrot.slane %v4119_v41, 5  ;;  %v3481_v45 = vmax.f32 %v3409_v2, 0.0  ;;  %v3407_v53 = vadd.f32 %v12003_v5, %v3328_v38  ;;  %v14013_v44 = vld [vmem:[#allocation86_spill] sm:$0xff]  ;;  %v14015_v19 = vld [vmem:[#allocation37_spill] sm:$0xff]  ;;  %v14016_v41 = vld [vmem:[#allocation63_spill] sm:$0xff] }
 0x21d   :  { %3551 = vst.msk [vmem:[#allocation4 + $0xa0] sm:$0xff] %vm3530_vm3, %v3478_v0  ;;  %v3333_v3 = vadd.f32 %v10168_v56, %v12151_v20  ;;  %v12253_v28 = vadd.f32 %v14013_v44, %v14012_v50  ;;  %v3623_v16 = vld [vmem:[#allocation4 + $0x90] ss:$2 sm:$0xff]  ;;  %v3116_v34 = vpop.f32.mrf.mxu0  ;;  %v4098_v1 = vrot.slane %v4096_v55, 7  ;;  %v9309_v60 = vpack.c.bf16 %v3795_v32, %v3795_v32  ;;  %v3695_v25 = vld [vmem:[#allocation4 + $0x91] ss:$2 sm:$0xff] }
 0x21e   :  { %v4122_v57 = vor.u32 %v4121_v39, %v4118_v31  ;;  %v12258_v4 = vadd.f32 %v14015_v19, %v14014_v54  ;;  %3554 = vst.msk [vmem:[#allocation4 + $0xb8] sm:$0xff] %vm3530_vm3, %v3481_v45  ;;  %v3479_v20 = vmax.f32 %v3407_v53, 0.0  ;;  %v3331_v27 = vadd.f32 %v3116_v34, %v12157_v18  ;;  %v12271_v31 = vpop.f32.mrf.mxu1  ;;  %v14017_v45 = vld [vmem:[#allocation64_spill] sm:$0xff] }
 0x21f   :  { %4071 = vrot.lane.b32.xlu0 %v4070_v52, %s10828_s11  ;;  %v3412_v46 = vadd.f32 %v12003_v5, %v3333_v3  ;;  %v12264_v33 = vadd.f32 %v12014_v15, %v1806_v13  ;;  %v12268_v0 = vadd.f32 %v12023_v14, %v14016_v41  ;;  %v10169_v38 = vpop.f32.mrf.mxu0  ;;  %v8781_v56 = vrot.slane %v4130_v12, 9  ;;  %3976 = vst.msk [vmem:[#allocation6 + $0x18] sm:$0xf] %vm3969_vm4, %v9309_v60 }
 0x220   :  { %v3621_v55 = vld [vmem:[#allocation4 + $0x80] ss:$2 sm:$0xff]  ;;  %v3693_v2 = vld [vmem:[#allocation4 + $0x81] ss:$2 sm:$0xff]  ;;  %v4099_v52 = vshll.u32 %v4094_v47, 16  ;;  %3552 = vst.msk [vmem:[#allocation4 + $0xa8] sm:$0xff] %vm3530_vm3, %v3479_v20  ;;  %v3410_v18 = vadd.f32 %v12003_v5, %v3331_v27  ;;  %v3334_v13 = vadd.f32 %v10169_v38, %v12161_v21  ;;  %v12278_v53 = vadd.f32 %v12033_v40, %v14017_v45 }
 0x221   :  { %v3484_v39 = vmax.f32 %v3412_v46, 0.0  ;;  %v4157_v15 = vld [vmem:[#allocation6 + $0x10] sm:$0xf]  ;;  %v3756_v14 = vmax.f32 %v3621_v55, %v3693_v2  ;;  %v3757_v12 = vmax.f32 %v3623_v16, %v3695_v25  ;;  %v3119_v47 = vpop.f32.mrf.mxu0  ;;  %v4123_v3 = vrot.slane %v4122_v57, 4  ;;  %v12285_v46 = vpop.f32.mrf.mxu1 }
 0x222   :  { %v4179_v32 = vld [vmem:[#allocation6 + $0x10] sm:$0xe]  ;;  %4159 = vrot.lane.b32.xlu1 %v4157_v15, %s10825_s29  ;;  %v4101_v50 = vor.u32 %v4099_v52, %v4098_v1  ;;  %v3482_v60 = vmax.f32 %v3410_v18, 0.0  ;;  %v3413_v21 = vadd.f32 %v12003_v5, %v3334_v13  ;;  %v3332_v54 = vadd.f32 %v3119_v47, %v12165_v49 }
 0x223   :  { %4134 = vrot.lane.b32.xlu0 %v8781_v56, %s10826_s9  ;;  %v4163_v44 = vld [vmem:[#allocation6 + $0x10] sm:$0xf]  ;;  %3557 = vst.msk [vmem:[#allocation4 + $0xd0] sm:$0xff] %vm3530_vm3, %v3484_v39  ;;  %v10172_v40 = vpop.f32.mrf.mxu0  ;;  %v8782_v20 = vrot.slane %v4179_v32, 9  ;;  %v3797_v52 = vmax.f32 %v3756_v14, %v3757_v12 }
 0x224   :  { %v4143_v34 = vld [vmem:[#allocation6 + $0x10] sm:$0xf]  ;;  %v4165_v19 = vshrl.u32 %v4163_v44, 16  ;;  %v4168_v16 = vshll.u32 %v4163_v44, 16  ;;  %3555 = vst.msk [vmem:[#allocation4 + $0xc0] sm:$0xff] %vm3530_vm3, %v3482_v60  ;;  %v3485_v57 = vmax.f32 %v3413_v21, 0.0  ;;  %v3411_v1 = vadd.f32 %v12003_v5, %v3332_v54  ;;  %v12297_v54 = vpop.f32.mrf.mxu1 }
 0x225   :  { %v4145_v25 = vshrl.u32 %v4143_v34, 16  ;;  %v3337_v27 = vadd.f32 %v10172_v40, %v12173_v17  ;;  %v3627_v55 = vld [vmem:[#allocation4 + $0xb0] ss:$2 sm:$0xff]  ;;  %v3699_v2 = vld [vmem:[#allocation4 + $0xb1] ss:$2 sm:$0xff]  ;;  %v3132_v49 = vpop.f32.mrf.mxu0  ;;  %v4148_v13 = vshll.u32 %v4143_v34, 16  ;;  %v9311_v21 = vpack.c.bf16 %v3797_v52, %v3797_v52 }
 0x226   :  { %v4167_v41 = vrot.slane %v4165_v19, 4  ;;  %4124 = vrot.lane.b32.xlu1 %v4123_v3, %s10828_s11  ;;  %v4170_v38 = vrot.slane %v4168_v16, 5  ;;  %3558 = vst.msk [vmem:[#allocation4 + $0xd8] sm:$0xff] %vm3530_vm3, %v3485_v57  ;;  %v3483_v39 = vmax.f32 %v3411_v1, 0.0  ;;  %v3335_v15 = vadd.f32 %v3132_v49, %v12177_v23  ;;  %v14018_v17 = vld [vmem:[#allocation66_spill] sm:$0xff]  ;;  %v12308_v52 = vpop.f32.mrf.mxu1 }
 0x227   :  { %4102 = vrot.lane.b32.xlu0 %v4101_v50, %s10827_s10  ;;  %v4147_v56 = vrot.slane %v4145_v25, 7  ;;  %v3416_v18 = vadd.f32 %v12003_v5, %v3337_v27  ;;  %v1810_v32 = vadd.f32 %v14018_v17, %v12061_v26  ;;  %v3759_v45 = vmax.f32 %v3627_v55, %v3699_v2  ;;  %v3625_v47 = vld [vmem:[#allocation4 + $0xa0] ss:$2 sm:$0xff]  ;;  %v3697_v3 = vld [vmem:[#allocation4 + $0xa1] ss:$2 sm:$0xff]  ;;  %v10173_v44 = vpop.f32.mrf.mxu0 }
 0x228   :  { %v4171_v50 = vor.u32 %v4170_v38, %v4167_v41  ;;  %v4228_v60 = vld [vmem:[#allocation6 + $0x18] sm:$0xe]  ;;  %v3758_v14 = vmax.f32 %v3625_v47, %v3697_v3  ;;  %3556 = vst.msk [vmem:[#allocation4 + $0xc8] sm:$0xff] %vm3530_vm3, %v3483_v39  ;;  %v3414_v19 = vadd.f32 %v12003_v5, %v3335_v15  ;;  %v3338_v23 = vadd.f32 %v10173_v44, %v12181_v11  ;;  %v14019_v15 = vld [vmem:[#allocation65_spill] sm:$0xff] }
 0x229   :  { %v3488_v12 = vmax.f32 %v3416_v18, 0.0  ;;  %v4192_v34 = vld [vmem:[#allocation6 + $0x18] sm:$0xf]  ;;  %v3135_v16 = vpop.f32.mrf.mxu0  ;;  %v4150_v25 = vor.u32 %v4148_v13, %v4147_v56  ;;  %3978 = vst.msk [vmem:[#allocation6 + $0x20] sm:$0xf] %vm3969_vm4, %v9311_v21  ;;  %v8783_v2 = vrot.slane %v4228_v60, 9  ;;  %v12315_v13 = vadd.f32 %v12043_v37, %v14019_v15 }
 0x22a   :  { %v4212_v40 = vld [vmem:[#allocation6 + $0x18] sm:$0xf]  ;;  %4183 = vrot.lane.b32.xlu1 %v8782_v20, %s10826_s9  ;;  %v4172_v26 = vrot.slane %v4171_v50, 4  ;;  %v4194_v57 = vshrl.u32 %v4192_v34, 16  ;;  %v3486_v27 = vmax.f32 %v3414_v19, 0.0  ;;  %v3417_v41 = vadd.f32 %v12003_v5, %v3338_v23  ;;  %v14020_v37 = vld [vmem:[#allocation67_spill] sm:$0xff] }
 0x22b   :  { %v4214_v1 = vshrl.u32 %v4212_v40, 16  ;;  %3561 = vst.msk [vmem:[#allocation4 + $0xf0] sm:$0xff] %vm3530_vm3, %v3488_v12  ;;  %v3336_v55 = vadd.f32 %v3135_v16, %v12185_v7  ;;  %v10176_v11 = vpop.f32.mrf.mxu0  ;;  %v4217_v20 = vshll.u32 %v4212_v40, 16  ;;  %v3799_v38 = vmax.f32 %v3758_v14, %v3759_v45  ;;  %v14021_v12 = vld [vmem:[#allocation68_spill] sm:$0xff]  ;;  %v12334_v16 = vpop.f32.mrf.mxu1 }
 0x22c   :  { %4173 = vrot.lane.b32.xlu0 %v4172_v26, %s10828_s11  ;;  %3559 = vst.msk [vmem:[#allocation4 + $0xe0] sm:$0xff] %vm3530_vm3, %v3486_v27  ;;  %v3489_v56 = vmax.f32 %v3417_v41, 0.0  ;;  %v3341_v18 = vadd.f32 %v10176_v11, %v12195_v43  ;;  %v4196_v3 = vrot.slane %v4194_v57, 7  ;;  %v12319_v50 = vadd.f32 %v12065_v8, %v1810_v32  ;;  %v4206_v57 = vld [vmem:[#allocation6 + $0x18] sm:$0xf]  ;;  %v14023_v41 = vld [vmem:[#allocation69_spill] sm:$0xff] }
 0x22d   :  { %v4216_v49 = vrot.slane %v4214_v1, 4  ;;  %v3415_v39 = vadd.f32 %v12003_v5, %v3336_v55  ;;  %v3631_v7 = vld [vmem:[#allocation4 + $0xd0] ss:$2 sm:$0xff]  ;;  %v3703_v17 = vld [vmem:[#allocation4 + $0xd1] ss:$2 sm:$0xff]  ;;  %v3148_v47 = vpop.f32.mrf.mxu0  ;;  %v4219_v45 = vrot.slane %v4217_v20, 5  ;;  %v9313_v44 = vpack.c.bf16 %v3799_v38, %v3799_v38 }
 0x22e   :  { %4151 = vrot.lane.b32.xlu1 %v4150_v25, %s10827_s10  ;;  %3562 = vst.msk [vmem:[#allocation4 + $0xf8] sm:$0xff] %vm3530_vm3, %v3489_v56  ;;  %v3420_v43 = vadd.f32 %v12003_v5, %v3341_v18  ;;  %v3339_v21 = vadd.f32 %v3148_v47, %v12216_v58  ;;  %v12326_v14 = vadd.f32 %v12102_v61, %v14020_v37  ;;  %v4197_v32 = vshll.u32 %v4192_v34, 16  ;;  %v14022_v1 = vld [vmem:[#allocation70_spill] sm:$0xff] }
 0x22f   :  { %v3487_v60 = vmax.f32 %v3415_v39, 0.0  ;;  %v12330_v19 = vadd.f32 %v12133_v35, %v14021_v12  ;;  %v3629_v23 = vld [vmem:[#allocation4 + $0xc0] ss:$2 sm:$0xff]  ;;  %v3701_v40 = vld [vmem:[#allocation4 + $0xc1] ss:$2 sm:$0xff]  ;;  %v10177_v8 = vpop.f32.mrf.mxu0  ;;  %v4220_v26 = vor.u32 %v4219_v45, %v4216_v49  ;;  %v1814_v27 = vadd.f32 %v14022_v1, %v12074_v36 }
 0x230   :  { %4232 = vrot.lane.b32.xlu0 %v8783_v2, %s10826_s9  ;;  %3980 = vst.msk [vmem:[#allocation6 + $0x28] sm:$0xf] %vm3969_vm4, %v9313_v44  ;;  %v3760_v58 = vmax.f32 %v3629_v23, %v3701_v40  ;;  %v3492_v61 = vmax.f32 %v3420_v43, 0.0  ;;  %v3418_v25 = vadd.f32 %v12003_v5, %v3339_v21  ;;  %v3342_v35 = vadd.f32 %v10177_v8, %v12220_v29  ;;  %v4261_v49 = vld [vmem:[#allocation6 + $0x20] sm:$0xf]  ;;  %v10637_v44 = vld [vmem:[%s13860_s3 + $0x30] sm:$0xff]  }
 0x231   :  { %3560 = vst.msk [vmem:[#allocation4 + $0xe8] sm:$0xff] %vm3530_vm3, %v3487_v60  ;;  %v12343_v34 = vadd.f32 %v12167_v48, %v14023_v41  ;;  %v3761_v55 = vmax.f32 %v3631_v7, %v3703_v17  ;;  %v4199_v11 = vor.u32 %v4197_v32, %v4196_v3  ;;  %v3151_v2 = vpop.f32.mrf.mxu0  ;;  %v12346_v20 = vld [vmem:[#allocation6 + $0x20] sm:$0xf]  ;;  %v4221_v36 = vrot.slane %v4220_v26, 4  ;;  %v12353_v7 = vpop.f32.mrf.mxu1 }
 0x232   :  { %4208 = vrot.lane.b32.xlu1 %v4206_v57, %s10825_s29  ;;  %3565 = vst.msk [vmem:[#allocation4 + $0x110] sm:$0xff] %vm3530_vm3, %v3492_v61  ;;  %v3490_v38 = vmax.f32 %v3418_v25, 0.0  ;;  %v3421_v29 = vadd.f32 %v12003_v5, %v3342_v35  ;;  %v3340_v56 = vadd.f32 %v3151_v2, %v12224_v30  ;;  %v4263_v39 = vshrl.u32 %v4261_v49, 16  ;;  %v4277_v45 = vld [vmem:[#allocation6 + $0x20] sm:$0xe] }
 0x233   :  { %v10180_v48 = vpop.f32.mrf.mxu0  ;;  %v4266_v18 = vshll.u32 %v4261_v49, 16  ;;  %v4243_v15 = vshrl.u32 %v12346_v20, 16  ;;  %v10636_v30 = vld [vmem:[%s13860_s3 + $0x38] sm:$0xff]   ;;  %v12365_v60 = vadd.f32 %v12200_v22, %v1814_v27  ;;  %v3801_v23 = vmax.f32 %v3760_v58, %v3761_v55  ;;  %v12376_v41 = vpop.f32.mrf.mxu1 }
 0x234   :  { %4200 = vrot.lane.b32.xlu0 %v4199_v11, %s10827_s10  ;;  %3563 = vst.msk [vmem:[#allocation4 + $0x100] sm:$0xff] %vm3530_vm3, %v3490_v38  ;;  %v3493_v17 = vmax.f32 %v3421_v29, 0.0  ;;  %v3419_v47 = vadd.f32 %v12003_v5, %v3340_v56  ;;  %v3345_v3 = vadd.f32 %v10180_v48, %v12231_v42  ;;  %v4255_v43 = vld [vmem:[#allocation6 + $0x20] sm:$0xf]  ;;  %v4265_v37 = vrot.slane %v4263_v39, 4  ;;  %v14024_v42 = vld [vmem:[#allocation71_spill] sm:$0xff]  ;;  %10218 = vmatprep.subr.bf16.mxu1 %v10636_v30 }
 0x235   :  { %v3164_v21 = vpop.f32.mrf.mxu0  ;;  %v4268_v12 = vrot.slane %v4266_v18, 5  ;;  %v12370_v40 = vadd.f32 %v12209_v62, %v14024_v42  ;;  %v3635_v8 = vld [vmem:[#allocation4 + $0xf0] ss:$2 sm:$0xff]  ;;  %v3707_v32 = vld [vmem:[#allocation4 + $0xf1] ss:$2 sm:$0xff]  ;;  %v8784_v35 = vrot.slane %v4277_v45, 9  ;;  %v9315_v62 = vpack.c.bf16 %v3801_v23, %v3801_v23  ;;  %10219 = vmatpush3.bf16.msra.mxu1 %v10636_v30 }
 0x236   :  { %4222 = vrot.lane.b32.xlu1 %v4221_v36, %s10828_s11  ;;  %3566 = vst.msk [vmem:[#allocation4 + $0x118] sm:$0xff] %vm3530_vm3, %v3493_v17  ;;  %v3491_v26 = vmax.f32 %v3419_v47, 0.0  ;;  %v3424_v61 = vadd.f32 %v12003_v5, %v3345_v3  ;;  %v3343_v22 = vadd.f32 %v3164_v21, %v12253_v28  ;;  %v4245_v27 = vrot.slane %v4243_v15, 7  ;;  %v12382_v5 = vld [vmem:[%s13859_s2] ss:$0 sm:$0xff]  ;;  %10220 = vmatprep.subr.bf16.mxu1 %v10637_v44  ;;  %v14025_v15 = vld [vmem:[#allocation72_spill] sm:$0xff] }
 0x237   :  { %v10181_v58 = vpop.f32.mrf.mxu0  ;;  %v4269_v1 = vor.u32 %v4268_v12, %v4265_v37  ;;  %v4326_v2 = vld [vmem:[#allocation6 + $0x28] sm:$0xe]  ;;  %v3763_v29 = vmax.f32 %v3635_v8, %v3707_v32  ;;  %v4246_v48 = vshll.u32 %v12346_v20, 16  ;;  %3982 = vst.msk [vmem:[#allocation6 + $0x30] sm:$0xf] %vm3969_vm4, %v9315_v62  ;;  %v12400_v37 = vpop.f32.mrf.mxu1 }
 0x238   :  { %v3633_v25 = vld [vmem:[#allocation4 + $0xe0] ss:$2 sm:$0xff]  ;;  %v3705_v57 = vld [vmem:[#allocation4 + $0xe1] ss:$2 sm:$0xff]  ;;  %4257 = vrot.lane.b32.xlu0 %v4255_v43, %s10825_s29  ;;  %3564 = vst.msk [vmem:[#allocation4 + $0x108] sm:$0xff] %vm3530_vm3, %v3491_v26  ;;  %v3496_v55 = vmax.f32 %v3424_v61, 0.0  ;;  %v3422_v28 = vadd.f32 %v12382_v5, %v3343_v22  ;;  %v3346_v11 = vadd.f32 %v10181_v58, %v12258_v4  ;;  %v12394_v4 = vadd.f32 %v12236_v6, %v14025_v15 }
 0x239   :  { %v12386_v49 = vld [vmem:[#allocation6 + $0x28] sm:$0xf]  ;;  %v3762_v38 = vmax.f32 %v3633_v25, %v3705_v57  ;;  %v4270_v56 = vrot.slane %v4269_v1, 4  ;;  %v3167_v36 = vpop.f32.mrf.mxu0  ;;  %v4248_v45 = vor.u32 %v4246_v48, %v4245_v27  ;;  %v8785_v30 = vrot.slane %v4326_v2, 9  ;;  %10221 = vmatpush3.bf16.msra.mxu1 %v10637_v44  ;;  %v4138_v8 = vld [vmem:[#allocation6 + $0x10] sm:$0x7] }
 0x23a   :  { %4281 = vrot.lane.b32.xlu1 %v8784_v35, %s10826_s9  ;;  %v4292_v39 = vshrl.u32 %v12386_v49, 16  ;;  %v4310_v18 = vld [vmem:[#allocation6 + $0x28] sm:$0xf]  ;;  %3569 = vst.msk [vmem:[#allocation4 + $0x130] sm:$0xff] %vm3530_vm3, %v3496_v55  ;;  %v3494_v17 = vmax.f32 %v3422_v28, 0.0  ;;  %v3425_v47 = vadd.f32 %v12382_v5, %v3346_v11  ;;  %v3344_v3 = vadd.f32 %v3167_v36, %v12264_v33  ;;  %v10638_v33 = vld [vmem:[%s13860_s3 + $0x28] sm:$0xff]  }
 0x23b   :  { %v10184_v20 = vpop.f32.mrf.mxu0  ;;  %v3803_v43 = vmax.f32 %v3762_v38, %v3763_v29  ;;  %v4089_v21 = vld [vmem:[#allocation6 + $0x8] sm:$0x7]  ;;  %v4312_v42 = vshrl.u32 %v4310_v18, 16  ;;  %v4315_v61 = vshll.u32 %v4310_v18, 16  ;;  %v4295_v35 = vshll.u32 %v12386_v49, 16  ;;  %10222 = vmatprep.subr.bf16.mxu1 %v10638_v33  ;;  %v10640_v58 = vld [vmem:[%s13860_s3 + $0xb8] sm:$0xff]  }
 0x23c   :  { %4271 = vrot.lane.b32.xlu0 %v4270_v56, %s10828_s11  ;;  %3567 = vst.msk [vmem:[#allocation4 + $0x120] sm:$0xff] %vm3530_vm3, %v3494_v17  ;;  %v3497_v6 = vmax.f32 %v3425_v47, 0.0  ;;  %v3423_v12 = vadd.f32 %v12382_v5, %v3344_v3  ;;  %v3349_v23 = vadd.f32 %v10184_v20, %v12268_v0  ;;  %v10639_v32 = vld [vmem:[%s13860_s3 + $0xc0] sm:$0xff]   ;;  %v4294_v26 = vrot.slane %v4292_v39, 7  ;;  %v14027_v29 = vld [vmem:[#allocation73_spill] sm:$0xff] }
 0x23d   :  { %v3180_v44 = vpop.f32.mrf.mxu0  ;;  %v9317_v22 = vpack.c.bf16 %v3803_v43, %v3803_v43  ;;  %10334 = vmatprep.subr.bf16.mxu0 %v10639_v32  ;;  %v14026_v1 = vld [vmem:[#allocation74_spill] sm:$0xff]  ;;  %v4091_v55 = vrot.slane %v4089_v21, 7  ;;  %v4140_v28 = vrot.slane %v4138_v8, 7  ;;  %10223 = vmatpush3.bf16.msra.mxu1 %v10638_v33  ;;  %v12432_v56 = vadd.f32 %v12246_v59, %v14027_v29  ;;  %v10642_v59 = vld [vmem:[%s13860_s3 + $0xb0] sm:$0xff]  }
 0x23e   :  { %4249 = vrot.lane.b32.xlu1 %v4248_v45, %s10827_s10  ;;  %3570 = vst.msk [vmem:[#allocation4 + $0x138] sm:$0xff] %vm3530_vm3, %v3497_v6  ;;  %v3495_v25 = vmax.f32 %v3423_v12, 0.0  ;;  %v3428_v0 = vadd.f32 %v12382_v5, %v3349_v23  ;;  %v3347_v57 = vadd.f32 %v3180_v44, %v12278_v53  ;;  %v12421_v27 = vadd.f32 %v14026_v1, %v12078_v10  ;;  %v12425_v53 = vpop.f32.mrf.mxu1  ;;  %v4304_v49 = vld [vmem:[#allocation6 + $0x28] sm:$0xf]  ;;  %v4375_v10 = vld [vmem:[#allocation6 + $0x30] sm:$0xe] }
 0x23f   :  { %v10185_v62 = vpop.f32.mrf.mxu0  ;;  %3984 = vst.msk [vmem:[#allocation6 + $0x38] sm:$0xf] %vm3969_vm4, %v9317_v22  ;;  %10335 = vmatpush3.bf16.msra.mxu0 %v10639_v32  ;;  %v4297_v36 = vor.u32 %v4295_v35, %v4294_v26  ;;  %v4339_v39 = vld [vmem:[#allocation6 + $0x30] sm:$0xf]  ;;  %v4314_v18 = vrot.slane %v4312_v42, 4  ;;  %v4317_v15 = vrot.slane %v4315_v61, 5 }
 0x240   :  { %4330 = vrot.lane.b32.xlu0 %v8785_v30, %s10826_s9  ;;  %3568 = vst.msk [vmem:[#allocation4 + $0x128] sm:$0xff] %vm3530_vm3, %v3495_v25  ;;  %v3500_v11 = vmax.f32 %v3428_v0, 0.0  ;;  %v3426_v2 = vadd.f32 %v12382_v5, %v3347_v57  ;;  %v3350_v38 = vadd.f32 %v10185_v62, %v12315_v13  ;;  %v4359_v17 = vld [vmem:[#allocation6 + $0x30] sm:$0xf]  ;;  %10336 = vmatprep.subr.bf16.mxu0 %v10640_v58  ;;  %v8786_v45 = vrot.slane %v4375_v10, 9  ;;  %v12444_v21 = vpop.f32.mrf.mxu1 }
 0x241   :  { %v3183_v48 = vpop.f32.mrf.mxu0  ;;  %4093 = vst.msk [vmem:[#allocation2 + $0xc] sm:$0xe] %vm4035_vm5, %v4091_v55  ;;  %4142 = vst.msk [vmem:[#allocation2 + $0x10] sm:$0xe] %vm4035_vm5, %v4140_v28  ;;  %v4341_v30 = vshrl.u32 %v4339_v39, 16  ;;  %v4361_v43 = vshrl.u32 %v4359_v17, 16 }
 0x242   :  { %4306 = vrot.lane.b32.xlu1 %v4304_v49, %s10825_s29  ;;  %3573 = vst.msk [vmem:[#allocation4 + $0x150] sm:$0xff] %vm3530_vm3, %v3500_v11  ;;  %v3498_v13 = vmax.f32 %v3426_v2, 0.0  ;;  %v3429_v47 = vadd.f32 %v12382_v5, %v3350_v38  ;;  %v3348_v3 = vadd.f32 %v3183_v48, %v12319_v50  ;;  %v4344_v33 = vshll.u32 %v4339_v39, 16  ;;  %v4353_v44 = vld [vmem:[#allocation6 + $0x30] sm:$0xf] }
 0x243   :  { %v10188_v20 = vpop.f32.mrf.mxu0  ;;  %10337 = vmatpush3.bf16.msra.mxu0 %v10640_v58  ;;  %v4343_v8 = vrot.slane %v4341_v30, 7  ;;  %v4318_v50 = vor.u32 %v4317_v15, %v4314_v18  ;;  %v4363_v22 = vrot.slane %v4361_v43, 4  ;;  %v12454_v58 = vpop.f32.mrf.mxu1  ;;  %v2587_v30 = vadd.f32 %v12271_v31, %v12421_v27  ;;  %v4334_v27 = vld [vmem:[#allocation6 + $0x30] sm:$0x7] }
 0x244   :  { %4298 = vrot.lane.b32.xlu0 %v4297_v36, %s10827_s10  ;;  %3571 = vst.msk [vmem:[#allocation4 + $0x140] sm:$0xff] %vm3530_vm3, %v3498_v13  ;;  %v3501_v6 = vmax.f32 %v3429_v47, 0.0  ;;  %v3353_v12 = vadd.f32 %v10188_v20, %v12326_v14  ;;  %v3427_v23 = vadd.f32 %v12382_v5, %v3348_v3  ;;  %10338 = vmatprep.subr.bf16.mxu0 %v10642_v59  ;;  %v4364_v14 = vshll.u32 %v4359_v17, 16  ;;  %v4187_v17 = vld [vmem:[#allocation6 + $0x18] sm:$0x7] }
 0x245   :  { %v3196_v42 = vpop.f32.mrf.mxu0  ;;  %v4346_v0 = vor.u32 %v4344_v33, %v4343_v8  ;;  %v4319_v11 = vrot.slane %v4318_v50, 4  ;;  %v4236_v13 = vld [vmem:[#allocation6 + $0x20] sm:$0x7]  ;;  %v12467_v47 = vpop.f32.mrf.mxu1  ;;  %v4285_v20 = vld [vmem:[#allocation6 + $0x28] sm:$0x7] }
 0x246   :  { %4379 = vrot.lane.b32.xlu1 %v8786_v45, %s10826_s9  ;;  %3574 = vst.msk [vmem:[#allocation4 + $0x158] sm:$0xff] %vm3530_vm3, %v3501_v6  ;;  %v3432_v32 = vadd.f32 %v12382_v5, %v3353_v12  ;;  %v3351_v26 = vadd.f32 %v3196_v42, %v12330_v19  ;;  %v4388_v61 = vld [vmem:[#allocation6 + $0x38] sm:$0xf]  ;;  %v3499_v25 = vmax.f32 %v3427_v23, 0.0  ;;  %v10643_v19 = vld [vmem:[%s13860_s3 + $0xa8] sm:$0xff]   ;;  %v4366_v10 = vrot.slane %v4364_v14, 5 }
 0x247   :  { %v10189_v57 = vpop.f32.mrf.mxu0  ;;  %v4390_v35 = vshrl.u32 %v4388_v61, 16  ;;  %v4408_v28 = vld [vmem:[#allocation6 + $0x38] sm:$0xf]  ;;  %10339 = vmatpush3.bf16.msra.mxu0 %v10642_v59  ;;  %v4393_v38 = vshll.u32 %v4388_v61, 16  ;;  %v4238_v14 = vrot.slane %v4236_v13, 7 }
 0x248   :  { %4355 = vrot.lane.b32.xlu0 %v4353_v44, %s10825_s29  ;;  %v3504_v1 = vmax.f32 %v3432_v32, 0.0  ;;  %v3430_v62 = vadd.f32 %v12382_v5, %v3351_v26  ;;  %v3354_v55 = vadd.f32 %v10189_v57, %v12343_v34  ;;  %3572 = vst.msk [vmem:[#allocation4 + $0x148] sm:$0xff] %vm3530_vm3, %v3499_v25  ;;  %10340 = vmatprep.subr.bf16.mxu0 %v10643_v19  ;;  %v4410_v15 = vshrl.u32 %v4408_v28, 16  ;;  %v4402_v3 = vld [vmem:[#allocation6 + $0x38] sm:$0xf]  ;;  %v12483_v25 = vpop.f32.mrf.mxu1 }
 0x249   :  { %v3199_v2 = vpop.f32.mrf.mxu0  ;;  %v4392_v49 = vrot.slane %v4390_v35, 7  ;;  %v4367_v18 = vor.u32 %v4366_v10, %v4363_v22  ;;  %v4413_v31 = vshll.u32 %v4408_v28, 16  ;;  %v4383_v32 = vld [vmem:[#allocation6 + $0x38] sm:$0x7]  ;;  %v4189_v22 = vrot.slane %v4187_v17, 7 }
 0x24a   :  { %4347 = vrot.lane.b32.xlu1 %v4346_v0, %s10827_s10  ;;  %3577 = vst.msk [vmem:[#allocation4 + $0x170] sm:$0xff] %vm3530_vm3, %v3504_v1  ;;  %v3502_v29 = vmax.f32 %v3430_v62, 0.0  ;;  %v3433_v34 = vadd.f32 %v12382_v5, %v3354_v55  ;;  %v3352_v36 = vadd.f32 %v3199_v2, %v12365_v60  ;;  %v14028_v60 = vld [vmem:[#allocation75_spill] sm:$0xff]  ;;  %v12480_v50 = vrot.slane %v4410_v15, 4  ;;  %v4424_v61 = vld [vmem:[#allocation6 + $0x38] sm:$0xe] }
 0x24b   :  { %v10192_v48 = vpop.f32.mrf.mxu0  ;;  %v4395_v39 = vor.u32 %v4393_v38, %v4392_v49  ;;  %10341 = vmatpush3.bf16.msra.mxu0 %v10643_v19  ;;  %v2592_v43 = vadd.f32 %v12285_v46, %v14028_v60  ;;  %v4368_v8 = vrot.slane %v4367_v18, 4  ;;  %v4415_v62 = vrot.slane %v4413_v31, 5  ;;  %4191 = vst.msk [vmem:[#allocation2 + $0x14] sm:$0xe] %vm4035_vm5, %v4189_v22  ;;  %4240 = vst.msk [vmem:[#allocation2 + $0x18] sm:$0xe] %vm4035_vm5, %v4238_v14 }
 0x24c   :  { %4320 = vrot.lane.b32.xlu0 %v4319_v11, %s10828_s11  ;;  %3575 = vst.msk [vmem:[#allocation4 + $0x160] sm:$0xff] %vm3530_vm3, %v3502_v29  ;;  %v3505_v59 = vmax.f32 %v3433_v34, 0.0  ;;  %v3357_v45 = vadd.f32 %v10192_v48, %v12370_v40  ;;  %v3431_v23 = vadd.f32 %v12382_v5, %v3352_v36  ;;  %v4287_v19 = vrot.slane %v4285_v20, 7  ;;  %v10647_v49 = vld [vmem:[%s13860_s3 + $0xa0] sm:$0xff]   ;;  %v14031_v17 = vld [vmem:[#allocation76_spill] sm:$0xff] }
 0x24d   :  { %v3647_v6 = vld [vmem:[#allocation4 + $0x150] ss:$2 sm:$0xff]  ;;  %v3719_v12 = vld [vmem:[#allocation4 + $0x151] ss:$2 sm:$0xff]  ;;  %v3212_v42 = vpop.f32.mrf.mxu0  ;;  %v4336_v11 = vrot.slane %v4334_v27, 7  ;;  %v4385_v2 = vrot.slane %v4383_v32, 7  ;;  %v4416_v18 = vor.u32 %v4415_v62, %v12480_v50  ;;  %10342 = vmatprep.subr.bf16.mxu0 %v10647_v49  ;;  %v2590_v13 = vadd.f32 %v12297_v54, %v14031_v17 }
 0x24e   :  { %4404 = vrot.lane.b32.xlu1 %v4402_v3, %s10825_s29  ;;  %3578 = vst.msk [vmem:[#allocation4 + $0x178] sm:$0xff] %vm3530_vm3, %v3505_v59  ;;  %v3436_v40 = vadd.f32 %v12382_v5, %v3357_v45  ;;  %v3355_v33 = vadd.f32 %v3212_v42, %v12394_v4  ;;  %v3769_v46 = vmax.f32 %v3647_v6, %v3719_v12  ;;  %v3503_v44 = vmax.f32 %v3431_v23, 0.0  ;;  %v14029_v38 = vld [vmem:[#allocation38_spill] sm:$0xff]  ;;  %v10132_v59 = vpop.f32.mrf.mxu1  ;;  %v14033_v23 = vld [vmem:[#allocation79_spill] sm:$0xff]  ;;  %v14035_v31 = vld [vmem:[#allocation36_spill] sm:$0xff] }
 0x24f   :  { %v10193_v26 = vpop.f32.mrf.mxu0  ;;  %v3645_v0 = vld [vmem:[#allocation4 + $0x140] ss:$2 sm:$0xff]  ;;  %v3717_v57 = vld [vmem:[#allocation4 + $0x141] ss:$2 sm:$0xff]  ;;  %v8787_v48 = vrot.slane %v4424_v61, 9  ;;  %10343 = vmatpush3.bf16.msra.mxu0 %v10647_v49  ;;  %v1826_v54 = vadd.f32 %v14033_v23, %v12090_v63  ;;  %v14036_v32 = vld [vmem:[#allocation20_spill] sm:$0xff] }
 0x250   :  { %4396 = vrot.lane.b32.xlu0 %v4395_v39, %s10827_s10  ;;  %v3508_v35 = vmax.f32 %v3436_v40, 0.0  ;;  %v3434_v4 = vadd.f32 %v12382_v5, %v3355_v33  ;;  %v3358_v1 = vadd.f32 %v10193_v26, %v12432_v56  ;;  %v3768_v55 = vmax.f32 %v3645_v0, %v3717_v57  ;;  %3576 = vst.msk [vmem:[#allocation4 + $0x168] sm:$0xff] %vm3530_vm3, %v3503_v44  ;;  %v14030_v56 = vld [vmem:[#allocation78_spill] sm:$0xff]  ;;  %v14034_v50 = vld [vmem:[#allocation35_spill] sm:$0xff]  ;;  %v14037_v63 = vld [vmem:[#allocation21_spill] sm:$0xff]  ;;  %v2507_v22 = vpop.f32.mrf.mxu1 }
 0x251   :  { %v3215_v28 = vpop.f32.mrf.mxu0  ;;  %v1822_v10 = vadd.f32 %v14030_v56, %v14029_v38  ;;  %4289 = vst.msk [vmem:[#allocation2 + $0x1c] sm:$0xe] %vm4035_vm5, %v4287_v19  ;;  %4338 = vst.msk [vmem:[#allocation2 + $0x20] sm:$0xe] %vm4035_vm5, %v4336_v11  ;;  %10364 = vmatprep.subr.bf16.mxu0 %v13865_v9  ;;  %v4417_v44 = vrot.slane %v4416_v18, 4  ;;  %v2594_v61 = vadd.f32 %v12376_v41, %v14037_v63  ;;  %v14040_v38 = vld [vmem:[#allocation25_spill] sm:$0xff] }
 0x252   :  { %4369 = vrot.lane.b32.xlu1 %v4368_v8, %s10828_s11  ;;  %3581 = vst.msk [vmem:[#allocation4 + $0x190] sm:$0xff] %vm3530_vm3, %v3508_v35  ;;  %v3506_v29 = vmax.f32 %v3434_v4, 0.0  ;;  %v3437_v34 = vadd.f32 %v12382_v5, %v3358_v1  ;;  %v3356_v36 = vadd.f32 %v3215_v28, %v2587_v30  ;;  %v3809_v15 = vmax.f32 %v3768_v55, %v3769_v46  ;;  %v14032_v30 = vld [vmem:[#allocation77_spill] sm:$0xff] }
 0x253   :  { %v10196_v39 = vpop.f32.mrf.mxu0  ;;  %4387 = vst.msk [vmem:[#allocation2 + $0x24] sm:$0xe] %vm4035_vm5, %v4385_v2  ;;  %v2593_v60 = vadd.f32 %v12308_v52, %v14032_v30  ;;  %v12516_v52 = vadd.f32 %v14035_v31, %v14034_v50  ;;  %v2591_v27 = vadd.f32 %v12334_v16, %v1822_v10  ;;  %v2596_v46 = vadd.f32 %v12353_v7, %v14036_v32  ;;  %v14038_v16 = vld [vmem:[#allocation22_spill] sm:$0xff]  ;;  %v14039_v7 = vld [vmem:[#allocation81_spill] sm:$0xff] }
 0x254   :  { %3579 = vst.msk [vmem:[#allocation4 + $0x180] sm:$0xff] %vm3530_vm3, %v3506_v29  ;;  %v3509_v3 = vmax.f32 %v3437_v34, 0.0  ;;  %v3435_v45 = vadd.f32 %v12382_v5, %v3356_v36  ;;  %v3361_v20 = vadd.f32 %v10196_v39, %v2592_v43  ;;  %v9323_v12 = vpack.c.bf16 %v3809_v15, %v3809_v15  ;;  %v14042_v34 = vld [vmem:[#allocation27_spill] sm:$0xff] }
 0x255   :  { %v3228_v6 = vpop.f32.mrf.mxu0  ;;  %v3651_v42 = vld [vmem:[#allocation4 + $0x170] ss:$2 sm:$0xff]  ;;  %v3723_v8 = vld [vmem:[#allocation4 + $0x171] ss:$2 sm:$0xff]  ;;  %v2597_v1 = vadd.f32 %v12400_v37, %v14038_v16  ;;  %v1830_v62 = vadd.f32 %v14039_v7, %v12094_v51  ;;  %v2595_v19 = vadd.f32 %v12425_v53, %v1826_v54  ;;  %v2600_v56 = vadd.f32 %v12444_v21, %v14040_v38  ;;  %v14041_v37 = vld [vmem:[#allocation26_spill] sm:$0xff]  ;;  %v10133_v53 = vpop.f32.mrf.mxu1 }
 0x256   :  { %4428 = vrot.lane.b32.xlu1 %v8787_v48, %s10826_s9  ;;  %3582 = vst.msk [vmem:[#allocation4 + $0x198] sm:$0xff] %vm3530_vm3, %v3509_v3  ;;  %v3507_v40 = vmax.f32 %v3435_v45, 0.0  ;;  %v3440_v43 = vadd.f32 %v12382_v5, %v3361_v20  ;;  %v3359_v33 = vadd.f32 %v3228_v6, %v2590_v13  ;;  %v3771_v55 = vmax.f32 %v3651_v42, %v3723_v8  ;;  %v14043_v21 = vld [vmem:[#allocation30_spill] sm:$0xff]  ;;  %v14044_v20 = vld [vmem:[#allocation31_spill] sm:$0xff] }
 0x257   :  { %v10197_v26 = vpop.f32.mrf.mxu0  ;;  %3990 = vst.msk [vmem:[#allocation6 + $0x50] sm:$0xf] %vm3969_vm4, %v9323_v12  ;;  %v3649_v14 = vld [vmem:[#allocation4 + $0x160] ss:$2 sm:$0xff]  ;;  %v3721_v0 = vld [vmem:[#allocation4 + $0x161] ss:$2 sm:$0xff]  ;;  %v12538_v10 = vadd.f32 %v12454_v58, %v14041_v37  ;;  %v12542_v36 = vadd.f32 %v12467_v47, %v14042_v34  ;;  %v12547_v15 = vadd.f32 %v12483_v25, %v1830_v62  ;;  %v12550_v17 = vadd.f32 %v10132_v59, %v14043_v21  ;;  %v2510_v31 = vpop.f32.mrf.mxu1 }
 0x258   :  { %3580 = vst.msk [vmem:[#allocation4 + $0x188] sm:$0xff] %vm3530_vm3, %v3507_v40  ;;  %v3512_v57 = vmax.f32 %v3440_v43, 0.0  ;;  %v3438_v35 = vadd.f32 %v12382_v5, %v3359_v33  ;;  %v3362_v4 = vadd.f32 %v10197_v26, %v2593_v60  ;;  %v3770_v28 = vmax.f32 %v3649_v14, %v3721_v0  ;;  %v14045_v25 = vld [vmem:[#allocation83_spill] sm:$0xff]  ;;  %v14046_v59 = vld [vmem:[#allocation82_spill] sm:$0xff] }
 0x259   :  { %v3231_v41 = vpop.f32.mrf.mxu0  ;;  %v12553_v47 = vadd.f32 %v2507_v22, %v14044_v20  ;;  %v1834_v54 = vadd.f32 %v14045_v25, %v12098_v24  ;;  %v12560_v42 = vadd.f32 %v10133_v53, %v14046_v59 }
 0x25a   :  { %4418 = vrot.lane.b32.xlu1 %v4417_v44, %s10828_s11  ;;  %3585 = vst.msk [vmem:[#allocation4 + $0x1b0] sm:$0xff] %vm3530_vm3, %v3512_v57  ;;  %v3510_v11 = vmax.f32 %v3438_v35, 0.0  ;;  %v3441_v2 = vadd.f32 %v12382_v5, %v3362_v4  ;;  %v3360_v49 = vadd.f32 %v3231_v41, %v2591_v27  ;;  %v3811_v29 = vmax.f32 %v3770_v28, %v3771_v55  ;;  %v10136_v41 = vpop.f32.mrf.mxu1 }
 0x25b   :  { %v10200_v51 = vpop.f32.mrf.mxu0 }
 0x25c   :  { %3583 = vst.msk [vmem:[#allocation4 + $0x1a0] sm:$0xff] %vm3530_vm3, %v3510_v11  ;;  %v3513_v48 = vmax.f32 %v3441_v2, 0.0  ;;  %v3439_v39 = vadd.f32 %v12382_v5, %v3360_v49  ;;  %v3365_v18 = vadd.f32 %v10200_v51, %v2596_v46  ;;  %v9325_v45 = vpack.c.bf16 %v3811_v29, %v3811_v29 }
 0x25d   :  { %v3655_v58 = vld [vmem:[#allocation4 + $0x190] ss:$2 sm:$0xff]  ;;  %v3727_v13 = vld [vmem:[#allocation4 + $0x191] ss:$2 sm:$0xff]  ;;  %v3244_v3 = vpop.f32.mrf.mxu0 }
 0x25e   :  { %3586 = vst.msk [vmem:[#allocation4 + $0x1b8] sm:$0xff] %vm3530_vm3, %v3513_v48  ;;  %v3511_v30 = vmax.f32 %v3439_v39, 0.0  ;;  %v3444_v60 = vadd.f32 %v12382_v5, %v3365_v18  ;;  %v3363_v6 = vadd.f32 %v3244_v3, %v2594_v61  ;;  %v4451_v12 = vld [vmem:[#allocation6 + $0x50] sm:$0xf]  ;;  %v3773_v8 = vmax.f32 %v3655_v58, %v3727_v13  ;;  %v14047_v3 = vld [vmem:[#allocation85_spill] sm:$0xff] }
 0x25f   :  { %v4473_v23 = vld [vmem:[#allocation6 + $0x50] sm:$0xe]  ;;  %4453 = vrot.lane.b32.xlu0 %v4451_v12, %s10825_s29  ;;  %v10201_v33 = vpop.f32.mrf.mxu0  ;;  %3992 = vst.msk [vmem:[#allocation6 + $0x58] sm:$0xf] %vm3969_vm4, %v9325_v45  ;;  %v12571_v48 = vadd.f32 %v2510_v31, %v1834_v54 }
 0x260   :  { %v3653_v40 = vld [vmem:[#allocation4 + $0x180] ss:$2 sm:$0xff]  ;;  %v3725_v43 = vld [vmem:[#allocation4 + $0x181] ss:$2 sm:$0xff]  ;;  %v8788_v50 = vrot.slane %v4473_v23, 9  ;;  %3584 = vst.msk [vmem:[#allocation4 + $0x1a8] sm:$0xff] %vm3530_vm3, %v3511_v30  ;;  %v3442_v46 = vadd.f32 %v12382_v5, %v3363_v6  ;;  %v3366_v24 = vadd.f32 %v10201_v33, %v2597_v1 }
 0x261   :  { %v3772_v27 = vmax.f32 %v3653_v40, %v3725_v43  ;;  %v3516_v32 = vmax.f32 %v3444_v60, 0.0  ;;  %v4437_v44 = vld [vmem:[#allocation6 + $0x50] sm:$0xf]  ;;  %v3247_v63 = vpop.f32.mrf.mxu0 }
 0x262   :  { %v4457_v26 = vld [vmem:[#allocation6 + $0x50] sm:$0xf]  ;;  %4477 = vrot.lane.b32.xlu1 %v8788_v50, %s10826_s9  ;;  %v4439_v61 = vshrl.u32 %v4437_v44, 16  ;;  %v4442_v22 = vshll.u32 %v4437_v44, 16  ;;  %v3514_v57 = vmax.f32 %v3442_v46, 0.0  ;;  %v3445_v35 = vadd.f32 %v12382_v5, %v3366_v24 }
 0x263   :  { %v4459_v14 = vshrl.u32 %v4457_v26, 16  ;;  %v4462_v0 = vshll.u32 %v4457_v26, 16  ;;  %3589 = vst.msk [vmem:[#allocation4 + $0x1d0] sm:$0xff] %vm3530_vm3, %v3516_v32  ;;  %v3364_v4 = vadd.f32 %v3247_v63, %v2595_v19  ;;  %v4432_v16 = vld [vmem:[#allocation6 + $0x50] sm:$0x7]  ;;  %v3813_v28 = vmax.f32 %v3772_v27, %v3773_v8 }
 0x264   :  { %v10204_v7 = vpop.f32.mrf.mxu0  ;;  %v4441_v62 = vrot.slane %v4439_v61, 7  ;;  %3587 = vst.msk [vmem:[#allocation4 + $0x1c0] sm:$0xff] %vm3530_vm3, %v3514_v57  ;;  %v3517_v11 = vmax.f32 %v3445_v35, 0.0  ;;  %v4434_v19 = vrot.slane %v4432_v16, 7 }
 0x265   :  { %v4461_v55 = vrot.slane %v4459_v14, 4  ;;  %v4464_v1 = vrot.slane %v4462_v0, 5  ;;  %v3443_v2 = vadd.f32 %v12382_v5, %v3364_v4  ;;  %v3369_v49 = vadd.f32 %v10204_v7, %v2600_v56  ;;  %v3659_v38 = vld [vmem:[#allocation4 + $0x1b0] ss:$2 sm:$0xff]  ;;  %v3731_v37 = vld [vmem:[#allocation4 + $0x1b1] ss:$2 sm:$0xff] }
 0x266   :  { %v4444_v51 = vor.u32 %v4442_v22, %v4441_v62  ;;  %v3260_v29 = vpop.f32.mrf.mxu0  ;;  %v9327_v53 = vpack.c.bf16 %v3813_v28, %v3813_v28  ;;  %3590 = vst.msk [vmem:[#allocation4 + $0x1d8] sm:$0xff] %vm3530_vm3, %v3517_v11  ;;  %v4500_v58 = vld [vmem:[#allocation6 + $0x58] sm:$0xf]  ;;  %v12577_v56 = vadd.f32 %v10136_v41, %v14047_v3  ;;  %v3775_v45 = vmax.f32 %v3659_v38, %v3731_v37  ;;  %v14048_v4 = vld [vmem:[#allocation34_spill] sm:$0xff]  ;;  %v14050_v37 = vld [vmem:[#allocation87_spill] sm:$0xff] }
 0x267   :  { %v4465_v34 = vor.u32 %v4464_v1, %v4461_v55  ;;  %v3515_v39 = vmax.f32 %v3443_v2, 0.0  ;;  %v3448_v18 = vadd.f32 %v12382_v5, %v3369_v49  ;;  %v3367_v21 = vadd.f32 %v3260_v29, %v12538_v10  ;;  %v4486_v13 = vld [vmem:[#allocation6 + $0x58] sm:$0xf]  ;;  %v3657_v20 = vld [vmem:[#allocation4 + $0x1a0] ss:$2 sm:$0xff]  ;;  %4502 = vrot.lane.b32.xlu1 %v4500_v58, %s10825_s29  ;;  %v2523_v10 = vpop.f32.mrf.mxu1 }
 0x268   :  { %v3729_v30 = vld [vmem:[#allocation4 + $0x1a1] ss:$2 sm:$0xff]  ;;  %4445 = vrot.lane.b32.xlu0 %v4444_v51, %s10827_s10  ;;  %v10205_v60 = vpop.f32.mrf.mxu0  ;;  %v4488_v12 = vshrl.u32 %v4486_v13, 16  ;;  %3994 = vst.msk [vmem:[#allocation6 + $0x60] sm:$0xf] %vm3969_vm4, %v9327_v53  ;;  %v4491_v50 = vshll.u32 %v4486_v13, 16  ;;  %v12594_v16 = vadd.f32 %v2523_v10, %v14048_v4 }
 0x269   :  { %v4466_v6 = vrot.slane %v4465_v34, 4  ;;  %4436 = vst.msk [vmem:[#allocation2 + $0x38] sm:$0xe] %vm4035_vm5, %v4434_v19  ;;  %v3774_v23 = vmax.f32 %v3657_v20, %v3729_v30  ;;  %v3520_v25 = vmax.f32 %v3448_v18, 0.0  ;;  %v3446_v54 = vadd.f32 %v12382_v5, %v3367_v21  ;;  %v4522_v8 = vld [vmem:[#allocation6 + $0x58] sm:$0xe]  ;;  %v10137_v14 = vpop.f32.mrf.mxu1 }
 0x26a   :  { %3588 = vst.msk [vmem:[#allocation4 + $0x1c8] sm:$0xff] %vm3530_vm3, %v3515_v39  ;;  %v3370_v59 = vadd.f32 %v10205_v60, %v12542_v36  ;;  %v4506_v40 = vld [vmem:[#allocation6 + $0x58] sm:$0xf]  ;;  %v3263_v43 = vpop.f32.mrf.mxu0  ;;  %v4490_v33 = vrot.slane %v4488_v12, 7  ;;  %v8789_v31 = vrot.slane %v4522_v8, 9  ;;  %v12603_v51 = vadd.f32 %v10137_v14, %v14050_v37 }
 0x26b   :  { %v4508_v27 = vshrl.u32 %v4506_v40, 16  ;;  %3593 = vst.msk [vmem:[#allocation4 + $0x1f0] sm:$0xff] %vm3530_vm3, %v3520_v25  ;;  %v3518_v32 = vmax.f32 %v3446_v54, 0.0  ;;  %v3368_v24 = vadd.f32 %v3263_v43, %v12547_v15  ;;  %v4481_v44 = vld [vmem:[#allocation6 + $0x58] sm:$0x7]  ;;  %v4511_v61 = vshll.u32 %v4506_v40, 16 }
 0x26c   :  { %v3449_v46 = vadd.f32 %v12382_v5, %v3370_v59  ;;  %4467 = vrot.lane.b32.xlu0 %v4466_v6, %s10828_s11  ;;  %v10208_v26 = vpop.f32.mrf.mxu0  ;;  %v4493_v63 = vor.u32 %v4491_v50, %v4490_v33  ;;  %v3815_v22 = vmax.f32 %v3774_v23, %v3775_v45  ;;  %v4483_v28 = vrot.slane %v4481_v44, 7  ;;  %v14049_v41 = vld [vmem:[#allocation88_spill] sm:$0xff]  ;;  %v2526_v59 = vpop.f32.mrf.mxu1 }
 0x26d   :  { %v4510_v36 = vrot.slane %v4508_v27, 4  ;;  %3591 = vst.msk [vmem:[#allocation4 + $0x1e0] sm:$0xff] %vm3530_vm3, %v3518_v32  ;;  %v3447_v57 = vadd.f32 %v12382_v5, %v3368_v24  ;;  %v3373_v35 = vadd.f32 %v10208_v26, %v12550_v17  ;;  %v3663_v15 = vld [vmem:[#allocation4 + $0x1d0] ss:$2 sm:$0xff]  ;;  %v3735_v7 = vld [vmem:[#allocation4 + $0x1d1] ss:$2 sm:$0xff]  ;;  %v1838_v11 = vadd.f32 %v14049_v41, %v12516_v52 }
 0x26e   :  { %v3521_v0 = vmax.f32 %v3449_v46, 0.0  ;;  %4494 = vrot.lane.b32.xlu1 %v4493_v63, %s10827_s10  ;;  %v3276_v62 = vpop.f32.mrf.mxu0  ;;  %v4513_v55 = vrot.slane %v4511_v61, 5  ;;  %v9329_v1 = vpack.c.bf16 %v3815_v22, %v3815_v22  ;;  %v3777_v29 = vmax.f32 %v3663_v15, %v3735_v7  ;;  %4485 = vst.msk [vmem:[#allocation2 + $0x3c] sm:$0xe] %vm4035_vm5, %v4483_v28 }
 0x26f   :  { %v3519_v2 = vmax.f32 %v3447_v57, 0.0  ;;  %v3452_v49 = vadd.f32 %v12382_v5, %v3373_v35  ;;  %v3371_v17 = vadd.f32 %v3276_v62, %v12553_v47  ;;  %v4571_v38 = vld [vmem:[#allocation6 + $0x60] sm:$0xe] }
 0x270   :  { %3594 = vst.msk [vmem:[#allocation4 + $0x1f8] sm:$0xff] %vm3530_vm3, %v3521_v0  ;;  %4526 = vrot.lane.b32.xlu0 %v8789_v31, %s10826_s9  ;;  %v10209_v19 = vpop.f32.mrf.mxu0  ;;  %v4514_v39 = vor.u32 %v4513_v55, %v4510_v36  ;;  %v8790_v18 = vrot.slane %v4571_v38, 9  ;;  %v4535_v13 = vld [vmem:[#allocation6 + $0x60] sm:$0xf]  ;;  %v2607_v36 = vadd.f32 %v2526_v59, %v1838_v11 }
 0x271   :  { %v3661_v34 = vld [vmem:[#allocation4 + $0x1c0] ss:$2 sm:$0xff]  ;;  %v3733_v53 = vld [vmem:[#allocation4 + $0x1c1] ss:$2 sm:$0xff]  ;;  %3996 = vst.msk [vmem:[#allocation6 + $0x68] sm:$0xf] %vm3969_vm4, %v9329_v1  ;;  %v3450_v21 = vadd.f32 %v12382_v5, %v3371_v17  ;;  %v3374_v58 = vadd.f32 %v10209_v19, %v12560_v42 }
 0x272   :  { %v3776_v52 = vmax.f32 %v3661_v34, %v3733_v53  ;;  %3592 = vst.msk [vmem:[#allocation4 + $0x1e8] sm:$0xff] %vm3530_vm3, %v3519_v2  ;;  %v3524_v47 = vmax.f32 %v3452_v49, 0.0  ;;  %v4555_v3 = vld [vmem:[#allocation6 + $0x60] sm:$0xf]  ;;  %v4515_v45 = vrot.slane %v4514_v39, 4  ;;  %v3279_v20 = vpop.f32.mrf.mxu0  ;;  %v4537_v30 = vshrl.u32 %v4535_v13, 16 }
 0x273   :  { %v4540_v60 = vshll.u32 %v4535_v13, 16  ;;  %v4557_v6 = vshrl.u32 %v4555_v3, 16  ;;  %v3522_v12 = vmax.f32 %v3450_v21, 0.0  ;;  %v3453_v10 = vadd.f32 %v12382_v5, %v3374_v58  ;;  %v4549_v23 = vld [vmem:[#allocation6 + $0x60] sm:$0xf] }
 0x274   :  { %3597 = vst.msk [vmem:[#allocation4 + $0x210] sm:$0xff] %vm3530_vm3, %v3524_v47  ;;  %v3372_v25 = vadd.f32 %v3279_v20, %v12571_v48  ;;  %v4530_v54 = vld [vmem:[#allocation6 + $0x60] sm:$0x7]  ;;  %4516 = vrot.lane.b32.xlu1 %v4515_v45, %s10828_s11  ;;  %4551 = vrot.lane.b32.xlu0 %v4549_v23, %s10825_s29  ;;  %v10212_v42 = vpop.f32.mrf.mxu0  ;;  %v4539_v8 = vrot.slane %v4537_v30, 7  ;;  %v4560_v43 = vshll.u32 %v4555_v3, 16  ;;  %v3817_v33 = vmax.f32 %v3776_v52, %v3777_v29 }
 0x275   :  { %v4559_v40 = vrot.slane %v4557_v6, 4  ;;  %3595 = vst.msk [vmem:[#allocation4 + $0x200] sm:$0xff] %vm3530_vm3, %v3522_v12  ;;  %v3525_v50 = vmax.f32 %v3453_v10, 0.0  ;;  %v3377_v27 = vadd.f32 %v10212_v42, %v12577_v56  ;;  %v4532_v63 = vrot.slane %v4530_v54, 7 }
 0x276   :  { %v3451_v31 = vadd.f32 %v12382_v5, %v3372_v25  ;;  %v4542_v46 = vor.u32 %v4540_v60, %v4539_v8  ;;  %v3292_v24 = vpop.f32.mrf.mxu0  ;;  %v4562_v44 = vrot.slane %v4560_v43, 5  ;;  %v9331_v26 = vpack.c.bf16 %v3817_v33, %v3817_v33 }
 0x277   :  { %v3667_v32 = vld [vmem:[#allocation4 + $0x1f0] ss:$2 sm:$0xff]  ;;  %v3739_v48 = vld [vmem:[#allocation4 + $0x1f1] ss:$2 sm:$0xff]  ;;  %3598 = vst.msk [vmem:[#allocation4 + $0x218] sm:$0xff] %vm3530_vm3, %v3525_v50  ;;  %v3456_v22 = vadd.f32 %v12382_v5, %v3377_v27  ;;  %v3375_v14 = vadd.f32 %v3292_v24, %v12594_v16  ;;  %v12643_v50 = vld [vmem:[%s13860_s3 + $0x20] sm:$0xff]  }
 0x278   :  { %v3523_v61 = vmax.f32 %v3451_v31, 0.0  ;;  %v4584_v0 = vld [vmem:[#allocation6 + $0x68] sm:$0xf]  ;;  %v3779_v57 = vmax.f32 %v3667_v32, %v3739_v48  ;;  %4575 = vrot.lane.b32.xlu1 %v8790_v18, %s10826_s9  ;;  %4543 = vrot.lane.b32.xlu0 %v4542_v46, %s10827_s10  ;;  %v10213_v56 = vpop.f32.mrf.mxu0  ;;  %v4563_v15 = vor.u32 %v4562_v44, %v4559_v40  ;;  %3998 = vst.msk [vmem:[#allocation6 + $0x70] sm:$0xf] %vm3969_vm4, %v9331_v26 }
 0x279   :  { %v3665_v35 = vld [vmem:[#allocation4 + $0x1e0] ss:$2 sm:$0xff]  ;;  %v3737_v4 = vld [vmem:[#allocation4 + $0x1e1] ss:$2 sm:$0xff]  ;;  %v4586_v7 = vshrl.u32 %v4584_v0, 16  ;;  %v4589_v62 = vshll.u32 %v4584_v0, 16  ;;  %v3454_v1 = vadd.f32 %v12382_v5, %v3375_v14  ;;  %v3378_v28 = vadd.f32 %v10213_v56, %v12603_v51  ;;  %10244 = vmatprep.subr.bf16.mxu1 %v12643_v50 }
 0x27a   :  { %4534 = vst.msk [vmem:[#allocation2 + $0x40] sm:$0xe] %vm4035_vm5, %v4532_v63  ;;  %v3778_v55 = vmax.f32 %v3665_v35, %v3737_v4  ;;  %v3528_v16 = vmax.f32 %v3456_v22, 0.0  ;;  %v4604_v41 = vld [vmem:[#allocation6 + $0x68] sm:$0xf]  ;;  %v4564_v11 = vrot.slane %v4563_v15, 4  ;;  %v3295_v2 = vpop.f32.mrf.mxu0 }
 0x27b   :  { %3596 = vst.msk [vmem:[#allocation4 + $0x208] sm:$0xff] %vm3530_vm3, %v3523_v61  ;;  %v4588_v49 = vrot.slane %v4586_v7, 7  ;;  %v4606_v17 = vshrl.u32 %v4604_v41, 16  ;;  %v4609_v38 = vshll.u32 %v4604_v41, 16  ;;  %v3526_v37 = vmax.f32 %v3454_v1, 0.0 }
 0x27c   :  { %3601 = vst.msk [vmem:[#allocation4 + $0x230] sm:$0xff] %vm3530_vm3, %v3528_v16  ;;  %v3457_v29 = vadd.f32 %v12382_v5, %v3378_v28  ;;  %v4598_v34 = vld [vmem:[#allocation6 + $0x68] sm:$0xf]  ;;  %v3376_v53 = vadd.f32 %v3295_v2, %v2607_v36  ;;  %4565 = vrot.lane.b32.xlu0 %v4564_v11, %s10828_s11  ;;  %v3819_v18 = vmax.f32 %v3778_v55, %v3779_v57  ;;  %v4051_v61 = vld [vmem:[#allocation2 + $0x8] sm:$0xf] }
 0x27d   :  { %v4579_v19 = vld [vmem:[#allocation6 + $0x68] sm:$0x7]  ;;  %4600 = vrot.lane.b32.xlu1 %v4598_v34, %s10825_s29  ;;  %v4591_v39 = vor.u32 %v4589_v62, %v4588_v49  ;;  %v4608_v51 = vrot.slane %v4606_v17, 4  ;;  %3599 = vst.msk [vmem:[#allocation4 + $0x220] sm:$0xff] %vm3530_vm3, %v3526_v37  ;;  %v4611_v21 = vrot.slane %v4609_v38, 5 }
 0x27e   :  { %v3529_v52 = vmax.f32 %v3457_v29, 0.0  ;;  %v3455_v47 = vadd.f32 %v12382_v5, %v3376_v53  ;;  %v3671_v58 = vld [vmem:[#allocation4 + $0x210] ss:$2 sm:$0xff]  ;;  %v3743_v13 = vld [vmem:[#allocation4 + $0x211] ss:$2 sm:$0xff]  ;;  %v9333_v3 = vpack.c.bf16 %v3819_v18, %v3819_v18  ;;  %v4581_v45 = vrot.slane %v4579_v19, 7 }
 0x27f   :  { %v4633_v30 = vld [vmem:[#allocation6 + $0x70] sm:$0xf]  ;;  %v3781_v10 = vmax.f32 %v3671_v58, %v3743_v13  ;;  %v4612_v23 = vor.u32 %v4611_v21, %v4608_v51  ;;  %v4620_v21 = vld [vmem:[#allocation6 + $0x68] sm:$0xe] }
 0x280   :  { %3602 = vst.msk [vmem:[#allocation4 + $0x238] sm:$0xff] %vm3530_vm3, %v3529_v52  ;;  %v3527_v20 = vmax.f32 %v3455_v47, 0.0  ;;  %4592 = vrot.lane.b32.xlu0 %v4591_v39, %s10827_s10  ;;  %v4635_v12 = vshrl.u32 %v4633_v30, 16  ;;  %v4653_v25 = vld [vmem:[#allocation6 + $0x70] sm:$0xf]  ;;  %v4638_v59 = vshll.u32 %v4633_v30, 16 }
 0x281   :  { %4000 = vst.msk [vmem:[#allocation6 + $0x78] sm:$0xf] %vm3969_vm4, %v9333_v3  ;;  %v4655_v42 = vshrl.u32 %v4653_v25, 16  ;;  %v4658_v8 = vshll.u32 %v4653_v25, 16  ;;  %v4647_v40 = vld [vmem:[#allocation6 + $0x70] sm:$0xf]  ;;  %v4057_v55 = vpop.permute.xlu1 %4056 }
 0x282   :  { %v3669_v60 = vld [vmem:[#allocation4 + $0x200] ss:$2 sm:$0xff]  ;;  %v3741_v6 = vld [vmem:[#allocation4 + $0x201] ss:$2 sm:$0xff]  ;;  %4583 = vst.msk [vmem:[#allocation2 + $0x44] sm:$0xe] %vm4035_vm5, %v4581_v45 }
 0x283   :  { %v3780_v5 = vmax.f32 %v3669_v60, %v3741_v6  ;;  %3600 = vst.msk [vmem:[#allocation4 + $0x228] sm:$0xff] %vm3530_vm3, %v3527_v20  ;;  %v4637_v54 = vrot.slane %v4635_v12, 7  ;;  %v4628_v33 = vld [vmem:[#allocation6 + $0x70] sm:$0x7]  ;;  %v4657_v27 = vrot.slane %v4655_v42, 4  ;;  %v4660_v32 = vrot.slane %v4658_v8, 5 }
 0x284   :  { %4649 = vrot.lane.b32.xlu0 %v4647_v40, %s10825_s29  ;;  %v4630_v48 = vrot.slane %v4628_v33, 7  ;;  %v4613_v26 = vrot.slane %v4612_v23, 4  ;;  %v4669_v42 = vld [vmem:[#allocation6 + $0x70] sm:$0xe]  ;;  %v4105_v33 = vld [vmem:[#allocation2 + $0xc] sm:$0xf] }
 0x285   :  { %v3821_v43 = vmax.f32 %v3780_v5, %v3781_v10  ;;  %v4640_v31 = vor.u32 %v4638_v59, %v4637_v54  ;;  %v4661_v35 = vor.u32 %v4660_v32, %v4657_v27  ;;  %v4085_v18 = vpop.permute.xlu1 %4084  ;;  %v8791_v59 = vrot.slane %v4620_v21, 9  ;;  %v10672_v52 = vld [vmem:[%s13860_s3 + $0x60] sm:$0xff]  }
 0x286   :  { %4632 = vst.msk [vmem:[#allocation2 + $0x48] sm:$0xe] %vm4035_vm5, %v4630_v48  ;;  %vm6365_vm3 = vcmask 517120  }
 0x287   :  { %v9335_v46 = vpack.c.bf16 %v3821_v43, %v3821_v43  ;;  %v3675_v24 = vld [vmem:[#allocation4 + $0x230] ss:$2 sm:$0xff]  ;;  %v3747_v44 = vld [vmem:[#allocation4 + $0x231] ss:$2 sm:$0xff]  ;;  %4641 = vrot.lane.b32.xlu1 %v4640_v31, %s10827_s10  ;;  %v4662_v49 = vrot.slane %v4661_v35, 4  ;;  %v8792_v31 = vrot.slane %v4669_v42, 9 }
 0x288   :  { %v3783_v36 = vmax.f32 %v3675_v24, %v3747_v44  ;;  %v4682_v22 = vld [vmem:[#allocation6 + $0x78] sm:$0xf]  ;;  %4614 = vrot.lane.b32.xlu0 %v4613_v26, %s10828_s11 }
 0x289   :  { %4002 = vst.msk [vmem:[#allocation6 + $0x80] sm:$0xf] %vm3969_vm4, %v9335_v46  ;;  %v4046_v57 = vpop.permute.xlu0 %4045  ;;  %v4684_v4 = vshrl.u32 %v4682_v22, 16  ;;  %v4696_v7 = vld [vmem:[#allocation6 + $0x78] sm:$0xf]  ;;  %v4687_v1 = vshll.u32 %v4682_v22, 16 }
 0x28a   :  { %v3673_v14 = vld [vmem:[#allocation4 + $0x220] ss:$2 sm:$0xff]  ;;  %v3745_v0 = vld [vmem:[#allocation4 + $0x221] ss:$2 sm:$0xff]  ;;  %v4052_v15 = vsel %vm12650_vm8, %v4046_v57, %v4051_v61  ;;  %v4702_v62 = vld [vmem:[#allocation6 + $0x78] sm:$0xf] }
 0x28b   :  { %v3782_v56 = vmax.f32 %v3673_v14, %v3745_v0  ;;  %4053 = vst [vmem:[#allocation2 + $0x8] sm:$0xf] %v4052_v15  ;;  %4698 = vrot.lane.b32.xlu1 %v4696_v7, %s10825_s29  ;;  %v4686_v16 = vrot.slane %v4684_v4, 7  ;;  %v4677_v28 = vld [vmem:[#allocation6 + $0x78] sm:$0x7]  ;;  %v4704_v38 = vshrl.u32 %v4702_v62, 16 }
 0x28c   :  { %4060 = vst.msk [vmem:[#allocation2 + $0x8] sm:$0xf] %vm4059_vm9, %v4057_v55  ;;  %v4679_v11 = vrot.slane %v4677_v28, 7  ;;  %v4707_v37 = vshll.u32 %v4702_v62, 16  ;;  %v4718_v32 = vld [vmem:[#allocation6 + $0x78] sm:$0xe] }
 0x28d   :  { %v3823_v41 = vmax.f32 %v3782_v56, %v3783_v36  ;;  %v12661_v2 = vpop.permute.xlu0 %4110  ;;  %v4689_v17 = vor.u32 %v4687_v1, %v4686_v16  ;;  %v4706_v58 = vrot.slane %v4704_v38, 4  ;;  %v12683_v14 = vld [vmem:[#allocation2 + $0x4] sm:$0xf]  ;;  %v8793_v35 = vrot.slane %v4718_v32, 9 }
 0x28e   :  { %4681 = vst.msk [vmem:[#allocation2 + $0x4c] sm:$0xe] %vm4035_vm5, %v4679_v11  ;;  %v4709_v13 = vrot.slane %v4707_v37, 5  ;;  %v4154_v11 = vld [vmem:[#allocation2 + $0x10] sm:$0xf] }
 0x28f   :  { %v9337_v29 = vpack.c.bf16 %v3823_v41, %v3823_v41  ;;  %4663 = vrot.lane.b32.xlu1 %v4662_v49, %s10828_s11  ;;  %4690 = vrot.lane.b32.xlu0 %v4689_v17, %s10827_s10 }
 0x290   :  { %v4731_v34 = vld [vmem:[#allocation6 + $0x80] sm:$0xf]  ;;  %v4710_v8 = vor.u32 %v4709_v13, %v4706_v58 }
 0x291   :  { %v4751_v53 = vld [vmem:[#allocation6 + $0x80] sm:$0xf]  ;;  %4004 = vst.msk [vmem:[#allocation6 + $0x88] sm:$0xf] %vm3969_vm4, %v9337_v29  ;;  %v4733_v19 = vshrl.u32 %v4731_v34, 16  ;;  %v4072_v47 = vpop.permute.xlu0 %4071  ;;  %v4736_v30 = vshll.u32 %v4731_v34, 16 }
 0x292   :  { %v4753_v39 = vshrl.u32 %v4751_v53, 16  ;;  %v4756_v51 = vshll.u32 %v4751_v53, 16  ;;  %v4726_v3 = vld [vmem:[#allocation6 + $0x80] sm:$0x7]  ;;  %v4711_v44 = vrot.slane %v4710_v8, 4  ;;  %vm6442_vm4 = vcmask 518146  }
 0x293   :  { %v4745_v45 = vld [vmem:[#allocation6 + $0x80] sm:$0xf]  ;;  %v4735_v20 = vrot.slane %v4733_v19, 7  ;;  %v4728_v60 = vrot.slane %v4726_v3, 7  ;;  %v4077_v6 = vld [vmem:[#allocation2 + $0x8] sm:$0xf] }
 0x294   :  { %4747 = vrot.lane.b32.xlu0 %v4745_v45, %s10825_s29  ;;  %v4078_v12 = vsel %vm12668_vm12, %v4072_v47, %v4077_v6  ;;  %v4755_v5 = vrot.slane %v4753_v39, 4  ;;  %v4758_v23 = vrot.slane %v4756_v51, 5  ;;  %v4160_v25 = vpop.permute.xlu1 %4159  ;;  %v4767_v4 = vld [vmem:[#allocation6 + $0x80] sm:$0xe] }
 0x295   :  { %v4738_v10 = vor.u32 %v4736_v30, %v4735_v20  ;;  %4730 = vst.msk [vmem:[#allocation2 + $0x50] sm:$0xe] %vm4035_vm5, %v4728_v60  ;;  %4079 = vst [vmem:[#allocation2 + $0x8] sm:$0xf] %v4078_v12  ;;  %v4135_v54 = vpop.permute.xlu0 %4134  ;;  %v8794_v41 = vrot.slane %v4767_v4, 9 }
 0x296   :  { %4088 = vst.msk [vmem:[#allocation2 + $0x8] sm:$0x7] %vm4087_vm13, %v4085_v18  ;;  %v4759_v27 = vor.u32 %v4758_v23, %v4755_v5  ;;  %v4203_v18 = vld [vmem:[#allocation2 + $0x14] sm:$0xf]  ;;  %v4252_v5 = vld [vmem:[#allocation2 + $0x18] sm:$0xf] }
 0x297   :  { %4739 = vrot.lane.b32.xlu1 %v4738_v10, %s10827_s10 }
 0x298   :  { %4624 = vrot.lane.b32.xlu0 %v8791_v59, %s10826_s9  ;;  %v4780_v40 = vld [vmem:[#allocation6 + $0x88] sm:$0xf]  ;;  %v4125_v46 = vpop.permute.xlu1 %4124  ;;  %v4760_v57 = vrot.slane %v4759_v27, 4 }
 0x299   :  { %v4800_v43 = vld [vmem:[#allocation6 + $0x88] sm:$0xf]  ;;  %v4782_v48 = vshrl.u32 %v4780_v40, 16  ;;  %v4103_v24 = vpop.permute.xlu0 %4102  ;;  %v4785_v28 = vshll.u32 %v4780_v40, 16 }
 0x29a   :  { %v4802_v26 = vshrl.u32 %v4800_v43, 16  ;;  %v4805_v36 = vshll.u32 %v4800_v43, 16  ;;  %v4775_v61 = vld [vmem:[#allocation6 + $0x88] sm:$0x7]  ;;  %v4106_v22 = vsel %vm12650_vm8, %v4103_v24, %v4105_v33  ;;  %v10660_v43 = vld [vmem:[%s13860_s3 + $0x18] sm:$0xff]  }
 0x29b   :  { %4673 = vrot.lane.b32.xlu1 %v8792_v31, %s10826_s9  ;;  %4107 = vst [vmem:[#allocation2 + $0xc] sm:$0xf] %v4106_v22  ;;  %v4777_v0 = vrot.slane %v4775_v61, 7  ;;  %v4784_v56 = vrot.slane %v4782_v48, 7  ;;  %v4794_v19 = vld [vmem:[#allocation6 + $0x88] sm:$0xf] }
 0x29c   :  { %4712 = vrot.lane.b32.xlu0 %v4711_v44, %s10828_s11  ;;  %4113 = vst.msk [vmem:[#allocation2 + $0xc] sm:$0xf] %vm4059_vm9, %v12661_v2  ;;  %v4184_v15 = vpop.permute.xlu1 %4183  ;;  %v4804_v62 = vrot.slane %v4802_v26, 4  ;;  %v4807_v55 = vrot.slane %v4805_v36, 5  ;;  %v4816_v51 = vld [vmem:[#allocation6 + $0x88] sm:$0xe] }
 0x29d   :  { %v12687_v7 = vld [vmem:[#allocation2 + $0x8] sm:$0xf]  ;;  %4779 = vst.msk [vmem:[#allocation2 + $0x54] sm:$0xe] %vm4035_vm5, %v4777_v0  ;;  %v4787_v49 = vor.u32 %v4785_v28, %v4784_v56  ;;  %v8795_v58 = vrot.slane %v4816_v51, 9  ;;  %v10661_v48 = vld [vmem:[%s13860_s3 + $0x10] sm:$0xff]  }
 0x29e   :  { %v8806_v16 = vcombine.low %v12683_v14, %v12687_v7  ;;  %v4174_v1 = vpop.permute.xlu0 %4173  ;;  %v4808_v17 = vor.u32 %v4807_v55, %v4804_v62  ;;  %v4301_v33 = vld [vmem:[#allocation2 + $0x1c] sm:$0xf]  ;;  %v4350_v61 = vld [vmem:[#allocation2 + $0x20] sm:$0xf]  ;;  %v4399_v55 = vld [vmem:[#allocation2 + $0x24] sm:$0xf] }
 0x29f   :  { %4761 = vrot.lane.b32.xlu1 %v4760_v57, %s10828_s11  ;;  %v10666_v57 = vld [vmem:[%s13860_s3 + $0x8] sm:$0xff]   ;;  %v10668_v62 = vld [vmem:[%s13860_s3] sm:$0xff]   ;;  %vm6346_vm5 = vcmask 517121  }
 0x2a0   :  { %4722 = vrot.lane.b32.xlu0 %v8793_v35, %s10826_s9  ;;  %10224 = vmatprep.mubr.msk.bf16.mxu1 %vm4946_vm14, %v8806_v16  ;;  %v4152_v2 = vpop.permute.xlu1 %4151  ;;  %v4809_v39 = vrot.slane %v4808_v17, 4 }
 0x2a1   :  { %v4155_v38 = vsel %vm12650_vm8, %v4152_v2, %v4154_v11  ;;  %v12767_v2 = vld [vmem:[%s13860_s3 + $0x70] sm:$0xff]  }
 0x2a2   :  { %4156 = vst [vmem:[#allocation2 + $0x10] sm:$0xf] %v4155_v38  ;;  %v4233_v29 = vpop.permute.xlu0 %4232 }
 0x2a3   :  { %4771 = vrot.lane.b32.xlu1 %v8794_v41, %s10826_s9  ;;  %v4127_v37 = vld [vmem:[#allocation2 + $0xc] sm:$0xf]  ;;  %4162 = vst.msk [vmem:[#allocation2 + $0x10] sm:$0xf] %vm4059_vm9, %v4160_v25 }
 0x2a4   :  { %4788 = vrot.lane.b32.xlu0 %v4787_v49, %s10827_s10  ;;  %v4128_v34 = vsel %vm12668_vm12, %v4125_v46, %v4127_v37  ;;  %v4209_v53 = vpop.permute.xlu1 %4208 }
 0x2a5   :  { %4129 = vst [vmem:[#allocation2 + $0xc] sm:$0xf] %v4128_v34 }
 0x2a6   :  { %4137 = vst.msk [vmem:[#allocation2 + $0xc] sm:$0x7] %vm4087_vm13, %v4135_v54  ;;  %v4201_v47 = vpop.permute.xlu0 %4200 }
 0x2a7   :  { %4796 = vrot.lane.b32.xlu1 %v4794_v19, %s10825_s29  ;;  %v4204_v21 = vsel %vm12650_vm8, %v4201_v47, %v4203_v18  ;;  %v12787_v47 = vld [vmem:[#allocation2 + $0x28] sm:$0xf] }
 0x2a8   :  { %4810 = vrot.lane.b32.xlu0 %v4809_v39, %s10828_s11  ;;  %4205 = vst [vmem:[#allocation2 + $0x14] sm:$0xf] %v4204_v21  ;;  %v4223_v13 = vpop.permute.xlu1 %4222  ;;  %v12789_v21 = vld [vmem:[#allocation2 + $0x2c] sm:$0xf] }
 0x2a9   :  { %4211 = vst.msk [vmem:[#allocation2 + $0x14] sm:$0xf] %vm4059_vm9, %v4209_v53 }
 0x2aa   :  { %v4176_v3 = vld [vmem:[#allocation2 + $0x10] sm:$0xf]  ;;  %v4258_v45 = vpop.permute.xlu0 %4257 }
 0x2ab   :  { %4820 = vrot.lane.b32.xlu1 %v8795_v58, %s10826_s9  ;;  %v4177_v20 = vsel %vm12668_vm12, %v4174_v1, %v4176_v3  ;;  %v12791_v58 = vld [vmem:[#allocation2 + $0x30] sm:$0xf] }
 0x2ac   :  { %4178 = vst [vmem:[#allocation2 + $0x10] sm:$0xf] %v4177_v20  ;;  %v4282_v60 = vpop.permute.xlu1 %4281  ;;  %v10657_v3 = vld [vmem:[#allocation2 + $0x30] sm:$0xff]  }
 0x2ad   :  { %v12711_v30 = vld [vmem:[#allocation2 + $0xc] sm:$0xf]  ;;  %4186 = vst.msk [vmem:[#allocation2 + $0x10] sm:$0x7] %vm4087_vm13, %v4184_v15 }
 0x2ae   :  { %v8832_v6 = vcombine.low %v12687_v7, %v12711_v30  ;;  %v4272_v12 = vpop.permute.xlu0 %4271  ;;  %v10673_v7 = vld [vmem:[%s13860_s3 + $0x58] sm:$0xff]  }
 0x2b0   :  { %v4225_v10 = vld [vmem:[#allocation2 + $0x14] sm:$0xf]  ;;  %v4250_v23 = vpop.permute.xlu1 %4249 }
 0x2b1   :  { %v4226_v25 = vsel %vm12668_vm12, %v4223_v13, %v4225_v10  ;;  %v4253_v54 = vsel %vm12650_vm8, %v4250_v23, %v4252_v5  ;;  %v10656_v13 = vld [vmem:[#allocation2 + $0x28] sm:$0xff]   ;;  %v8811_v10 = vcombine.low %v12789_v21, %v12791_v58 }
 0x2b2   :  { %4227 = vst [vmem:[#allocation2 + $0x14] sm:$0xf] %v4226_v25  ;;  %4254 = vst [vmem:[#allocation2 + $0x18] sm:$0xf] %v4253_v54  ;;  %v4331_v59 = vpop.permute.xlu0 %4330  ;;  %v4448_v25 = vld [vmem:[#allocation2 + $0x38] sm:$0xf] }
 0x2b3   :  { %4235 = vst.msk [vmem:[#allocation2 + $0x14] sm:$0x7] %vm4087_vm13, %v4233_v29 }
 0x2b4   :  { %4260 = vst.msk [vmem:[#allocation2 + $0x18] sm:$0xf] %vm4059_vm9, %v4258_v45  ;;  %v12722_v42 = vld [vmem:[#allocation2 + $0x10] sm:$0xf]  ;;  %v4307_v8 = vpop.permute.xlu1 %4306 }
 0x2b5   :  { %v8807_v40 = vcombine.low %v12711_v30, %v12722_v42  ;;  %v10674_v30 = vld [vmem:[%s13860_s3 + $0x50] sm:$0xff]  }
 0x2b6   :  { %v4299_v31 = vpop.permute.xlu0 %4298 }
 0x2b7   :  { %v4302_v27 = vsel %vm12650_vm8, %v4299_v31, %v4301_v33  ;;  %10225 = vmatmul.mubr.msk.bf16.vlgmr.msra.gmra.mxu1 %vm4946_vm14, %v8807_v40 }
 0x2b8   :  { %4303 = vst [vmem:[#allocation2 + $0x1c] sm:$0xf] %v4302_v27  ;;  %v4380_v32 = vpop.permute.xlu1 %4379  ;;  %10245 = vmatpush3.bf16.msra.mxu1 %v12643_v50 }
 0x2b9   :  { %4309 = vst.msk [vmem:[#allocation2 + $0x1c] sm:$0xf] %vm4059_vm9, %v4307_v8  ;;  %10246 = vmatprep.subr.bf16.mxu1 %v10660_v43 }
 0x2ba   :  { %v4356_v24 = vpop.permute.xlu0 %4355  ;;  %v10641_v44 = vld [vmem:[#allocation2 + $0x10] sm:$0xff]  }
 0x2bb   :  { %v4274_v46 = vld [vmem:[#allocation2 + $0x18] sm:$0xf]  ;;  %v12739_v36 = vld [vmem:[#allocation2 + $0x14] sm:$0xf]  ;;  %10344 = vmatprep.mubr.msk.bf16.mxu0 %vm4946_vm14, %v10641_v44 }
 0x2bc   :  { %v4275_v26 = vsel %vm12668_vm12, %v4272_v12, %v4274_v46  ;;  %v4348_v22 = vpop.permute.xlu1 %4347  ;;  %10247 = vmatpush3.bf16.msra.mxu1 %v10660_v43  ;;  %v8833_v50 = vcombine.low %v12722_v42, %v12739_v36  ;;  %v4497_v43 = vld [vmem:[#allocation2 + $0x3c] sm:$0xf] }
 0x2bd   :  { %4276 = vst [vmem:[#allocation2 + $0x18] sm:$0xf] %v4275_v26  ;;  %v4351_v0 = vsel %vm12650_vm8, %v4348_v22, %v4350_v61  ;;  %10248 = vmatprep.subr.bf16.mxu1 %v10661_v48  ;;  %v4546_v26 = vld [vmem:[#allocation2 + $0x40] sm:$0xf] }
 0x2be   :  { %4284 = vst.msk [vmem:[#allocation2 + $0x18] sm:$0x7] %vm4087_vm13, %v4282_v60  ;;  %4352 = vst [vmem:[#allocation2 + $0x20] sm:$0xf] %v4351_v0  ;;  %v4321_v35 = vpop.permute.xlu0 %4320 }
 0x2bf   :  { %4358 = vst.msk [vmem:[#allocation2 + $0x20] sm:$0xf] %vm4059_vm9, %v4356_v24 }
 0x2c0   :  { %v4323_v4 = vld [vmem:[#allocation2 + $0x1c] sm:$0xf]  ;;  %v4405_v56 = vpop.permute.xlu1 %4404  ;;  %10249 = vmatpush3.bf16.msra.mxu1 %v10661_v48 }
 0x2c1   :  { %v4324_v15 = vsel %vm12668_vm12, %v4321_v35, %v4323_v4  ;;  %10250 = vmatprep.subr.bf16.mxu1 %v10666_v57 }
 0x2c2   :  { %4325 = vst [vmem:[#allocation2 + $0x1c] sm:$0xf] %v4324_v15  ;;  %v4397_v16 = vpop.permute.xlu0 %4396 }
 0x2c3   :  { %4333 = vst.msk [vmem:[#allocation2 + $0x1c] sm:$0x7] %vm4087_vm13, %v4331_v59  ;;  %v4400_v1 = vsel %vm12650_vm8, %v4397_v16, %v4399_v55 }
 0x2c4   :  { %4401 = vst [vmem:[#allocation2 + $0x24] sm:$0xf] %v4400_v1  ;;  %v4370_v28 = vpop.permute.xlu1 %4369  ;;  %10251 = vmatpush3.bf16.msra.mxu1 %v10666_v57  ;;  %v12819_v57 = vld [vmem:[#allocation2 + $0x34] sm:$0xf] }
 0x2c5   :  { %v12759_v41 = vld [vmem:[#allocation2 + $0x18] sm:$0xf]  ;;  %4407 = vst.msk [vmem:[#allocation2 + $0x24] sm:$0xf] %vm4059_vm9, %v4405_v56  ;;  %10252 = vmatprep.subr.bf16.mxu1 %v10668_v62  ;;  %v8837_v42 = vcombine.low %v12791_v58, %v12819_v57  ;;  %v10681_v58 = vld [vmem:[#allocation2 + $0x28] sm:$0xff]  }
 0x2c6   :  { %v8808_v11 = vcombine.low %v12739_v36, %v12759_v41  ;;  %v4372_v49 = vld [vmem:[#allocation2 + $0x20] sm:$0xf]  ;;  %v10677_v36 = vld [vmem:[%s13860_s3 + $0x98] sm:$0xff]  }
 0x2c7   :  { %v4373_v17 = vsel %vm12668_vm12, %v4370_v28, %v4372_v49 }
 0x2c8   :  { %10228 = vmatprep.mubr.msk.bf16.mxu1 %vm4946_vm14, %v8808_v11  ;;  %4374 = vst [vmem:[#allocation2 + $0x20] sm:$0xf] %v4373_v17  ;;  %v4429_v38 = vpop.permute.xlu1 %4428  ;;  %10253 = vmatpush3.bf16.msra.mxu1 %v10668_v62  ;;  %v4595_v62 = vld [vmem:[#allocation2 + $0x44] sm:$0xf] }
 0x2c9   :  { %4382 = vst.msk [vmem:[#allocation2 + $0x20] sm:$0x7] %vm4087_vm13, %v4380_v32  ;;  %10274 = vmatprep.subr.bf16.mxu1 %v12767_v2 }
 0x2ca   :  { %v12774_v37 = vld [vmem:[#allocation2 + $0x1c] sm:$0xf] }
 0x2cb   :  { %v10648_v29 = vld [vmem:[#allocation2 + $0x18] sm:$0xff]   ;;  %v8834_v34 = vcombine.low %v12759_v41, %v12774_v37 }
 0x2cc   :  { %v4419_v53 = vpop.permute.xlu1 %4418  ;;  %v4421_v19 = vld [vmem:[#allocation2 + $0x24] sm:$0xf]  ;;  %10345 = vmatmul.mubr.msk.bf16.vlgmr.msra.gmra.mxu0 %vm4946_vm14, %v10648_v29 }
 0x2cd   :  { %v4422_v39 = vsel %vm12668_vm12, %v4419_v53, %v4421_v19 }
 0x2ce   :  { %4423 = vst [vmem:[#allocation2 + $0x24] sm:$0xf] %v4422_v39 }
 0x2cf   :  { %4431 = vst.msk [vmem:[#allocation2 + $0x24] sm:$0x7] %vm4087_vm13, %v4429_v38  ;;  %v4644_v38 = vld [vmem:[#allocation2 + $0x48] sm:$0xf] }
 0x2d0   :  { %v12782_v51 = vld [vmem:[#allocation2 + $0x20] sm:$0xf] }
 0x2d1   :  { %v8809_v18 = vcombine.low %v12774_v37, %v12782_v51  ;;  %v4454_v45 = vpop.permute.xlu0 %4453  ;;  %v10675_v37 = vld [vmem:[#allocation2 + $0x8] sm:$0xff]  }
 0x2d3   :  { %10229 = vmatmul.mubr.msk.bf16.gmra.mxu1 %vm4946_vm14, %v8809_v18 }
 0x2d4   :  { %v4478_v23 = vpop.permute.xlu1 %4477 }
 0x2d6   :  { %v12793_v20 = vld [vmem:[#allocation2 + $0x24] sm:$0xf] }
 0x2d7   :  { %v10652_v60 = vld [vmem:[#allocation2 + $0x20] sm:$0xff]   ;;  %v8810_v12 = vcombine.low %v12793_v20, %v12787_v47  ;;  %v8835_v5 = vcombine.low %v12782_v51, %v12793_v20  ;;  %v10680_v51 = vld [vmem:[%s13860_s3 + $0x90] sm:$0xff]  }
 0x2d8   :  { %10348 = vmatprep.mubr.msk.bf16.mxu0 %vm4946_vm14, %v10652_v60  ;;  %v10679_v20 = vld [vmem:[#allocation2 + $0x20] sm:$0xff]  }
 0x2d9   :  { %10232 = vmatprep.mubr.msk.bf16.mxu1 %vm4946_vm14, %v8810_v12  ;;  %10349 = vmatmul.mubr.msk.bf16.gmra.mxu0 %vm4946_vm14, %v10656_v13  ;;  %v4503_v8 = vpop.permute.xlu1 %4502  ;;  %v4693_v12 = vld [vmem:[#allocation2 + $0x4c] sm:$0xf] }
 0x2da   :  { %v4446_v54 = vpop.permute.xlu0 %4445  ;;  %10352 = vmatprep.mubr.msk.bf16.mxu0 %vm4946_vm14, %v10657_v3 }
 0x2db   :  { %v4449_v59 = vsel %vm12650_vm8, %v4446_v54, %v4448_v25  ;;  %10233 = vmatmul.mubr.msk.bf16.gmra.mxu1 %vm4946_vm14, %v8811_v10 }
 0x2dc   :  { %4450 = vst [vmem:[#allocation2 + $0x38] sm:$0xf] %v4449_v59 }
 0x2dd   :  { %4456 = vst.msk [vmem:[#allocation2 + $0x38] sm:$0xf] %vm4059_vm9, %v4454_v45 }
 0x2de   :  { %v4468_v40 = vpop.permute.xlu0 %4467 }
 0x2e0   :  { %v4495_v33 = vpop.permute.xlu1 %4494 }
 0x2e1   :  { %v4498_v31 = vsel %vm12650_vm8, %v4495_v33, %v4497_v43 }
 0x2e2   :  { %4499 = vst [vmem:[#allocation2 + $0x3c] sm:$0xf] %v4498_v31  ;;  %v4527_v27 = vpop.permute.xlu0 %4526 }
 0x2e3   :  { %4505 = vst.msk [vmem:[#allocation2 + $0x3c] sm:$0xf] %vm4059_vm9, %v4503_v8 }
 0x2e4   :  { %v4470_v32 = vld [vmem:[#allocation2 + $0x38] sm:$0xf] }
 0x2e5   :  { %v4471_v48 = vsel %vm12668_vm12, %v4468_v40, %v4470_v32  ;;  %v4742_v40 = vld [vmem:[#allocation2 + $0x50] sm:$0xf] }
 0x2e6   :  { %4472 = vst [vmem:[#allocation2 + $0x38] sm:$0xf] %v4471_v48  ;;  %v4552_v46 = vpop.permute.xlu0 %4551  ;;  %v4517_v24 = vpop.permute.xlu1 %4516 }
 0x2e7   :  { %4480 = vst.msk [vmem:[#allocation2 + $0x38] sm:$0x7] %vm4087_vm13, %v4478_v23 }
 0x2ea   :  { %v4519_v44 = vld [vmem:[#allocation2 + $0x3c] sm:$0xf]  ;;  %v4544_v61 = vpop.permute.xlu0 %4543  ;;  %v4576_v35 = vpop.permute.xlu1 %4575 }
 0x2eb   :  { %v4520_v22 = vsel %vm12668_vm12, %v4517_v24, %v4519_v44  ;;  %v4547_v0 = vsel %vm12650_vm8, %v4544_v61, %v4546_v26 }
 0x2ec   :  { %4521 = vst [vmem:[#allocation2 + $0x3c] sm:$0xf] %v4520_v22  ;;  %4548 = vst [vmem:[#allocation2 + $0x40] sm:$0xf] %v4547_v0 }
 0x2ed   :  { %4529 = vst.msk [vmem:[#allocation2 + $0x3c] sm:$0x7] %vm4087_vm13, %v4527_v27 }
 0x2ee   :  { %4554 = vst.msk [vmem:[#allocation2 + $0x40] sm:$0xf] %vm4059_vm9, %v4552_v46  ;;  %v4566_v4 = vpop.permute.xlu0 %4565  ;;  %v12823_v56 = vld [vmem:[#allocation2 + $0x38] sm:$0xf] }
 0x2ef   :  { %v8812_v15 = vcombine.low %v12819_v57, %v12823_v56  ;;  %v4601_v1 = vpop.permute.xlu1 %4600  ;;  %v10689_v57 = vld [vmem:[%s13860_s3 + $0x78] sm:$0xff]  }
 0x2f1   :  { %10236 = vmatprep.mubr.msk.bf16.mxu1 %vm4946_vm14, %v8812_v15  ;;  %v4791_v15 = vld [vmem:[#allocation2 + $0x54] sm:$0xf] }
 0x2f2   :  { %v4593_v55 = vpop.permute.xlu0 %4592 }
 0x2f3   :  { %v4596_v16 = vsel %vm12650_vm8, %v4593_v55, %v4595_v62 }
 0x2f4   :  { %4597 = vst [vmem:[#allocation2 + $0x44] sm:$0xf] %v4596_v16  ;;  %v10658_v49 = vld [vmem:[#allocation2 + $0x38] sm:$0xff]  }
 0x2f5   :  { %v4568_v28 = vld [vmem:[#allocation2 + $0x40] sm:$0xf]  ;;  %4603 = vst.msk [vmem:[#allocation2 + $0x44] sm:$0xf] %vm4059_vm9, %v4601_v1  ;;  %10353 = vmatmul.mubr.msk.bf16.gmra.mxu0 %vm4946_vm14, %v10658_v49  ;;  %v12838_v13 = vld [vmem:[#allocation2 + $0x3c] sm:$0xf] }
 0x2f6   :  { %v4569_v11 = vsel %vm12668_vm12, %v4566_v4, %v4568_v28  ;;  %v4650_v17 = vpop.permute.xlu0 %4649 }
 0x2f7   :  { %4570 = vst [vmem:[#allocation2 + $0x40] sm:$0xf] %v4569_v11  ;;  %v4824_v11 = vld [vmem:[#allocation2] sm:$0xf] }
 0x2f8   :  { %4578 = vst.msk [vmem:[#allocation2 + $0x40] sm:$0x7] %vm4087_vm13, %v4576_v35 }
 0x2f9   :  { %v4642_v29 = vpop.permute.xlu1 %4641 }
 0x2fa   :  { %v4645_v53 = vsel %vm12650_vm8, %v4642_v29, %v4644_v38  ;;  %v4615_v39 = vpop.permute.xlu0 %4614  ;;  %v8831_v38 = vcombine.low %v4824_v11, %v12683_v14  ;;  %v10699_v14 = vld [vmem:[#allocation2 + $0x58] sm:$0xff]  }
 0x2fb   :  { %4646 = vst [vmem:[#allocation2 + $0x48] sm:$0xf] %v4645_v53 }
 0x2fc   :  { %4652 = vst.msk [vmem:[#allocation2 + $0x48] sm:$0xf] %vm4059_vm9, %v4650_v17  ;;  %v4617_v19 = vld [vmem:[#allocation2 + $0x44] sm:$0xf] }
 0x2fd   :  { %v4699_v18 = vpop.permute.xlu1 %4698  ;;  %v4618_v3 = vsel %vm12668_vm12, %v4615_v39, %v4617_v19 }
 0x2fe   :  { %4619 = vst [vmem:[#allocation2 + $0x44] sm:$0xf] %v4618_v3 }
 0x2ff   :  { %v12842_v45 = vld [vmem:[#allocation2 + $0x40] sm:$0xf] }
 0x300   :  { %v8813_v60 = vcombine.low %v12838_v13, %v12842_v45 }
 0x301   :  { %v4691_v10 = vpop.permute.xlu0 %4690  ;;  %v4664_v25 = vpop.permute.xlu1 %4663 }
 0x302   :  { %10237 = vmatmul.mubr.msk.bf16.gmra.mxu1 %vm4946_vm14, %v8813_v60  ;;  %v4694_v23 = vsel %vm12650_vm8, %v4691_v10, %v4693_v12  ;;  %v10690_v10 = vld [vmem:[#allocation2 + $0xc] sm:$0xff]  }
 0x303   :  { %v4666_v54 = vld [vmem:[#allocation2 + $0x48] sm:$0xf]  ;;  %4695 = vst [vmem:[#allocation2 + $0x4c] sm:$0xf] %v4694_v23  ;;  %v10691_v23 = vld [vmem:[#allocation2 + $0x14] sm:$0xff]  }
 0x304   :  { %v4667_v59 = vsel %vm12668_vm12, %v4664_v25, %v4666_v54  ;;  %4701 = vst.msk [vmem:[#allocation2 + $0x4c] sm:$0xf] %vm4059_vm9, %v4699_v18  ;;  %v10671_v18 = vld [vmem:[%s13860_s3 + $0x68] sm:$0xff]   ;;  %v10692_v25 = vld [vmem:[#allocation2 + $0x1c] sm:$0xff]  }
 0x305   :  { %4668 = vst [vmem:[#allocation2 + $0x48] sm:$0xf] %v4667_v59  ;;  %v10694_v54 = vld [vmem:[#allocation2 + $0x2c] sm:$0xff]   ;;  %v10693_v59 = vld [vmem:[#allocation2 + $0x24] sm:$0xff]  }
 0x306   :  { %v4748_v8 = vpop.permute.xlu0 %4747 }
 0x309   :  { %v4740_v43 = vpop.permute.xlu1 %4739 }
 0x30a   :  { %v4743_v33 = vsel %vm12650_vm8, %v4740_v43, %v4742_v40  ;;  %v4625_v31 = vpop.permute.xlu0 %4624  ;;  %v10696_v40 = vld [vmem:[#allocation2 + $0x3c] sm:$0xff]  }
 0x30b   :  { %4744 = vst [vmem:[#allocation2 + $0x50] sm:$0xf] %v4743_v33  ;;  %4627 = vst.msk [vmem:[#allocation2 + $0x44] sm:$0x7] %vm4087_vm13, %v4625_v31  ;;  %v4715_v32 = vld [vmem:[#allocation2 + $0x4c] sm:$0xf] }
 0x30c   :  { %4750 = vst.msk [vmem:[#allocation2 + $0x50] sm:$0xf] %vm4059_vm9, %v4748_v8  ;;  %v10695_v8 = vld [vmem:[#allocation2 + $0x34] sm:$0xff]  }
 0x30d   :  { %v4674_v27 = vpop.permute.xlu1 %4673 }
 0x30e   :  { %4676 = vst.msk [vmem:[#allocation2 + $0x48] sm:$0x7] %vm4087_vm13, %v4674_v27  ;;  %v4713_v48 = vpop.permute.xlu0 %4712 }
 0x30f   :  { %v4716_v46 = vsel %vm12668_vm12, %v4713_v48, %v4715_v32 }
 0x310   :  { %4717 = vst [vmem:[#allocation2 + $0x4c] sm:$0xf] %v4716_v46 }
 0x311   :  { %v4762_v24 = vpop.permute.xlu1 %4761 }
 0x312   :  { %v4723_v44 = vpop.permute.xlu0 %4722  ;;  %v10662_v26 = vld [vmem:[#allocation2 + $0x40] sm:$0xff]  }
 0x313   :  { %v4764_v61 = vld [vmem:[#allocation2 + $0x50] sm:$0xf]  ;;  %4725 = vst.msk [vmem:[#allocation2 + $0x4c] sm:$0x7] %vm4087_vm13, %v4723_v44  ;;  %10356 = vmatprep.mubr.msk.bf16.mxu0 %vm4946_vm14, %v10662_v26  ;;  %v4841_v0 = vld [vmem:[#allocation2 + $0x44] sm:$0xf] }
 0x314   :  { %v4765_v22 = vsel %vm12668_vm12, %v4762_v24, %v4764_v61  ;;  %v8839_v41 = vcombine.low %v12842_v45, %v4841_v0  ;;  %v10685_v45 = vld [vmem:[#allocation2 + $0x40] sm:$0xff]  }
 0x315   :  { %4766 = vst [vmem:[#allocation2 + $0x50] sm:$0xf] %v4765_v22  ;;  %v4772_v35 = vpop.permute.xlu1 %4771  ;;  %v4842_v4 = vld [vmem:[#allocation2 + $0x48] sm:$0xf] }
 0x316   :  { %4774 = vst.msk [vmem:[#allocation2 + $0x50] sm:$0x7] %vm4087_vm13, %v4772_v35  ;;  %v4789_v62 = vpop.permute.xlu0 %4788  ;;  %v8814_v55 = vcombine.low %v4841_v0, %v4842_v4  ;;  %v10697_v43 = vld [vmem:[#allocation2 + $0x44] sm:$0xff]  }
 0x317   :  { %v4792_v16 = vsel %vm12650_vm8, %v4789_v62, %v4791_v15  ;;  %vm6420_vm8 = vcmask 519170  }
 0x318   :  { %4793 = vst [vmem:[#allocation2 + $0x54] sm:$0xf] %v4792_v16  ;;  %10240 = vmatprep.mubr.msk.bf16.mxu1 %vm4946_vm14, %v8814_v55 }
 0x319   :  { %v4797_v1 = vpop.permute.xlu1 %4796 }
 0x31a   :  { %4799 = vst.msk [vmem:[#allocation2 + $0x54] sm:$0xf] %vm4059_vm9, %v4797_v1  ;;  %v10667_v28 = vld [vmem:[#allocation2 + $0x48] sm:$0xff]   ;;  %v4811_v63 = vpop.permute.xlu0 %4810  ;;  %vm6852_vm9 = vcmask 1045504  }
 0x31b   :  { %v4843_v49 = vld [vmem:[#allocation2 + $0x4c] sm:$0xf]  ;;  %10357 = vmatmul.mubr.msk.bf16.gmra.mxu0 %vm4946_vm14, %v10667_v28 }
 0x31c   :  { %v10687_v60 = vld [vmem:[#allocation2 + $0x48] sm:$0xff]  }
 0x31d   :  { %v4854_v17 = vld [vmem:[#allocation2 + $0x50] sm:$0xf]  ;;  %v4821_v39 = vpop.permute.xlu1 %4820 }
 0x31e   :  { %v8815_v29 = vcombine.low %v4843_v49, %v4854_v17  ;;  %v10698_v33 = vld [vmem:[#allocation2 + $0x4c] sm:$0xff]  }
 0x320   :  { %10241 = vmatmul.mubr.msk.bf16.gmra.mxu1 %vm4946_vm14, %v8815_v29 }
 0x321   :  { %v4813_v53 = vld [vmem:[#allocation2 + $0x54] sm:$0xf]  ;;  %10254 = vmatprep.mubr.msk.bf16.mxu1 %vm4946_vm14, %v8831_v38 }
 0x322   :  { %v4814_v19 = vsel %vm12668_vm12, %v4811_v63, %v4813_v53  ;;  %vm13449_vm12 = vmand %vm6359_vm10, %vm4049_vm6 }
 0x323   :  { %4815 = vst [vmem:[#allocation2 + $0x54] sm:$0xf] %v4814_v19 }
 0x324   :  { %4823 = vst.msk [vmem:[#allocation2 + $0x54] sm:$0x7] %vm4087_vm13, %v4821_v39  ;;  %vm6380_vm13 = vsmask.f32 1280 }
 0x325   :  { %vm13462_vm6 = vmand %vm6359_vm10, %vm6380_vm13 }
 0x328   :  { %10255 = vmatmul.mubr.msk.bf16.vlgmr.msra.gmra.mxu1 %vm4946_vm14, %v8832_v6  ;;  %v8836_v6 = vcombine.low %v12787_v47, %v12789_v21  ;;  %v10678_v47 = vld [vmem:[#allocation2 + $0x18] sm:$0xff]   ;;  %v10683_v21 = vld [vmem:[%s13860_s3 + $0x88] sm:$0xff]  }
 0x329   :  { %10258 = vmatprep.mubr.msk.bf16.mxu1 %vm4946_vm14, %v8833_v50  ;;  %10275 = vmatpush3.bf16.msra.mxu1 %v12767_v2  ;;  %v8838_v50 = vcombine.low %v12823_v56, %v12838_v13  ;;  %v8840_v2 = vcombine.low %v4842_v4, %v4843_v49  ;;  %v10682_v56 = vld [vmem:[#allocation2 + $0x30] sm:$0xff]   ;;  %v10684_v13 = vld [vmem:[#allocation2 + $0x38] sm:$0xff]   ;;  %v10821_v49 = vld [vmem:[#allocation3] sm:$0xff] }
 0x32a   :  { %10276 = vmatprep.subr.bf16.mxu1 %v10671_v18  ;;  %6327 = vst.msk [vmem:[#allocation3 + $0x8] sm:$0xf] %vm6315_vm0, %v10821_v49  ;;  %6329 = vst.msk [vmem:[#allocation3 + $0x14] sm:$0xf] %vm6315_vm0, %v10821_v49 }
 0x32b   :  { %v10670_v3 = vld [vmem:[#allocation2 + $0x50] sm:$0xff]   ;;  %6331 = vst.msk [vmem:[#allocation3 + $0x20] sm:$0xf] %vm6315_vm0, %v10821_v49  ;;  %6333 = vst.msk [vmem:[#allocation3 + $0x2c] sm:$0xf] %vm6315_vm0, %v10821_v49 }
 0x32c   :  { %10360 = vmatprep.mubr.msk.bf16.mxu0 %vm4946_vm14, %v10670_v3  ;;  %v10688_v12 = vld [vmem:[#allocation2 + $0x50] sm:$0xff]   ;;  %6335 = vst.msk [vmem:[#allocation3 + $0x38] sm:$0xf] %vm6315_vm0, %v10821_v49  ;;  %6337 = vst.msk [vmem:[#allocation3 + $0x44] sm:$0xf] %vm6315_vm0, %v10821_v49 }
 0x32d   :  { %10277 = vmatpush3.bf16.msra.mxu1 %v10671_v18  ;;  %10361 = vmatmul.mubr.msk.bf16.gmra.mxu0 %vm4946_vm14, %v10699_v14  ;;  %v10700_v31 = vld [vmem:[#allocation2 + $0x54] sm:$0xff]   ;;  %6339 = vst.msk [vmem:[#allocation3 + $0x50] sm:$0xf] %vm6315_vm0, %v10821_v49  ;;  %6341 = vst.msk [vmem:[#allocation3 + $0x5c] sm:$0xf] %vm6315_vm0, %v10821_v49 }
 0x32e   :  { %10278 = vmatprep.subr.bf16.mxu1 %v10672_v52  ;;  %v10701_v18 = vld [vmem:[%s13861_s5 + $0x138] sm:$0xff]   ;;  %v10702_v14 = vld [vmem:[%s13861_s5 + $0x130] sm:$0xff]   ;;  %10372 = vmatprep.mubr.msk.bf16.mxu0 %vm10829_vm1, %v13865_v9 }
 0x32f   :  { %10365 = vmatpush3.bf16.msra.mxu0 %v10701_v18 }
 0x330   :  { %10259 = vmatmul.mubr.msk.bf16.gmra.mxu1 %vm4946_vm14, %v8834_v34  ;;  %v10676_v34 = vld [vmem:[#allocation2 + $0x10] sm:$0xff]   ;;  %10366 = vmatprep.subr.bf16.mxu0 %v13865_v9 }
 0x331   :  { %10262 = vmatprep.mubr.msk.bf16.mxu1 %vm4946_vm14, %v8835_v5  ;;  %10279 = vmatpush3.bf16.msra.mxu1 %v10672_v52  ;;  %v10686_v5 = vld [vmem:[%s13860_s3 + $0x80] sm:$0xff]  }
 0x332   :  { %10280 = vmatprep.subr.bf16.mxu1 %v10673_v7 }
 0x333   :  { %10367 = vmatpush3.bf16.msra.mxu0 %v10702_v14 }
 0x334   :  { %10368 = vmatprep.subr.bf16.mxu0 %v13865_v9 }
 0x335   :  { %10281 = vmatpush3.bf16.msra.mxu1 %v10673_v7 }
 0x336   :  { %10282 = vmatprep.subr.bf16.mxu1 %v10674_v30 }
 0x338   :  { %10263 = vmatmul.mubr.msk.bf16.gmra.mxu1 %vm4946_vm14, %v8836_v6 }
 0x339   :  { %10266 = vmatprep.mubr.msk.bf16.mxu1 %vm4946_vm14, %v8837_v42  ;;  %10283 = vmatpush3.bf16.msra.mxu1 %v10674_v30  ;;  %v10703_v30 = vld [vmem:[%s13861_s5 + $0x128] sm:$0xff]  }
 0x33a   :  { %10304 = vmatprep.subr.bf16.mxu1 %v10677_v36  ;;  %10369 = vmatpush3.bf16.msra.mxu0 %v10703_v30 }
 0x33b   :  { %10370 = vmatprep.subr.bf16.mxu0 %v13865_v9 }
 0x340   :  { %10267 = vmatmul.mubr.msk.bf16.gmra.mxu1 %vm4946_vm14, %v8838_v50 }
 0x341   :  { %10270 = vmatprep.mubr.msk.bf16.mxu1 %vm4946_vm14, %v8839_v41 }
 0x348   :  { %10271 = vmatmul.mubr.msk.bf16.gmra.mxu1 %vm4946_vm14, %v8840_v2 }
 0x349   :  { %10284 = vmatprep.mubr.msk.bf16.mxu1 %vm4946_vm14, %v10675_v37 }
 0x350   :  { %10285 = vmatmul.mubr.msk.bf16.vlgmr.msra.gmra.mxu1 %vm4946_vm14, %v10676_v34 }
 0x351   :  { %10288 = vmatprep.mubr.msk.bf16.mxu1 %vm4946_vm14, %v10678_v47  ;;  %10305 = vmatpush3.bf16.msra.mxu1 %v10677_v36  ;;  %v10704_v36 = vld [vmem:[%s13861_s5 + $0x120] sm:$0xff]  }
 0x352   :  { %10306 = vmatprep.subr.bf16.mxu1 %v10680_v51  ;;  %10371 = vmatpush3.bf16.msra.mxu0 %v10704_v36 }
 0x353   :  { %10384 = vmatprep.subr.bf16.mxu0 %v13865_v9 }
 0x355   :  { %10307 = vmatpush3.bf16.msra.mxu1 %v10680_v51 }
 0x356   :  { %10308 = vmatprep.subr.bf16.mxu1 %v10683_v21 }
 0x358   :  { %10289 = vmatmul.mubr.msk.bf16.gmra.mxu1 %vm4946_vm14, %v10679_v20 }
 0x359   :  { %10292 = vmatprep.mubr.msk.bf16.mxu1 %vm4946_vm14, %v10681_v58  ;;  %10309 = vmatpush3.bf16.msra.mxu1 %v10683_v21 }
 0x35a   :  { %10310 = vmatprep.subr.bf16.mxu1 %v10686_v5 }
 0x35d   :  { %10311 = vmatpush3.bf16.msra.mxu1 %v10686_v5 }
 0x35e   :  { %10312 = vmatprep.subr.bf16.mxu1 %v10689_v57 }
 0x360   :  { %10293 = vmatmul.mubr.msk.bf16.gmra.mxu1 %vm4946_vm14, %v10682_v56 }
 0x361   :  { %10296 = vmatprep.mubr.msk.bf16.mxu1 %vm4946_vm14, %v10684_v13  ;;  %10313 = vmatpush3.bf16.msra.mxu1 %v10689_v57 }
 0x368   :  { %10297 = vmatmul.mubr.msk.bf16.gmra.mxu1 %vm4946_vm14, %v10685_v45 }
 0x369   :  { %10300 = vmatprep.mubr.msk.bf16.mxu1 %vm4946_vm14, %v10687_v60 }
 0x370   :  { %10301 = vmatmul.mubr.msk.bf16.gmra.mxu1 %vm4946_vm14, %v10688_v12 }
 0x371   :  { %10314 = vmatprep.mubr.msk.bf16.mxu1 %vm4946_vm14, %v10690_v10 }
 0x377   :  { %v12953_v27 = vpop.f32.mrf.mxu1 }
 0x378   :  { %10315 = vmatmul.mubr.msk.bf16.vlgmr.msra.gmra.mxu1 %vm4946_vm14, %v10691_v23 }
 0x379   :  { %10318 = vmatprep.mubr.msk.bf16.mxu1 %vm4946_vm14, %v10692_v25  ;;  %v12955_v32 = vpop.f32.mrf.mxu1 }
 0x37b   :  { %v12957_v48 = vpop.f32.mrf.mxu1 }
 0x37d   :  { %v12959_v46 = vpop.f32.mrf.mxu1 }
 0x380   :  { %10319 = vmatmul.mubr.msk.bf16.gmra.mxu1 %vm4946_vm14, %v10693_v59 }
 0x381   :  { %10322 = vmatprep.mubr.msk.bf16.mxu1 %vm4946_vm14, %v10694_v54 }
 0x388   :  { %10323 = vmatmul.mubr.msk.bf16.gmra.mxu1 %vm4946_vm14, %v10695_v8 }
 0x389   :  { %10326 = vmatprep.mubr.msk.bf16.mxu1 %vm4946_vm14, %v10696_v40 }
 0x38c   :  { %v10346_v59 = vpop.f32.mrf.mxu0 }
 0x390   :  { %10327 = vmatmul.mubr.msk.bf16.gmra.mxu1 %vm4946_vm14, %v10697_v43  ;;  %v5998_v43 = vpop.f32.mrf.mxu0 }
 0x391   :  { %10330 = vmatprep.mubr.msk.bf16.mxu1 %vm4946_vm14, %v10698_v33 }
 0x393   :  { %v12961_v24 = vpop.f32.mrf.mxu1 }
 0x395   :  { %v12963_v44 = vpop.f32.mrf.mxu1 }
 0x397   :  { %v12965_v26 = vpop.f32.mrf.mxu1 }
 0x398   :  { %10331 = vmatmul.mubr.msk.bf16.gmra.mxu1 %vm4946_vm14, %v10700_v31  ;;  %vm6410_vm14 = vcmask 1043970  }
 0x399   :  { %v12967_v61 = vpop.f32.mrf.mxu1 }
 0x39b   :  { %v12971_v22 = vpop.f32.mrf.mxu1 }
 0x39d   :  { %v12973_v0 = vpop.f32.mrf.mxu1 }
 0x39f   :  { %v12975_v35 = vpop.f32.mrf.mxu1 }
 0x3a1   :  { %v12977_v4 = vpop.f32.mrf.mxu1 }
 0x3c2   :  { %v10238_v15 = vpop.f32.mrf.mxu1 }
 0x3c4   :  { %v5059_v62 = vpop.f32.mrf.mxu1 }
 0x3c6   :  { %v10239_v55 = vpop.f32.mrf.mxu1 }
 0x3c8   :  { %v12979_v16 = vpop.f32.mrf.mxu1 }
 0x3e0   :  { %v10242_v1 = vpop.f32.mrf.mxu1 }
 0x3e2   :  { %v5075_v28 = vpop.f32.mrf.mxu1 }
 0x3e4   :  { %v10243_v11 = vpop.f32.mrf.mxu1 }
 0x3e6   :  { %v12989_v17 = vpop.f32.mrf.mxu1 }
 0x3e7   :  { %14055 = vst [vmem:[#allocation39_spill] sm:$0xff] %v12989_v17 }
 0x3e8   :  { %v12991_v38 = vpop.f32.mrf.mxu1 }
 0x3ea   :  { %v12993_v29 = vpop.f32.mrf.mxu1 }
 0x3eb   :  { %v5197_v9 = vadd.f32 %v12993_v29, %v12955_v32 }
 0x3ec   :  { %v12995_v53 = vpop.f32.mrf.mxu1 }
 0x3ee   :  { %v12997_v63 = vpop.f32.mrf.mxu1 }
 0x3f0   :  { %v12999_v19 = vpop.f32.mrf.mxu1 }
 0x3f2   :  { %v13001_v39 = vpop.f32.mrf.mxu1 }
 0x3f4   :  { %v13006_v52 = vpop.f32.mrf.mxu1 }
 0x3f6   :  { %v13011_v3 = vpop.f32.mrf.mxu1 }
 0x3f8   :  { %v13014_v7 = vpop.f32.mrf.mxu1 }
 0x3fa   :  { %v13021_v6 = vpop.f32.mrf.mxu1 }
 0x3fc   :  { %v13024_v42 = vpop.f32.mrf.mxu1 }
 0x3fe   :  { %v13029_v50 = vpop.f32.mrf.mxu1 }
 0x400   :  { %v10268_v41 = vpop.f32.mrf.mxu1 }
 0x401   :  { %v13032_v2 = vadd.f32 %v10268_v41, %v10238_v15  ;;  %v10347_v15 = vpop.f32.mrf.mxu0 }
 0x402   :  { %v5244_v37 = vpop.f32.mrf.mxu1 }
 0x403   :  { %v13035_v34 = vadd.f32 %v5244_v37, %v5059_v62 }
 0x404   :  { %v10269_v51 = vpop.f32.mrf.mxu1 }
 0x405   :  { %v13037_v47 = vadd.f32 %v10269_v51, %v10239_v55 }
 0x406   :  { %v13039_v21 = vpop.f32.mrf.mxu1 }
 0x408   :  { %v10272_v58 = vpop.f32.mrf.mxu1 }
 0x409   :  { %v13041_v20 = vadd.f32 %v10272_v58, %v10242_v1  ;;  %v6001_v1 = vpop.f32.mrf.mxu0 }
 0x40a   :  { %v5260_v5 = vpop.f32.mrf.mxu1 }
 0x40b   :  { %14056 = vst [vmem:[#allocation40_spill] sm:$0xff] %v13041_v20  ;;  %v13043_v57 = vadd.f32 %v5260_v5, %v5075_v28  ;;  %v5205_v5 = vadd.f32 %v12991_v38, %v12953_v27  ;;  %v5200_v38 = vadd.f32 %v12997_v63, %v12959_v46 }
 0x40c   :  { %v10273_v56 = vpop.f32.mrf.mxu1 }
 0x40d   :  { %14057 = vst [vmem:[#allocation41_spill] sm:$0xff] %v13043_v57  ;;  %v13045_v13 = vadd.f32 %v10273_v56, %v10243_v11  ;;  %v10350_v11 = vpop.f32.mrf.mxu0  ;;  %v5208_v57 = vadd.f32 %v12995_v53, %v12957_v48 }
 0x40e   :  { %v13047_v45 = vpop.f32.mrf.mxu1 }
 0x40f   :  { %14058 = vst [vmem:[#allocation42_spill] sm:$0xff] %v13045_v13  ;;  %14059 = vst [vmem:[#allocation8_spill] sm:$0xff] %v13047_v45  ;;  %v6014_v14 = vpop.f32.mrf.mxu0 }
 0x410   :  { %v10286_v60 = vpop.f32.mrf.mxu1 }
 0x411   :  { %v13069_v41 = vpop.f32.mrf.mxu0  ;;  %v5531_v45 = vadd.f32 %v10286_v60, %v5205_v5  ;;  %v5221_v60 = vadd.f32 %v12999_v19, %v12961_v24  ;;  %v5224_v24 = vadd.f32 %v13006_v52, %v12965_v26 }
 0x412   :  { %v5450_v12 = vpop.f32.mrf.mxu1 }
 0x413   :  { %v13075_v58 = vpop.f32.mrf.mxu0 }
 0x414   :  { %v10287_v10 = vpop.f32.mrf.mxu1 }
 0x415   :  { %v13083_v13 = vpop.f32.mrf.mxu0 }
 0x416   :  { %v5453_v23 = vpop.f32.mrf.mxu1 }
 0x417   :  { %v13096_v20 = vpop.f32.mrf.mxu0 }
 0x418   :  { %v10290_v25 = vpop.f32.mrf.mxu1 }
 0x41a   :  { %v5466_v54 = vpop.f32.mrf.mxu1 }
 0x41c   :  { %v10291_v8 = vpop.f32.mrf.mxu1 }
 0x41e   :  { %v13049_v40 = vpop.f32.mrf.mxu1 }
 0x420   :  { %v13051_v33 = vpop.f32.mrf.mxu1 }
 0x422   :  { %v13053_v31 = vpop.f32.mrf.mxu1 }
 0x424   :  { %v13055_v62 = vpop.f32.mrf.mxu1 }
 0x426   :  { %v13057_v55 = vpop.f32.mrf.mxu1 }
 0x428   :  { %v13059_v28 = vpop.f32.mrf.mxu1 }
 0x42a   :  { %v13061_v49 = vpop.f32.mrf.mxu1 }
 0x42c   :  { %v13063_v18 = vpop.f32.mrf.mxu1 }
 0x42e   :  { %v13065_v30 = vpop.f32.mrf.mxu1 }
 0x42f   :  { %14060 = vst [vmem:[#allocation9_spill] sm:$0xff] %v13065_v30 }
 0x430   :  { %v13067_v36 = vpop.f32.mrf.mxu1 }
 0x431   :  { %14061 = vst [vmem:[#allocation43_spill] sm:$0xff] %v13067_v36 }
 0x432   :  { %v13071_v37 = vpop.f32.mrf.mxu1 }
 0x433   :  { %14062 = vst [vmem:[#allocation10_spill] sm:$0xff] %v13071_v37  ;;  %v5529_v37 = vadd.f32 %v5450_v12, %v5197_v9  ;;  %v5530_v9 = vadd.f32 %v5453_v23, %v5200_v38  ;;  %v5535_v12 = vadd.f32 %v10290_v25, %v5221_v60  ;;  %v13104_v23 = vpop.f32.mrf.mxu0  ;;  %v5216_v25 = vadd.f32 %v13011_v3, %v12967_v61 }
 0x434   :  { %v13073_v51 = vpop.f32.mrf.mxu1 }
 0x435   :  { %14063 = vst [vmem:[#allocation11_spill] sm:$0xff] %v13073_v51  ;;  %v13090_v51 = vld [vmem:[%s13862_s4] ss:$0 sm:$0xff] }
 0x436   :  { %v13079_v56 = vpop.f32.mrf.mxu1 }
 0x437   :  { %14064 = vst [vmem:[#allocation12_spill] sm:$0xff] %v13079_v56  ;;  %v5532_v56 = vadd.f32 %v10287_v10, %v5208_v57 }
 0x438   :  { %v10316_v17 = vpop.f32.mrf.mxu1 }
 0x439   :  { %v5805_v36 = vadd.f32 %v10316_v17, %v5531_v45  ;;  %v5213_v45 = vadd.f32 %v13001_v39, %v12963_v44 }
 0x43a   :  { %v5724_v27 = vpop.f32.mrf.mxu1 }
 0x43b   :  { %v6079_v32 = vadd.f32 %v10346_v59, %v5805_v36  ;;  %v5803_v29 = vadd.f32 %v5724_v27, %v5529_v37  ;;  %v5533_v19 = vadd.f32 %v5466_v54, %v5213_v45  ;;  %v5536_v37 = vadd.f32 %v10291_v8, %v5224_v24 }
 0x43c   :  { %v10317_v5 = vpop.f32.mrf.mxu1  ;;  %v5534_v27 = vadd.f32 %v13049_v40, %v5216_v25  ;;  %v5232_v45 = vadd.f32 %v13029_v50, %v12977_v4  ;;  %v10728_v4 = vld [vmem:[%s13861_s5 + $0x110] sm:$0xff]  }
 0x43d   :  { %v6106_v48 = vadd.f32 %v13090_v51, %v6079_v32  ;;  %v6077_v17 = vadd.f32 %v5998_v43, %v5803_v29  ;;  %v5806_v53 = vadd.f32 %v10317_v5, %v5532_v56  ;;  %v5237_v56 = vadd.f32 %v13014_v7, %v12971_v22 }
 0x43e   :  { %v5727_v30 = vpop.f32.mrf.mxu1  ;;  %v5229_v29 = vadd.f32 %v13021_v6, %v12973_v0 }
 0x43f   :  { %v6126_v46 = vmax.f32 %v6106_v48, 0.0  ;;  %v6104_v63 = vadd.f32 %v13090_v51, %v6077_v17  ;;  %v6080_v57 = vadd.f32 %v10347_v15, %v5806_v53  ;;  %v5804_v10 = vadd.f32 %v5727_v30, %v5530_v9 }
 0x440   :  { %v10320_v59 = vpop.f32.mrf.mxu1  ;;  %v5537_v48 = vadd.f32 %v13053_v31, %v5229_v29  ;;  %v5240_v53 = vadd.f32 %v13024_v42, %v12975_v35  ;;  %v10726_v31 = vld [vmem:[%s13861_s5 + $0x118] sm:$0xff]  }
 0x441   :  { %6147 = vst.msk [vmem:[#allocation5 + $0x10] sm:$0xff] %vm6144_vm15, %v6126_v46  ;;  %v6124_v43 = vmax.f32 %v6104_v63, 0.0  ;;  %v6107_v36 = vadd.f32 %v13090_v51, %v6080_v57  ;;  %v6078_v44 = vadd.f32 %v6001_v1, %v5804_v10  ;;  %v5809_v39 = vadd.f32 %v10320_v59, %v5535_v12  ;;  %v13115_v1 = vpop.f32.mrf.mxu0  ;;  %9629 = vmatprep.subr.bf16.mxu1 %v10726_v31 }
 0x442   :  { %v5740_v15 = vpop.f32.mrf.mxu1  ;;  %v5540_v50 = vadd.f32 %v13055_v62, %v5240_v53  ;;  %v5538_v10 = vadd.f32 %v13057_v55, %v5232_v45  ;;  %v14066_v45 = vld [vmem:[#allocation40_spill] sm:$0xff] }
 0x443   :  { %6145 = vst.msk [vmem:[#allocation5] sm:$0xff] %vm6144_vm15, %v6124_v43  ;;  %v6127_v30 = vmax.f32 %v6107_v36, 0.0  ;;  %v6105_v26 = vadd.f32 %v13090_v51, %v6078_v44  ;;  %v6083_v52 = vadd.f32 %v10350_v11, %v5809_v39  ;;  %v5807_v54 = vadd.f32 %v5740_v15, %v5533_v19  ;;  %v13122_v5 = vpop.f32.mrf.mxu0 }
 0x444   :  { %v10321_v38 = vpop.f32.mrf.mxu1  ;;  %v5539_v11 = vadd.f32 %v13051_v33, %v5237_v56 }
 0x445   :  { %6148 = vst.msk [vmem:[#allocation5 + $0x18] sm:$0xff] %vm6144_vm15, %v6127_v30  ;;  %v6125_v61 = vmax.f32 %v6105_v26, 0.0  ;;  %v6110_v3 = vadd.f32 %v13090_v51, %v6083_v52  ;;  %v6081_v8 = vadd.f32 %v6014_v14, %v5807_v54  ;;  %v5810_v32 = vadd.f32 %v10321_v38, %v5536_v37  ;;  %v6046_v46 = vpop.f32.mrf.mxu0 }
 0x446   :  { %v5743_v60 = vpop.f32.mrf.mxu1 }
 0x447   :  { %6146 = vst.msk [vmem:[#allocation5 + $0x8] sm:$0xff] %vm6144_vm15, %v6125_v61  ;;  %v6130_v22 = vmax.f32 %v6110_v3, 0.0  ;;  %v6108_v7 = vadd.f32 %v13090_v51, %v6081_v8  ;;  %v6084_v40 = vadd.f32 %v13069_v41, %v5810_v32  ;;  %v5808_v9 = vadd.f32 %v5743_v60, %v5534_v27  ;;  %v10727_v41 = vld [vmem:[%s13861_s5 + $0xd8] sm:$0xff]   ;;  %v10359_v25 = vpop.f32.mrf.mxu0 }
 0x448   :  { %v10324_v14 = vpop.f32.mrf.mxu1  ;;  %9630 = vmatpush3.bf16.msra.mxu1 %v10727_v41  ;;  %v5248_v3 = vadd.f32 %v13039_v21, %v12979_v16  ;;  %v5544_v16 = vadd.f32 %v13063_v18, %v13037_v47 }
 0x449   :  { %6151 = vst.msk [vmem:[#allocation5 + $0x30] sm:$0xff] %vm6144_vm15, %v6130_v22  ;;  %v6128_v17 = vmax.f32 %v6108_v7, 0.0  ;;  %v6111_v0 = vadd.f32 %v13090_v51, %v6084_v40  ;;  %v6082_v6 = vadd.f32 %v13075_v58, %v5808_v9  ;;  %v5813_v33 = vadd.f32 %v10324_v14, %v5539_v11  ;;  %9631 = vmatprep.subr.bf16.mxu1 %v10728_v4  ;;  %v6049_v60 = vpop.f32.mrf.mxu0  ;;  %v10734_v14 = vld [vmem:[%s13861_s5 + $0x108] sm:$0xff]  }
 0x44a   :  { %v5756_v12 = vpop.f32.mrf.mxu1 }
 0x44b   :  { %6149 = vst.msk [vmem:[#allocation5 + $0x20] sm:$0xff] %vm6144_vm15, %v6128_v17  ;;  %v6131_v58 = vmax.f32 %v6111_v0, 0.0  ;;  %v6109_v63 = vadd.f32 %v13090_v51, %v6082_v6  ;;  %v6087_v35 = vadd.f32 %v13083_v13, %v5813_v33  ;;  %v5811_v42 = vadd.f32 %v5756_v12, %v5537_v48  ;;  %v14065_v17 = vld [vmem:[#allocation9_spill] sm:$0xff]  ;;  %v10362_v53 = vpop.f32.mrf.mxu0  ;;  %v14067_v12 = vld [vmem:[#allocation43_spill] sm:$0xff] }
 0x44c   :  { %v10325_v57 = vpop.f32.mrf.mxu1  ;;  %v5543_v13 = vadd.f32 %v13059_v28, %v13032_v2  ;;  %v5541_v2 = vadd.f32 %v13061_v49, %v13035_v34  ;;  %v6168_v28 = vld [vmem:[#allocation5 + $0x10] ss:$2 sm:$0xff]  ;;  %v6188_v56 = vld [vmem:[#allocation5 + $0x11] ss:$2 sm:$0xff]  ;;  %v5542_v0 = vadd.f32 %v14065_v17, %v5248_v3  ;;  %v5547_v31 = vadd.f32 %v14067_v12, %v14066_v45 }
 0x44d   :  { %6152 = vst.msk [vmem:[#allocation5 + $0x38] sm:$0xff] %vm6144_vm15, %v6131_v58  ;;  %v6129_v24 = vmax.f32 %v6109_v63, 0.0  ;;  %v6114_v19 = vadd.f32 %v13090_v51, %v6087_v35  ;;  %v6085_v59 = vadd.f32 %v13096_v20, %v5811_v42  ;;  %v5814_v39 = vadd.f32 %v10325_v57, %v5540_v50 }
 0x44e   :  { %v6166_v43 = vld [vmem:[#allocation5] ss:$2 sm:$0xff]  ;;  %v6186_v36 = vld [vmem:[#allocation5 + $0x1] ss:$2 sm:$0xff]  ;;  %v5759_v62 = vpop.f32.mrf.mxu1  ;;  %v6206_v21 = vmax.f32 %v6168_v28, %v6188_v56  ;;  %v10736_v56 = vld [vmem:[%s13861_s5 + $0xc8] sm:$0xff]  }
 0x44f   :  { %v6216_v44 = vld [vmem:[#allocation5 + $0x8] ss:$2 sm:$0xff]  ;;  %v6205_v37 = vmax.f32 %v6166_v43, %v6186_v36  ;;  %v6236_v55 = vld [vmem:[#allocation5 + $0x9] ss:$2 sm:$0xff]  ;;  %6150 = vst.msk [vmem:[#allocation5 + $0x28] sm:$0xff] %vm6144_vm15, %v6129_v24  ;;  %v6134_v15 = vmax.f32 %v6114_v19, 0.0  ;;  %v6112_v30 = vadd.f32 %v13090_v51, %v6085_v59  ;;  %v5812_v26 = vadd.f32 %v5759_v62, %v5538_v10 }
 0x450   :  { %v6255_v20 = vmax.f32 %v6216_v44, %v6236_v55  ;;  %v6088_v52 = vadd.f32 %v13104_v23, %v5814_v39  ;;  %v10328_v54 = vpop.f32.mrf.mxu1  ;;  %v14069_v43 = vld [vmem:[#allocation10_spill] sm:$0xff] }
 0x451   :  { %6155 = vst.msk [vmem:[#allocation5 + $0x50] sm:$0xff] %vm6144_vm15, %v6134_v15  ;;  %v6132_v27 = vmax.f32 %v6112_v30, 0.0  ;;  %v6086_v38 = vadd.f32 %v13115_v1, %v5812_v26  ;;  %v5817_v61 = vadd.f32 %v10328_v54, %v5543_v13  ;;  %v10731_v1 = vld [vmem:[%s13861_s5 + $0xd0] sm:$0xff]   ;;  %v14068_v13 = vld [vmem:[#allocation41_spill] sm:$0xff]  ;;  %v6062_v15 = vpop.f32.mrf.mxu0  ;;  %v14070_v30 = vld [vmem:[#allocation42_spill] sm:$0xff] }
 0x452   :  { %v6218_v8 = vld [vmem:[#allocation5 + $0x18] ss:$2 sm:$0xff]  ;;  %v6238_v32 = vld [vmem:[#allocation5 + $0x19] ss:$2 sm:$0xff]  ;;  %v6115_v29 = vadd.f32 %v13090_v51, %v6088_v52  ;;  %v5772_v23 = vpop.f32.mrf.mxu1  ;;  %v6265_v11 = vmax.f32 %v6205_v37, %v6255_v20  ;;  %9632 = vmatpush3.bf16.msra.mxu1 %v10731_v1  ;;  %v5545_v36 = vadd.f32 %v14069_v43, %v14068_v13  ;;  %v10741_v13 = vld [vmem:[%s13861_s5 + $0xc0] sm:$0xff]  }
 0x453   :  { %v6256_v22 = vmax.f32 %v6218_v8, %v6238_v32  ;;  %6153 = vst.msk [vmem:[#allocation5 + $0x40] sm:$0xff] %vm6144_vm15, %v6132_v27  ;;  %v6113_v34 = vadd.f32 %v13090_v51, %v6086_v38  ;;  %v6091_v49 = vadd.f32 %v13122_v5, %v5817_v61  ;;  %v5815_v7 = vadd.f32 %v5772_v23, %v5541_v2  ;;  %v14071_v26 = vld [vmem:[#allocation11_spill] sm:$0xff]  ;;  %v14073_v32 = vld [vmem:[#allocation8_spill] sm:$0xff]  ;;  %v10363_v1 = vpop.f32.mrf.mxu0 }
 0x454   :  { %v6135_v40 = vmax.f32 %v6115_v29, 0.0  ;;  %v10329_v9 = vpop.f32.mrf.mxu1  ;;  %v9339_v48 = vpack.c.bf16 %v6265_v11, %v6265_v11  ;;  %9633 = vmatprep.subr.bf16.mxu1 %v10734_v14  ;;  %v6172_v44 = vld [vmem:[#allocation5 + $0x30] ss:$2 sm:$0xff]  ;;  %v6192_v39 = vld [vmem:[#allocation5 + $0x31] ss:$2 sm:$0xff]  ;;  %v5548_v20 = vadd.f32 %v14071_v26, %v14070_v30 }
 0x455   :  { %v6133_v6 = vmax.f32 %v6113_v34, 0.0  ;;  %v6118_v5 = vadd.f32 %v13090_v51, %v6091_v49  ;;  %v6089_v33 = vadd.f32 %v6046_v46, %v5815_v7  ;;  %v5818_v58 = vadd.f32 %v10329_v9, %v5544_v16  ;;  %v14072_v8 = vld [vmem:[#allocation39_spill] sm:$0xff] }
 0x456   :  { %v6170_v47 = vld [vmem:[#allocation5 + $0x20] ss:$2 sm:$0xff]  ;;  %v6190_v18 = vld [vmem:[#allocation5 + $0x21] ss:$2 sm:$0xff]  ;;  %6156 = vst.msk [vmem:[#allocation5 + $0x58] sm:$0xff] %vm6144_vm15, %v6135_v40  ;;  %v5775_v63 = vpop.f32.mrf.mxu1  ;;  %v6266_v35 = vmax.f32 %v6206_v21, %v6256_v22  ;;  %v5264_v29 = vadd.f32 %v14073_v32, %v14072_v8  ;;  %v6208_v23 = vmax.f32 %v6172_v44, %v6192_v39  ;;  %9634 = vmatpush3.bf16.msra.mxu1 %v10736_v56 }
 0x457   :  { %v6220_v41 = vld [vmem:[#allocation5 + $0x28] ss:$2 sm:$0xff]  ;;  %6316 = vst.msk [vmem:[#allocation7] sm:$0xf] %vm6315_vm0, %v9339_v48  ;;  %v6207_v42 = vmax.f32 %v6170_v47, %v6190_v18  ;;  %v6240_v4 = vld [vmem:[#allocation5 + $0x29] ss:$2 sm:$0xff]  ;;  %v6116_v50 = vadd.f32 %v13090_v51, %v6089_v33  ;;  %v5816_v57 = vadd.f32 %v5775_v63, %v5542_v0  ;;  %v6092_v24 = vadd.f32 %v10359_v25, %v5818_v58  ;;  %v6065_v47 = vpop.f32.mrf.mxu0 }
 0x458   :  { %6154 = vst.msk [vmem:[#allocation5 + $0x48] sm:$0xff] %vm6144_vm15, %v6133_v6  ;;  %v6138_v46 = vmax.f32 %v6118_v5, 0.0  ;;  %v6257_v10 = vmax.f32 %v6220_v41, %v6240_v4  ;;  %v10332_v19 = vpop.f32.mrf.mxu1  ;;  %v9340_v59 = vpack.c.bf16 %v6266_v35, %v6266_v35  ;;  %v14074_v21 = vld [vmem:[#allocation12_spill] sm:$0xff] }
 0x459   :  { %v6136_v62 = vmax.f32 %v6116_v50, 0.0  ;;  %v6090_v37 = vadd.f32 %v6049_v60, %v5816_v57  ;;  %v5821_v55 = vadd.f32 %v10332_v19, %v5547_v31  ;;  %v6119_v25 = vadd.f32 %v13090_v51, %v6092_v24 }
 0x45a   :  { %6159 = vst.msk [vmem:[#allocation5 + $0x70] sm:$0xff] %vm6144_vm15, %v6138_v46  ;;  %v6222_v52 = vld [vmem:[#allocation5 + $0x38] ss:$2 sm:$0xff]  ;;  %v6242_v54 = vld [vmem:[#allocation5 + $0x39] ss:$2 sm:$0xff]  ;;  %v5788_v2 = vpop.f32.mrf.mxu1  ;;  %v6267_v28 = vmax.f32 %v6207_v42, %v6257_v10  ;;  %v5546_v40 = vadd.f32 %v14074_v21, %v5264_v29  ;;  %v10740_v10 = vld [vmem:[%s13861_s5 + $0x100] sm:$0xff]  }
 0x45b   :  { %6317 = vst.msk [vmem:[#allocation7 + $0x4] sm:$0xf] %vm6315_vm0, %v9340_v59  ;;  %v6258_v27 = vmax.f32 %v6222_v52, %v6242_v54  ;;  %v6117_v38 = vadd.f32 %v13090_v51, %v6090_v37  ;;  %v6095_v61 = vadd.f32 %v10362_v53, %v5821_v55  ;;  %v5819_v3 = vadd.f32 %v5788_v2, %v5545_v36 }
 0x45c   :  { %6157 = vst.msk [vmem:[#allocation5 + $0x60] sm:$0xff] %vm6144_vm15, %v6136_v62  ;;  %v6139_v11 = vmax.f32 %v6119_v25, 0.0  ;;  %v10333_v60 = vpop.f32.mrf.mxu1  ;;  %v9341_v22 = vpack.c.bf16 %v6267_v28, %v6267_v28  ;;  %9635 = vmatprep.subr.bf16.mxu1 %v10740_v10 }
 0x45d   :  { %v6137_v34 = vmax.f32 %v6117_v38, 0.0  ;;  %v6122_v49 = vadd.f32 %v13090_v51, %v6095_v61  ;;  %v6093_v7 = vadd.f32 %v6062_v15, %v5819_v3  ;;  %v5822_v16 = vadd.f32 %v10333_v60, %v5548_v20  ;;  %9636 = vmatpush3.bf16.msra.mxu1 %v10741_v13 }
 0x45e   :  { %6160 = vst.msk [vmem:[#allocation5 + $0x78] sm:$0xff] %vm6144_vm15, %v6139_v11  ;;  %v5791_v9 = vpop.f32.mrf.mxu1  ;;  %v6268_v48 = vmax.f32 %v6208_v23, %v6258_v27  ;;  %v6348_v6 = vld [vmem:[#allocation7] sm:$0x3] }
 0x45f   :  { %6318 = vst.msk [vmem:[#allocation7 + $0x8] sm:$0xf] %vm6315_vm0, %v9341_v22  ;;  %v6142_v14 = vmax.f32 %v6122_v49, 0.0  ;;  %v6120_v17 = vadd.f32 %v13090_v51, %v6093_v7  ;;  %v6096_v0 = vadd.f32 %v10363_v1, %v5822_v16  ;;  %v5820_v5 = vadd.f32 %v5791_v9, %v5546_v40  ;;  %v6367_v45 = vld [vmem:[#allocation7] sm:$0x3] }
 0x460   :  { %6158 = vst.msk [vmem:[#allocation5 + $0x68] sm:$0xff] %vm6144_vm15, %v6137_v34  ;;  %v6350_v33 = vshrl.u32 %v6348_v6, 16  ;;  %v6353_v53 = vshll.u32 %v6348_v6, 16  ;;  %v6369_v18 = vshrl.u32 %v6367_v45, 16  ;;  %v6372_v41 = vshll.u32 %v6367_v45, 16 }
 0x461   :  { %6163 = vst.msk [vmem:[#allocation5 + $0x90] sm:$0xff] %vm6144_vm15, %v6142_v14  ;;  %v6140_v12 = vmax.f32 %v6120_v17, 0.0  ;;  %v6123_v31 = vadd.f32 %v13090_v51, %v6096_v0  ;;  %v6094_v63 = vadd.f32 %v6065_v47, %v5820_v5  ;;  %v6385_v39 = vld [vmem:[#allocation7] sm:$0x2]  ;;  %v6342_v11 = vld [vmem:[#allocation7] sm:$0x1] }
 0x462   :  { %v6398_v58 = vld [vmem:[#allocation7 + $0x4] sm:$0x3]  ;;  %v6352_v35 = vrot.slane %v6350_v33, 7  ;;  %v6371_v46 = vrot.slane %v6369_v18, 4  ;;  %v6374_v50 = vrot.slane %v6372_v41, 5  ;;  %v8972_v7 = vrot.slane %v6385_v39, 9 }
 0x463   :  { %v6400_v42 = vshrl.u32 %v6398_v58, 16  ;;  %6161 = vst.msk [vmem:[#allocation5 + $0x80] sm:$0xff] %vm6144_vm15, %v6140_v12  ;;  %v6143_v4 = vmax.f32 %v6123_v31, 0.0  ;;  %v6422_v57 = vld [vmem:[#allocation7 + $0x4] sm:$0x3]  ;;  %v6121_v24 = vadd.f32 %v13090_v51, %v6094_v63  ;;  %v6403_v36 = vshll.u32 %v6398_v58, 16 }
 0x464   :  { %v6355_v19 = vor.u32 %v6353_v53, %v6352_v35  ;;  %v6375_v43 = vor.u32 %v6374_v50, %v6371_v46  ;;  %v6424_v44 = vshrl.u32 %v6422_v57, 16  ;;  %v9342_v51 = vpack.c.bf16 %v6268_v48, %v6268_v48  ;;  %v6438_v61 = vld [vmem:[#allocation7 + $0x4] sm:$0x2]  ;;  %v6364_v48 = vld [vmem:[#allocation7] sm:$0x3]  ;;  %v10744_v41 = vld [vmem:[%s13861_s5 + $0xf8] sm:$0xff]  }
 0x465   :  { %v6402_v59 = vrot.slane %v6400_v42, 5  ;;  %6164 = vst.msk [vmem:[#allocation5 + $0x98] sm:$0xff] %vm6144_vm15, %v6143_v4  ;;  %v6180_v15 = vld [vmem:[#allocation5 + $0x70] ss:$2 sm:$0xff]  ;;  %v6200_v30 = vld [vmem:[#allocation5 + $0x71] ss:$2 sm:$0xff]  ;;  %9637 = vmatprep.subr.bf16.mxu1 %v10744_v41 }
 0x466   :  { %6356 = vrot.lane.b32.xlu0 %v6355_v19, %s10826_s9  ;;  %v6141_v52 = vmax.f32 %v6121_v24, 0.0  ;;  %v6376_v54 = vrot.slane %v6375_v43, 4  ;;  %v6449_v25 = vld [vmem:[#allocation7 + $0x8] sm:$0x3]  ;;  %v6405_v28 = vrot.slane %v6403_v36, 6  ;;  %v6426_v56 = vrot.slane %v6424_v44, 6 }
 0x467   :  { %v6178_v62 = vld [vmem:[#allocation5 + $0x60] ss:$2 sm:$0xff]  ;;  %v6198_v37 = vld [vmem:[#allocation5 + $0x61] ss:$2 sm:$0xff]  ;;  %v6427_v27 = vshll.u32 %v6422_v57, 16  ;;  %v6451_v3 = vshrl.u32 %v6449_v25, 16  ;;  %v6212_v14 = vmax.f32 %v6180_v15, %v6200_v30 }
 0x468   :  { %v6228_v55 = vld [vmem:[#allocation5 + $0x68] ss:$2 sm:$0xff]  ;;  %v6211_v26 = vmax.f32 %v6178_v62, %v6198_v37  ;;  %v6248_v20 = vld [vmem:[#allocation5 + $0x69] ss:$2 sm:$0xff]  ;;  %v6465_v38 = vld [vmem:[#allocation7 + $0x8] sm:$0x3]  ;;  %6377 = vrot.lane.b32.xlu1 %v6376_v54, %s10826_s9  ;;  %v6406_v34 = vor.u32 %v6405_v28, %v6402_v59 }
 0x469   :  { %v6261_v2 = vmax.f32 %v6228_v55, %v6248_v20  ;;  %6319 = vst.msk [vmem:[#allocation7 + $0xc] sm:$0xf] %vm6315_vm0, %v9342_v51  ;;  %v6454_v8 = vshll.u32 %v6449_v25, 16  ;;  %v6467_v32 = vshrl.u32 %v6465_v38, 16  ;;  %v6470_v29 = vshll.u32 %v6465_v38, 16  ;;  %v10745_v55 = vld [vmem:[%s13861_s5 + $0xb8] sm:$0xff]  }
 0x46a   :  { %6162 = vst.msk [vmem:[#allocation5 + $0x88] sm:$0xff] %vm6144_vm15, %v6141_v52  ;;  %v6481_v23 = vld [vmem:[#allocation7 + $0x8] sm:$0x2]  ;;  %v6230_v60 = vld [vmem:[#allocation5 + $0x78] ss:$2 sm:$0xff]  ;;  %v6429_v49 = vrot.slane %v6427_v27, 7  ;;  %6407 = vrot.lane.b32.xlu0 %v6406_v34, %s10826_s9  ;;  %9638 = vmatpush3.bf16.msra.mxu1 %v10745_v55 }
 0x46b   :  { %v6250_v22 = vld [vmem:[#allocation5 + $0x79] ss:$2 sm:$0xff]  ;;  %v6271_v1 = vmax.f32 %v6211_v26, %v6261_v2  ;;  %v6453_v21 = vrot.slane %v6451_v3, 7  ;;  %v6469_v40 = vrot.slane %v6467_v32, 4  ;;  %v6472_v9 = vrot.slane %v6470_v29, 5 }
 0x46c   :  { %v6262_v16 = vmax.f32 %v6230_v60, %v6250_v22  ;;  %v6184_v17 = vld [vmem:[#allocation5 + $0x90] ss:$2 sm:$0xff]  ;;  %v6204_v0 = vld [vmem:[#allocation5 + $0x91] ss:$2 sm:$0xff]  ;;  %v6430_v5 = vor.u32 %v6429_v49, %v6426_v56  ;;  %6391 = vst.msk [vmem:[#allocation3 + $0x14] sm:$0x1] %vm6390_vm2, %v8972_v7 }
 0x46d   :  { %v6234_v6 = vld [vmem:[#allocation5 + $0x98] ss:$2 sm:$0xff]  ;;  %v9345_v33 = vpack.c.bf16 %v6271_v1, %v6271_v1  ;;  %6366 = vst.msk [vmem:[#allocation3 + $0x10] sm:$0x3] %vm6365_vm3, %v6364_v48  ;;  %v6214_v53 = vmax.f32 %v6184_v17, %v6204_v0  ;;  %v6254_v45 = vld [vmem:[#allocation5 + $0x99] ss:$2 sm:$0xff]  ;;  %v6456_v12 = vor.u32 %v6454_v8, %v6453_v21  ;;  %v6473_v31 = vor.u32 %v6472_v9, %v6469_v40 }
 0x46e   :  { %v6440_v47 = vrot.slane %v6438_v61, 7  ;;  %v6392_v18 = vld [vmem:[#allocation7 + $0x4] sm:$0x1]  ;;  %v6264_v58 = vmax.f32 %v6234_v6, %v6254_v45  ;;  %6431 = vrot.lane.b32.xlu1 %v6430_v5, %s10826_s9  ;;  %v8973_v63 = vrot.slane %v6481_v23, 9  ;;  %v6272_v35 = vmax.f32 %v6212_v14, %v6262_v16  ;;  %v6463_v20 = vld [vmem:[#allocation7 + $0x8] sm:$0x3] }
 0x46f   :  { %6322 = vst.msk [vmem:[#allocation7 + $0x18] sm:$0xf] %vm6315_vm0, %v9345_v33  ;;  %v6344_v42 = vrot.slane %v6342_v11, 7  ;;  %v6474_v4 = vrot.slane %v6473_v31, 4  ;;  %v6394_v57 = vrot.slane %v6392_v18, 5  ;;  %6457 = vrot.lane.b32.xlu0 %v6456_v12, %s10826_s9  ;;  %v10748_v60 = vld [vmem:[%s13861_s5 + $0xf0] sm:$0xff]  }
 0x470   :  { %v6492_v46 = vld [vmem:[#allocation7 + $0xc] sm:$0x3]  ;;  %6443 = vst.msk [vmem:[#allocation3 + $0x14] sm:$0x4] %vm6442_vm4, %v6440_v47  ;;  %v6416_v10 = vld [vmem:[#allocation7 + $0x4] sm:$0x3]  ;;  %v9346_v13 = vpack.c.bf16 %v6272_v35, %v6272_v35  ;;  %v6274_v43 = vmax.f32 %v6214_v53, %v6264_v58  ;;  %9639 = vmatprep.subr.bf16.mxu1 %v10748_v60 }
 0x471   :  { %v6512_v50 = vld [vmem:[#allocation7 + $0xc] sm:$0x3]  ;;  %v6232_v59 = vld [vmem:[#allocation5 + $0x88] ss:$2 sm:$0xff]  ;;  %6486 = vst.msk [vmem:[#allocation3 + $0x20] sm:$0x1] %vm6390_vm2, %v8973_v63 }
 0x472   :  { %v6182_v24 = vld [vmem:[#allocation5 + $0x80] ss:$2 sm:$0xff]  ;;  %v6202_v19 = vld [vmem:[#allocation5 + $0x81] ss:$2 sm:$0xff]  ;;  %6347 = vst.msk [vmem:[#allocation3 + $0xc] sm:$0x2] %vm6346_vm5, %v6344_v42  ;;  %6475 = vrot.lane.b32.xlu1 %v6474_v4, %s10826_s9  ;;  %v9348_v26 = vpack.c.bf16 %v6274_v43, %v6274_v43 }
 0x473   :  { %v6213_v36 = vmax.f32 %v6182_v24, %v6202_v19  ;;  %v6252_v44 = vld [vmem:[#allocation5 + $0x89] ss:$2 sm:$0xff]  ;;  %v6494_v39 = vshrl.u32 %v6492_v46, 16  ;;  %v6497_v62 = vshll.u32 %v6492_v46, 16  ;;  %v6514_v37 = vshrl.u32 %v6512_v50, 16  ;;  %v10750_v12 = vld [vmem:[%s13861_s5 + $0xb0] sm:$0xff]  }
 0x474   :  { %6397 = vst.msk [vmem:[#allocation3 + $0xc] sm:$0x8] %vm6396_vm7, %v6394_v57  ;;  %v6263_v51 = vmax.f32 %v6232_v59, %v6252_v44  ;;  %v6517_v15 = vshll.u32 %v6512_v50, 16  ;;  %v6527_v30 = vld [vmem:[#allocation7 + $0xc] sm:$0x2]  ;;  %v6418_v27 = vrot.slane %v6416_v10, 6  ;;  %9640 = vmatpush3.bf16.msra.mxu1 %v10750_v12 }
 0x475   :  { %6323 = vst.msk [vmem:[#allocation7 + $0x1c] sm:$0xf] %vm6315_vm0, %v9346_v13  ;;  %v6496_v52 = vrot.slane %v6494_v39, 5  ;;  %v6499_v54 = vrot.slane %v6497_v62, 6  ;;  %v6516_v25 = vrot.slane %v6514_v37, 6  ;;  %v6529_v2 = vrot.slane %v6527_v30, 7 }
 0x476   :  { %6464 = vst.msk [vmem:[#allocation3 + $0x1c] sm:$0x3] %vm6365_vm3, %v6463_v20  ;;  %v6519_v28 = vrot.slane %v6517_v15, 7  ;;  %v6273_v56 = vmax.f32 %v6213_v36, %v6263_v51  ;;  %v6444_v38 = vld [vmem:[#allocation7 + $0x8] sm:$0x1]  ;;  %v10710_v13 = vld [vmem:[%s13861_s5 + $0x98] sm:$0xff]  }
 0x477   :  { %6325 = vst.msk [vmem:[#allocation7 + $0x24] sm:$0xf] %vm6315_vm0, %v9348_v26  ;;  %v6500_v61 = vor.u32 %v6499_v54, %v6496_v52  ;;  %v6537_v3 = vld [vmem:[#allocation7 + $0x18] sm:$0x3]  ;;  %v6761_v22 = vld [vmem:[#allocation3 + $0x8] sm:$0xc] }
 0x478   :  { %6531 = vst.msk [vmem:[#allocation3 + $0x20] sm:$0x4] %vm6442_vm4, %v6529_v2  ;;  %v6553_v8 = vld [vmem:[#allocation7 + $0x18] sm:$0x3]  ;;  %v6520_v29 = vor.u32 %v6519_v28, %v6516_v25  ;;  %v6539_v23 = vshrl.u32 %v6537_v3, 16  ;;  %v6542_v34 = vshll.u32 %v6537_v3, 16  ;;  %v9347_v7 = vpack.c.bf16 %v6273_v56, %v6273_v56 }
 0x479   :  { %v6569_v32 = vld [vmem:[#allocation7 + $0x18] sm:$0x2]  ;;  %v6555_v11 = vshrl.u32 %v6553_v8, 16  ;;  %6421 = vst.msk [vmem:[#allocation3 + $0x10] sm:$0xc] %vm6420_vm8, %v6418_v27  ;;  %6501 = vrot.lane.b32.xlu0 %v6500_v61, %s10826_s9  ;;  %v6558_v49 = vshll.u32 %v6553_v8, 16 }
 0x47a   :  { %6521 = vrot.lane.b32.xlu1 %v6520_v29, %s10826_s9  ;;  %v13245_v1 = vld [vmem:[#allocation3 + $0x14] sm:$0xf]  ;;  %v13247_v16 = vld [vmem:[#allocation3 + $0x2c] sm:$0xf]  ;;  %v6541_v21 = vrot.slane %v6539_v23, 7  ;;  %v8974_v9 = vrot.slane %v6569_v32, 9 }
 0x47b   :  { %v6557_v40 = vrot.slane %v6555_v11, 4  ;;  %v6446_v48 = vrot.slane %v6444_v38, 7  ;;  %v6560_v14 = vrot.slane %v6558_v49, 5  ;;  %6324 = vst.msk [vmem:[#allocation7 + $0x20] sm:$0xf] %vm6315_vm0, %v9347_v7  ;;  %v9018_v31 = vcombine.low %v6761_v22, %v13245_v1  ;;  %v10753_v20 = vld [vmem:[%s13861_s5 + $0xe8] sm:$0xff]  }
 0x47c   :  { %v6580_v17 = vld [vmem:[#allocation7 + $0x1c] sm:$0x3]  ;;  %v6544_v6 = vor.u32 %v6542_v34, %v6541_v21  ;;  %6574 = vst.msk [vmem:[#allocation3 + $0x44] sm:$0x1] %vm6390_vm2, %v8974_v9  ;;  %v13278_v54 = vld [vmem:[#allocation3 + $0x38] sm:$0xf]  ;;  %9641 = vmatprep.subr.bf16.mxu1 %v10753_v20 }
 0x47d   :  { %v6600_v0 = vld [vmem:[#allocation7 + $0x1c] sm:$0x3]  ;;  %v6582_v5 = vshrl.u32 %v6580_v17, 16  ;;  %v6585_v33 = vshll.u32 %v6580_v17, 16  ;;  %6448 = vst.msk [vmem:[#allocation3 + $0x18] sm:$0x2] %vm6346_vm5, %v6446_v48  ;;  %v6561_v47 = vor.u32 %v6560_v14, %v6557_v40  ;;  %v9122_v20 = vcombine.low %v13247_v16, %v13278_v54 }
 0x47e   :  { %v6602_v53 = vshrl.u32 %v6600_v0, 16  ;;  %v6615_v45 = vld [vmem:[#allocation7 + $0x1c] sm:$0x2]  ;;  %v6605_v18 = vshll.u32 %v6600_v0, 16  ;;  %6545 = vrot.lane.b32.xlu0 %v6544_v6, %s10826_s9  ;;  %v6668_v42 = vld [vmem:[#allocation7 + $0x24] sm:$0x3] }
 0x47f   :  { %v6617_v41 = vrot.slane %v6615_v45, 7  ;;  %v13256_v58 = vld [vmem:[#allocation3 + $0x20] sm:$0xf]  ;;  %v6584_v63 = vrot.slane %v6582_v5, 5  ;;  %v6587_v35 = vrot.slane %v6585_v33, 6  ;;  %v6562_v46 = vrot.slane %v6561_v47, 4 }
 0x480   :  { %v13261_v4 = vcombine.low %v13256_v58, %v13247_v16  ;;  %v6604_v50 = vrot.slane %v6602_v53, 6  ;;  %v6607_v57 = vrot.slane %v6605_v18, 7  ;;  %v6703_v10 = vld [vmem:[#allocation7 + $0x24] sm:$0x2]  ;;  %v6859_v19 = vrot.slane %v9018_v31, 2  ;;  %v10711_v25 = vld [vmem:[%s13861_s5 + $0x90] sm:$0xff]  }
 0x481   :  { %6619 = vst.msk [vmem:[#allocation3 + $0x44] sm:$0x4] %vm6442_vm4, %v6617_v41  ;;  %v6588_v24 = vor.u32 %v6587_v35, %v6584_v63  ;;  %6563 = vrot.lane.b32.xlu1 %v6562_v46, %s10826_s9  ;;  %v6688_v43 = vld [vmem:[#allocation7 + $0x24] sm:$0x3]  ;;  %v6705_v36 = vrot.slane %v6703_v10, 7  ;;  %v6670_v62 = vshrl.u32 %v6668_v42, 16 }
 0x482   :  { %v6860_v59 = vrot.slane %v13261_v4, 2  ;;  %v6625_v44 = vld [vmem:[#allocation7 + $0x20] sm:$0x3]  ;;  %v6673_v37 = vshll.u32 %v6668_v42, 16  ;;  %v6608_v51 = vor.u32 %v6607_v57, %v6604_v50  ;;  %v14075_v38 = vmov 0.0   ;;  %v10758_v48 = vld [vmem:[%s13861_s5 + $0xe0] sm:$0xff]  }
 0x483   :  { %6589 = vrot.lane.b32.xlu0 %v6588_v24, %s10826_s9  ;;  %v6641_v39 = vld [vmem:[#allocation7 + $0x20] sm:$0x3]  ;;  %v6627_v15 = vshrl.u32 %v6625_v44, 16  ;;  %6707 = vst.msk [vmem:[#allocation3 + $0x50] sm:$0x4] %vm6442_vm4, %v6705_v36  ;;  %v6630_v56 = vshll.u32 %v6625_v44, 16 }
 0x484   :  { %v6861_v55 = vsel %vm6852_vm9, %v6859_v19, %v6860_v59  ;;  %v6643_v30 = vshrl.u32 %v6641_v39, 16  ;;  %v6657_v26 = vld [vmem:[#allocation7 + $0x20] sm:$0x2]  ;;  %v6646_v52 = vshll.u32 %v6641_v39, 16  ;;  %v6487_v61 = vld [vmem:[#allocation7 + $0xc] sm:$0x1] }
 0x485   :  { %10373 = vmatmul.mubr.msk.bf16.vlgmr.msra.gmra.mxu0 %vm6144_vm15, %v6861_v55  ;;  %v8975_v2 = vrot.slane %v6657_v26, 9  ;;  %6609 = vrot.lane.b32.xlu1 %v6608_v51, %s10826_s9  ;;  %v6629_v28 = vrot.slane %v6627_v15, 7  ;;  %v10755_v3 = vld [vmem:[%s13861_s5 + $0xa8] sm:$0xff]   ;;  %v6690_v29 = vshrl.u32 %v6688_v43, 16  ;;  %v6693_v23 = vshll.u32 %v6688_v43, 16  ;;  %v10759_v14 = vld [vmem:[%s13861_s5 + $0xa0] sm:$0xff]  }
 0x486   :  { %v6645_v27 = vrot.slane %v6643_v30, 4  ;;  %10376 = vmatprep.mubr.msk.bf16.mxu0 %vm10829_vm1, %v14075_v38  ;;  %v6648_v8 = vrot.slane %v6646_v52, 5  ;;  %10385 = vmatpush3.bf16.msra.mxu0 %v10710_v13  ;;  %v6489_v11 = vrot.slane %v6487_v61, 5  ;;  %v6672_v22 = vrot.slane %v6670_v62, 5  ;;  %v6507_v7 = vld [vmem:[#allocation7 + $0xc] sm:$0x3] }
 0x487   :  { %6662 = vst.msk [vmem:[#allocation3 + $0x50] sm:$0x1] %vm6390_vm2, %v8975_v2  ;;  %v6632_v60 = vor.u32 %v6630_v56, %v6629_v28  ;;  %v6675_v34 = vrot.slane %v6673_v37, 6  ;;  %10386 = vmatprep.subr.bf16.mxu0 %v14075_v38  ;;  %9642 = vmatpush3.bf16.msra.mxu1 %v10755_v3  ;;  %v6509_v40 = vrot.slane %v6507_v7, 6  ;;  %v6532_v9 = vld [vmem:[#allocation7 + $0x18] sm:$0x1]  ;;  %v9119_v30 = vcombine.low %v13245_v1, %v13256_v58 }
 0x488   :  { %v13289_v32 = vld [vmem:[#allocation3 + $0x44] sm:$0xf]  ;;  %v6649_v21 = vor.u32 %v6648_v8, %v6645_v27  ;;  %6491 = vst.msk [vmem:[#allocation3 + $0x18] sm:$0x8] %vm6396_vm7, %v6489_v11  ;;  %v6534_v0 = vrot.slane %v6532_v9, 7  ;;  %v6692_v53 = vrot.slane %v6690_v29, 6  ;;  %9643 = vmatprep.subr.bf16.mxu1 %v10758_v48 }
 0x489   :  { %v13294_v49 = vcombine.low %v13278_v54, %v13289_v32  ;;  %6633 = vrot.lane.b32.xlu0 %v6632_v60, %s10826_s9  ;;  %v6551_v6 = vld [vmem:[#allocation7 + $0x18] sm:$0x3]  ;;  %v6575_v5 = vld [vmem:[#allocation7 + $0x1c] sm:$0x1]  ;;  %v6695_v45 = vrot.slane %v6693_v23, 7  ;;  %v10713_v12 = vld [vmem:[%s13861_s5 + $0x88] sm:$0xff]   ;;  %v6676_v18 = vor.u32 %v6675_v34, %v6672_v22 }
 0x48a   :  { %v6650_v33 = vrot.slane %v6649_v21, 4  ;;  %10387 = vmatpush3.bf16.msra.mxu0 %v10711_v25  ;;  %6511 = vst.msk [vmem:[#allocation3 + $0x1c] sm:$0xc] %vm6420_vm8, %v6509_v40  ;;  %v6577_v31 = vrot.slane %v6575_v5, 5  ;;  %v10762_v47 = vld [vmem:[%s13861_s5 + $0x78] sm:$0xff]   ;;  %v10714_v24 = vld [vmem:[%s13861_s5 + $0x80] sm:$0xff]  }
 0x48b   :  { %v6866_v17 = vrot.slane %v13294_v49, 2  ;;  %6552 = vst.msk [vmem:[#allocation3 + $0x40] sm:$0x3] %vm6365_vm3, %v6551_v6  ;;  %10388 = vmatprep.subr.bf16.mxu0 %v14075_v38  ;;  %9644 = vmatpush3.bf16.msra.mxu1 %v10759_v14  ;;  %v6595_v63 = vld [vmem:[#allocation7 + $0x1c] sm:$0x3]  ;;  %v6696_v10 = vor.u32 %v6695_v45, %v6692_v53  ;;  %v10715_v62 = vld [vmem:[%s13861_s5 + $0x1d8] sm:$0xff]  }
 0x48c   :  { %6536 = vst.msk [vmem:[#allocation3 + $0x3c] sm:$0x2] %vm6346_vm5, %v6534_v0  ;;  %v6620_v35 = vld [vmem:[#allocation7 + $0x20] sm:$0x1]  ;;  %6651 = vrot.lane.b32.xlu1 %v6650_v33, %s10826_s9  ;;  %v6597_v42 = vrot.slane %v6595_v63, 6  ;;  %9670 = vmatprep.subr.bf16.mxu1 %v10762_v47  ;;  %v10716_v55 = vld [vmem:[%s13861_s5 + $0x1d0] sm:$0xff]  }
 0x48d   :  { %v6867_v41 = vsel %vm6852_vm9, %v6860_v59, %v6866_v17  ;;  %6579 = vst.msk [vmem:[#allocation3 + $0x3c] sm:$0x8] %vm6396_vm7, %v6577_v31  ;;  %v6622_v46 = vrot.slane %v6620_v35, 7  ;;  %v6639_v50 = vld [vmem:[#allocation7 + $0x20] sm:$0x3]  ;;  %6677 = vrot.lane.b32.xlu0 %v6676_v18, %s10826_s9  ;;  %v10718_v15 = vld [vmem:[%s13861_s5 + $0x1c0] sm:$0xff]  }
 0x48e   :  { %10377 = vmatmul.mubr.msk.bf16.gmra.mxu0 %vm6144_vm15, %v6867_v41  ;;  %v10712_v57 = vld [vmem:[#allocation3 + $0x50] ss:$0 sps:$4 sm:$0x33]   ;;  %6640 = vst.msk [vmem:[#allocation3 + $0x4c] sm:$0x3] %vm6365_vm3, %v6639_v50  ;;  %v10717_v51 = vld [vmem:[%s13861_s5 + $0x1c8] sm:$0xff]   ;;  %vm13483_vm3 = vmand %vm6410_vm14, %vm4075_vm11 }
 0x48f   :  { %10380 = vmatprep.mubr.msk.bf16.mxu0 %vm10829_vm1, %v14075_v38  ;;  %10389 = vmatpush3.bf16.msra.mxu0 %v10713_v12  ;;  %6599 = vst.msk [vmem:[#allocation3 + $0x40] sm:$0xc] %vm6420_vm8, %v6597_v42  ;;  %v6663_v19 = vld [vmem:[#allocation7 + $0x24] sm:$0x1]  ;;  %v6872_v59 = vrot.slane %v10712_v57, 2  ;;  %v10720_v26 = vld [vmem:[%s13861_s5 + $0x270] sm:$0xff]  }
 0x490   :  { %6624 = vst.msk [vmem:[#allocation3 + $0x48] sm:$0x2] %vm6346_vm5, %v6622_v46  ;;  %10390 = vmatprep.subr.bf16.mxu0 %v14075_v38  ;;  %v6665_v13 = vrot.slane %v6663_v19, 5  ;;  %v6683_v43 = vld [vmem:[#allocation7 + $0x24] sm:$0x3]  ;;  %6697 = vrot.lane.b32.xlu1 %v6696_v10, %s10826_s9  ;;  %v10722_v58 = vld [vmem:[%s13861_s5 + $0x260] sm:$0xff]  }
 0x491   :  { %v6685_v36 = vrot.slane %v6683_v43, 6  ;;  %v6873_v44 = vsel %vm6852_vm9, %v6866_v17, %v6872_v59  ;;  %v6709_v39 = vld [vmem:[#allocation3 + $0x8] sm:$0xf]  ;;  %v10730_v16 = vld [vmem:[%s13861_s5 + $0x2f8] sm:$0xff]   ;;  %v7373_v52 = vld [vmem:[#allocation3 + $0x50] sm:$0xf] }
 0x492   :  { %6667 = vst.msk [vmem:[#allocation3 + $0x48] sm:$0x8] %vm6396_vm7, %v6665_v13  ;;  %v9053_v37 = vcombine.low %v6709_v39, %v13245_v1  ;;  %v10721_v1 = vld [vmem:[%s13861_s5 + $0x268] sm:$0xff]   ;;  %v13396_v54 = vld [vmem:[#allocation3 + $0x20] sm:$0xf]  ;;  %v9125_v28 = vcombine.low %v13289_v32, %v7373_v52  ;;  %v10732_v32 = vld [vmem:[%s13861_s5 + $0x2b8] sm:$0xff]  }
 0x493   :  { %10391 = vmatpush3.bf16.msra.mxu0 %v10714_v24  ;;  %6687 = vst.msk [vmem:[#allocation3 + $0x4c] sm:$0xc] %vm6420_vm8, %v6685_v36  ;;  %v13398_v25 = vld [vmem:[#allocation3 + $0x2c] sm:$0xf]  ;;  %v13400_v2 = vld [vmem:[#allocation3 + $0x38] sm:$0xf] }
 0x494   :  { %10404 = vmatprep.subr.bf16.mxu0 %v14075_v38  ;;  %v7679_v56 = vld [vmem:[#allocation3 + $0x14] sm:$0xc]  ;;  %v9194_v61 = vcombine.low %v13398_v25, %v13400_v2  ;;  %v13409_v29 = vld [vmem:[#allocation3 + $0x50] sm:$0xf]  ;;  %v13414_v23 = vld [vmem:[#allocation3 + $0x44] sm:$0xf] }
 0x495   :  { %v9191_v27 = vcombine.low %v7679_v56, %v13396_v54  ;;  %v10733_v11 = vld [vmem:[%s13861_s5 + $0x2f0] sm:$0xff]   ;;  %v9197_v22 = vcombine.low %v13414_v23, %v13409_v29  ;;  %v10739_v21 = vld [vmem:[%s13861_s5 + $0x2a8] sm:$0xff]   ;;  %v10742_v40 = vld [vmem:[%s13861_s5 + $0x2e0] sm:$0xff]   ;;  %vm6411_vm0 = vsmask.f32 7946 }
 0x496   :  { %10381 = vmatmul.mubr.msk.bf16.gmra.mxu0 %vm6144_vm15, %v6873_v44  ;;  %v7787_v8 = vrot.slane %v9194_v61, 2  ;;  %v10735_v34 = vld [vmem:[%s13861_s5 + $0x2b0] sm:$0xff]   ;;  %v10737_v48 = vld [vmem:[#allocation3 + $0x5c] ss:$0 sps:$4 sm:$0x33]   ;;  %v10743_v14 = vld [vmem:[%s13861_s5 + $0x2a0] sm:$0xff]  }
 0x497   :  { %10392 = vmatprep.mubr.msk.bf16.mxu0 %vm10829_vm1, %v14075_v38  ;;  %v7786_v3 = vrot.slane %v9191_v27, 2  ;;  %v7793_v7 = vrot.slane %v9197_v22, 2  ;;  %v10746_v17 = vld [vmem:[%s13861_s5 + $0x2d8] sm:$0xff]   ;;  %v7799_v0 = vrot.slane %v10737_v48, 2  ;;  %v6361_v53 = vld [vmem:[#allocation3 + $0xc] sm:$0x3]  ;;  %vm13474_vm2 = vmand %vm6410_vm14, %vm6411_vm0 }
 0x498   :  { %v10747_v5 = vld [vmem:[%s13861_s5 + $0x298] sm:$0xff]   ;;  %v10749_v45 = vld [vmem:[%s13861_s5 + $0x2d0] sm:$0xff]   ;;  %v10752_v46 = vld [vmem:[%s13861_s5 + $0x2c8] sm:$0xff]  }
 0x499   :  { %v7788_v60 = vsel %vm6852_vm9, %v7786_v3, %v7787_v8  ;;  %v7794_v9 = vsel %vm6852_vm9, %v7787_v8, %v7793_v7  ;;  %v7800_v47 = vsel %vm6852_vm9, %v7793_v7, %v7799_v0  ;;  %v6382_v41 = vld [vmem:[#allocation3 + $0x10] sm:$0x3]  ;;  %v6413_v50 = vld [vmem:[#allocation3 + $0xc] sm:$0xc]  ;;  %v6435_v59 = vld [vmem:[#allocation3 + $0x10] sm:$0xc] }
 0x49a   :  { %v10751_v63 = vld [vmem:[%s13861_s5 + $0x290] sm:$0xff]   ;;  %v10754_v19 = vld [vmem:[%s13861_s5 + $0x288] sm:$0xff]   ;;  %v10756_v43 = vld [vmem:[%s13861_s5 + $0x2c0] sm:$0xff]  }
 0x49b   :  { %v6460_v44 = vld [vmem:[#allocation3 + $0x18] sm:$0x3]  ;;  %v6760_v56 = vld [vmem:[#allocation3] sm:$0xcc]  ;;  %v6566_v61 = vld [vmem:[#allocation3 + $0x40] sm:$0x3] }
 0x49c   :  { %v13520_v7 = vld [vmem:[#allocation3] sm:$0xff]  ;;  %v10770_v10 = vld [vmem:[%s13861_s5 + $0x58] sm:$0xff]  }
 0x49e   :  { %10393 = vmatmul.mubr.msk.bf16.vlgmr.msra.gmra.mxu0 %vm6144_vm15, %v9053_v37  ;;  %v10757_v37 = vld [vmem:[%s13861_s5 + $0x280] sm:$0xff]  }
 0x49f   :  { %10396 = vmatprep.mubr.msk.bf16.mxu0 %vm10829_vm1, %v14075_v38  ;;  %10405 = vmatpush3.bf16.msra.mxu0 %v10715_v62 }
 0x4a0   :  { %10406 = vmatprep.subr.bf16.mxu0 %v14075_v38 }
 0x4a3   :  { %10407 = vmatpush3.bf16.msra.mxu0 %v10716_v55  ;;  %v6478_v55 = vld [vmem:[#allocation3 + $0x1c] sm:$0x3] }
 0x4a4   :  { %10408 = vmatprep.subr.bf16.mxu0 %v14075_v38 }
 0x4a6   :  { %10397 = vmatmul.mubr.msk.bf16.gmra.mxu0 %vm6144_vm15, %v13261_v4  ;;  %v10719_v4 = vld [vmem:[%s13861_s5 + $0x278] sm:$0xff]  }
 0x4a7   :  { %10400 = vmatprep.mubr.msk.bf16.mxu0 %vm10829_vm1, %v14075_v38  ;;  %10409 = vmatpush3.bf16.msra.mxu0 %v10717_v51 }
 0x4a8   :  { %10410 = vmatprep.subr.bf16.mxu0 %v14075_v38 }
 0x4ab   :  { %10411 = vmatpush3.bf16.msra.mxu0 %v10718_v15 }
 0x4ac   :  { %10424 = vmatprep.subr.bf16.mxu0 %v14075_v38 }
 0x4ae   :  { %10401 = vmatmul.mubr.msk.bf16.gmra.mxu0 %vm6144_vm15, %v13294_v49  ;;  %v10738_v49 = vld [vmem:[%s13861_s5 + $0x2e8] sm:$0xff]  }
 0x4af   :  { %10412 = vmatprep.mubr.msk.bf16.mxu0 %vm10829_vm1, %v14075_v38 }
 0x4b6   :  { %10413 = vmatmul.mubr.msk.bf16.vlgmr.msra.gmra.mxu0 %vm6144_vm15, %v9119_v30 }
 0x4b7   :  { %10416 = vmatprep.mubr.msk.bf16.mxu0 %vm10829_vm1, %v14075_v38  ;;  %10425 = vmatpush3.bf16.msra.mxu0 %v10719_v4  ;;  %v6504_v4 = vld [vmem:[#allocation3 + $0x18] sm:$0xc] }
 0x4b8   :  { %10426 = vmatprep.subr.bf16.mxu0 %v14075_v38 }
 0x4bb   :  { %10427 = vmatpush3.bf16.msra.mxu0 %v10720_v26 }
 0x4bc   :  { %10428 = vmatprep.subr.bf16.mxu0 %v14075_v38 }
 0x4be   :  { %10417 = vmatmul.mubr.msk.bf16.gmra.mxu0 %vm6144_vm15, %v9122_v20  ;;  %v6524_v20 = vld [vmem:[#allocation3 + $0x1c] sm:$0xc] }
 0x4bf   :  { %10420 = vmatprep.mubr.msk.bf16.mxu0 %vm10829_vm1, %v14075_v38  ;;  %10429 = vmatpush3.bf16.msra.mxu0 %v10721_v1 }
 0x4c0   :  { %10430 = vmatprep.subr.bf16.mxu0 %v14075_v38 }
 0x4c3   :  { %10431 = vmatpush3.bf16.msra.mxu0 %v10722_v58 }
 0x4c4   :  { %9793 = vmatprep.subr.bf16.mxu0 %v10730_v16  ;;  %v6548_v16 = vld [vmem:[#allocation3 + $0x3c] sm:$0x3] }
 0x4c6   :  { %10421 = vmatmul.mubr.msk.bf16.gmra.mxu0 %vm6144_vm15, %v9125_v28 }
 0x4c7   :  { %10432 = vmatprep.mubr.msk.bf16.mxu0 %vm10829_vm1, %v14075_v38 }
 0x4ce   :  { %10433 = vmatmul.mubr.msk.bf16.vlgmr.msra.gmra.mxu0 %vm6144_vm15, %v7788_v60 }
 0x4cf   :  { %10436 = vmatprep.mubr.msk.bf16.mxu0 %vm10829_vm1, %v14075_v38  ;;  %9794 = vmatpush3.bf16.msra.mxu0 %v10732_v32 }
 0x4d0   :  { %9795 = vmatprep.subr.bf16.mxu0 %v10733_v11  ;;  %v6592_v11 = vld [vmem:[#allocation3 + $0x3c] sm:$0xc] }
 0x4d3   :  { %9796 = vmatpush3.bf16.msra.mxu0 %v10735_v34 }
 0x4d4   :  { %9797 = vmatprep.subr.bf16.mxu0 %v10738_v49 }
 0x4d6   :  { %10437 = vmatmul.mubr.msk.bf16.gmra.mxu0 %vm6144_vm15, %v7794_v9 }
 0x4d7   :  { %10440 = vmatprep.mubr.msk.bf16.mxu0 %vm10829_vm1, %v14075_v38  ;;  %9798 = vmatpush3.bf16.msra.mxu0 %v10739_v21 }
 0x4d8   :  { %9799 = vmatprep.subr.bf16.mxu0 %v10742_v40  ;;  %v6357_v33 = vpop.permute.xlu0 %6356 }
 0x4d9   :  { %v6362_v12 = vsel %vm13449_vm12, %v6357_v33, %v6361_v53 }
 0x4da   :  { %6363 = vst [vmem:[#allocation3 + $0xc] sm:$0x3] %v6362_v12  ;;  %v6378_v18 = vpop.permute.xlu1 %6377 }
 0x4db   :  { %9800 = vmatpush3.bf16.msra.mxu0 %v10743_v14  ;;  %v6383_v35 = vsel %vm13462_vm6, %v6378_v18, %v6382_v41  ;;  %v6612_v14 = vld [vmem:[#allocation3 + $0x40] sm:$0xc]  ;;  %v10764_v18 = vld [vmem:[%s13861_s5 + $0x70] sm:$0xff]   ;;  %v6636_v41 = vld [vmem:[#allocation3 + $0x48] sm:$0x3] }
 0x4dc   :  { %9801 = vmatprep.subr.bf16.mxu0 %v10746_v17  ;;  %6384 = vst [vmem:[#allocation3 + $0x10] sm:$0x3] %v6383_v35  ;;  %v6408_v57 = vpop.permute.xlu0 %6407 }
 0x4dd   :  { %v6414_v24 = vsel %vm13474_vm2, %v6408_v57, %v6413_v50  ;;  %v6654_v50 = vld [vmem:[#allocation3 + $0x4c] sm:$0x3] }
 0x4de   :  { %10441 = vmatmul.mubr.msk.bf16.gmra.mxu0 %vm6144_vm15, %v7800_v47  ;;  %6415 = vst [vmem:[#allocation3 + $0xc] sm:$0xc] %v6414_v24  ;;  %v10766_v24 = vld [vmem:[%s13861_s5 + $0x68] sm:$0xff]  }
 0x4df   :  { %9802 = vmatpush3.bf16.msra.mxu0 %v10747_v5 }
 0x4e0   :  { %9803 = vmatprep.subr.bf16.mxu0 %v10749_v45  ;;  %v6432_v13 = vpop.permute.xlu1 %6431  ;;  %v10763_v45 = vld [vmem:[%s13861_s5 + $0x38] sm:$0xff]  }
 0x4e1   :  { %v6436_v36 = vsel %vm13483_vm3, %v6432_v13, %v6435_v59  ;;  %v6458_v39 = vpop.permute.xlu0 %6457  ;;  %v6680_v59 = vld [vmem:[#allocation3 + $0x48] sm:$0xc] }
 0x4e2   :  { %6437 = vst [vmem:[#allocation3 + $0x10] sm:$0xc] %v6436_v36  ;;  %v6461_v62 = vsel %vm13449_vm12, %v6458_v39, %v6460_v44  ;;  %v10767_v36 = vld [vmem:[%s13861_s5 + $0x28] sm:$0xff]  }
 0x4e3   :  { %9804 = vmatpush3.bf16.msra.mxu0 %v10751_v63  ;;  %6462 = vst [vmem:[#allocation3 + $0x18] sm:$0x3] %v6461_v62  ;;  %v6700_v39 = vld [vmem:[#allocation3 + $0x4c] sm:$0xc]  ;;  %v10768_v62 = vld [vmem:[%s13861_s5 + $0x60] sm:$0xff]  }
 0x4e4   :  { %9805 = vmatprep.subr.bf16.mxu0 %v10752_v46  ;;  %v6476_v51 = vpop.permute.xlu1 %6475  ;;  %v10765_v46 = vld [vmem:[%s13861_s5 + $0x30] sm:$0xff]  }
 0x4e5   :  { %v6479_v15 = vsel %vm13462_vm6, %v6476_v51, %v6478_v55 }
 0x4e6   :  { %6480 = vst [vmem:[#allocation3 + $0x1c] sm:$0x3] %v6479_v15  ;;  %v10769_v15 = vld [vmem:[%s13861_s5 + $0x20] sm:$0xff]  }
 0x4e7   :  { %9806 = vmatpush3.bf16.msra.mxu0 %v10754_v19 }
 0x4e8   :  { %9807 = vmatprep.subr.bf16.mxu0 %v10756_v43 }
 0x4e9   :  { %v13508_v28 = vld [vmem:[#allocation3 + $0xc] sm:$0xff] }
 0x4ea   :  { %v9016_v8 = vcombine.low %v6760_v56, %v13508_v28  ;;  %v9017_v22 = vcombine.high %v6760_v56, %v13508_v28 }
 0x4eb   :  { %9808 = vmatpush3.bf16.msra.mxu0 %v10757_v37  ;;  %v6502_v30 = vpop.permute.xlu0 %6501 }
 0x4ec   :  { %v6505_v26 = vsel %vm13474_vm2, %v6502_v30, %v6504_v4  ;;  %v6522_v1 = vpop.permute.xlu1 %6521  ;;  %v6853_v48 = vrot.slane %v9016_v8, 2  ;;  %v6856_v0 = vrot.slane %v9017_v22, 2  ;;  %v9052_v22 = vcombine.high %v13520_v7, %v13508_v28 }
 0x4ed   :  { %6506 = vst [vmem:[#allocation3 + $0x18] sm:$0xc] %v6505_v26  ;;  %v6525_v58 = vsel %vm13483_vm3, %v6522_v1, %v6524_v20 }
 0x4ee   :  { %6526 = vst [vmem:[#allocation3 + $0x1c] sm:$0xc] %v6525_v58  ;;  %v10771_v58 = vld [vmem:[%s13861_s5 + $0x18] sm:$0xff]  }
 0x4f0   :  { %v6546_v52 = vpop.permute.xlu0 %6545 }
 0x4f1   :  { %v6549_v27 = vsel %vm13449_vm12, %v6546_v52, %v6548_v16  ;;  %v10773_v52 = vld [vmem:[%s13861_s5 + $0x50] sm:$0xff]  }
 0x4f2   :  { %6550 = vst [vmem:[#allocation3 + $0x3c] sm:$0x3] %v6549_v27 }
 0x4f3   :  { %v6564_v3 = vpop.permute.xlu1 %6563 }
 0x4f4   :  { %v6567_v32 = vsel %vm13462_vm6, %v6564_v3, %v6566_v61 }
 0x4f5   :  { %v6590_v60 = vpop.permute.xlu0 %6589  ;;  %6568 = vst [vmem:[#allocation3 + $0x40] sm:$0x3] %v6567_v32  ;;  %v13516_v34 = vld [vmem:[#allocation3 + $0x18] sm:$0xff]  ;;  %v10774_v32 = vld [vmem:[%s13861_s5 + $0x10] sm:$0xff]  }
 0x4f6   :  { %v6593_v49 = vsel %vm13474_vm2, %v6590_v60, %v6592_v11  ;;  %v13524_v21 = vcombine.low %v13516_v34, %v13520_v7  ;;  %v13528_v40 = vcombine.high %v13516_v34, %v13520_v7  ;;  %v9117_v9 = vcombine.low %v13508_v28, %v13516_v34  ;;  %v10775_v11 = vld [vmem:[%s13861_s5 + $0x48] sm:$0xff]  }
 0x4f7   :  { %6594 = vst [vmem:[#allocation3 + $0x3c] sm:$0xc] %v6593_v49  ;;  %v6610_v17 = vpop.permute.xlu1 %6609  ;;  %v10777_v49 = vld [vmem:[%s13861_s5 + $0x8] sm:$0xff]  }
 0x4f8   :  { %8274 = vmatprep.mubr.bf16.mxu0 %v13528_v40  ;;  %v6857_v5 = vrot.slane %v13528_v40, 2  ;;  %v6613_v33 = vsel %vm13483_vm3, %v6610_v17, %v6612_v14  ;;  %v6854_v53 = vrot.slane %v13524_v21, 2  ;;  %v10779_v14 = vld [vmem:[%s13861_s5] sm:$0xff]   ;;  %v10780_v17 = vld [vmem:[%s13861_s5 + $0x1b8] sm:$0xff]  }
 0x4f9   :  { %8275 = vmatmul.mubr.bf16.vlgmr.msra.gmra.mxu0 %v13524_v21  ;;  %6614 = vst [vmem:[#allocation3 + $0x40] sm:$0xc] %v6613_v33  ;;  %v10782_v33 = vld [vmem:[%s13861_s5 + $0x1b0] sm:$0xff]  }
 0x4fa   :  { %v6858_v12 = vsel %vm6852_vm9, %v6856_v0, %v6857_v5  ;;  %v6855_v47 = vsel %vm6852_vm9, %v6853_v48, %v6854_v53  ;;  %v10778_v48 = vld [vmem:[%s13861_s5 + $0x40] sm:$0xff]   ;;  %v10781_v0 = vld [vmem:[%s13861_s5 + $0x178] sm:$0xff]  }
 0x4fb   :  { %7041 = vmatprep.mubr.bf16.mxu1 %v6858_v12  ;;  %v6634_v63 = vpop.permute.xlu0 %6633  ;;  %v10785_v12 = vld [vmem:[%s13861_s5 + $0x168] sm:$0xff]  }
 0x4fc   :  { %7042 = vmatmul.mubr.bf16.vlgmr.msra.gmra.mxu1 %v6855_v47  ;;  %v6637_v35 = vsel %vm13449_vm12, %v6634_v63, %v6636_v41  ;;  %v10786_v47 = vld [vmem:[%s13861_s5 + $0x1a0] sm:$0xff]   ;;  %v10789_v41 = vld [vmem:[%s13861_s5 + $0x158] sm:$0xff]   ;;  %v9118_v63 = vcombine.high %v13508_v28, %v13516_v34 }
 0x4fd   :  { %9671 = vmatpush3.bf16.msra.mxu1 %v10763_v45  ;;  %6638 = vst [vmem:[#allocation3 + $0x48] sm:$0x3] %v6637_v35  ;;  %v10784_v45 = vld [vmem:[%s13861_s5 + $0x1a8] sm:$0xff]   ;;  %v10791_v35 = vld [vmem:[%s13861_s5 + $0x150] sm:$0xff]  }
 0x4fe   :  { %9672 = vmatprep.subr.bf16.mxu1 %v10764_v18  ;;  %v6652_v57 = vpop.permute.xlu1 %6651  ;;  %v10788_v18 = vld [vmem:[%s13861_s5 + $0x198] sm:$0xff]  }
 0x4ff   :  { %v6655_v19 = vsel %vm13462_vm6, %v6652_v57, %v6654_v50  ;;  %v6678_v13 = vpop.permute.xlu0 %6677  ;;  %v10793_v50 = vld [vmem:[%s13861_s5 + $0x148] sm:$0xff]   ;;  %v10794_v57 = vld [vmem:[%s13861_s5 + $0x180] sm:$0xff]  }
 0x500   :  { %6656 = vst [vmem:[#allocation3 + $0x4c] sm:$0x3] %v6655_v19  ;;  %v6681_v6 = vsel %vm13474_vm2, %v6678_v13, %v6680_v59  ;;  %v13558_v43 = vld [vmem:[#allocation3 + $0x3c] sm:$0xff]  ;;  %v10798_v13 = vld [vmem:[%s13861_s5 + $0x250] sm:$0xff]  }
 0x501   :  { %9673 = vmatpush3.bf16.msra.mxu1 %v10765_v46  ;;  %6682 = vst [vmem:[#allocation3 + $0x48] sm:$0xc] %v6681_v6  ;;  %v13565_v44 = vcombine.high %v13520_v7, %v13558_v43  ;;  %v13569_v31 = vcombine.low %v13520_v7, %v13558_v43  ;;  %v10792_v46 = vld [vmem:[%s13861_s5 + $0x188] sm:$0xff]   ;;  %v10796_v19 = vld [vmem:[%s13861_s5 + $0x258] sm:$0xff]   ;;  %v13686_v6 = vcombine.high %v13520_v7, %v13520_v7 }
 0x502   :  { %9674 = vmatprep.subr.bf16.mxu1 %v10766_v24  ;;  %v6698_v42 = vpop.permute.xlu1 %6697  ;;  %v10795_v24 = vld [vmem:[%s13861_s5 + $0x140] sm:$0xff]   ;;  %v10797_v59 = vld [vmem:[%s13861_s5 + $0x218] sm:$0xff]  }
 0x503   :  { %v6701_v37 = vsel %vm13483_vm3, %v6698_v42, %v6700_v39  ;;  %8282 = vmatprep.mubr.bf16.mxu0 %v13565_v44  ;;  %v6864_v55 = vrot.slane %v13565_v44, 2  ;;  %v6862_v51 = vrot.slane %v13569_v31, 2  ;;  %v7678_v42 = vld [vmem:[#allocation3 + $0xc] sm:$0xcc] }
 0x504   :  { %6702 = vst [vmem:[#allocation3 + $0x4c] sm:$0xc] %v6701_v37  ;;  %8283 = vmatmul.mubr.bf16.gmra.mxu0 %v13569_v31  ;;  %v9190_v37 = vcombine.high %v7678_v42, %v13516_v34 }
 0x505   :  { %9675 = vmatpush3.bf16.msra.mxu1 %v10767_v36  ;;  %v6865_v4 = vsel %vm6852_vm9, %v6857_v5, %v6864_v55  ;;  %v6863_v30 = vsel %vm6852_vm9, %v6854_v53, %v6862_v51  ;;  %v9051_v5 = vcombine.low %v13520_v7, %v13508_v28  ;;  %v10783_v53 = vld [vmem:[%s13861_s5 + $0x170] sm:$0xff]   ;;  %v13703_v28 = vcombine.low %v13520_v7, %v13520_v7 }
 0x506   :  { %9676 = vmatprep.subr.bf16.mxu1 %v10768_v62  ;;  %7049 = vmatprep.mubr.bf16.mxu1 %v6865_v4  ;;  %v10799_v36 = vld [vmem:[%s13861_s5 + $0x210] sm:$0xff]   ;;  %v7783_v4 = vrot.slane %v9190_v37, 2 }
 0x507   :  { %7050 = vmatmul.mubr.bf16.gmra.mxu1 %v6863_v30  ;;  %v6762_v26 = vld [vmem:[#allocation3 + $0x48] sm:$0x33]  ;;  %v7784_v30 = vrot.slane %v13686_v6, 2 }
 0x508   :  { %v9026_v20 = vcombine.high %v6762_v26, %v6762_v26  ;;  %v9025_v1 = vcombine.low %v6762_v26, %v6762_v26 }
 0x509   :  { %9677 = vmatpush3.bf16.msra.mxu1 %v10769_v15 }
 0x50a   :  { %9678 = vmatprep.subr.bf16.mxu1 %v10770_v10  ;;  %v6870_v16 = vrot.slane %v9026_v20, 2  ;;  %v6868_v56 = vrot.slane %v9025_v1, 2  ;;  %v10807_v10 = vld [vmem:[%s13861_s5 + $0x1f8] sm:$0xff]   ;;  %v10808_v1 = vld [vmem:[%s13861_s5 + $0x230] sm:$0xff]  }
 0x50b   :  { %v13594_v27 = vld [vmem:[#allocation3 + $0x48] sm:$0xff] }
 0x50c   :  { %v6871_v61 = vsel %vm6852_vm9, %v6864_v55, %v6870_v16  ;;  %v9270_v3 = vcombine.low %v13594_v27, %v13520_v7  ;;  %v9271_v8 = vcombine.high %v13594_v27, %v13520_v7  ;;  %v6869_v60 = vsel %vm6852_vm9, %v6862_v51, %v6868_v56  ;;  %v10805_v7 = vld [vmem:[%s13861_s5 + $0x200] sm:$0xff]   ;;  %v10806_v51 = vld [vmem:[%s13861_s5 + $0x238] sm:$0xff]   ;;  %v10810_v56 = vld [vmem:[%s13861_s5 + $0x228] sm:$0xff]  }
 0x50d   :  { %9679 = vmatpush3.bf16.msra.mxu1 %v10771_v58  ;;  %7055 = vmatprep.mubr.bf16.mxu1 %v6871_v61  ;;  %v13710_v39 = vcombine.high %v13558_v43, %v13594_v27  ;;  %v13731_v26 = vcombine.low %v13558_v43, %v13594_v27  ;;  %v7785_v58 = vsel %vm6852_vm9, %v7783_v4, %v7784_v30  ;;  %v10811_v61 = vld [vmem:[%s13861_s5 + $0x1e8] sm:$0xff]  }
 0x50e   :  { %9680 = vmatprep.subr.bf16.mxu1 %v10773_v52  ;;  %8288 = vmatprep.mubr.bf16.mxu0 %v9271_v8  ;;  %v10809_v52 = vld [vmem:[%s13861_s5 + $0x1f0] sm:$0xff]   ;;  %v10812_v8 = vld [vmem:[%s13861_s5 + $0x220] sm:$0xff]  }
 0x50f   :  { %8289 = vmatmul.mubr.bf16.gmra.mxu0 %v9270_v3  ;;  %7056 = vmatmul.mubr.bf16.gmra.mxu1 %v6869_v60  ;;  %v10813_v60 = vld [vmem:[%s13861_s5 + $0x1e0] sm:$0xff]  }
 0x510   :  { %7294 = vmatprep.mubr.bf16.mxu1 %v9052_v22 }
 0x511   :  { %9681 = vmatpush3.bf16.msra.mxu1 %v10774_v32  ;;  %v9189_v32 = vcombine.low %v7678_v42, %v13516_v34  ;;  %v10814_v34 = vld [vmem:[%s13861_s5 + $0x318] sm:$0xff]  }
 0x512   :  { %9682 = vmatprep.subr.bf16.mxu1 %v10775_v11 }
 0x515   :  { %9683 = vmatpush3.bf16.msra.mxu1 %v10777_v49  ;;  %v7781_v49 = vrot.slane %v13703_v28, 2 }
 0x516   :  { %9684 = vmatprep.subr.bf16.mxu1 %v10778_v48  ;;  %v7780_v48 = vrot.slane %v9189_v32, 2 }
 0x519   :  { %9685 = vmatpush3.bf16.msra.mxu1 %v10779_v14  ;;  %v7791_v14 = vrot.slane %v13710_v39, 2 }
 0x51a   :  { %9711 = vmatprep.subr.bf16.mxu1 %v10780_v17 }
 0x51c   :  { %7295 = vmatmul.mubr.bf16.vlgmr.msra.gmra.mxu1 %v9051_v5 }
 0x51d   :  { %9712 = vmatpush3.bf16.msra.mxu1 %v10781_v0  ;;  %7302 = vmatprep.mubr.bf16.mxu1 %v13528_v40  ;;  %v10787_v40 = vld [vmem:[%s13861_s5 + $0x160] sm:$0xff]   ;;  %v7690_v0 = vld [vmem:[#allocation3 + $0x54] sm:$0x33] }
 0x51e   :  { %9713 = vmatprep.subr.bf16.mxu1 %v10782_v33  ;;  %v7782_v33 = vsel %vm6852_vm9, %v7780_v48, %v7781_v49 }
 0x521   :  { %9714 = vmatpush3.bf16.msra.mxu1 %v10783_v53  ;;  %v7792_v53 = vsel %vm6852_vm9, %v7784_v30, %v7791_v14 }
 0x522   :  { %9715 = vmatprep.subr.bf16.mxu1 %v10784_v45 }
 0x524   :  { %7303 = vmatmul.mubr.bf16.gmra.mxu1 %v13524_v21  ;;  %v10790_v21 = vld [vmem:[%s13861_s5 + $0x190] sm:$0xff]  }
 0x525   :  { %9716 = vmatpush3.bf16.msra.mxu1 %v10785_v12  ;;  %7308 = vmatprep.mubr.bf16.mxu1 %v13565_v44  ;;  %v10800_v44 = vld [vmem:[%s13861_s5 + $0x248] sm:$0xff]   ;;  %v9199_v12 = vcombine.high %v7690_v0, %v7690_v0 }
 0x526   :  { %9717 = vmatprep.subr.bf16.mxu1 %v10786_v47  ;;  %v10815_v47 = vld [vmem:[%s13861_s5 + $0x310] sm:$0xff]  }
 0x529   :  { %9718 = vmatpush3.bf16.msra.mxu1 %v10787_v40 }
 0x52a   :  { %9719 = vmatprep.subr.bf16.mxu1 %v10788_v18  ;;  %v7789_v18 = vrot.slane %v13731_v26, 2 }
 0x52c   :  { %7309 = vmatmul.mubr.bf16.gmra.mxu1 %v13569_v31  ;;  %v10803_v31 = vld [vmem:[%s13861_s5 + $0x208] sm:$0xff]  }
 0x52d   :  { %9720 = vmatpush3.bf16.msra.mxu1 %v10789_v41  ;;  %7596 = vmatprep.mubr.bf16.mxu1 %v9118_v63  ;;  %v7797_v41 = vrot.slane %v9199_v12, 2  ;;  %v10817_v63 = vld [vmem:[%s13861_s5 + $0x308] sm:$0xff]  }
 0x52e   :  { %9721 = vmatprep.subr.bf16.mxu1 %v10790_v21 }
 0x531   :  { %9722 = vmatpush3.bf16.msra.mxu1 %v10791_v35 }
 0x532   :  { %9723 = vmatprep.subr.bf16.mxu1 %v10792_v46  ;;  %v7790_v46 = vsel %vm6852_vm9, %v7781_v49, %v7789_v18 }
 0x535   :  { %9724 = vmatpush3.bf16.msra.mxu1 %v10793_v50  ;;  %v9198_v50 = vcombine.low %v7690_v0, %v7690_v0 }
 0x536   :  { %9725 = vmatprep.subr.bf16.mxu1 %v10794_v57  ;;  %v7798_v57 = vsel %vm6852_vm9, %v7791_v14, %v7797_v41 }
 0x539   :  { %9726 = vmatpush3.bf16.msra.mxu1 %v10795_v24 }
 0x53a   :  { %9752 = vmatprep.subr.bf16.mxu1 %v10796_v19  ;;  %v10819_v19 = vld [vmem:[%s13861_s5 + $0x300] sm:$0xff]  }
 0x53c   :  { %7597 = vmatmul.mubr.bf16.vlgmr.msra.gmra.mxu1 %v9117_v9  ;;  %v10804_v9 = vld [vmem:[%s13861_s5 + $0x240] sm:$0xff]  }
 0x53d   :  { %9753 = vmatpush3.bf16.msra.mxu1 %v10797_v59  ;;  %7604 = vmatprep.mubr.bf16.mxu1 %v13686_v6 }
 0x53e   :  { %9754 = vmatprep.subr.bf16.mxu1 %v10798_v13  ;;  %v7795_v13 = vrot.slane %v9198_v50, 2 }
 0x541   :  { %9755 = vmatpush3.bf16.msra.mxu1 %v10799_v36 }
 0x542   :  { %9756 = vmatprep.subr.bf16.mxu1 %v10800_v44  ;;  %v7796_v44 = vsel %vm6852_vm9, %v7789_v18, %v7795_v13 }
 0x544   :  { %7605 = vmatmul.mubr.bf16.gmra.mxu1 %v13703_v28 }
 0x545   :  { %v13712_v62 = vpop.f32.mrf.mxu0  ;;  %7610 = vmatprep.mubr.bf16.mxu1 %v13710_v39  ;;  %9757 = vmatpush3.bf16.msra.mxu1 %v10803_v31  ;;  %v9266_v39 = vcombine.low %v13396_v54, %v13398_v25  ;;  %v8051_v25 = vld [vmem:[#allocation3 + $0x5c] sm:$0xf] }
 0x546   :  { %9758 = vmatprep.subr.bf16.mxu1 %v10804_v9 }
 0x547   :  { %v10374_v55 = vpop.f32.mrf.mxu0 }
 0x549   :  { %v13723_v15 = vpop.f32.mrf.mxu0  ;;  %9759 = vmatpush3.bf16.msra.mxu1 %v10805_v7 }
 0x54a   :  { %9760 = vmatprep.subr.bf16.mxu1 %v10806_v51  ;;  %v9269_v51 = vcombine.low %v13400_v2, %v13414_v23 }
 0x54b   :  { %v10375_v20 = vpop.f32.mrf.mxu0 }
 0x54c   :  { %7611 = vmatmul.mubr.bf16.gmra.mxu1 %v13731_v26  ;;  %v9272_v26 = vcombine.low %v13409_v29, %v8051_v25 }
 0x54d   :  { %9761 = vmatpush3.bf16.msra.mxu1 %v10807_v10  ;;  %7968 = vmatprep.mubr.bf16.mxu1 %v7785_v58 }
 0x54e   :  { %v7106_v16 = vpop.f32.mrf.mxu0  ;;  %9762 = vmatprep.subr.bf16.mxu1 %v10808_v1 }
 0x550   :  { %v10378_v43 = vpop.f32.mrf.mxu0 }
 0x551   :  { %9763 = vmatpush3.bf16.msra.mxu1 %v10809_v52 }
 0x552   :  { %v7108_v27 = vpop.f32.mrf.mxu0  ;;  %9764 = vmatprep.subr.bf16.mxu1 %v10810_v56 }
 0x554   :  { %v10379_v3 = vpop.f32.mrf.mxu0 }
 0x555   :  { %9765 = vmatpush3.bf16.msra.mxu1 %v10811_v61 }
 0x556   :  { %v13751_v11 = vpop.f32.mrf.mxu0  ;;  %9766 = vmatprep.subr.bf16.mxu1 %v10812_v8 }
 0x558   :  { %v10382_v22 = vpop.f32.mrf.mxu0 }
 0x559   :  { %9767 = vmatpush3.bf16.msra.mxu1 %v10813_v60 }
 0x55a   :  { %v13758_v17 = vpop.f32.mrf.mxu0  ;;  %10444 = vmatprep.subr.bf16.mxu1 %v14075_v38 }
 0x55c   :  { %v10383_v5 = vpop.f32.mrf.mxu0  ;;  %7969 = vmatmul.mubr.bf16.vlgmr.msra.gmra.mxu1 %v7782_v33 }
 0x55d   :  { %7976 = vmatprep.mubr.bf16.mxu1 %v7792_v53  ;;  %10445 = vmatpush3.bf16.msra.mxu1 %v10814_v34 }
 0x55e   :  { %v13766_v45 = vpop.f32.mrf.mxu0  ;;  %10446 = vmatprep.subr.bf16.mxu1 %v14075_v38 }
 0x560   :  { %v10394_v40 = vpop.f32.mrf.mxu0 }
 0x561   :  { %10447 = vmatpush3.bf16.msra.mxu1 %v10815_v47 }
 0x562   :  { %v13773_v21 = vpop.f32.mrf.mxu0  ;;  %10448 = vmatprep.subr.bf16.mxu1 %v14075_v38 }
 0x564   :  { %v10395_v35 = vpop.f32.mrf.mxu0  ;;  %7977 = vmatmul.mubr.bf16.gmra.mxu1 %v7790_v46 }
 0x565   :  { %7982 = vmatprep.mubr.bf16.mxu1 %v7798_v57  ;;  %10449 = vmatpush3.bf16.msra.mxu1 %v10817_v63 }
 0x566   :  { %v7359_v24 = vpop.f32.mrf.mxu0  ;;  %10450 = vmatprep.subr.bf16.mxu1 %v14075_v38 }
 0x568   :  { %v10398_v59 = vpop.f32.mrf.mxu0 }
 0x569   :  { %10451 = vmatpush3.bf16.msra.mxu1 %v10819_v19 }
 0x56a   :  { %v7361_v6 = vpop.f32.mrf.mxu0 }
 0x56c   :  { %v10399_v36 = vpop.f32.mrf.mxu0  ;;  %7983 = vmatmul.mubr.bf16.gmra.mxu1 %v7796_v44 }
 0x56d   :  { %10452 = vmatprep.mubr.msk.bf16.mxu1 %vm10829_vm1, %v14075_v38 }
 0x56e   :  { %v13786_v31 = vpop.f32.mrf.mxu0 }
 0x570   :  { %v10402_v28 = vpop.f32.mrf.mxu0 }
 0x572   :  { %v13790_v9 = vpop.f32.mrf.mxu0 }
 0x574   :  { %v10403_v42 = vpop.f32.mrf.mxu0  ;;  %10453 = vmatmul.mubr.msk.bf16.vlgmr.msra.gmra.mxu1 %vm6144_vm15, %v9266_v39 }
 0x575   :  { %10456 = vmatprep.mubr.msk.bf16.mxu1 %vm10829_vm1, %v14075_v38 }
 0x576   :  { %v13795_v37 = vpop.f32.mrf.mxu0 }
 0x578   :  { %v10414_v7 = vpop.f32.mrf.mxu0 }
 0x57a   :  { %v13799_v55 = vpop.f32.mrf.mxu0 }
 0x57c   :  { %v10415_v4 = vpop.f32.mrf.mxu0  ;;  %10457 = vmatmul.mubr.msk.bf16.gmra.mxu1 %vm6144_vm15, %v9269_v51 }
 0x57d   :  { %10460 = vmatprep.mubr.msk.bf16.mxu1 %vm10829_vm1, %v14075_v38 }
 0x57e   :  { %v7661_v30 = vpop.f32.mrf.mxu0 }
 0x580   :  { %v10418_v54 = vpop.f32.mrf.mxu0 }
 0x582   :  { %v7663_v10 = vpop.f32.mrf.mxu0 }
 0x584   :  { %v10419_v20 = vpop.f32.mrf.mxu0  ;;  %10461 = vmatmul.mubr.msk.bf16.gmra.mxu1 %vm6144_vm15, %v9272_v26 }
 0x586   :  { %v13808_v1 = vpop.f32.mrf.mxu0 }
 0x588   :  { %v10422_v58 = vpop.f32.mrf.mxu0 }
 0x58a   :  { %v13810_v16 = vpop.f32.mrf.mxu0 }
 0x58c   :  { %v10423_v2 = vpop.f32.mrf.mxu0 }
 0x58e   :  { %v13812_v23 = vpop.f32.mrf.mxu0 }
 0x590   :  { %v10434_v52 = vpop.f32.mrf.mxu0 }
 0x592   :  { %v13814_v43 = vpop.f32.mrf.mxu0 }
 0x594   :  { %v10435_v38 = vpop.f32.mrf.mxu0 }
 0x596   :  { %v8033_v56 = vpop.f32.mrf.mxu0 }
 0x598   :  { %v10438_v27 = vpop.f32.mrf.mxu0 }
 0x59a   :  { %v8035_v61 = vpop.f32.mrf.mxu0 }
 0x59c   :  { %v10439_v3 = vpop.f32.mrf.mxu0 }
 0x59e   :  { %v13816_v29 = vpop.f32.mrf.mxu0 }
 0x5a0   :  { %v10442_v8 = vpop.f32.mrf.mxu0 }
 0x5a2   :  { %v13818_v32 = vpop.f32.mrf.mxu0 }
 0x5a4   :  { %v10443_v60 = vpop.f32.mrf.mxu0 }
 0x5b9   :  { %v9809_v22 = vpop.f32.mrf.mxu0 }
 0x5bb   :  { %v9810_v49 = vpop.f32.mrf.mxu0 }
 0x5bc   :  { %v13820_v48 = vadd.f32 %v9810_v49, %v9809_v22  ;;  %v9645_v14 = vpop.f32.mrf.mxu1 }
 0x5bd   :  { %v9812_v34 = vpop.f32.mrf.mxu0 }
 0x5be   :  { %v9646_v0 = vpop.f32.mrf.mxu1 }
 0x5bf   :  { %v9647_v5 = vadd.f32 %v9646_v0, %v9645_v14  ;;  %v9813_v33 = vpop.f32.mrf.mxu0 }
 0x5c0   :  { %v13822_v53 = vadd.f32 %v9813_v33, %v9812_v34  ;;  %v9648_v12 = vpop.f32.mrf.mxu1 }
 0x5c1   :  { %v7099_v42 = vadd.f32 %v9647_v5, %v13712_v62 }
 0x5c2   :  { %v9649_v47 = vpop.f32.mrf.mxu1 }
 0x5c3   :  { %v9650_v40 = vadd.f32 %v9649_v47, %v9648_v12 }
 0x5c4   :  { %v9815_v18 = vpop.f32.mrf.mxu0 }
 0x5c5   :  { %v7102_v54 = vadd.f32 %v9650_v40, %v13723_v15 }
 0x5c6   :  { %v9816_v41 = vpop.f32.mrf.mxu0 }
 0x5c7   :  { %v9651_v63 = vpop.f32.mrf.mxu1 }
 0x5c8   :  { %v9818_v35 = vpop.f32.mrf.mxu0 }
 0x5c9   :  { %v9652_v46 = vpop.f32.mrf.mxu1 }
 0x5ca   :  { %v9819_v50 = vpop.f32.mrf.mxu0 }
 0x5cb   :  { %v9654_v57 = vpop.f32.mrf.mxu1 }
 0x5cd   :  { %v9655_v24 = vpop.f32.mrf.mxu1 }
 0x5cf   :  { %v9657_v19 = vpop.f32.mrf.mxu1 }
 0x5d1   :  { %v9658_v59 = vpop.f32.mrf.mxu1 }
 0x5d2   :  { %v9659_v13 = vadd.f32 %v9658_v59, %v9657_v19 }
 0x5d3   :  { %v9660_v6 = vpop.f32.mrf.mxu1 }
 0x5d4   :  { %v7113_v56 = vadd.f32 %v9659_v13, %v13751_v11 }
 0x5d5   :  { %v9661_v36 = vpop.f32.mrf.mxu1 }
 0x5d6   :  { %v9662_v44 = vadd.f32 %v9661_v36, %v9660_v6 }
 0x5d8   :  { %v7116_v8 = vadd.f32 %v9662_v44, %v13758_v17 }
 0x5dc   :  { %v9686_v28 = vpop.f32.mrf.mxu1 }
 0x5de   :  { %v9687_v39 = vpop.f32.mrf.mxu1 }
 0x5df   :  { %v9688_v7 = vadd.f32 %v9687_v39, %v9686_v28 }
 0x5e0   :  { %v9689_v51 = vpop.f32.mrf.mxu1 }
 0x5e1   :  { %v7297_v4 = vadd.f32 %v9688_v7, %v7099_v42 }
 0x5e2   :  { %v9690_v30 = vpop.f32.mrf.mxu1 }
 0x5e3   :  { %v9691_v25 = vadd.f32 %v9690_v30, %v9689_v51  ;;  %v7352_v39 = vadd.f32 %v13766_v45, %v7297_v4  ;;  %v9296_v45 = vld [vmem:[%s13863_s6] ss:$0 sm:$0xff] }
 0x5e4   :  { %v9692_v10 = vpop.f32.mrf.mxu1 }
 0x5e5   :  { %v7300_v26 = vadd.f32 %v9691_v25, %v7102_v54 }
 0x5e6   :  { %v9693_v20 = vpop.f32.mrf.mxu1 }
 0x5e7   :  { %v7355_v10 = vadd.f32 %v13773_v21, %v7300_v26 }
 0x5e8   :  { %v9695_v58 = vpop.f32.mrf.mxu1 }
 0x5ea   :  { %v9696_v2 = vpop.f32.mrf.mxu1 }
 0x5ec   :  { %v9698_v52 = vpop.f32.mrf.mxu1 }
 0x5ee   :  { %v9699_v38 = vpop.f32.mrf.mxu1 }
 0x5ef   :  { %v9700_v27 = vadd.f32 %v9699_v38, %v9698_v52 }
 0x5f0   :  { %v9701_v61 = vpop.f32.mrf.mxu1 }
 0x5f1   :  { %v13827_v3 = vadd.f32 %v9700_v27, %v7113_v56  ;;  %v9821_v56 = vpop.f32.mrf.mxu0 }
 0x5f2   :  { %v9702_v62 = vpop.f32.mrf.mxu1 }
 0x5f3   :  { %v9703_v60 = vadd.f32 %v9702_v62, %v9701_v61 }
 0x5f5   :  { %v13830_v22 = vadd.f32 %v9703_v60, %v7116_v8 }
 0x5fc   :  { %v9727_v15 = vpop.f32.mrf.mxu1 }
 0x5fe   :  { %v9728_v49 = vpop.f32.mrf.mxu1 }
 0x5ff   :  { %v9729_v19 = vadd.f32 %v9728_v49, %v9727_v15 }
 0x600   :  { %v9730_v14 = vpop.f32.mrf.mxu1 }
 0x601   :  { %v7654_v36 = vadd.f32 %v9729_v19, %v13795_v37 }
 0x602   :  { %v9731_v34 = vpop.f32.mrf.mxu1 }
 0x603   :  { %v9732_v44 = vadd.f32 %v9731_v34, %v9730_v14  ;;  %v7674_v30 = vadd.f32 %v7654_v36, %v7352_v39 }
 0x604   :  { %v9733_v0 = vpop.f32.mrf.mxu1 }
 0x605   :  { %v7657_v54 = vadd.f32 %v9732_v44, %v13799_v55 }
 0x606   :  { %v9734_v5 = vpop.f32.mrf.mxu1 }
 0x607   :  { %v7675_v52 = vadd.f32 %v7657_v54, %v7355_v10 }
 0x608   :  { %v9736_v33 = vpop.f32.mrf.mxu1 }
 0x609   :  { %v7366_v33 = vadd.f32 %v13786_v31, %v13827_v3 }
 0x60a   :  { %v9737_v12 = vpop.f32.mrf.mxu1 }
 0x60c   :  { %v9739_v47 = vpop.f32.mrf.mxu1 }
 0x60e   :  { %v9740_v11 = vpop.f32.mrf.mxu1 }
 0x60f   :  { %v9741_v61 = vadd.f32 %v9740_v11, %v9739_v47 }
 0x610   :  { %v9742_v40 = vpop.f32.mrf.mxu1 }
 0x611   :  { %v7668_v15 = vadd.f32 %v9741_v61, %v13808_v1 }
 0x612   :  { %v9743_v18 = vpop.f32.mrf.mxu1 }
 0x613   :  { %v9744_v49 = vadd.f32 %v9743_v18, %v9742_v40  ;;  %v7369_v18 = vadd.f32 %v13790_v9, %v13830_v22 }
 0x61c   :  { %v9768_v41 = vpop.f32.mrf.mxu1 }
 0x61e   :  { %v9769_v63 = vpop.f32.mrf.mxu1 }
 0x61f   :  { %v9770_v13 = vadd.f32 %v9769_v63, %v9768_v41  ;;  %v7676_v63 = vadd.f32 %v7668_v15, %v7366_v33 }
 0x620   :  { %v9771_v35 = vpop.f32.mrf.mxu1 }
 0x621   :  { %v8026_v42 = vadd.f32 %v9770_v13, %v13812_v23 }
 0x622   :  { %v9772_v46 = vpop.f32.mrf.mxu1 }
 0x623   :  { %v9773_v7 = vadd.f32 %v9772_v46, %v9771_v35  ;;  %v8046_v58 = vadd.f32 %v8026_v42, %v7674_v30  ;;  %v7671_v35 = vadd.f32 %v9744_v49, %v13810_v16 }
 0x624   :  { %v9774_v17 = vpop.f32.mrf.mxu1 }
 0x625   :  { %v8029_v20 = vadd.f32 %v9773_v7, %v13814_v43  ;;  %v9822_v43 = vpop.f32.mrf.mxu0 }
 0x626   :  { %v9775_v50 = vpop.f32.mrf.mxu1  ;;  %v9823_v41 = vadd.f32 %v9822_v43, %v9821_v56 }
 0x627   :  { %v8047_v4 = vadd.f32 %v8029_v20, %v7675_v52  ;;  %v9824_v0 = vpop.f32.mrf.mxu0  ;;  %v7677_v50 = vadd.f32 %v7671_v35, %v7369_v18 }
 0x628   :  { %v9777_v57 = vpop.f32.mrf.mxu1 }
 0x629   :  { %v9825_v1 = vpop.f32.mrf.mxu0 }
 0x62a   :  { %v9778_v24 = vpop.f32.mrf.mxu1  ;;  %v9826_v17 = vadd.f32 %v9825_v1, %v9824_v0 }
 0x62c   :  { %v9780_v59 = vpop.f32.mrf.mxu1 }
 0x62e   :  { %v9781_v6 = vpop.f32.mrf.mxu1 }
 0x62f   :  { %v9782_v8 = vadd.f32 %v9781_v6, %v9780_v59 }
 0x630   :  { %v9783_v28 = vpop.f32.mrf.mxu1 }
 0x632   :  { %v9784_v51 = vpop.f32.mrf.mxu1 }
 0x633   :  { %v9785_v12 = vadd.f32 %v9784_v51, %v9783_v28 }
 0x634   :  { %v8331_v25 = vpop.f32.mrf.mxu1 }
 0x635   :  { %v8332_v2 = vadd.f32 %v13820_v48, %v8331_v25  ;;  %v8043_v31 = vadd.f32 %v9785_v12, %v13818_v32 }
 0x636   :  { %v10454_v37 = vpop.f32.mrf.mxu1 }
 0x637   :  { %v8352_v38 = vadd.f32 %v8332_v2, %v8046_v58  ;;  %v8049_v19 = vadd.f32 %v8043_v31, %v7677_v50 }
 0x638   :  { %v8334_v23 = vpop.f32.mrf.mxu1 }
 0x639   :  { %v8335_v55 = vadd.f32 %v13822_v53, %v8334_v23  ;;  %v8363_v21 = vadd.f32 %v9296_v45, %v8352_v38  ;;  %v8040_v53 = vadd.f32 %v9782_v8, %v13816_v29 }
 0x63a   :  { %v10455_v27 = vpop.f32.mrf.mxu1 }
 0x63b   :  { %v8353_v26 = vadd.f32 %v8335_v55, %v8047_v4  ;;  %v8367_v14 = vmax.f32 %v8363_v21, 0.0  ;;  %v8048_v3 = vadd.f32 %v8040_v53, %v7676_v63 }
 0x63c   :  { %v8339_v62 = vpop.f32.mrf.mxu1 }
 0x63d   :  { %v8364_v48 = vadd.f32 %v9296_v45, %v8353_v26 }
 0x63e   :  { %v10458_v60 = vpop.f32.mrf.mxu1 }
 0x63f   :  { %v8368_v34 = vmax.f32 %v8364_v48, 0.0 }
 0x640   :  { %v8341_v5 = vpop.f32.mrf.mxu1 }
 0x641   :  { %v9356_v47 = vpack.c.bf16 %v8368_v34, %v8367_v14 }
 0x642   :  { %v10459_v11 = vpop.f32.mrf.mxu1 }
 0x643   :  { %9357 = vst [vmem:[%s13864_s7] sm:$0xff] %v9356_v47  }
 0x644   :  { %v8345_v40 = vpop.f32.mrf.mxu1 }
 0x645   :  { %v8346_v29 = vadd.f32 %v9823_v41, %v8345_v40 }
 0x646   :  { %v10462_v46 = vpop.f32.mrf.mxu1 }
 0x647   :  { %v8354_v57 = vadd.f32 %v8346_v29, %v8048_v3 }
 0x648   :  { %v8348_v24 = vpop.f32.mrf.mxu1 }
 0x649   :  { %v8349_v16 = vadd.f32 %v9826_v17, %v8348_v24  ;;  %v8365_v13 = vadd.f32 %v9296_v45, %v8354_v57 }
 0x64a   :  { %v10463_v59 = vpop.f32.mrf.mxu1 }
 0x64b   :  { %v8355_v6 = vadd.f32 %v8349_v16, %v8049_v19  ;;  %v8369_v44 = vmax.f32 %v8365_v13, 0.0 }
 0x64d   :  { %v8366_v36 = vadd.f32 %v9296_v45, %v8355_v6 }
 0x64f   :  { %v8370_v28 = vmax.f32 %v8366_v36, 0.0 }
 0x651   :  { %v9361_v39 = vpack.c.bf16 %v8370_v28, %v8369_v44 }
 0x653   :  { %9363 = vst [vmem:[%s13864_s7 + $0x8] sm:$0xff] %v9361_v39  }

</bundles_post_ra>
